<compile_context>
chip_gen: v7x
topology: tpu7x:2x2x1
jax: 0.10.0
libtpu: 0.0.40
codegen_flags: <defaults>
</compile_context>

<pallas_src>
import math

import jax
import jax.numpy as jnp
from jax.experimental import pallas as pl
from jax.experimental.pallas import tpu as pltpu

# ---------------- synthetic "T5" config (small) ----------------
VOCAB = 64
V_PAD = 128            # lane-dense lm head (pad vocab to one full vreg lane width)
D_MODEL = 32
N_HEADS = 4
D_HEAD = 8
HD = N_HEADS * D_HEAD  # 32
D_FF = 64
N_LAYERS = 2
N_PROMPT = 4           # prompt_config.total_virtual_tokens
REL_BUCKETS = 32
REL_MAX_DIST = 128
PAD_ID = 0             # base_config.pad_token_id  (CE ignore_index, per the module)
DEC_START_ID = 0       # base_config.decoder_start_token_id
NEG_INF = -1e9

MXU_DTYPE = jnp.bfloat16   # bf16 MXU inputs, f32 accumulation everywhere


# =========================== in-kernel helpers ===========================

def _mm(a, b):
    """a @ b  — bf16 MXU inputs, f32 accumulation. (astype is a no-op on bf16 weights)"""
    return jax.lax.dot_general(
        a.astype(MXU_DTYPE), b.astype(MXU_DTYPE),
        (((1,), (0,)), ((), ())), preferred_element_type=jnp.float32)


def _mm_t(a, b):
    """a @ b.T (contract last dims) — bf16 MXU inputs, f32 accumulation."""
    return jax.lax.dot_general(
        a.astype(MXU_DTYPE), b.astype(MXU_DTYPE),
        (((1,), (1,)), ((), ())), preferred_element_type=jnp.float32)


def _rmsnorm(x, g):
    # T5LayerNorm: x * rsqrt(mean(x^2) + eps) * g   (no mean subtraction)
    var = jnp.mean(x * x, axis=-1, keepdims=True)
    return x * jax.lax.rsqrt(var + 1e-6) * g


def _softmax(s):
    m = jnp.max(s, axis=-1, keepdims=True)
    p = jnp.exp(s - m)
    return p * pl.reciprocal(jnp.sum(p, axis=-1, keepdims=True), approx=True)


def _mha(q_all, kv_all, wo, bias):
    """Multi-head attention from pre-projected activations.

    q_all : (Sq, H*Dh) f32   (already x @ Wq, fused across heads)
    kv_all: (Sk, 2*H*Dh) f32 layout [k heads | v heads]
    wo    : (H*Dh, D) bf16   fused output projection
    bias  : (Hb, Sq, Sk) f32 with Hb in {1, H} (already includes masks)
    """
    ctxs = []
    for h in range(N_HEADS):
        q = q_all[:, h * D_HEAD:(h + 1) * D_HEAD]
        k = kv_all[:, h * D_HEAD:(h + 1) * D_HEAD]
        v = kv_all[:, HD + h * D_HEAD: HD + (h + 1) * D_HEAD]
        b = bias[h] if bias.shape[0] == N_HEADS else bias[0]
        s = _mm_t(q, k) + b                       # T5: no 1/sqrt(d)
        p = _softmax(s)
        ctxs.append(_mm(p, v))                    # (Sq, Dh)
    ctx = jnp.concatenate(ctxs, axis=-1)          # (Sq, H*Dh)
    return _mm(ctx, wo)                           # (Sq, D)


def _self_attn(x, wqkv, wo, bias):
    qkv = _mm(x, wqkv)                            # ONE matmul: (S, 3*H*Dh)
    return _mha(qkv[:, :HD], qkv[:, HD:], wo, bias)


def _cross_attn(x, mem, wq, wkv, wo, bias):
    return _mha(_mm(x, wq), _mm(mem, wkv), wo, bias)


# ============================ fused kernel ============================

def _prompt_t5_kernel(
        # per-batch-group data
        enc_in_ref, dec_in_ref, enc_maskb_ref, enc_rel_ref, dec_rel_ref, labels_ref,
        # encoder weights
        e_ln_ref, e_qkv_ref, e_wo_ref, e_wi_ref, e_wf_ref, e_fln_ref,
        # decoder weights
        d_ln_ref, d_sqkv_ref, d_swo_ref, d_cq_ref, d_ckv_ref, d_cwo_ref,
        d_wi_ref, d_wf_ref, d_fln_ref,
        # tied embedding (lm head, vocab padded to V_PAD, bf16)
        shared_ref,
        # outputs
        logits_ref, stats_ref):

    Bb = enc_in_ref.shape[0]
    S_enc = enc_in_ref.shape[1]
    S_dec = dec_in_ref.shape[1]

    enc_rel = enc_rel_ref[...]                     # (H, Se, Se)  shared across batch
    dec_rel = dec_rel_ref[...]                     # (H, Sd, Sd)  rel-pos + causal

    # padded-vocab column mask for the lane-dense lm head (hoisted, constant)
    col = jax.lax.broadcasted_iota(jnp.int32, (S_dec, V_PAD), 1)
    pad_col_bias = jnp.where(col < VOCAB, 0.0, NEG_INF)

    nll_total = jnp.zeros((1, 1), jnp.float32)
    cnt_total = jnp.zeros((1, 1), jnp.float32)

    for b in range(Bb):
        mask_row = enc_maskb_ref[b]                # (1, S_enc) additive pad-mask bias
        # hoisted bias assembly (built once per batch element, reused across L*H)
        enc_bias = enc_rel + mask_row              # (H, Se, Se)
        cross_bias = jnp.broadcast_to(mask_row, (S_dec, S_enc))[None]  # (1, Sd, Se)

        # ------------------------------ encoder ------------------------------
        h = enc_in_ref[b]                          # (S_enc, D)
        for l in range(N_LAYERS):
            x = _rmsnorm(h, e_ln_ref[l, 0])
            h = h + _self_attn(x, e_qkv_ref[l], e_wo_ref[l], enc_bias)
            x = _rmsnorm(h, e_ln_ref[l, 1])
            ff = jnp.maximum(_mm(x, e_wi_ref[l]), 0.0)     # T5 ReLU FFN
            h = h + _mm(ff, e_wf_ref[l])
        enc_out = _rmsnorm(h, e_fln_ref[...])

        # ------------------------------ decoder ------------------------------
        h = dec_in_ref[b]                          # (S_dec, D)
        for l in range(N_LAYERS):
            x = _rmsnorm(h, d_ln_ref[l, 0])
            h = h + _self_attn(x, d_sqkv_ref[l], d_swo_ref[l], dec_rel)
            x = _rmsnorm(h, d_ln_ref[l, 1])
            h = h + _cross_attn(x, enc_out, d_cq_ref[l], d_ckv_ref[l],
                                d_cwo_ref[l], cross_bias)
            x = _rmsnorm(h, d_ln_ref[l, 2])
            ff = jnp.maximum(_mm(x, d_wi_ref[l]), 0.0)
            h = h + _mm(ff, d_wf_ref[l])
        dec_out = _rmsnorm(h, d_fln_ref[...])

        # --------------------- tied lm head + cross-entropy ---------------------
        seq = dec_out * (D_MODEL ** -0.5)          # tied-embedding scaling
        logits = _mm_t(seq, shared_ref[...])       # (S_dec, V_PAD); full 128-lane N
        logits = logits + pad_col_bias             # kill padded vocab columns
        logits_ref[b] = logits                     # lane-dense (128) store

        labels = labels_ref[b]                     # (S_dec, 1) int32
        mx = jnp.max(logits, axis=-1, keepdims=True)
        lse = jnp.log(jnp.sum(jnp.exp(logits - mx), axis=-1, keepdims=True)) + mx
        picked = jnp.sum(logits * (col == labels).astype(jnp.float32),
                         axis=-1, keepdims=True)
        valid = (labels != PAD_ID).astype(jnp.float32)      # ignore_index = pad_id
        nll_total = nll_total + jnp.sum((lse - picked) * valid, axis=(0, 1),
                                        keepdims=True)
        cnt_total = cnt_total + jnp.sum(valid, axis=(0, 1), keepdims=True)

    stats_ref[...] = jnp.concatenate([nll_total, cnt_total], axis=-1)[None]  # (1,1,2)


# ============================ kernel wrapper ============================

def _shared_spec(shape):
    zeros = (0,) * len(shape)
    return pl.BlockSpec(shape, lambda g: zeros)


def _group_spec(block_shape):
    tail = (0,) * (len(block_shape) - 1)
    return pl.BlockSpec(block_shape, lambda g: (g,) + tail)


def _num_batch_groups(batch):
    """2 grid steps on v7x (batch shards across its 2 TensorCores), 1 step (whole
    batch folded per step) on single-TC v5e/v6e."""
    try:
        kind = jax.devices()[0].device_kind.lower()
        n_tc = 2 if "v7" in kind else 1
    except Exception:  # pragma: no cover - be robust to exotic backends
        n_tc = 1
    return n_tc if (n_tc > 0 and batch % n_tc == 0) else 1


def fused_prompt_t5(params, enc_in, dec_in, enc_mask_bias, enc_rel, dec_rel, labels3d):
    B, S_enc, _ = enc_in.shape
    S_dec = dec_in.shape[1]
    L, H, Dh, D, F = N_LAYERS, N_HEADS, D_HEAD, D_MODEL, D_FF

    G = _num_batch_groups(B)
    Bb = B // G

    in_specs = [
        _group_spec((Bb, S_enc, D)),         # enc_in
        _group_spec((Bb, S_dec, D)),         # dec_in
        _group_spec((Bb, 1, S_enc)),         # encoder padding mask bias (additive)
        _shared_spec((H, S_enc, S_enc)),     # encoder rel-pos bias
        _shared_spec((H, S_dec, S_dec)),     # decoder rel-pos + causal bias
        _group_spec((Bb, S_dec, 1)),         # labels
        _shared_spec((L, 2, 1, D)),          # e_ln
        _shared_spec((L, D, 3 * HD)),        # e_qkv (fused q|k|v, per-head blocks)
        _shared_spec((L, HD, D)),            # e_wo  (fused output proj)
        _shared_spec((L, D, F)),             # e_wi
        _shared_spec((L, F, D)),             # e_wf
        _shared_spec((1, D)),                # enc_final_ln
        _shared_spec((L, 3, 1, D)),          # d_ln
        _shared_spec((L, D, 3 * HD)),        # d_sqkv (self, fused)
        _shared_spec((L, HD, D)),            # d_swo
        _shared_spec((L, D, HD)),            # d_cq   (cross q)
        _shared_spec((L, D, 2 * HD)),        # d_ckv  (cross k|v fused)
        _shared_spec((L, HD, D)),            # d_cwo
        _shared_spec((L, D, F)),             # d_wi
        _shared_spec((L, F, D)),             # d_wf
        _shared_spec((1, D)),                # dec_final_ln
        _shared_spec((V_PAD, D)),            # shared embedding (tied lm head, padded)
    ]
    out_specs = (
        _group_spec((Bb, S_dec, V_PAD)),                  # padded logits (lane-dense)
        pl.BlockSpec((1, 1, 2), lambda g: (g, 0, 0)),     # [nll, count] per step
    )
    out_shape = (
        jax.ShapeDtypeStruct((B, S_dec, V_PAD), jnp.float32),
        jax.ShapeDtypeStruct((G, 1, 2), jnp.float32),
    )
    return pl.pallas_call(
        _prompt_t5_kernel,
        grid=(G,),
        in_specs=in_specs,
        out_specs=out_specs,
        out_shape=out_shape,
        compiler_params=pltpu.CompilerParams(
            dimension_semantics=("parallel",)),
    )(enc_in, dec_in, enc_mask_bias, enc_rel, dec_rel, labels3d,
      params['e_ln'], params['e_qkv'], params['e_wo'], params['e_wi'],
      params['e_wf'], params['enc_final_ln'],
      params['d_ln'], params['d_sqkv'], params['d_swo'], params['d_cq'],
      params['d_ckv'], params['d_cwo'], params['d_wi'], params['d_wf'],
      params['dec_final_ln'], params['shared_lm'])


# ============================ JAX glue ============================

def _relative_position_bucket(rel_pos, bidirectional, num_buckets, max_distance):
    buckets = jnp.zeros_like(rel_pos)
    if bidirectional:
        num_buckets //= 2
        buckets = buckets + (rel_pos > 0).astype(jnp.int32) * num_buckets
        rel_pos = jnp.abs(rel_pos)
    else:
        rel_pos = -jnp.minimum(rel_pos, 0)
    max_exact = num_buckets // 2
    is_small = rel_pos < max_exact
    rp_f = jnp.maximum(rel_pos, 1).astype(jnp.float32)
    rp_large = max_exact + (jnp.log(rp_f / max_exact) /
                            math.log(max_distance / max_exact) *
                            (num_buckets - max_exact)).astype(jnp.int32)
    rp_large = jnp.minimum(rp_large, num_buckets - 1)
    return buckets + jnp.where(is_small, rel_pos, rp_large)


def compute_rel_bias(table, q_len, k_len, bidirectional):
    ctx = jnp.arange(q_len)[:, None]
    mem = jnp.arange(k_len)[None, :]
    buckets = _relative_position_bucket(mem - ctx, bidirectional,
                                        REL_BUCKETS, REL_MAX_DIST)
    bias = jnp.take(table, buckets, axis=0)        # (q, k, H)
    return jnp.transpose(bias, (2, 0, 1))          # (H, q, k)


@jax.jit
def prompt_t5_forward(params, input_ids, labels, attention_mask):
    B = input_ids.shape[0]
    S_dec = labels.shape[1]
    shared = params['shared']

    # word embeddings + shift_tokens_right (decoder inputs) — gathers stay in JAX
    inputs_embeds = jnp.take(shared, input_ids, axis=0)
    dec_ids = jnp.concatenate(
        [jnp.full((B, 1), DEC_START_ID, dtype=labels.dtype), labels[:, :-1]], axis=1)
    dec_embeds = jnp.take(shared, dec_ids, axis=0)

    # soft prompt (get_prompt) prepended to encoder inputs
    prompts = jnp.broadcast_to(params['prompt_embedding'][None], (B, N_PROMPT, D_MODEL))
    enc_embeds = jnp.concatenate([prompts, inputs_embeds], axis=1)
    S_enc = enc_embeds.shape[1]
    full_mask = jnp.concatenate(
        [jnp.ones((B, N_PROMPT), jnp.float32), attention_mask.astype(jnp.float32)],
        axis=1)
    enc_mask_bias = ((1.0 - full_mask) * NEG_INF)[:, None, :]       # (B, 1, S_enc)

    # position biases (tiny precompute; shared across batch / layers)
    enc_rel = compute_rel_bias(params['enc_rel_bias'], S_enc, S_enc, True)
    causal = jnp.where(jnp.arange(S_dec)[:, None] >= jnp.arange(S_dec)[None, :],
                       0.0, NEG_INF)
    dec_rel = compute_rel_bias(params['dec_rel_bias'], S_dec, S_dec, False) + causal[None]

    labels3d = labels.reshape(B, S_dec, 1).astype(jnp.int32)

    logits_pad, stats = fused_prompt_t5(params, enc_embeds, dec_embeds, enc_mask_bias,
                                        enc_rel, dec_rel, labels3d)
    logits = logits_pad[:, :, :VOCAB]              # drop padded vocab columns
    # guard against all-PAD batches (divide-by-zero)
    loss = jnp.sum(stats[..., 0]) / jnp.maximum(jnp.sum(stats[..., 1]), 1.0)
    return loss, logits


# ============================ parameter init ============================

def init_params(key):
    keys = iter(jax.random.split(key, 64))

    def dense(shape, dtype=jnp.float32):
        return (0.02 * jax.random.normal(next(keys), shape, jnp.float32)).astype(dtype)

    L, H, Dh, D, F = N_LAYERS, N_HEADS, D_HEAD, D_MODEL, D_FF
    bf = MXU_DTYPE

    shared = dense((VOCAB, D))                                  # f32, for embedding gathers
    shared_lm = jnp.zeros((V_PAD, D), jnp.float32).at[:VOCAB].set(shared).astype(bf)

    return {
        'shared': shared,                              # tied word embeddings (f32)
        'shared_lm': shared_lm,                        # lm head copy: bf16, vocab padded to 128
        'prompt_embedding': dense((N_PROMPT, D)),      # soft prompt ('random' init)
        'enc_rel_bias': dense((REL_BUCKETS, H)),
        'dec_rel_bias': dense((REL_BUCKETS, H)),
        'e_ln': jnp.ones((L, 2, 1, D), jnp.float32),   # [ln_self, ln_ff]
        'e_qkv': dense((L, D, 3 * HD), bf),            # fused [q heads | k heads | v heads]
        'e_wo': dense((L, HD, D), bf),
        'e_wi': dense((L, D, F), bf),
        'e_wf': dense((L, F, D), bf),
        'enc_final_ln': jnp.ones((1, D), jnp.float32),
        'd_ln': jnp.ones((L, 3, 1, D), jnp.float32),   # [ln_self, ln_cross, ln_ff]
        'd_sqkv': dense((L, D, 3 * HD), bf),
        'd_swo': dense((L, HD, D), bf),
        'd_cq': dense((L, D, HD), bf),
        'd_ckv': dense((L, D, 2 * HD), bf),
        'd_cwo': dense((L, HD, D), bf),
        'd_wi': dense((L, D, F), bf),
        'd_wf': dense((L, F, D), bf),
        'dec_final_ln': jnp.ones((1, D), jnp.float32),
    }


# ================================ main ================================

if __name__ == "__main__":
    key = jax.random.PRNGKey(0)
    pkey, ikey, lkey = jax.random.split(key, 3)
    params = init_params(pkey)

    B, S_IN, S_DEC = 2, 8, 8
    input_ids = jax.random.randint(ikey, (B, S_IN), 1, VOCAB, dtype=jnp.int32)
    labels = jax.random.randint(lkey, (B, S_DEC), 1, VOCAB, dtype=jnp.int32)
    labels = labels.at[:, -2:].set(PAD_ID)        # padded targets exercise ignore_index
    attention_mask = jnp.ones((B, S_IN), jnp.float32).at[1, -1].set(0.0)

    loss, logits = prompt_t5_forward(params, input_ids, labels, attention_mask)
    jax.block_until_ready((loss, logits))

    assert logits.shape == (B, S_DEC, VOCAB)
    assert bool(jnp.isfinite(loss))
    print("KERNEL_OK")
</pallas_src>

<mosaic_0001>
module attributes {stable_mosaic.version = 11 : i64} {
  func.func @_prompt_t5_kernel(%arg0: i32, %arg1: memref<2x12x32xf32, #tpu.memory_space<vmem>>, %arg2: memref<2x8x32xf32, #tpu.memory_space<vmem>>, %arg3: memref<2x1x12xf32, #tpu.memory_space<vmem>>, %arg4: memref<4x12x12xf32, #tpu.memory_space<vmem>>, %arg5: memref<4x8x8xf32, #tpu.memory_space<vmem>>, %arg6: memref<2x8x1xi32, #tpu.memory_space<vmem>>, %arg7: memref<2x2x1x32xf32, #tpu.memory_space<vmem>>, %arg8: memref<2x32x96xbf16, #tpu.memory_space<vmem>>, %arg9: memref<2x32x32xbf16, #tpu.memory_space<vmem>>, %arg10: memref<2x32x64xbf16, #tpu.memory_space<vmem>>, %arg11: memref<2x64x32xbf16, #tpu.memory_space<vmem>>, %arg12: memref<1x32xf32, #tpu.memory_space<vmem>>, %arg13: memref<2x3x1x32xf32, #tpu.memory_space<vmem>>, %arg14: memref<2x32x96xbf16, #tpu.memory_space<vmem>>, %arg15: memref<2x32x32xbf16, #tpu.memory_space<vmem>>, %arg16: memref<2x32x32xbf16, #tpu.memory_space<vmem>>, %arg17: memref<2x32x64xbf16, #tpu.memory_space<vmem>>, %arg18: memref<2x32x32xbf16, #tpu.memory_space<vmem>>, %arg19: memref<2x32x64xbf16, #tpu.memory_space<vmem>>, %arg20: memref<2x64x32xbf16, #tpu.memory_space<vmem>>, %arg21: memref<1x32xf32, #tpu.memory_space<vmem>>, %arg22: memref<128x32xbf16, #tpu.memory_space<vmem>>, %arg23: memref<2x8x128xf32, #tpu.memory_space<vmem>>, %arg24: memref<1x1x2xf32, #tpu.memory_space<vmem>>) attributes {dimension_semantics = [#tpu.dimension_semantics<parallel>], iteration_bounds = array<i64: 1>, scalar_prefetch = 0 : i64, scratch_operands = 0 : i64, tpu.core_type = #tpu.core_type<tc>, window_params = [{transform_indices = @transform_0, window_bounds = array<i64: 2, 12, 32>}, {transform_indices = @transform_1, window_bounds = array<i64: 2, 8, 32>}, {transform_indices = @transform_2, window_bounds = array<i64: 2, 1, 12>}, {pipeline_mode = #tpu.pipeline_mode<synchronous>, transform_indices = @transform_3, window_bounds = array<i64: 4, 12, 12>}, {pipeline_mode = #tpu.pipeline_mode<synchronous>, transform_indices = @transform_4, window_bounds = array<i64: 4, 8, 8>}, {transform_indices = @transform_5, window_bounds = array<i64: 2, 8, 1>}, {pipeline_mode = #tpu.pipeline_mode<synchronous>, transform_indices = @transform_6, window_bounds = array<i64: 2, 2, 1, 32>}, {pipeline_mode = #tpu.pipeline_mode<synchronous>, transform_indices = @transform_7, window_bounds = array<i64: 2, 32, 96>}, {pipeline_mode = #tpu.pipeline_mode<synchronous>, transform_indices = @transform_8, window_bounds = array<i64: 2, 32, 32>}, {pipeline_mode = #tpu.pipeline_mode<synchronous>, transform_indices = @transform_9, window_bounds = array<i64: 2, 32, 64>}, {pipeline_mode = #tpu.pipeline_mode<synchronous>, transform_indices = @transform_10, window_bounds = array<i64: 2, 64, 32>}, {pipeline_mode = #tpu.pipeline_mode<synchronous>, transform_indices = @transform_11, window_bounds = array<i64: 1, 32>}, {pipeline_mode = #tpu.pipeline_mode<synchronous>, transform_indices = @transform_12, window_bounds = array<i64: 2, 3, 1, 32>}, {pipeline_mode = #tpu.pipeline_mode<synchronous>, transform_indices = @transform_13, window_bounds = array<i64: 2, 32, 96>}, {pipeline_mode = #tpu.pipeline_mode<synchronous>, transform_indices = @transform_14, window_bounds = array<i64: 2, 32, 32>}, {pipeline_mode = #tpu.pipeline_mode<synchronous>, transform_indices = @transform_15, window_bounds = array<i64: 2, 32, 32>}, {pipeline_mode = #tpu.pipeline_mode<synchronous>, transform_indices = @transform_16, window_bounds = array<i64: 2, 32, 64>}, {pipeline_mode = #tpu.pipeline_mode<synchronous>, transform_indices = @transform_17, window_bounds = array<i64: 2, 32, 32>}, {pipeline_mode = #tpu.pipeline_mode<synchronous>, transform_indices = @transform_18, window_bounds = array<i64: 2, 32, 64>}, {pipeline_mode = #tpu.pipeline_mode<synchronous>, transform_indices = @transform_19, window_bounds = array<i64: 2, 64, 32>}, {pipeline_mode = #tpu.pipeline_mode<synchronous>, transform_indices = @transform_20, window_bounds = array<i64: 1, 32>}, {pipeline_mode = #tpu.pipeline_mode<synchronous>, transform_indices = @transform_21, window_bounds = array<i64: 128, 32>}, {transform_indices = @transform_22, window_bounds = array<i64: 2, 8, 128>}, {transform_indices = @transform_23, window_bounds = array<i64: 1, 1, 2>}]} {
    %c0 = arith.constant 0 : index
    %c0_0 = arith.constant 0 : index
    %c0_1 = arith.constant 0 : index
    %0 = vector.load %arg4[%c0, %c0_0, %c0_1] : memref<4x12x12xf32, #tpu.memory_space<vmem>>, vector<4x12x12xf32>
    %c0_2 = arith.constant 0 : index
    %c0_3 = arith.constant 0 : index
    %c0_4 = arith.constant 0 : index
    %1 = vector.load %arg5[%c0_2, %c0_3, %c0_4] : memref<4x8x8xf32, #tpu.memory_space<vmem>>, vector<4x8x8xf32>
    %2 = tpu.iota {dimensions = array<i32: 1>} : vector<8x128xi32>
    %c64_i32 = arith.constant 64 : i32
    %3 = vector.broadcast %c64_i32 : i32 to vector<8x128xi32>
    %4 = arith.cmpi slt, %2, %3 : vector<8x128xi32>
    %cst = arith.constant 0.000000e+00 : f32
    %cst_5 = arith.constant -1.000000e+09 : f32
    %5 = vector.broadcast %cst : f32 to vector<8x128xf32>
    %6 = vector.broadcast %cst_5 : f32 to vector<8x128xf32>
    %7 = arith.select %4, %5, %6 : vector<8x128xi1>, vector<8x128xf32>
    %cst_6 = arith.constant 0.000000e+00 : f32
    %8 = vector.broadcast %cst_6 : f32 to vector<1x1xf32>
    %cst_7 = arith.constant 0.000000e+00 : f32
    %9 = vector.broadcast %cst_7 : f32 to vector<1x1xf32>
    %c0_8 = arith.constant 0 : index
    %c0_9 = arith.constant 0 : index
    %c0_10 = arith.constant 0 : index
    %10 = vector.load %arg3[%c0_8, %c0_9, %c0_10] : memref<2x1x12xf32, #tpu.memory_space<vmem>>, vector<1x1x12xf32>
    %11 = vector.shape_cast %10 : vector<1x1x12xf32> to vector<1x12xf32>
    %12 = vector.shape_cast %11 : vector<1x12xf32> to vector<1x1x12xf32>
    %13 = vector.broadcast %12 : vector<1x1x12xf32> to vector<4x12x12xf32>
    %14 = arith.addf %0, %13 : vector<4x12x12xf32>
    %15 = vector.shape_cast %11 : vector<1x12xf32> to vector<1x12xf32>
    %16 = vector.broadcast %15 : vector<1x12xf32> to vector<8x12xf32>
    %17 = vector.shape_cast %16 : vector<8x12xf32> to vector<1x8x12xf32>
    %c0_11 = arith.constant 0 : index
    %c0_12 = arith.constant 0 : index
    %c0_13 = arith.constant 0 : index
    %18 = vector.load %arg1[%c0_11, %c0_12, %c0_13] : memref<2x12x32xf32, #tpu.memory_space<vmem>>, vector<1x12x32xf32>
    %19 = vector.shape_cast %18 : vector<1x12x32xf32> to vector<12x32xf32>
    %c0_14 = arith.constant 0 : index
    %c0_15 = arith.constant 0 : index
    %c0_16 = arith.constant 0 : index
    %c0_17 = arith.constant 0 : index
    %20 = vector.load %arg7[%c0_14, %c0_15, %c0_16, %c0_17] : memref<2x2x1x32xf32, #tpu.memory_space<vmem>>, vector<1x1x1x32xf32>
    %21 = vector.shape_cast %20 : vector<1x1x1x32xf32> to vector<1x32xf32>
    %22 = arith.mulf %19, %19 : vector<12x32xf32>
    %cst_18 = arith.constant dense<0.000000e+00> : vector<12xf32>
    %23 = vector.multi_reduction <add>, %22, %cst_18 [1] : vector<12x32xf32> to vector<12xf32>
    %24 = vector.shape_cast %23 : vector<12xf32> to vector<12x1xf32>
    %cst_19 = arith.constant 3.200000e+01 : f32
    %25 = vector.broadcast %cst_19 : f32 to vector<12x1xf32>
    %26 = arith.divf %24, %25 : vector<12x1xf32>
    %cst_20 = arith.constant 9.99999997E-7 : f32
    %27 = vector.broadcast %cst_20 : f32 to vector<12x1xf32>
    %28 = arith.addf %26, %27 : vector<12x1xf32>
    %29 = math.rsqrt %28 : vector<12x1xf32>
    %30 = vector.broadcast %29 : vector<12x1xf32> to vector<12x32xf32>
    %31 = arith.mulf %19, %30 : vector<12x32xf32>
    %32 = vector.broadcast %21 : vector<1x32xf32> to vector<12x32xf32>
    %33 = arith.mulf %31, %32 : vector<12x32xf32>
    %c0_21 = arith.constant 0 : index
    %c0_22 = arith.constant 0 : index
    %c0_23 = arith.constant 0 : index
    %34 = vector.load %arg8[%c0_21, %c0_22, %c0_23] : memref<2x32x96xbf16, #tpu.memory_space<vmem>>, vector<1x32x96xbf16>
    %35 = vector.shape_cast %34 : vector<1x32x96xbf16> to vector<32x96xbf16>
    %c0_24 = arith.constant 0 : index
    %c0_25 = arith.constant 0 : index
    %c0_26 = arith.constant 0 : index
    %36 = vector.load %arg9[%c0_24, %c0_25, %c0_26] : memref<2x32x32xbf16, #tpu.memory_space<vmem>>, vector<1x32x32xbf16>
    %37 = vector.shape_cast %36 : vector<1x32x32xbf16> to vector<32x32xbf16>
    %38 = arith.truncf %33 : vector<12x32xf32> to vector<12x32xbf16>
    %cst_27 = arith.constant dense<0.000000e+00> : vector<12x96xf32>
    %39 = tpu.matmul %38, %35, %cst_27 {dimension_numbers = #tpu.dot_dimension_numbers<[1], [0], [0], [1], [0, 0, 1, 1], [], []>} : vector<12x32xbf16>, vector<32x96xbf16>, vector<12x96xf32> -> vector<12x96xf32>
    %40 = vector.extract_strided_slice %39 {offsets = [0, 0], sizes = [12, 32], strides = [1, 1]} : vector<12x96xf32> to vector<12x32xf32>
    %41 = vector.extract_strided_slice %39 {offsets = [0, 32], sizes = [12, 64], strides = [1, 1]} : vector<12x96xf32> to vector<12x64xf32>
    %42 = vector.extract_strided_slice %40 {offsets = [0, 0], sizes = [12, 8], strides = [1, 1]} : vector<12x32xf32> to vector<12x8xf32>
    %43 = vector.extract_strided_slice %41 {offsets = [0, 0], sizes = [12, 8], strides = [1, 1]} : vector<12x64xf32> to vector<12x8xf32>
    %44 = vector.extract_strided_slice %41 {offsets = [0, 32], sizes = [12, 8], strides = [1, 1]} : vector<12x64xf32> to vector<12x8xf32>
    %45 = vector.extract_strided_slice %14 {offsets = [0, 0, 0], sizes = [1, 12, 12], strides = [1, 1, 1]} : vector<4x12x12xf32> to vector<1x12x12xf32>
    %46 = vector.shape_cast %45 : vector<1x12x12xf32> to vector<12x12xf32>
    %47 = arith.truncf %42 : vector<12x8xf32> to vector<12x8xbf16>
    %48 = arith.truncf %43 : vector<12x8xf32> to vector<12x8xbf16>
    %cst_28 = arith.constant dense<0.000000e+00> : vector<12x12xf32>
    %49 = tpu.matmul %47, %48, %cst_28 {dimension_numbers = #tpu.dot_dimension_numbers<[1], [1], [0], [0], [0, 0, 1, 0], [], []>} : vector<12x8xbf16>, vector<12x8xbf16>, vector<12x12xf32> -> vector<12x12xf32>
    %50 = arith.addf %49, %46 : vector<12x12xf32>
    %cst_29 = arith.constant dense<0xFF800000> : vector<12xf32>
    %51 = vector.multi_reduction <maximumf>, %50, %cst_29 [1] : vector<12x12xf32> to vector<12xf32>
    %52 = vector.shape_cast %51 : vector<12xf32> to vector<12x1xf32>
    %53 = vector.broadcast %52 : vector<12x1xf32> to vector<12x12xf32>
    %54 = arith.subf %50, %53 : vector<12x12xf32>
    %55 = math.exp %54 : vector<12x12xf32>
    %cst_30 = arith.constant dense<0.000000e+00> : vector<12xf32>
    %56 = vector.multi_reduction <add>, %55, %cst_30 [1] : vector<12x12xf32> to vector<12xf32>
    %57 = vector.shape_cast %56 : vector<12xf32> to vector<12x1xf32>
    %58 = tpu.reciprocal %57 {approx = true} : vector<12x1xf32> -> vector<12x1xf32>
    %59 = vector.broadcast %58 : vector<12x1xf32> to vector<12x12xf32>
    %60 = arith.mulf %55, %59 : vector<12x12xf32>
    %61 = arith.truncf %60 : vector<12x12xf32> to vector<12x12xbf16>
    %62 = arith.truncf %44 : vector<12x8xf32> to vector<12x8xbf16>
    %cst_31 = arith.constant dense<0.000000e+00> : vector<12x8xf32>
    %63 = tpu.matmul %61, %62, %cst_31 {dimension_numbers = #tpu.dot_dimension_numbers<[1], [0], [0], [1], [0, 0, 1, 1], [], []>} : vector<12x12xbf16>, vector<12x8xbf16>, vector<12x8xf32> -> vector<12x8xf32>
    %64 = vector.extract_strided_slice %40 {offsets = [0, 8], sizes = [12, 8], strides = [1, 1]} : vector<12x32xf32> to vector<12x8xf32>
    %65 = vector.extract_strided_slice %41 {offsets = [0, 8], sizes = [12, 8], strides = [1, 1]} : vector<12x64xf32> to vector<12x8xf32>
    %66 = vector.extract_strided_slice %41 {offsets = [0, 40], sizes = [12, 8], strides = [1, 1]} : vector<12x64xf32> to vector<12x8xf32>
    %67 = vector.extract_strided_slice %14 {offsets = [1, 0, 0], sizes = [1, 12, 12], strides = [1, 1, 1]} : vector<4x12x12xf32> to vector<1x12x12xf32>
    %68 = vector.shape_cast %67 : vector<1x12x12xf32> to vector<12x12xf32>
    %69 = arith.truncf %64 : vector<12x8xf32> to vector<12x8xbf16>
    %70 = arith.truncf %65 : vector<12x8xf32> to vector<12x8xbf16>
    %cst_32 = arith.constant dense<0.000000e+00> : vector<12x12xf32>
    %71 = tpu.matmul %69, %70, %cst_32 {dimension_numbers = #tpu.dot_dimension_numbers<[1], [1], [0], [0], [0, 0, 1, 0], [], []>} : vector<12x8xbf16>, vector<12x8xbf16>, vector<12x12xf32> -> vector<12x12xf32>
    %72 = arith.addf %71, %68 : vector<12x12xf32>
    %cst_33 = arith.constant dense<0xFF800000> : vector<12xf32>
    %73 = vector.multi_reduction <maximumf>, %72, %cst_33 [1] : vector<12x12xf32> to vector<12xf32>
    %74 = vector.shape_cast %73 : vector<12xf32> to vector<12x1xf32>
    %75 = vector.broadcast %74 : vector<12x1xf32> to vector<12x12xf32>
    %76 = arith.subf %72, %75 : vector<12x12xf32>
    %77 = math.exp %76 : vector<12x12xf32>
    %cst_34 = arith.constant dense<0.000000e+00> : vector<12xf32>
    %78 = vector.multi_reduction <add>, %77, %cst_34 [1] : vector<12x12xf32> to vector<12xf32>
    %79 = vector.shape_cast %78 : vector<12xf32> to vector<12x1xf32>
    %80 = tpu.reciprocal %79 {approx = true} : vector<12x1xf32> -> vector<12x1xf32>
    %81 = vector.broadcast %80 : vector<12x1xf32> to vector<12x12xf32>
    %82 = arith.mulf %77, %81 : vector<12x12xf32>
    %83 = arith.truncf %82 : vector<12x12xf32> to vector<12x12xbf16>
    %84 = arith.truncf %66 : vector<12x8xf32> to vector<12x8xbf16>
    %cst_35 = arith.constant dense<0.000000e+00> : vector<12x8xf32>
    %85 = tpu.matmul %83, %84, %cst_35 {dimension_numbers = #tpu.dot_dimension_numbers<[1], [0], [0], [1], [0, 0, 1, 1], [], []>} : vector<12x12xbf16>, vector<12x8xbf16>, vector<12x8xf32> -> vector<12x8xf32>
    %86 = vector.extract_strided_slice %40 {offsets = [0, 16], sizes = [12, 8], strides = [1, 1]} : vector<12x32xf32> to vector<12x8xf32>
    %87 = vector.extract_strided_slice %41 {offsets = [0, 16], sizes = [12, 8], strides = [1, 1]} : vector<12x64xf32> to vector<12x8xf32>
    %88 = vector.extract_strided_slice %41 {offsets = [0, 48], sizes = [12, 8], strides = [1, 1]} : vector<12x64xf32> to vector<12x8xf32>
    %89 = vector.extract_strided_slice %14 {offsets = [2, 0, 0], sizes = [1, 12, 12], strides = [1, 1, 1]} : vector<4x12x12xf32> to vector<1x12x12xf32>
    %90 = vector.shape_cast %89 : vector<1x12x12xf32> to vector<12x12xf32>
    %91 = arith.truncf %86 : vector<12x8xf32> to vector<12x8xbf16>
    %92 = arith.truncf %87 : vector<12x8xf32> to vector<12x8xbf16>
    %cst_36 = arith.constant dense<0.000000e+00> : vector<12x12xf32>
    %93 = tpu.matmul %91, %92, %cst_36 {dimension_numbers = #tpu.dot_dimension_numbers<[1], [1], [0], [0], [0, 0, 1, 0], [], []>} : vector<12x8xbf16>, vector<12x8xbf16>, vector<12x12xf32> -> vector<12x12xf32>
    %94 = arith.addf %93, %90 : vector<12x12xf32>
    %cst_37 = arith.constant dense<0xFF800000> : vector<12xf32>
    %95 = vector.multi_reduction <maximumf>, %94, %cst_37 [1] : vector<12x12xf32> to vector<12xf32>
    %96 = vector.shape_cast %95 : vector<12xf32> to vector<12x1xf32>
    %97 = vector.broadcast %96 : vector<12x1xf32> to vector<12x12xf32>
    %98 = arith.subf %94, %97 : vector<12x12xf32>
    %99 = math.exp %98 : vector<12x12xf32>
    %cst_38 = arith.constant dense<0.000000e+00> : vector<12xf32>
    %100 = vector.multi_reduction <add>, %99, %cst_38 [1] : vector<12x12xf32> to vector<12xf32>
    %101 = vector.shape_cast %100 : vector<12xf32> to vector<12x1xf32>
    %102 = tpu.reciprocal %101 {approx = true} : vector<12x1xf32> -> vector<12x1xf32>
    %103 = vector.broadcast %102 : vector<12x1xf32> to vector<12x12xf32>
    %104 = arith.mulf %99, %103 : vector<12x12xf32>
    %105 = arith.truncf %104 : vector<12x12xf32> to vector<12x12xbf16>
    %106 = arith.truncf %88 : vector<12x8xf32> to vector<12x8xbf16>
    %cst_39 = arith.constant dense<0.000000e+00> : vector<12x8xf32>
    %107 = tpu.matmul %105, %106, %cst_39 {dimension_numbers = #tpu.dot_dimension_numbers<[1], [0], [0], [1], [0, 0, 1, 1], [], []>} : vector<12x12xbf16>, vector<12x8xbf16>, vector<12x8xf32> -> vector<12x8xf32>
    %108 = vector.extract_strided_slice %40 {offsets = [0, 24], sizes = [12, 8], strides = [1, 1]} : vector<12x32xf32> to vector<12x8xf32>
    %109 = vector.extract_strided_slice %41 {offsets = [0, 24], sizes = [12, 8], strides = [1, 1]} : vector<12x64xf32> to vector<12x8xf32>
    %110 = vector.extract_strided_slice %41 {offsets = [0, 56], sizes = [12, 8], strides = [1, 1]} : vector<12x64xf32> to vector<12x8xf32>
    %111 = vector.extract_strided_slice %14 {offsets = [3, 0, 0], sizes = [1, 12, 12], strides = [1, 1, 1]} : vector<4x12x12xf32> to vector<1x12x12xf32>
    %112 = vector.shape_cast %111 : vector<1x12x12xf32> to vector<12x12xf32>
    %113 = arith.truncf %108 : vector<12x8xf32> to vector<12x8xbf16>
    %114 = arith.truncf %109 : vector<12x8xf32> to vector<12x8xbf16>
    %cst_40 = arith.constant dense<0.000000e+00> : vector<12x12xf32>
    %115 = tpu.matmul %113, %114, %cst_40 {dimension_numbers = #tpu.dot_dimension_numbers<[1], [1], [0], [0], [0, 0, 1, 0], [], []>} : vector<12x8xbf16>, vector<12x8xbf16>, vector<12x12xf32> -> vector<12x12xf32>
    %116 = arith.addf %115, %112 : vector<12x12xf32>
    %cst_41 = arith.constant dense<0xFF800000> : vector<12xf32>
    %117 = vector.multi_reduction <maximumf>, %116, %cst_41 [1] : vector<12x12xf32> to vector<12xf32>
    %118 = vector.shape_cast %117 : vector<12xf32> to vector<12x1xf32>
    %119 = vector.broadcast %118 : vector<12x1xf32> to vector<12x12xf32>
    %120 = arith.subf %116, %119 : vector<12x12xf32>
    %121 = math.exp %120 : vector<12x12xf32>
    %cst_42 = arith.constant dense<0.000000e+00> : vector<12xf32>
    %122 = vector.multi_reduction <add>, %121, %cst_42 [1] : vector<12x12xf32> to vector<12xf32>
    %123 = vector.shape_cast %122 : vector<12xf32> to vector<12x1xf32>
    %124 = tpu.reciprocal %123 {approx = true} : vector<12x1xf32> -> vector<12x1xf32>
    %125 = vector.broadcast %124 : vector<12x1xf32> to vector<12x12xf32>
    %126 = arith.mulf %121, %125 : vector<12x12xf32>
    %127 = arith.truncf %126 : vector<12x12xf32> to vector<12x12xbf16>
    %128 = arith.truncf %110 : vector<12x8xf32> to vector<12x8xbf16>
    %cst_43 = arith.constant dense<0.000000e+00> : vector<12x8xf32>
    %129 = tpu.matmul %127, %128, %cst_43 {dimension_numbers = #tpu.dot_dimension_numbers<[1], [0], [0], [1], [0, 0, 1, 1], [], []>} : vector<12x12xbf16>, vector<12x8xbf16>, vector<12x8xf32> -> vector<12x8xf32>
    %130 = tpu.concatenate %63, %85, %107, %129 in 1 : vector<12x8xf32>, vector<12x8xf32>, vector<12x8xf32>, vector<12x8xf32> -> vector<12x32xf32>
    %131 = arith.truncf %130 : vector<12x32xf32> to vector<12x32xbf16>
    %cst_44 = arith.constant dense<0.000000e+00> : vector<12x32xf32>
    %132 = tpu.matmul %131, %37, %cst_44 {dimension_numbers = #tpu.dot_dimension_numbers<[1], [0], [0], [1], [0, 0, 1, 1], [], []>} : vector<12x32xbf16>, vector<32x32xbf16>, vector<12x32xf32> -> vector<12x32xf32>
    %133 = arith.addf %19, %132 : vector<12x32xf32>
    %c0_45 = arith.constant 0 : index
    %c1 = arith.constant 1 : index
    %c0_46 = arith.constant 0 : index
    %c0_47 = arith.constant 0 : index
    %134 = vector.load %arg7[%c0_45, %c1, %c0_46, %c0_47] : memref<2x2x1x32xf32, #tpu.memory_space<vmem>>, vector<1x1x1x32xf32>
    %135 = vector.shape_cast %134 : vector<1x1x1x32xf32> to vector<1x32xf32>
    %136 = arith.mulf %133, %133 : vector<12x32xf32>
    %cst_48 = arith.constant dense<0.000000e+00> : vector<12xf32>
    %137 = vector.multi_reduction <add>, %136, %cst_48 [1] : vector<12x32xf32> to vector<12xf32>
    %138 = vector.shape_cast %137 : vector<12xf32> to vector<12x1xf32>
    %cst_49 = arith.constant 3.200000e+01 : f32
    %139 = vector.broadcast %cst_49 : f32 to vector<12x1xf32>
    %140 = arith.divf %138, %139 : vector<12x1xf32>
    %cst_50 = arith.constant 9.99999997E-7 : f32
    %141 = vector.broadcast %cst_50 : f32 to vector<12x1xf32>
    %142 = arith.addf %140, %141 : vector<12x1xf32>
    %143 = math.rsqrt %142 : vector<12x1xf32>
    %144 = vector.broadcast %143 : vector<12x1xf32> to vector<12x32xf32>
    %145 = arith.mulf %133, %144 : vector<12x32xf32>
    %146 = vector.broadcast %135 : vector<1x32xf32> to vector<12x32xf32>
    %147 = arith.mulf %145, %146 : vector<12x32xf32>
    %c0_51 = arith.constant 0 : index
    %c0_52 = arith.constant 0 : index
    %c0_53 = arith.constant 0 : index
    %148 = vector.load %arg10[%c0_51, %c0_52, %c0_53] : memref<2x32x64xbf16, #tpu.memory_space<vmem>>, vector<1x32x64xbf16>
    %149 = vector.shape_cast %148 : vector<1x32x64xbf16> to vector<32x64xbf16>
    %150 = arith.truncf %147 : vector<12x32xf32> to vector<12x32xbf16>
    %cst_54 = arith.constant dense<0.000000e+00> : vector<12x64xf32>
    %151 = tpu.matmul %150, %149, %cst_54 {dimension_numbers = #tpu.dot_dimension_numbers<[1], [0], [0], [1], [0, 0, 1, 1], [], []>} : vector<12x32xbf16>, vector<32x64xbf16>, vector<12x64xf32> -> vector<12x64xf32>
    %cst_55 = arith.constant 0.000000e+00 : f32
    %152 = vector.broadcast %cst_55 : f32 to vector<12x64xf32>
    %153 = arith.maximumf %151, %152 : vector<12x64xf32>
    %c0_56 = arith.constant 0 : index
    %c0_57 = arith.constant 0 : index
    %c0_58 = arith.constant 0 : index
    %154 = vector.load %arg11[%c0_56, %c0_57, %c0_58] : memref<2x64x32xbf16, #tpu.memory_space<vmem>>, vector<1x64x32xbf16>
    %155 = vector.shape_cast %154 : vector<1x64x32xbf16> to vector<64x32xbf16>
    %156 = arith.truncf %153 : vector<12x64xf32> to vector<12x64xbf16>
    %cst_59 = arith.constant dense<0.000000e+00> : vector<12x32xf32>
    %157 = tpu.matmul %156, %155, %cst_59 {dimension_numbers = #tpu.dot_dimension_numbers<[1], [0], [0], [1], [0, 0, 1, 1], [], []>} : vector<12x64xbf16>, vector<64x32xbf16>, vector<12x32xf32> -> vector<12x32xf32>
    %158 = arith.addf %133, %157 : vector<12x32xf32>
    %c1_60 = arith.constant 1 : index
    %c0_61 = arith.constant 0 : index
    %c0_62 = arith.constant 0 : index
    %c0_63 = arith.constant 0 : index
    %159 = vector.load %arg7[%c1_60, %c0_61, %c0_62, %c0_63] : memref<2x2x1x32xf32, #tpu.memory_space<vmem>>, vector<1x1x1x32xf32>
    %160 = vector.shape_cast %159 : vector<1x1x1x32xf32> to vector<1x32xf32>
    %161 = arith.mulf %158, %158 : vector<12x32xf32>
    %cst_64 = arith.constant dense<0.000000e+00> : vector<12xf32>
    %162 = vector.multi_reduction <add>, %161, %cst_64 [1] : vector<12x32xf32> to vector<12xf32>
    %163 = vector.shape_cast %162 : vector<12xf32> to vector<12x1xf32>
    %cst_65 = arith.constant 3.200000e+01 : f32
    %164 = vector.broadcast %cst_65 : f32 to vector<12x1xf32>
    %165 = arith.divf %163, %164 : vector<12x1xf32>
    %cst_66 = arith.constant 9.99999997E-7 : f32
    %166 = vector.broadcast %cst_66 : f32 to vector<12x1xf32>
    %167 = arith.addf %165, %166 : vector<12x1xf32>
    %168 = math.rsqrt %167 : vector<12x1xf32>
    %169 = vector.broadcast %168 : vector<12x1xf32> to vector<12x32xf32>
    %170 = arith.mulf %158, %169 : vector<12x32xf32>
    %171 = vector.broadcast %160 : vector<1x32xf32> to vector<12x32xf32>
    %172 = arith.mulf %170, %171 : vector<12x32xf32>
    %c1_67 = arith.constant 1 : index
    %c0_68 = arith.constant 0 : index
    %c0_69 = arith.constant 0 : index
    %173 = vector.load %arg8[%c1_67, %c0_68, %c0_69] : memref<2x32x96xbf16, #tpu.memory_space<vmem>>, vector<1x32x96xbf16>
    %174 = vector.shape_cast %173 : vector<1x32x96xbf16> to vector<32x96xbf16>
    %c1_70 = arith.constant 1 : index
    %c0_71 = arith.constant 0 : index
    %c0_72 = arith.constant 0 : index
    %175 = vector.load %arg9[%c1_70, %c0_71, %c0_72] : memref<2x32x32xbf16, #tpu.memory_space<vmem>>, vector<1x32x32xbf16>
    %176 = vector.shape_cast %175 : vector<1x32x32xbf16> to vector<32x32xbf16>
    %177 = arith.truncf %172 : vector<12x32xf32> to vector<12x32xbf16>
    %cst_73 = arith.constant dense<0.000000e+00> : vector<12x96xf32>
    %178 = tpu.matmul %177, %174, %cst_73 {dimension_numbers = #tpu.dot_dimension_numbers<[1], [0], [0], [1], [0, 0, 1, 1], [], []>} : vector<12x32xbf16>, vector<32x96xbf16>, vector<12x96xf32> -> vector<12x96xf32>
    %179 = vector.extract_strided_slice %178 {offsets = [0, 0], sizes = [12, 32], strides = [1, 1]} : vector<12x96xf32> to vector<12x32xf32>
    %180 = vector.extract_strided_slice %178 {offsets = [0, 32], sizes = [12, 64], strides = [1, 1]} : vector<12x96xf32> to vector<12x64xf32>
    %181 = vector.extract_strided_slice %179 {offsets = [0, 0], sizes = [12, 8], strides = [1, 1]} : vector<12x32xf32> to vector<12x8xf32>
    %182 = vector.extract_strided_slice %180 {offsets = [0, 0], sizes = [12, 8], strides = [1, 1]} : vector<12x64xf32> to vector<12x8xf32>
    %183 = vector.extract_strided_slice %180 {offsets = [0, 32], sizes = [12, 8], strides = [1, 1]} : vector<12x64xf32> to vector<12x8xf32>
    %184 = vector.extract_strided_slice %14 {offsets = [0, 0, 0], sizes = [1, 12, 12], strides = [1, 1, 1]} : vector<4x12x12xf32> to vector<1x12x12xf32>
    %185 = vector.shape_cast %184 : vector<1x12x12xf32> to vector<12x12xf32>
    %186 = arith.truncf %181 : vector<12x8xf32> to vector<12x8xbf16>
    %187 = arith.truncf %182 : vector<12x8xf32> to vector<12x8xbf16>
    %cst_74 = arith.constant dense<0.000000e+00> : vector<12x12xf32>
    %188 = tpu.matmul %186, %187, %cst_74 {dimension_numbers = #tpu.dot_dimension_numbers<[1], [1], [0], [0], [0, 0, 1, 0], [], []>} : vector<12x8xbf16>, vector<12x8xbf16>, vector<12x12xf32> -> vector<12x12xf32>
    %189 = arith.addf %188, %185 : vector<12x12xf32>
    %cst_75 = arith.constant dense<0xFF800000> : vector<12xf32>
    %190 = vector.multi_reduction <maximumf>, %189, %cst_75 [1] : vector<12x12xf32> to vector<12xf32>
    %191 = vector.shape_cast %190 : vector<12xf32> to vector<12x1xf32>
    %192 = vector.broadcast %191 : vector<12x1xf32> to vector<12x12xf32>
    %193 = arith.subf %189, %192 : vector<12x12xf32>
    %194 = math.exp %193 : vector<12x12xf32>
    %cst_76 = arith.constant dense<0.000000e+00> : vector<12xf32>
    %195 = vector.multi_reduction <add>, %194, %cst_76 [1] : vector<12x12xf32> to vector<12xf32>
    %196 = vector.shape_cast %195 : vector<12xf32> to vector<12x1xf32>
    %197 = tpu.reciprocal %196 {approx = true} : vector<12x1xf32> -> vector<12x1xf32>
    %198 = vector.broadcast %197 : vector<12x1xf32> to vector<12x12xf32>
    %199 = arith.mulf %194, %198 : vector<12x12xf32>
    %200 = arith.truncf %199 : vector<12x12xf32> to vector<12x12xbf16>
    %201 = arith.truncf %183 : vector<12x8xf32> to vector<12x8xbf16>
    %cst_77 = arith.constant dense<0.000000e+00> : vector<12x8xf32>
    %202 = tpu.matmul %200, %201, %cst_77 {dimension_numbers = #tpu.dot_dimension_numbers<[1], [0], [0], [1], [0, 0, 1, 1], [], []>} : vector<12x12xbf16>, vector<12x8xbf16>, vector<12x8xf32> -> vector<12x8xf32>
    %203 = vector.extract_strided_slice %179 {offsets = [0, 8], sizes = [12, 8], strides = [1, 1]} : vector<12x32xf32> to vector<12x8xf32>
    %204 = vector.extract_strided_slice %180 {offsets = [0, 8], sizes = [12, 8], strides = [1, 1]} : vector<12x64xf32> to vector<12x8xf32>
    %205 = vector.extract_strided_slice %180 {offsets = [0, 40], sizes = [12, 8], strides = [1, 1]} : vector<12x64xf32> to vector<12x8xf32>
    %206 = vector.extract_strided_slice %14 {offsets = [1, 0, 0], sizes = [1, 12, 12], strides = [1, 1, 1]} : vector<4x12x12xf32> to vector<1x12x12xf32>
    %207 = vector.shape_cast %206 : vector<1x12x12xf32> to vector<12x12xf32>
    %208 = arith.truncf %203 : vector<12x8xf32> to vector<12x8xbf16>
    %209 = arith.truncf %204 : vector<12x8xf32> to vector<12x8xbf16>
    %cst_78 = arith.constant dense<0.000000e+00> : vector<12x12xf32>
    %210 = tpu.matmul %208, %209, %cst_78 {dimension_numbers = #tpu.dot_dimension_numbers<[1], [1], [0], [0], [0, 0, 1, 0], [], []>} : vector<12x8xbf16>, vector<12x8xbf16>, vector<12x12xf32> -> vector<12x12xf32>
    %211 = arith.addf %210, %207 : vector<12x12xf32>
    %cst_79 = arith.constant dense<0xFF800000> : vector<12xf32>
    %212 = vector.multi_reduction <maximumf>, %211, %cst_79 [1] : vector<12x12xf32> to vector<12xf32>
    %213 = vector.shape_cast %212 : vector<12xf32> to vector<12x1xf32>
    %214 = vector.broadcast %213 : vector<12x1xf32> to vector<12x12xf32>
    %215 = arith.subf %211, %214 : vector<12x12xf32>
    %216 = math.exp %215 : vector<12x12xf32>
    %cst_80 = arith.constant dense<0.000000e+00> : vector<12xf32>
    %217 = vector.multi_reduction <add>, %216, %cst_80 [1] : vector<12x12xf32> to vector<12xf32>
    %218 = vector.shape_cast %217 : vector<12xf32> to vector<12x1xf32>
    %219 = tpu.reciprocal %218 {approx = true} : vector<12x1xf32> -> vector<12x1xf32>
    %220 = vector.broadcast %219 : vector<12x1xf32> to vector<12x12xf32>
    %221 = arith.mulf %216, %220 : vector<12x12xf32>
    %222 = arith.truncf %221 : vector<12x12xf32> to vector<12x12xbf16>
    %223 = arith.truncf %205 : vector<12x8xf32> to vector<12x8xbf16>
    %cst_81 = arith.constant dense<0.000000e+00> : vector<12x8xf32>
    %224 = tpu.matmul %222, %223, %cst_81 {dimension_numbers = #tpu.dot_dimension_numbers<[1], [0], [0], [1], [0, 0, 1, 1], [], []>} : vector<12x12xbf16>, vector<12x8xbf16>, vector<12x8xf32> -> vector<12x8xf32>
    %225 = vector.extract_strided_slice %179 {offsets = [0, 16], sizes = [12, 8], strides = [1, 1]} : vector<12x32xf32> to vector<12x8xf32>
    %226 = vector.extract_strided_slice %180 {offsets = [0, 16], sizes = [12, 8], strides = [1, 1]} : vector<12x64xf32> to vector<12x8xf32>
    %227 = vector.extract_strided_slice %180 {offsets = [0, 48], sizes = [12, 8], strides = [1, 1]} : vector<12x64xf32> to vector<12x8xf32>
    %228 = vector.extract_strided_slice %14 {offsets = [2, 0, 0], sizes = [1, 12, 12], strides = [1, 1, 1]} : vector<4x12x12xf32> to vector<1x12x12xf32>
    %229 = vector.shape_cast %228 : vector<1x12x12xf32> to vector<12x12xf32>
    %230 = arith.truncf %225 : vector<12x8xf32> to vector<12x8xbf16>
    %231 = arith.truncf %226 : vector<12x8xf32> to vector<12x8xbf16>
    %cst_82 = arith.constant dense<0.000000e+00> : vector<12x12xf32>
    %232 = tpu.matmul %230, %231, %cst_82 {dimension_numbers = #tpu.dot_dimension_numbers<[1], [1], [0], [0], [0, 0, 1, 0], [], []>} : vector<12x8xbf16>, vector<12x8xbf16>, vector<12x12xf32> -> vector<12x12xf32>
    %233 = arith.addf %232, %229 : vector<12x12xf32>
    %cst_83 = arith.constant dense<0xFF800000> : vector<12xf32>
    %234 = vector.multi_reduction <maximumf>, %233, %cst_83 [1] : vector<12x12xf32> to vector<12xf32>
    %235 = vector.shape_cast %234 : vector<12xf32> to vector<12x1xf32>
    %236 = vector.broadcast %235 : vector<12x1xf32> to vector<12x12xf32>
    %237 = arith.subf %233, %236 : vector<12x12xf32>
    %238 = math.exp %237 : vector<12x12xf32>
    %cst_84 = arith.constant dense<0.000000e+00> : vector<12xf32>
    %239 = vector.multi_reduction <add>, %238, %cst_84 [1] : vector<12x12xf32> to vector<12xf32>
    %240 = vector.shape_cast %239 : vector<12xf32> to vector<12x1xf32>
    %241 = tpu.reciprocal %240 {approx = true} : vector<12x1xf32> -> vector<12x1xf32>
    %242 = vector.broadcast %241 : vector<12x1xf32> to vector<12x12xf32>
    %243 = arith.mulf %238, %242 : vector<12x12xf32>
    %244 = arith.truncf %243 : vector<12x12xf32> to vector<12x12xbf16>
    %245 = arith.truncf %227 : vector<12x8xf32> to vector<12x8xbf16>
    %cst_85 = arith.constant dense<0.000000e+00> : vector<12x8xf32>
    %246 = tpu.matmul %244, %245, %cst_85 {dimension_numbers = #tpu.dot_dimension_numbers<[1], [0], [0], [1], [0, 0, 1, 1], [], []>} : vector<12x12xbf16>, vector<12x8xbf16>, vector<12x8xf32> -> vector<12x8xf32>
    %247 = vector.extract_strided_slice %179 {offsets = [0, 24], sizes = [12, 8], strides = [1, 1]} : vector<12x32xf32> to vector<12x8xf32>
    %248 = vector.extract_strided_slice %180 {offsets = [0, 24], sizes = [12, 8], strides = [1, 1]} : vector<12x64xf32> to vector<12x8xf32>
    %249 = vector.extract_strided_slice %180 {offsets = [0, 56], sizes = [12, 8], strides = [1, 1]} : vector<12x64xf32> to vector<12x8xf32>
    %250 = vector.extract_strided_slice %14 {offsets = [3, 0, 0], sizes = [1, 12, 12], strides = [1, 1, 1]} : vector<4x12x12xf32> to vector<1x12x12xf32>
    %251 = vector.shape_cast %250 : vector<1x12x12xf32> to vector<12x12xf32>
    %252 = arith.truncf %247 : vector<12x8xf32> to vector<12x8xbf16>
    %253 = arith.truncf %248 : vector<12x8xf32> to vector<12x8xbf16>
    %cst_86 = arith.constant dense<0.000000e+00> : vector<12x12xf32>
    %254 = tpu.matmul %252, %253, %cst_86 {dimension_numbers = #tpu.dot_dimension_numbers<[1], [1], [0], [0], [0, 0, 1, 0], [], []>} : vector<12x8xbf16>, vector<12x8xbf16>, vector<12x12xf32> -> vector<12x12xf32>
    %255 = arith.addf %254, %251 : vector<12x12xf32>
    %cst_87 = arith.constant dense<0xFF800000> : vector<12xf32>
    %256 = vector.multi_reduction <maximumf>, %255, %cst_87 [1] : vector<12x12xf32> to vector<12xf32>
    %257 = vector.shape_cast %256 : vector<12xf32> to vector<12x1xf32>
    %258 = vector.broadcast %257 : vector<12x1xf32> to vector<12x12xf32>
    %259 = arith.subf %255, %258 : vector<12x12xf32>
    %260 = math.exp %259 : vector<12x12xf32>
    %cst_88 = arith.constant dense<0.000000e+00> : vector<12xf32>
    %261 = vector.multi_reduction <add>, %260, %cst_88 [1] : vector<12x12xf32> to vector<12xf32>
    %262 = vector.shape_cast %261 : vector<12xf32> to vector<12x1xf32>
    %263 = tpu.reciprocal %262 {approx = true} : vector<12x1xf32> -> vector<12x1xf32>
    %264 = vector.broadcast %263 : vector<12x1xf32> to vector<12x12xf32>
    %265 = arith.mulf %260, %264 : vector<12x12xf32>
    %266 = arith.truncf %265 : vector<12x12xf32> to vector<12x12xbf16>
    %267 = arith.truncf %249 : vector<12x8xf32> to vector<12x8xbf16>
    %cst_89 = arith.constant dense<0.000000e+00> : vector<12x8xf32>
    %268 = tpu.matmul %266, %267, %cst_89 {dimension_numbers = #tpu.dot_dimension_numbers<[1], [0], [0], [1], [0, 0, 1, 1], [], []>} : vector<12x12xbf16>, vector<12x8xbf16>, vector<12x8xf32> -> vector<12x8xf32>
    %269 = tpu.concatenate %202, %224, %246, %268 in 1 : vector<12x8xf32>, vector<12x8xf32>, vector<12x8xf32>, vector<12x8xf32> -> vector<12x32xf32>
    %270 = arith.truncf %269 : vector<12x32xf32> to vector<12x32xbf16>
    %cst_90 = arith.constant dense<0.000000e+00> : vector<12x32xf32>
    %271 = tpu.matmul %270, %176, %cst_90 {dimension_numbers = #tpu.dot_dimension_numbers<[1], [0], [0], [1], [0, 0, 1, 1], [], []>} : vector<12x32xbf16>, vector<32x32xbf16>, vector<12x32xf32> -> vector<12x32xf32>
    %272 = arith.addf %158, %271 : vector<12x32xf32>
    %c1_91 = arith.constant 1 : index
    %c1_92 = arith.constant 1 : index
    %c0_93 = arith.constant 0 : index
    %c0_94 = arith.constant 0 : index
    %273 = vector.load %arg7[%c1_91, %c1_92, %c0_93, %c0_94] : memref<2x2x1x32xf32, #tpu.memory_space<vmem>>, vector<1x1x1x32xf32>
    %274 = vector.shape_cast %273 : vector<1x1x1x32xf32> to vector<1x32xf32>
    %275 = arith.mulf %272, %272 : vector<12x32xf32>
    %cst_95 = arith.constant dense<0.000000e+00> : vector<12xf32>
    %276 = vector.multi_reduction <add>, %275, %cst_95 [1] : vector<12x32xf32> to vector<12xf32>
    %277 = vector.shape_cast %276 : vector<12xf32> to vector<12x1xf32>
    %cst_96 = arith.constant 3.200000e+01 : f32
    %278 = vector.broadcast %cst_96 : f32 to vector<12x1xf32>
    %279 = arith.divf %277, %278 : vector<12x1xf32>
    %cst_97 = arith.constant 9.99999997E-7 : f32
    %280 = vector.broadcast %cst_97 : f32 to vector<12x1xf32>
    %281 = arith.addf %279, %280 : vector<12x1xf32>
    %282 = math.rsqrt %281 : vector<12x1xf32>
    %283 = vector.broadcast %282 : vector<12x1xf32> to vector<12x32xf32>
    %284 = arith.mulf %272, %283 : vector<12x32xf32>
    %285 = vector.broadcast %274 : vector<1x32xf32> to vector<12x32xf32>
    %286 = arith.mulf %284, %285 : vector<12x32xf32>
    %c1_98 = arith.constant 1 : index
    %c0_99 = arith.constant 0 : index
    %c0_100 = arith.constant 0 : index
    %287 = vector.load %arg10[%c1_98, %c0_99, %c0_100] : memref<2x32x64xbf16, #tpu.memory_space<vmem>>, vector<1x32x64xbf16>
    %288 = vector.shape_cast %287 : vector<1x32x64xbf16> to vector<32x64xbf16>
    %289 = arith.truncf %286 : vector<12x32xf32> to vector<12x32xbf16>
    %cst_101 = arith.constant dense<0.000000e+00> : vector<12x64xf32>
    %290 = tpu.matmul %289, %288, %cst_101 {dimension_numbers = #tpu.dot_dimension_numbers<[1], [0], [0], [1], [0, 0, 1, 1], [], []>} : vector<12x32xbf16>, vector<32x64xbf16>, vector<12x64xf32> -> vector<12x64xf32>
    %cst_102 = arith.constant 0.000000e+00 : f32
    %291 = vector.broadcast %cst_102 : f32 to vector<12x64xf32>
    %292 = arith.maximumf %290, %291 : vector<12x64xf32>
    %c1_103 = arith.constant 1 : index
    %c0_104 = arith.constant 0 : index
    %c0_105 = arith.constant 0 : index
    %293 = vector.load %arg11[%c1_103, %c0_104, %c0_105] : memref<2x64x32xbf16, #tpu.memory_space<vmem>>, vector<1x64x32xbf16>
    %294 = vector.shape_cast %293 : vector<1x64x32xbf16> to vector<64x32xbf16>
    %295 = arith.truncf %292 : vector<12x64xf32> to vector<12x64xbf16>
    %cst_106 = arith.constant dense<0.000000e+00> : vector<12x32xf32>
    %296 = tpu.matmul %295, %294, %cst_106 {dimension_numbers = #tpu.dot_dimension_numbers<[1], [0], [0], [1], [0, 0, 1, 1], [], []>} : vector<12x64xbf16>, vector<64x32xbf16>, vector<12x32xf32> -> vector<12x32xf32>
    %297 = arith.addf %272, %296 : vector<12x32xf32>
    %c0_107 = arith.constant 0 : index
    %c0_108 = arith.constant 0 : index
    %298 = vector.load %arg12[%c0_107, %c0_108] : memref<1x32xf32, #tpu.memory_space<vmem>>, vector<1x32xf32>
    %299 = arith.mulf %297, %297 : vector<12x32xf32>
    %cst_109 = arith.constant dense<0.000000e+00> : vector<12xf32>
    %300 = vector.multi_reduction <add>, %299, %cst_109 [1] : vector<12x32xf32> to vector<12xf32>
    %301 = vector.shape_cast %300 : vector<12xf32> to vector<12x1xf32>
    %cst_110 = arith.constant 3.200000e+01 : f32
    %302 = vector.broadcast %cst_110 : f32 to vector<12x1xf32>
    %303 = arith.divf %301, %302 : vector<12x1xf32>
    %cst_111 = arith.constant 9.99999997E-7 : f32
    %304 = vector.broadcast %cst_111 : f32 to vector<12x1xf32>
    %305 = arith.addf %303, %304 : vector<12x1xf32>
    %306 = math.rsqrt %305 : vector<12x1xf32>
    %307 = vector.broadcast %306 : vector<12x1xf32> to vector<12x32xf32>
    %308 = arith.mulf %297, %307 : vector<12x32xf32>
    %309 = vector.broadcast %298 : vector<1x32xf32> to vector<12x32xf32>
    %310 = arith.mulf %308, %309 : vector<12x32xf32>
    %c0_112 = arith.constant 0 : index
    %c0_113 = arith.constant 0 : index
    %c0_114 = arith.constant 0 : index
    %311 = vector.load %arg2[%c0_112, %c0_113, %c0_114] : memref<2x8x32xf32, #tpu.memory_space<vmem>>, vector<1x8x32xf32>
    %312 = vector.shape_cast %311 : vector<1x8x32xf32> to vector<8x32xf32>
    %c0_115 = arith.constant 0 : index
    %c0_116 = arith.constant 0 : index
    %c0_117 = arith.constant 0 : index
    %c0_118 = arith.constant 0 : index
    %313 = vector.load %arg13[%c0_115, %c0_116, %c0_117, %c0_118] : memref<2x3x1x32xf32, #tpu.memory_space<vmem>>, vector<1x1x1x32xf32>
    %314 = vector.shape_cast %313 : vector<1x1x1x32xf32> to vector<1x32xf32>
    %315 = arith.mulf %312, %312 : vector<8x32xf32>
    %cst_119 = arith.constant dense<0.000000e+00> : vector<8xf32>
    %316 = vector.multi_reduction <add>, %315, %cst_119 [1] : vector<8x32xf32> to vector<8xf32>
    %317 = vector.shape_cast %316 : vector<8xf32> to vector<8x1xf32>
    %cst_120 = arith.constant 3.200000e+01 : f32
    %318 = vector.broadcast %cst_120 : f32 to vector<8x1xf32>
    %319 = arith.divf %317, %318 : vector<8x1xf32>
    %cst_121 = arith.constant 9.99999997E-7 : f32
    %320 = vector.broadcast %cst_121 : f32 to vector<8x1xf32>
    %321 = arith.addf %319, %320 : vector<8x1xf32>
    %322 = math.rsqrt %321 : vector<8x1xf32>
    %323 = vector.broadcast %322 : vector<8x1xf32> to vector<8x32xf32>
    %324 = arith.mulf %312, %323 : vector<8x32xf32>
    %325 = vector.broadcast %314 : vector<1x32xf32> to vector<8x32xf32>
    %326 = arith.mulf %324, %325 : vector<8x32xf32>
    %c0_122 = arith.constant 0 : index
    %c0_123 = arith.constant 0 : index
    %c0_124 = arith.constant 0 : index
    %327 = vector.load %arg14[%c0_122, %c0_123, %c0_124] : memref<2x32x96xbf16, #tpu.memory_space<vmem>>, vector<1x32x96xbf16>
    %328 = vector.shape_cast %327 : vector<1x32x96xbf16> to vector<32x96xbf16>
    %c0_125 = arith.constant 0 : index
    %c0_126 = arith.constant 0 : index
    %c0_127 = arith.constant 0 : index
    %329 = vector.load %arg15[%c0_125, %c0_126, %c0_127] : memref<2x32x32xbf16, #tpu.memory_space<vmem>>, vector<1x32x32xbf16>
    %330 = vector.shape_cast %329 : vector<1x32x32xbf16> to vector<32x32xbf16>
    %331 = arith.truncf %326 : vector<8x32xf32> to vector<8x32xbf16>
    %cst_128 = arith.constant dense<0.000000e+00> : vector<8x96xf32>
    %332 = tpu.matmul %331, %328, %cst_128 {dimension_numbers = #tpu.dot_dimension_numbers<[1], [0], [0], [1], [0, 0, 1, 1], [], []>} : vector<8x32xbf16>, vector<32x96xbf16>, vector<8x96xf32> -> vector<8x96xf32>
    %333 = vector.extract_strided_slice %332 {offsets = [0, 0], sizes = [8, 32], strides = [1, 1]} : vector<8x96xf32> to vector<8x32xf32>
    %334 = vector.extract_strided_slice %332 {offsets = [0, 32], sizes = [8, 64], strides = [1, 1]} : vector<8x96xf32> to vector<8x64xf32>
    %335 = vector.extract_strided_slice %333 {offsets = [0, 0], sizes = [8, 8], strides = [1, 1]} : vector<8x32xf32> to vector<8x8xf32>
    %336 = vector.extract_strided_slice %334 {offsets = [0, 0], sizes = [8, 8], strides = [1, 1]} : vector<8x64xf32> to vector<8x8xf32>
    %337 = vector.extract_strided_slice %334 {offsets = [0, 32], sizes = [8, 8], strides = [1, 1]} : vector<8x64xf32> to vector<8x8xf32>
    %338 = vector.extract_strided_slice %1 {offsets = [0, 0, 0], sizes = [1, 8, 8], strides = [1, 1, 1]} : vector<4x8x8xf32> to vector<1x8x8xf32>
    %339 = vector.shape_cast %338 : vector<1x8x8xf32> to vector<8x8xf32>
    %340 = arith.truncf %335 : vector<8x8xf32> to vector<8x8xbf16>
    %341 = arith.truncf %336 : vector<8x8xf32> to vector<8x8xbf16>
    %cst_129 = arith.constant dense<0.000000e+00> : vector<8x8xf32>
    %342 = tpu.matmul %340, %341, %cst_129 {dimension_numbers = #tpu.dot_dimension_numbers<[1], [1], [0], [0], [0, 0, 1, 0], [], []>} : vector<8x8xbf16>, vector<8x8xbf16>, vector<8x8xf32> -> vector<8x8xf32>
    %343 = arith.addf %342, %339 : vector<8x8xf32>
    %cst_130 = arith.constant dense<0xFF800000> : vector<8xf32>
    %344 = vector.multi_reduction <maximumf>, %343, %cst_130 [1] : vector<8x8xf32> to vector<8xf32>
    %345 = vector.shape_cast %344 : vector<8xf32> to vector<8x1xf32>
    %346 = vector.broadcast %345 : vector<8x1xf32> to vector<8x8xf32>
    %347 = arith.subf %343, %346 : vector<8x8xf32>
    %348 = math.exp %347 : vector<8x8xf32>
    %cst_131 = arith.constant dense<0.000000e+00> : vector<8xf32>
    %349 = vector.multi_reduction <add>, %348, %cst_131 [1] : vector<8x8xf32> to vector<8xf32>
    %350 = vector.shape_cast %349 : vector<8xf32> to vector<8x1xf32>
    %351 = tpu.reciprocal %350 {approx = true} : vector<8x1xf32> -> vector<8x1xf32>
    %352 = vector.broadcast %351 : vector<8x1xf32> to vector<8x8xf32>
    %353 = arith.mulf %348, %352 : vector<8x8xf32>
    %354 = arith.truncf %353 : vector<8x8xf32> to vector<8x8xbf16>
    %355 = arith.truncf %337 : vector<8x8xf32> to vector<8x8xbf16>
    %cst_132 = arith.constant dense<0.000000e+00> : vector<8x8xf32>
    %356 = tpu.matmul %354, %355, %cst_132 {dimension_numbers = #tpu.dot_dimension_numbers<[1], [0], [0], [1], [0, 0, 1, 1], [], []>} : vector<8x8xbf16>, vector<8x8xbf16>, vector<8x8xf32> -> vector<8x8xf32>
    %357 = vector.extract_strided_slice %333 {offsets = [0, 8], sizes = [8, 8], strides = [1, 1]} : vector<8x32xf32> to vector<8x8xf32>
    %358 = vector.extract_strided_slice %334 {offsets = [0, 8], sizes = [8, 8], strides = [1, 1]} : vector<8x64xf32> to vector<8x8xf32>
    %359 = vector.extract_strided_slice %334 {offsets = [0, 40], sizes = [8, 8], strides = [1, 1]} : vector<8x64xf32> to vector<8x8xf32>
    %360 = vector.extract_strided_slice %1 {offsets = [1, 0, 0], sizes = [1, 8, 8], strides = [1, 1, 1]} : vector<4x8x8xf32> to vector<1x8x8xf32>
    %361 = vector.shape_cast %360 : vector<1x8x8xf32> to vector<8x8xf32>
    %362 = arith.truncf %357 : vector<8x8xf32> to vector<8x8xbf16>
    %363 = arith.truncf %358 : vector<8x8xf32> to vector<8x8xbf16>
    %cst_133 = arith.constant dense<0.000000e+00> : vector<8x8xf32>
    %364 = tpu.matmul %362, %363, %cst_133 {dimension_numbers = #tpu.dot_dimension_numbers<[1], [1], [0], [0], [0, 0, 1, 0], [], []>} : vector<8x8xbf16>, vector<8x8xbf16>, vector<8x8xf32> -> vector<8x8xf32>
    %365 = arith.addf %364, %361 : vector<8x8xf32>
    %cst_134 = arith.constant dense<0xFF800000> : vector<8xf32>
    %366 = vector.multi_reduction <maximumf>, %365, %cst_134 [1] : vector<8x8xf32> to vector<8xf32>
    %367 = vector.shape_cast %366 : vector<8xf32> to vector<8x1xf32>
    %368 = vector.broadcast %367 : vector<8x1xf32> to vector<8x8xf32>
    %369 = arith.subf %365, %368 : vector<8x8xf32>
    %370 = math.exp %369 : vector<8x8xf32>
    %cst_135 = arith.constant dense<0.000000e+00> : vector<8xf32>
    %371 = vector.multi_reduction <add>, %370, %cst_135 [1] : vector<8x8xf32> to vector<8xf32>
    %372 = vector.shape_cast %371 : vector<8xf32> to vector<8x1xf32>
    %373 = tpu.reciprocal %372 {approx = true} : vector<8x1xf32> -> vector<8x1xf32>
    %374 = vector.broadcast %373 : vector<8x1xf32> to vector<8x8xf32>
    %375 = arith.mulf %370, %374 : vector<8x8xf32>
    %376 = arith.truncf %375 : vector<8x8xf32> to vector<8x8xbf16>
    %377 = arith.truncf %359 : vector<8x8xf32> to vector<8x8xbf16>
    %cst_136 = arith.constant dense<0.000000e+00> : vector<8x8xf32>
    %378 = tpu.matmul %376, %377, %cst_136 {dimension_numbers = #tpu.dot_dimension_numbers<[1], [0], [0], [1], [0, 0, 1, 1], [], []>} : vector<8x8xbf16>, vector<8x8xbf16>, vector<8x8xf32> -> vector<8x8xf32>
    %379 = vector.extract_strided_slice %333 {offsets = [0, 16], sizes = [8, 8], strides = [1, 1]} : vector<8x32xf32> to vector<8x8xf32>
    %380 = vector.extract_strided_slice %334 {offsets = [0, 16], sizes = [8, 8], strides = [1, 1]} : vector<8x64xf32> to vector<8x8xf32>
    %381 = vector.extract_strided_slice %334 {offsets = [0, 48], sizes = [8, 8], strides = [1, 1]} : vector<8x64xf32> to vector<8x8xf32>
    %382 = vector.extract_strided_slice %1 {offsets = [2, 0, 0], sizes = [1, 8, 8], strides = [1, 1, 1]} : vector<4x8x8xf32> to vector<1x8x8xf32>
    %383 = vector.shape_cast %382 : vector<1x8x8xf32> to vector<8x8xf32>
    %384 = arith.truncf %379 : vector<8x8xf32> to vector<8x8xbf16>
    %385 = arith.truncf %380 : vector<8x8xf32> to vector<8x8xbf16>
    %cst_137 = arith.constant dense<0.000000e+00> : vector<8x8xf32>
    %386 = tpu.matmul %384, %385, %cst_137 {dimension_numbers = #tpu.dot_dimension_numbers<[1], [1], [0], [0], [0, 0, 1, 0], [], []>} : vector<8x8xbf16>, vector<8x8xbf16>, vector<8x8xf32> -> vector<8x8xf32>
    %387 = arith.addf %386, %383 : vector<8x8xf32>
    %cst_138 = arith.constant dense<0xFF800000> : vector<8xf32>
    %388 = vector.multi_reduction <maximumf>, %387, %cst_138 [1] : vector<8x8xf32> to vector<8xf32>
    %389 = vector.shape_cast %388 : vector<8xf32> to vector<8x1xf32>
    %390 = vector.broadcast %389 : vector<8x1xf32> to vector<8x8xf32>
    %391 = arith.subf %387, %390 : vector<8x8xf32>
    %392 = math.exp %391 : vector<8x8xf32>
    %cst_139 = arith.constant dense<0.000000e+00> : vector<8xf32>
    %393 = vector.multi_reduction <add>, %392, %cst_139 [1] : vector<8x8xf32> to vector<8xf32>
    %394 = vector.shape_cast %393 : vector<8xf32> to vector<8x1xf32>
    %395 = tpu.reciprocal %394 {approx = true} : vector<8x1xf32> -> vector<8x1xf32>
    %396 = vector.broadcast %395 : vector<8x1xf32> to vector<8x8xf32>
    %397 = arith.mulf %392, %396 : vector<8x8xf32>
    %398 = arith.truncf %397 : vector<8x8xf32> to vector<8x8xbf16>
    %399 = arith.truncf %381 : vector<8x8xf32> to vector<8x8xbf16>
    %cst_140 = arith.constant dense<0.000000e+00> : vector<8x8xf32>
    %400 = tpu.matmul %398, %399, %cst_140 {dimension_numbers = #tpu.dot_dimension_numbers<[1], [0], [0], [1], [0, 0, 1, 1], [], []>} : vector<8x8xbf16>, vector<8x8xbf16>, vector<8x8xf32> -> vector<8x8xf32>
    %401 = vector.extract_strided_slice %333 {offsets = [0, 24], sizes = [8, 8], strides = [1, 1]} : vector<8x32xf32> to vector<8x8xf32>
    %402 = vector.extract_strided_slice %334 {offsets = [0, 24], sizes = [8, 8], strides = [1, 1]} : vector<8x64xf32> to vector<8x8xf32>
    %403 = vector.extract_strided_slice %334 {offsets = [0, 56], sizes = [8, 8], strides = [1, 1]} : vector<8x64xf32> to vector<8x8xf32>
    %404 = vector.extract_strided_slice %1 {offsets = [3, 0, 0], sizes = [1, 8, 8], strides = [1, 1, 1]} : vector<4x8x8xf32> to vector<1x8x8xf32>
    %405 = vector.shape_cast %404 : vector<1x8x8xf32> to vector<8x8xf32>
    %406 = arith.truncf %401 : vector<8x8xf32> to vector<8x8xbf16>
    %407 = arith.truncf %402 : vector<8x8xf32> to vector<8x8xbf16>
    %cst_141 = arith.constant dense<0.000000e+00> : vector<8x8xf32>
    %408 = tpu.matmul %406, %407, %cst_141 {dimension_numbers = #tpu.dot_dimension_numbers<[1], [1], [0], [0], [0, 0, 1, 0], [], []>} : vector<8x8xbf16>, vector<8x8xbf16>, vector<8x8xf32> -> vector<8x8xf32>
    %409 = arith.addf %408, %405 : vector<8x8xf32>
    %cst_142 = arith.constant dense<0xFF800000> : vector<8xf32>
    %410 = vector.multi_reduction <maximumf>, %409, %cst_142 [1] : vector<8x8xf32> to vector<8xf32>
    %411 = vector.shape_cast %410 : vector<8xf32> to vector<8x1xf32>
    %412 = vector.broadcast %411 : vector<8x1xf32> to vector<8x8xf32>
    %413 = arith.subf %409, %412 : vector<8x8xf32>
    %414 = math.exp %413 : vector<8x8xf32>
    %cst_143 = arith.constant dense<0.000000e+00> : vector<8xf32>
    %415 = vector.multi_reduction <add>, %414, %cst_143 [1] : vector<8x8xf32> to vector<8xf32>
    %416 = vector.shape_cast %415 : vector<8xf32> to vector<8x1xf32>
    %417 = tpu.reciprocal %416 {approx = true} : vector<8x1xf32> -> vector<8x1xf32>
    %418 = vector.broadcast %417 : vector<8x1xf32> to vector<8x8xf32>
    %419 = arith.mulf %414, %418 : vector<8x8xf32>
    %420 = arith.truncf %419 : vector<8x8xf32> to vector<8x8xbf16>
    %421 = arith.truncf %403 : vector<8x8xf32> to vector<8x8xbf16>
    %cst_144 = arith.constant dense<0.000000e+00> : vector<8x8xf32>
    %422 = tpu.matmul %420, %421, %cst_144 {dimension_numbers = #tpu.dot_dimension_numbers<[1], [0], [0], [1], [0, 0, 1, 1], [], []>} : vector<8x8xbf16>, vector<8x8xbf16>, vector<8x8xf32> -> vector<8x8xf32>
    %423 = tpu.concatenate %356, %378, %400, %422 in 1 : vector<8x8xf32>, vector<8x8xf32>, vector<8x8xf32>, vector<8x8xf32> -> vector<8x32xf32>
    %424 = arith.truncf %423 : vector<8x32xf32> to vector<8x32xbf16>
    %cst_145 = arith.constant dense<0.000000e+00> : vector<8x32xf32>
    %425 = tpu.matmul %424, %330, %cst_145 {dimension_numbers = #tpu.dot_dimension_numbers<[1], [0], [0], [1], [0, 0, 1, 1], [], []>} : vector<8x32xbf16>, vector<32x32xbf16>, vector<8x32xf32> -> vector<8x32xf32>
    %426 = arith.addf %312, %425 : vector<8x32xf32>
    %c0_146 = arith.constant 0 : index
    %c1_147 = arith.constant 1 : index
    %c0_148 = arith.constant 0 : index
    %c0_149 = arith.constant 0 : index
    %427 = vector.load %arg13[%c0_146, %c1_147, %c0_148, %c0_149] : memref<2x3x1x32xf32, #tpu.memory_space<vmem>>, vector<1x1x1x32xf32>
    %428 = vector.shape_cast %427 : vector<1x1x1x32xf32> to vector<1x32xf32>
    %429 = arith.mulf %426, %426 : vector<8x32xf32>
    %cst_150 = arith.constant dense<0.000000e+00> : vector<8xf32>
    %430 = vector.multi_reduction <add>, %429, %cst_150 [1] : vector<8x32xf32> to vector<8xf32>
    %431 = vector.shape_cast %430 : vector<8xf32> to vector<8x1xf32>
    %cst_151 = arith.constant 3.200000e+01 : f32
    %432 = vector.broadcast %cst_151 : f32 to vector<8x1xf32>
    %433 = arith.divf %431, %432 : vector<8x1xf32>
    %cst_152 = arith.constant 9.99999997E-7 : f32
    %434 = vector.broadcast %cst_152 : f32 to vector<8x1xf32>
    %435 = arith.addf %433, %434 : vector<8x1xf32>
    %436 = math.rsqrt %435 : vector<8x1xf32>
    %437 = vector.broadcast %436 : vector<8x1xf32> to vector<8x32xf32>
    %438 = arith.mulf %426, %437 : vector<8x32xf32>
    %439 = vector.broadcast %428 : vector<1x32xf32> to vector<8x32xf32>
    %440 = arith.mulf %438, %439 : vector<8x32xf32>
    %c0_153 = arith.constant 0 : index
    %c0_154 = arith.constant 0 : index
    %c0_155 = arith.constant 0 : index
    %441 = vector.load %arg16[%c0_153, %c0_154, %c0_155] : memref<2x32x32xbf16, #tpu.memory_space<vmem>>, vector<1x32x32xbf16>
    %442 = vector.shape_cast %441 : vector<1x32x32xbf16> to vector<32x32xbf16>
    %c0_156 = arith.constant 0 : index
    %c0_157 = arith.constant 0 : index
    %c0_158 = arith.constant 0 : index
    %443 = vector.load %arg17[%c0_156, %c0_157, %c0_158] : memref<2x32x64xbf16, #tpu.memory_space<vmem>>, vector<1x32x64xbf16>
    %444 = vector.shape_cast %443 : vector<1x32x64xbf16> to vector<32x64xbf16>
    %c0_159 = arith.constant 0 : index
    %c0_160 = arith.constant 0 : index
    %c0_161 = arith.constant 0 : index
    %445 = vector.load %arg18[%c0_159, %c0_160, %c0_161] : memref<2x32x32xbf16, #tpu.memory_space<vmem>>, vector<1x32x32xbf16>
    %446 = vector.shape_cast %445 : vector<1x32x32xbf16> to vector<32x32xbf16>
    %447 = arith.truncf %440 : vector<8x32xf32> to vector<8x32xbf16>
    %cst_162 = arith.constant dense<0.000000e+00> : vector<8x32xf32>
    %448 = tpu.matmul %447, %442, %cst_162 {dimension_numbers = #tpu.dot_dimension_numbers<[1], [0], [0], [1], [0, 0, 1, 1], [], []>} : vector<8x32xbf16>, vector<32x32xbf16>, vector<8x32xf32> -> vector<8x32xf32>
    %449 = arith.truncf %310 : vector<12x32xf32> to vector<12x32xbf16>
    %cst_163 = arith.constant dense<0.000000e+00> : vector<12x64xf32>
    %450 = tpu.matmul %449, %444, %cst_163 {dimension_numbers = #tpu.dot_dimension_numbers<[1], [0], [0], [1], [0, 0, 1, 1], [], []>} : vector<12x32xbf16>, vector<32x64xbf16>, vector<12x64xf32> -> vector<12x64xf32>
    %451 = vector.extract_strided_slice %448 {offsets = [0, 0], sizes = [8, 8], strides = [1, 1]} : vector<8x32xf32> to vector<8x8xf32>
    %452 = vector.extract_strided_slice %450 {offsets = [0, 0], sizes = [12, 8], strides = [1, 1]} : vector<12x64xf32> to vector<12x8xf32>
    %453 = vector.extract_strided_slice %450 {offsets = [0, 32], sizes = [12, 8], strides = [1, 1]} : vector<12x64xf32> to vector<12x8xf32>
    %454 = vector.shape_cast %17 : vector<1x8x12xf32> to vector<8x12xf32>
    %455 = arith.truncf %451 : vector<8x8xf32> to vector<8x8xbf16>
    %456 = arith.truncf %452 : vector<12x8xf32> to vector<12x8xbf16>
    %cst_164 = arith.constant dense<0.000000e+00> : vector<8x12xf32>
    %457 = tpu.matmul %455, %456, %cst_164 {dimension_numbers = #tpu.dot_dimension_numbers<[1], [1], [0], [0], [0, 0, 1, 0], [], []>} : vector<8x8xbf16>, vector<12x8xbf16>, vector<8x12xf32> -> vector<8x12xf32>
    %458 = arith.addf %457, %454 : vector<8x12xf32>
    %cst_165 = arith.constant dense<0xFF800000> : vector<8xf32>
    %459 = vector.multi_reduction <maximumf>, %458, %cst_165 [1] : vector<8x12xf32> to vector<8xf32>
    %460 = vector.shape_cast %459 : vector<8xf32> to vector<8x1xf32>
    %461 = vector.broadcast %460 : vector<8x1xf32> to vector<8x12xf32>
    %462 = arith.subf %458, %461 : vector<8x12xf32>
    %463 = math.exp %462 : vector<8x12xf32>
    %cst_166 = arith.constant dense<0.000000e+00> : vector<8xf32>
    %464 = vector.multi_reduction <add>, %463, %cst_166 [1] : vector<8x12xf32> to vector<8xf32>
    %465 = vector.shape_cast %464 : vector<8xf32> to vector<8x1xf32>
    %466 = tpu.reciprocal %465 {approx = true} : vector<8x1xf32> -> vector<8x1xf32>
    %467 = vector.broadcast %466 : vector<8x1xf32> to vector<8x12xf32>
    %468 = arith.mulf %463, %467 : vector<8x12xf32>
    %469 = arith.truncf %468 : vector<8x12xf32> to vector<8x12xbf16>
    %470 = arith.truncf %453 : vector<12x8xf32> to vector<12x8xbf16>
    %cst_167 = arith.constant dense<0.000000e+00> : vector<8x8xf32>
    %471 = tpu.matmul %469, %470, %cst_167 {dimension_numbers = #tpu.dot_dimension_numbers<[1], [0], [0], [1], [0, 0, 1, 1], [], []>} : vector<8x12xbf16>, vector<12x8xbf16>, vector<8x8xf32> -> vector<8x8xf32>
    %472 = vector.extract_strided_slice %448 {offsets = [0, 8], sizes = [8, 8], strides = [1, 1]} : vector<8x32xf32> to vector<8x8xf32>
    %473 = vector.extract_strided_slice %450 {offsets = [0, 8], sizes = [12, 8], strides = [1, 1]} : vector<12x64xf32> to vector<12x8xf32>
    %474 = vector.extract_strided_slice %450 {offsets = [0, 40], sizes = [12, 8], strides = [1, 1]} : vector<12x64xf32> to vector<12x8xf32>
    %475 = vector.shape_cast %17 : vector<1x8x12xf32> to vector<8x12xf32>
    %476 = arith.truncf %472 : vector<8x8xf32> to vector<8x8xbf16>
    %477 = arith.truncf %473 : vector<12x8xf32> to vector<12x8xbf16>
    %cst_168 = arith.constant dense<0.000000e+00> : vector<8x12xf32>
    %478 = tpu.matmul %476, %477, %cst_168 {dimension_numbers = #tpu.dot_dimension_numbers<[1], [1], [0], [0], [0, 0, 1, 0], [], []>} : vector<8x8xbf16>, vector<12x8xbf16>, vector<8x12xf32> -> vector<8x12xf32>
    %479 = arith.addf %478, %475 : vector<8x12xf32>
    %cst_169 = arith.constant dense<0xFF800000> : vector<8xf32>
    %480 = vector.multi_reduction <maximumf>, %479, %cst_169 [1] : vector<8x12xf32> to vector<8xf32>
    %481 = vector.shape_cast %480 : vector<8xf32> to vector<8x1xf32>
    %482 = vector.broadcast %481 : vector<8x1xf32> to vector<8x12xf32>
    %483 = arith.subf %479, %482 : vector<8x12xf32>
    %484 = math.exp %483 : vector<8x12xf32>
    %cst_170 = arith.constant dense<0.000000e+00> : vector<8xf32>
    %485 = vector.multi_reduction <add>, %484, %cst_170 [1] : vector<8x12xf32> to vector<8xf32>
    %486 = vector.shape_cast %485 : vector<8xf32> to vector<8x1xf32>
    %487 = tpu.reciprocal %486 {approx = true} : vector<8x1xf32> -> vector<8x1xf32>
    %488 = vector.broadcast %487 : vector<8x1xf32> to vector<8x12xf32>
    %489 = arith.mulf %484, %488 : vector<8x12xf32>
    %490 = arith.truncf %489 : vector<8x12xf32> to vector<8x12xbf16>
    %491 = arith.truncf %474 : vector<12x8xf32> to vector<12x8xbf16>
    %cst_171 = arith.constant dense<0.000000e+00> : vector<8x8xf32>
    %492 = tpu.matmul %490, %491, %cst_171 {dimension_numbers = #tpu.dot_dimension_numbers<[1], [0], [0], [1], [0, 0, 1, 1], [], []>} : vector<8x12xbf16>, vector<12x8xbf16>, vector<8x8xf32> -> vector<8x8xf32>
    %493 = vector.extract_strided_slice %448 {offsets = [0, 16], sizes = [8, 8], strides = [1, 1]} : vector<8x32xf32> to vector<8x8xf32>
    %494 = vector.extract_strided_slice %450 {offsets = [0, 16], sizes = [12, 8], strides = [1, 1]} : vector<12x64xf32> to vector<12x8xf32>
    %495 = vector.extract_strided_slice %450 {offsets = [0, 48], sizes = [12, 8], strides = [1, 1]} : vector<12x64xf32> to vector<12x8xf32>
    %496 = vector.shape_cast %17 : vector<1x8x12xf32> to vector<8x12xf32>
    %497 = arith.truncf %493 : vector<8x8xf32> to vector<8x8xbf16>
    %498 = arith.truncf %494 : vector<12x8xf32> to vector<12x8xbf16>
    %cst_172 = arith.constant dense<0.000000e+00> : vector<8x12xf32>
    %499 = tpu.matmul %497, %498, %cst_172 {dimension_numbers = #tpu.dot_dimension_numbers<[1], [1], [0], [0], [0, 0, 1, 0], [], []>} : vector<8x8xbf16>, vector<12x8xbf16>, vector<8x12xf32> -> vector<8x12xf32>
    %500 = arith.addf %499, %496 : vector<8x12xf32>
    %cst_173 = arith.constant dense<0xFF800000> : vector<8xf32>
    %501 = vector.multi_reduction <maximumf>, %500, %cst_173 [1] : vector<8x12xf32> to vector<8xf32>
    %502 = vector.shape_cast %501 : vector<8xf32> to vector<8x1xf32>
    %503 = vector.broadcast %502 : vector<8x1xf32> to vector<8x12xf32>
    %504 = arith.subf %500, %503 : vector<8x12xf32>
    %505 = math.exp %504 : vector<8x12xf32>
    %cst_174 = arith.constant dense<0.000000e+00> : vector<8xf32>
    %506 = vector.multi_reduction <add>, %505, %cst_174 [1] : vector<8x12xf32> to vector<8xf32>
    %507 = vector.shape_cast %506 : vector<8xf32> to vector<8x1xf32>
    %508 = tpu.reciprocal %507 {approx = true} : vector<8x1xf32> -> vector<8x1xf32>
    %509 = vector.broadcast %508 : vector<8x1xf32> to vector<8x12xf32>
    %510 = arith.mulf %505, %509 : vector<8x12xf32>
    %511 = arith.truncf %510 : vector<8x12xf32> to vector<8x12xbf16>
    %512 = arith.truncf %495 : vector<12x8xf32> to vector<12x8xbf16>
    %cst_175 = arith.constant dense<0.000000e+00> : vector<8x8xf32>
    %513 = tpu.matmul %511, %512, %cst_175 {dimension_numbers = #tpu.dot_dimension_numbers<[1], [0], [0], [1], [0, 0, 1, 1], [], []>} : vector<8x12xbf16>, vector<12x8xbf16>, vector<8x8xf32> -> vector<8x8xf32>
    %514 = vector.extract_strided_slice %448 {offsets = [0, 24], sizes = [8, 8], strides = [1, 1]} : vector<8x32xf32> to vector<8x8xf32>
    %515 = vector.extract_strided_slice %450 {offsets = [0, 24], sizes = [12, 8], strides = [1, 1]} : vector<12x64xf32> to vector<12x8xf32>
    %516 = vector.extract_strided_slice %450 {offsets = [0, 56], sizes = [12, 8], strides = [1, 1]} : vector<12x64xf32> to vector<12x8xf32>
    %517 = vector.shape_cast %17 : vector<1x8x12xf32> to vector<8x12xf32>
    %518 = arith.truncf %514 : vector<8x8xf32> to vector<8x8xbf16>
    %519 = arith.truncf %515 : vector<12x8xf32> to vector<12x8xbf16>
    %cst_176 = arith.constant dense<0.000000e+00> : vector<8x12xf32>
    %520 = tpu.matmul %518, %519, %cst_176 {dimension_numbers = #tpu.dot_dimension_numbers<[1], [1], [0], [0], [0, 0, 1, 0], [], []>} : vector<8x8xbf16>, vector<12x8xbf16>, vector<8x12xf32> -> vector<8x12xf32>
    %521 = arith.addf %520, %517 : vector<8x12xf32>
    %cst_177 = arith.constant dense<0xFF800000> : vector<8xf32>
    %522 = vector.multi_reduction <maximumf>, %521, %cst_177 [1] : vector<8x12xf32> to vector<8xf32>
    %523 = vector.shape_cast %522 : vector<8xf32> to vector<8x1xf32>
    %524 = vector.broadcast %523 : vector<8x1xf32> to vector<8x12xf32>
    %525 = arith.subf %521, %524 : vector<8x12xf32>
    %526 = math.exp %525 : vector<8x12xf32>
    %cst_178 = arith.constant dense<0.000000e+00> : vector<8xf32>
    %527 = vector.multi_reduction <add>, %526, %cst_178 [1] : vector<8x12xf32> to vector<8xf32>
    %528 = vector.shape_cast %527 : vector<8xf32> to vector<8x1xf32>
    %529 = tpu.reciprocal %528 {approx = true} : vector<8x1xf32> -> vector<8x1xf32>
    %530 = vector.broadcast %529 : vector<8x1xf32> to vector<8x12xf32>
    %531 = arith.mulf %526, %530 : vector<8x12xf32>
    %532 = arith.truncf %531 : vector<8x12xf32> to vector<8x12xbf16>
    %533 = arith.truncf %516 : vector<12x8xf32> to vector<12x8xbf16>
    %cst_179 = arith.constant dense<0.000000e+00> : vector<8x8xf32>
    %534 = tpu.matmul %532, %533, %cst_179 {dimension_numbers = #tpu.dot_dimension_numbers<[1], [0], [0], [1], [0, 0, 1, 1], [], []>} : vector<8x12xbf16>, vector<12x8xbf16>, vector<8x8xf32> -> vector<8x8xf32>
    %535 = tpu.concatenate %471, %492, %513, %534 in 1 : vector<8x8xf32>, vector<8x8xf32>, vector<8x8xf32>, vector<8x8xf32> -> vector<8x32xf32>
    %536 = arith.truncf %535 : vector<8x32xf32> to vector<8x32xbf16>
    %cst_180 = arith.constant dense<0.000000e+00> : vector<8x32xf32>
    %537 = tpu.matmul %536, %446, %cst_180 {dimension_numbers = #tpu.dot_dimension_numbers<[1], [0], [0], [1], [0, 0, 1, 1], [], []>} : vector<8x32xbf16>, vector<32x32xbf16>, vector<8x32xf32> -> vector<8x32xf32>
    %538 = arith.addf %426, %537 : vector<8x32xf32>
    %c0_181 = arith.constant 0 : index
    %c2 = arith.constant 2 : index
    %c0_182 = arith.constant 0 : index
    %c0_183 = arith.constant 0 : index
    %539 = vector.load %arg13[%c0_181, %c2, %c0_182, %c0_183] : memref<2x3x1x32xf32, #tpu.memory_space<vmem>>, vector<1x1x1x32xf32>
    %540 = vector.shape_cast %539 : vector<1x1x1x32xf32> to vector<1x32xf32>
    %541 = arith.mulf %538, %538 : vector<8x32xf32>
    %cst_184 = arith.constant dense<0.000000e+00> : vector<8xf32>
    %542 = vector.multi_reduction <add>, %541, %cst_184 [1] : vector<8x32xf32> to vector<8xf32>
    %543 = vector.shape_cast %542 : vector<8xf32> to vector<8x1xf32>
    %cst_185 = arith.constant 3.200000e+01 : f32
    %544 = vector.broadcast %cst_185 : f32 to vector<8x1xf32>
    %545 = arith.divf %543, %544 : vector<8x1xf32>
    %cst_186 = arith.constant 9.99999997E-7 : f32
    %546 = vector.broadcast %cst_186 : f32 to vector<8x1xf32>
    %547 = arith.addf %545, %546 : vector<8x1xf32>
    %548 = math.rsqrt %547 : vector<8x1xf32>
    %549 = vector.broadcast %548 : vector<8x1xf32> to vector<8x32xf32>
    %550 = arith.mulf %538, %549 : vector<8x32xf32>
    %551 = vector.broadcast %540 : vector<1x32xf32> to vector<8x32xf32>
    %552 = arith.mulf %550, %551 : vector<8x32xf32>
    %c0_187 = arith.constant 0 : index
    %c0_188 = arith.constant 0 : index
    %c0_189 = arith.constant 0 : index
    %553 = vector.load %arg19[%c0_187, %c0_188, %c0_189] : memref<2x32x64xbf16, #tpu.memory_space<vmem>>, vector<1x32x64xbf16>
    %554 = vector.shape_cast %553 : vector<1x32x64xbf16> to vector<32x64xbf16>
    %555 = arith.truncf %552 : vector<8x32xf32> to vector<8x32xbf16>
    %cst_190 = arith.constant dense<0.000000e+00> : vector<8x64xf32>
    %556 = tpu.matmul %555, %554, %cst_190 {dimension_numbers = #tpu.dot_dimension_numbers<[1], [0], [0], [1], [0, 0, 1, 1], [], []>} : vector<8x32xbf16>, vector<32x64xbf16>, vector<8x64xf32> -> vector<8x64xf32>
    %cst_191 = arith.constant 0.000000e+00 : f32
    %557 = vector.broadcast %cst_191 : f32 to vector<8x64xf32>
    %558 = arith.maximumf %556, %557 : vector<8x64xf32>
    %c0_192 = arith.constant 0 : index
    %c0_193 = arith.constant 0 : index
    %c0_194 = arith.constant 0 : index
    %559 = vector.load %arg20[%c0_192, %c0_193, %c0_194] : memref<2x64x32xbf16, #tpu.memory_space<vmem>>, vector<1x64x32xbf16>
    %560 = vector.shape_cast %559 : vector<1x64x32xbf16> to vector<64x32xbf16>
    %561 = arith.truncf %558 : vector<8x64xf32> to vector<8x64xbf16>
    %cst_195 = arith.constant dense<0.000000e+00> : vector<8x32xf32>
    %562 = tpu.matmul %561, %560, %cst_195 {dimension_numbers = #tpu.dot_dimension_numbers<[1], [0], [0], [1], [0, 0, 1, 1], [], []>} : vector<8x64xbf16>, vector<64x32xbf16>, vector<8x32xf32> -> vector<8x32xf32>
    %563 = arith.addf %538, %562 : vector<8x32xf32>
    %c1_196 = arith.constant 1 : index
    %c0_197 = arith.constant 0 : index
    %c0_198 = arith.constant 0 : index
    %c0_199 = arith.constant 0 : index
    %564 = vector.load %arg13[%c1_196, %c0_197, %c0_198, %c0_199] : memref<2x3x1x32xf32, #tpu.memory_space<vmem>>, vector<1x1x1x32xf32>
    %565 = vector.shape_cast %564 : vector<1x1x1x32xf32> to vector<1x32xf32>
    %566 = arith.mulf %563, %563 : vector<8x32xf32>
    %cst_200 = arith.constant dense<0.000000e+00> : vector<8xf32>
    %567 = vector.multi_reduction <add>, %566, %cst_200 [1] : vector<8x32xf32> to vector<8xf32>
    %568 = vector.shape_cast %567 : vector<8xf32> to vector<8x1xf32>
    %cst_201 = arith.constant 3.200000e+01 : f32
    %569 = vector.broadcast %cst_201 : f32 to vector<8x1xf32>
    %570 = arith.divf %568, %569 : vector<8x1xf32>
    %cst_202 = arith.constant 9.99999997E-7 : f32
    %571 = vector.broadcast %cst_202 : f32 to vector<8x1xf32>
    %572 = arith.addf %570, %571 : vector<8x1xf32>
    %573 = math.rsqrt %572 : vector<8x1xf32>
    %574 = vector.broadcast %573 : vector<8x1xf32> to vector<8x32xf32>
    %575 = arith.mulf %563, %574 : vector<8x32xf32>
    %576 = vector.broadcast %565 : vector<1x32xf32> to vector<8x32xf32>
    %577 = arith.mulf %575, %576 : vector<8x32xf32>
    %c1_203 = arith.constant 1 : index
    %c0_204 = arith.constant 0 : index
    %c0_205 = arith.constant 0 : index
    %578 = vector.load %arg14[%c1_203, %c0_204, %c0_205] : memref<2x32x96xbf16, #tpu.memory_space<vmem>>, vector<1x32x96xbf16>
    %579 = vector.shape_cast %578 : vector<1x32x96xbf16> to vector<32x96xbf16>
    %c1_206 = arith.constant 1 : index
    %c0_207 = arith.constant 0 : index
    %c0_208 = arith.constant 0 : index
    %580 = vector.load %arg15[%c1_206, %c0_207, %c0_208] : memref<2x32x32xbf16, #tpu.memory_space<vmem>>, vector<1x32x32xbf16>
    %581 = vector.shape_cast %580 : vector<1x32x32xbf16> to vector<32x32xbf16>
    %582 = arith.truncf %577 : vector<8x32xf32> to vector<8x32xbf16>
    %cst_209 = arith.constant dense<0.000000e+00> : vector<8x96xf32>
    %583 = tpu.matmul %582, %579, %cst_209 {dimension_numbers = #tpu.dot_dimension_numbers<[1], [0], [0], [1], [0, 0, 1, 1], [], []>} : vector<8x32xbf16>, vector<32x96xbf16>, vector<8x96xf32> -> vector<8x96xf32>
    %584 = vector.extract_strided_slice %583 {offsets = [0, 0], sizes = [8, 32], strides = [1, 1]} : vector<8x96xf32> to vector<8x32xf32>
    %585 = vector.extract_strided_slice %583 {offsets = [0, 32], sizes = [8, 64], strides = [1, 1]} : vector<8x96xf32> to vector<8x64xf32>
    %586 = vector.extract_strided_slice %584 {offsets = [0, 0], sizes = [8, 8], strides = [1, 1]} : vector<8x32xf32> to vector<8x8xf32>
    %587 = vector.extract_strided_slice %585 {offsets = [0, 0], sizes = [8, 8], strides = [1, 1]} : vector<8x64xf32> to vector<8x8xf32>
    %588 = vector.extract_strided_slice %585 {offsets = [0, 32], sizes = [8, 8], strides = [1, 1]} : vector<8x64xf32> to vector<8x8xf32>
    %589 = vector.extract_strided_slice %1 {offsets = [0, 0, 0], sizes = [1, 8, 8], strides = [1, 1, 1]} : vector<4x8x8xf32> to vector<1x8x8xf32>
    %590 = vector.shape_cast %589 : vector<1x8x8xf32> to vector<8x8xf32>
    %591 = arith.truncf %586 : vector<8x8xf32> to vector<8x8xbf16>
    %592 = arith.truncf %587 : vector<8x8xf32> to vector<8x8xbf16>
    %cst_210 = arith.constant dense<0.000000e+00> : vector<8x8xf32>
    %593 = tpu.matmul %591, %592, %cst_210 {dimension_numbers = #tpu.dot_dimension_numbers<[1], [1], [0], [0], [0, 0, 1, 0], [], []>} : vector<8x8xbf16>, vector<8x8xbf16>, vector<8x8xf32> -> vector<8x8xf32>
    %594 = arith.addf %593, %590 : vector<8x8xf32>
    %cst_211 = arith.constant dense<0xFF800000> : vector<8xf32>
    %595 = vector.multi_reduction <maximumf>, %594, %cst_211 [1] : vector<8x8xf32> to vector<8xf32>
    %596 = vector.shape_cast %595 : vector<8xf32> to vector<8x1xf32>
    %597 = vector.broadcast %596 : vector<8x1xf32> to vector<8x8xf32>
    %598 = arith.subf %594, %597 : vector<8x8xf32>
    %599 = math.exp %598 : vector<8x8xf32>
    %cst_212 = arith.constant dense<0.000000e+00> : vector<8xf32>
    %600 = vector.multi_reduction <add>, %599, %cst_212 [1] : vector<8x8xf32> to vector<8xf32>
    %601 = vector.shape_cast %600 : vector<8xf32> to vector<8x1xf32>
    %602 = tpu.reciprocal %601 {approx = true} : vector<8x1xf32> -> vector<8x1xf32>
    %603 = vector.broadcast %602 : vector<8x1xf32> to vector<8x8xf32>
    %604 = arith.mulf %599, %603 : vector<8x8xf32>
    %605 = arith.truncf %604 : vector<8x8xf32> to vector<8x8xbf16>
    %606 = arith.truncf %588 : vector<8x8xf32> to vector<8x8xbf16>
    %cst_213 = arith.constant dense<0.000000e+00> : vector<8x8xf32>
    %607 = tpu.matmul %605, %606, %cst_213 {dimension_numbers = #tpu.dot_dimension_numbers<[1], [0], [0], [1], [0, 0, 1, 1], [], []>} : vector<8x8xbf16>, vector<8x8xbf16>, vector<8x8xf32> -> vector<8x8xf32>
    %608 = vector.extract_strided_slice %584 {offsets = [0, 8], sizes = [8, 8], strides = [1, 1]} : vector<8x32xf32> to vector<8x8xf32>
    %609 = vector.extract_strided_slice %585 {offsets = [0, 8], sizes = [8, 8], strides = [1, 1]} : vector<8x64xf32> to vector<8x8xf32>
    %610 = vector.extract_strided_slice %585 {offsets = [0, 40], sizes = [8, 8], strides = [1, 1]} : vector<8x64xf32> to vector<8x8xf32>
    %611 = vector.extract_strided_slice %1 {offsets = [1, 0, 0], sizes = [1, 8, 8], strides = [1, 1, 1]} : vector<4x8x8xf32> to vector<1x8x8xf32>
    %612 = vector.shape_cast %611 : vector<1x8x8xf32> to vector<8x8xf32>
    %613 = arith.truncf %608 : vector<8x8xf32> to vector<8x8xbf16>
    %614 = arith.truncf %609 : vector<8x8xf32> to vector<8x8xbf16>
    %cst_214 = arith.constant dense<0.000000e+00> : vector<8x8xf32>
    %615 = tpu.matmul %613, %614, %cst_214 {dimension_numbers = #tpu.dot_dimension_numbers<[1], [1], [0], [0], [0, 0, 1, 0], [], []>} : vector<8x8xbf16>, vector<8x8xbf16>, vector<8x8xf32> -> vector<8x8xf32>
    %616 = arith.addf %615, %612 : vector<8x8xf32>
    %cst_215 = arith.constant dense<0xFF800000> : vector<8xf32>
    %617 = vector.multi_reduction <maximumf>, %616, %cst_215 [1] : vector<8x8xf32> to vector<8xf32>
    %618 = vector.shape_cast %617 : vector<8xf32> to vector<8x1xf32>
    %619 = vector.broadcast %618 : vector<8x1xf32> to vector<8x8xf32>
    %620 = arith.subf %616, %619 : vector<8x8xf32>
    %621 = math.exp %620 : vector<8x8xf32>
    %cst_216 = arith.constant dense<0.000000e+00> : vector<8xf32>
    %622 = vector.multi_reduction <add>, %621, %cst_216 [1] : vector<8x8xf32> to vector<8xf32>
    %623 = vector.shape_cast %622 : vector<8xf32> to vector<8x1xf32>
    %624 = tpu.reciprocal %623 {approx = true} : vector<8x1xf32> -> vector<8x1xf32>
    %625 = vector.broadcast %624 : vector<8x1xf32> to vector<8x8xf32>
    %626 = arith.mulf %621, %625 : vector<8x8xf32>
    %627 = arith.truncf %626 : vector<8x8xf32> to vector<8x8xbf16>
    %628 = arith.truncf %610 : vector<8x8xf32> to vector<8x8xbf16>
    %cst_217 = arith.constant dense<0.000000e+00> : vector<8x8xf32>
    %629 = tpu.matmul %627, %628, %cst_217 {dimension_numbers = #tpu.dot_dimension_numbers<[1], [0], [0], [1], [0, 0, 1, 1], [], []>} : vector<8x8xbf16>, vector<8x8xbf16>, vector<8x8xf32> -> vector<8x8xf32>
    %630 = vector.extract_strided_slice %584 {offsets = [0, 16], sizes = [8, 8], strides = [1, 1]} : vector<8x32xf32> to vector<8x8xf32>
    %631 = vector.extract_strided_slice %585 {offsets = [0, 16], sizes = [8, 8], strides = [1, 1]} : vector<8x64xf32> to vector<8x8xf32>
    %632 = vector.extract_strided_slice %585 {offsets = [0, 48], sizes = [8, 8], strides = [1, 1]} : vector<8x64xf32> to vector<8x8xf32>
    %633 = vector.extract_strided_slice %1 {offsets = [2, 0, 0], sizes = [1, 8, 8], strides = [1, 1, 1]} : vector<4x8x8xf32> to vector<1x8x8xf32>
    %634 = vector.shape_cast %633 : vector<1x8x8xf32> to vector<8x8xf32>
    %635 = arith.truncf %630 : vector<8x8xf32> to vector<8x8xbf16>
    %636 = arith.truncf %631 : vector<8x8xf32> to vector<8x8xbf16>
    %cst_218 = arith.constant dense<0.000000e+00> : vector<8x8xf32>
    %637 = tpu.matmul %635, %636, %cst_218 {dimension_numbers = #tpu.dot_dimension_numbers<[1], [1], [0], [0], [0, 0, 1, 0], [], []>} : vector<8x8xbf16>, vector<8x8xbf16>, vector<8x8xf32> -> vector<8x8xf32>
    %638 = arith.addf %637, %634 : vector<8x8xf32>
    %cst_219 = arith.constant dense<0xFF800000> : vector<8xf32>
    %639 = vector.multi_reduction <maximumf>, %638, %cst_219 [1] : vector<8x8xf32> to vector<8xf32>
    %640 = vector.shape_cast %639 : vector<8xf32> to vector<8x1xf32>
    %641 = vector.broadcast %640 : vector<8x1xf32> to vector<8x8xf32>
    %642 = arith.subf %638, %641 : vector<8x8xf32>
    %643 = math.exp %642 : vector<8x8xf32>
    %cst_220 = arith.constant dense<0.000000e+00> : vector<8xf32>
    %644 = vector.multi_reduction <add>, %643, %cst_220 [1] : vector<8x8xf32> to vector<8xf32>
    %645 = vector.shape_cast %644 : vector<8xf32> to vector<8x1xf32>
    %646 = tpu.reciprocal %645 {approx = true} : vector<8x1xf32> -> vector<8x1xf32>
    %647 = vector.broadcast %646 : vector<8x1xf32> to vector<8x8xf32>
    %648 = arith.mulf %643, %647 : vector<8x8xf32>
    %649 = arith.truncf %648 : vector<8x8xf32> to vector<8x8xbf16>
    %650 = arith.truncf %632 : vector<8x8xf32> to vector<8x8xbf16>
    %cst_221 = arith.constant dense<0.000000e+00> : vector<8x8xf32>
    %651 = tpu.matmul %649, %650, %cst_221 {dimension_numbers = #tpu.dot_dimension_numbers<[1], [0], [0], [1], [0, 0, 1, 1], [], []>} : vector<8x8xbf16>, vector<8x8xbf16>, vector<8x8xf32> -> vector<8x8xf32>
    %652 = vector.extract_strided_slice %584 {offsets = [0, 24], sizes = [8, 8], strides = [1, 1]} : vector<8x32xf32> to vector<8x8xf32>
    %653 = vector.extract_strided_slice %585 {offsets = [0, 24], sizes = [8, 8], strides = [1, 1]} : vector<8x64xf32> to vector<8x8xf32>
    %654 = vector.extract_strided_slice %585 {offsets = [0, 56], sizes = [8, 8], strides = [1, 1]} : vector<8x64xf32> to vector<8x8xf32>
    %655 = vector.extract_strided_slice %1 {offsets = [3, 0, 0], sizes = [1, 8, 8], strides = [1, 1, 1]} : vector<4x8x8xf32> to vector<1x8x8xf32>
    %656 = vector.shape_cast %655 : vector<1x8x8xf32> to vector<8x8xf32>
    %657 = arith.truncf %652 : vector<8x8xf32> to vector<8x8xbf16>
    %658 = arith.truncf %653 : vector<8x8xf32> to vector<8x8xbf16>
    %cst_222 = arith.constant dense<0.000000e+00> : vector<8x8xf32>
    %659 = tpu.matmul %657, %658, %cst_222 {dimension_numbers = #tpu.dot_dimension_numbers<[1], [1], [0], [0], [0, 0, 1, 0], [], []>} : vector<8x8xbf16>, vector<8x8xbf16>, vector<8x8xf32> -> vector<8x8xf32>
    %660 = arith.addf %659, %656 : vector<8x8xf32>
    %cst_223 = arith.constant dense<0xFF800000> : vector<8xf32>
    %661 = vector.multi_reduction <maximumf>, %660, %cst_223 [1] : vector<8x8xf32> to vector<8xf32>
    %662 = vector.shape_cast %661 : vector<8xf32> to vector<8x1xf32>
    %663 = vector.broadcast %662 : vector<8x1xf32> to vector<8x8xf32>
    %664 = arith.subf %660, %663 : vector<8x8xf32>
    %665 = math.exp %664 : vector<8x8xf32>
    %cst_224 = arith.constant dense<0.000000e+00> : vector<8xf32>
    %666 = vector.multi_reduction <add>, %665, %cst_224 [1] : vector<8x8xf32> to vector<8xf32>
    %667 = vector.shape_cast %666 : vector<8xf32> to vector<8x1xf32>
    %668 = tpu.reciprocal %667 {approx = true} : vector<8x1xf32> -> vector<8x1xf32>
    %669 = vector.broadcast %668 : vector<8x1xf32> to vector<8x8xf32>
    %670 = arith.mulf %665, %669 : vector<8x8xf32>
    %671 = arith.truncf %670 : vector<8x8xf32> to vector<8x8xbf16>
    %672 = arith.truncf %654 : vector<8x8xf32> to vector<8x8xbf16>
    %cst_225 = arith.constant dense<0.000000e+00> : vector<8x8xf32>
    %673 = tpu.matmul %671, %672, %cst_225 {dimension_numbers = #tpu.dot_dimension_numbers<[1], [0], [0], [1], [0, 0, 1, 1], [], []>} : vector<8x8xbf16>, vector<8x8xbf16>, vector<8x8xf32> -> vector<8x8xf32>
    %674 = tpu.concatenate %607, %629, %651, %673 in 1 : vector<8x8xf32>, vector<8x8xf32>, vector<8x8xf32>, vector<8x8xf32> -> vector<8x32xf32>
    %675 = arith.truncf %674 : vector<8x32xf32> to vector<8x32xbf16>
    %cst_226 = arith.constant dense<0.000000e+00> : vector<8x32xf32>
    %676 = tpu.matmul %675, %581, %cst_226 {dimension_numbers = #tpu.dot_dimension_numbers<[1], [0], [0], [1], [0, 0, 1, 1], [], []>} : vector<8x32xbf16>, vector<32x32xbf16>, vector<8x32xf32> -> vector<8x32xf32>
    %677 = arith.addf %563, %676 : vector<8x32xf32>
    %c1_227 = arith.constant 1 : index
    %c1_228 = arith.constant 1 : index
    %c0_229 = arith.constant 0 : index
    %c0_230 = arith.constant 0 : index
    %678 = vector.load %arg13[%c1_227, %c1_228, %c0_229, %c0_230] : memref<2x3x1x32xf32, #tpu.memory_space<vmem>>, vector<1x1x1x32xf32>
    %679 = vector.shape_cast %678 : vector<1x1x1x32xf32> to vector<1x32xf32>
    %680 = arith.mulf %677, %677 : vector<8x32xf32>
    %cst_231 = arith.constant dense<0.000000e+00> : vector<8xf32>
    %681 = vector.multi_reduction <add>, %680, %cst_231 [1] : vector<8x32xf32> to vector<8xf32>
    %682 = vector.shape_cast %681 : vector<8xf32> to vector<8x1xf32>
    %cst_232 = arith.constant 3.200000e+01 : f32
    %683 = vector.broadcast %cst_232 : f32 to vector<8x1xf32>
    %684 = arith.divf %682, %683 : vector<8x1xf32>
    %cst_233 = arith.constant 9.99999997E-7 : f32
    %685 = vector.broadcast %cst_233 : f32 to vector<8x1xf32>
    %686 = arith.addf %684, %685 : vector<8x1xf32>
    %687 = math.rsqrt %686 : vector<8x1xf32>
    %688 = vector.broadcast %687 : vector<8x1xf32> to vector<8x32xf32>
    %689 = arith.mulf %677, %688 : vector<8x32xf32>
    %690 = vector.broadcast %679 : vector<1x32xf32> to vector<8x32xf32>
    %691 = arith.mulf %689, %690 : vector<8x32xf32>
    %c1_234 = arith.constant 1 : index
    %c0_235 = arith.constant 0 : index
    %c0_236 = arith.constant 0 : index
    %692 = vector.load %arg16[%c1_234, %c0_235, %c0_236] : memref<2x32x32xbf16, #tpu.memory_space<vmem>>, vector<1x32x32xbf16>
    %693 = vector.shape_cast %692 : vector<1x32x32xbf16> to vector<32x32xbf16>
    %c1_237 = arith.constant 1 : index
    %c0_238 = arith.constant 0 : index
    %c0_239 = arith.constant 0 : index
    %694 = vector.load %arg17[%c1_237, %c0_238, %c0_239] : memref<2x32x64xbf16, #tpu.memory_space<vmem>>, vector<1x32x64xbf16>
    %695 = vector.shape_cast %694 : vector<1x32x64xbf16> to vector<32x64xbf16>
    %c1_240 = arith.constant 1 : index
    %c0_241 = arith.constant 0 : index
    %c0_242 = arith.constant 0 : index
    %696 = vector.load %arg18[%c1_240, %c0_241, %c0_242] : memref<2x32x32xbf16, #tpu.memory_space<vmem>>, vector<1x32x32xbf16>
    %697 = vector.shape_cast %696 : vector<1x32x32xbf16> to vector<32x32xbf16>
    %698 = arith.truncf %691 : vector<8x32xf32> to vector<8x32xbf16>
    %cst_243 = arith.constant dense<0.000000e+00> : vector<8x32xf32>
    %699 = tpu.matmul %698, %693, %cst_243 {dimension_numbers = #tpu.dot_dimension_numbers<[1], [0], [0], [1], [0, 0, 1, 1], [], []>} : vector<8x32xbf16>, vector<32x32xbf16>, vector<8x32xf32> -> vector<8x32xf32>
    %700 = arith.truncf %310 : vector<12x32xf32> to vector<12x32xbf16>
    %cst_244 = arith.constant dense<0.000000e+00> : vector<12x64xf32>
    %701 = tpu.matmul %700, %695, %cst_244 {dimension_numbers = #tpu.dot_dimension_numbers<[1], [0], [0], [1], [0, 0, 1, 1], [], []>} : vector<12x32xbf16>, vector<32x64xbf16>, vector<12x64xf32> -> vector<12x64xf32>
    %702 = vector.extract_strided_slice %699 {offsets = [0, 0], sizes = [8, 8], strides = [1, 1]} : vector<8x32xf32> to vector<8x8xf32>
    %703 = vector.extract_strided_slice %701 {offsets = [0, 0], sizes = [12, 8], strides = [1, 1]} : vector<12x64xf32> to vector<12x8xf32>
    %704 = vector.extract_strided_slice %701 {offsets = [0, 32], sizes = [12, 8], strides = [1, 1]} : vector<12x64xf32> to vector<12x8xf32>
    %705 = vector.shape_cast %17 : vector<1x8x12xf32> to vector<8x12xf32>
    %706 = arith.truncf %702 : vector<8x8xf32> to vector<8x8xbf16>
    %707 = arith.truncf %703 : vector<12x8xf32> to vector<12x8xbf16>
    %cst_245 = arith.constant dense<0.000000e+00> : vector<8x12xf32>
    %708 = tpu.matmul %706, %707, %cst_245 {dimension_numbers = #tpu.dot_dimension_numbers<[1], [1], [0], [0], [0, 0, 1, 0], [], []>} : vector<8x8xbf16>, vector<12x8xbf16>, vector<8x12xf32> -> vector<8x12xf32>
    %709 = arith.addf %708, %705 : vector<8x12xf32>
    %cst_246 = arith.constant dense<0xFF800000> : vector<8xf32>
    %710 = vector.multi_reduction <maximumf>, %709, %cst_246 [1] : vector<8x12xf32> to vector<8xf32>
    %711 = vector.shape_cast %710 : vector<8xf32> to vector<8x1xf32>
    %712 = vector.broadcast %711 : vector<8x1xf32> to vector<8x12xf32>
    %713 = arith.subf %709, %712 : vector<8x12xf32>
    %714 = math.exp %713 : vector<8x12xf32>
    %cst_247 = arith.constant dense<0.000000e+00> : vector<8xf32>
    %715 = vector.multi_reduction <add>, %714, %cst_247 [1] : vector<8x12xf32> to vector<8xf32>
    %716 = vector.shape_cast %715 : vector<8xf32> to vector<8x1xf32>
    %717 = tpu.reciprocal %716 {approx = true} : vector<8x1xf32> -> vector<8x1xf32>
    %718 = vector.broadcast %717 : vector<8x1xf32> to vector<8x12xf32>
    %719 = arith.mulf %714, %718 : vector<8x12xf32>
    %720 = arith.truncf %719 : vector<8x12xf32> to vector<8x12xbf16>
    %721 = arith.truncf %704 : vector<12x8xf32> to vector<12x8xbf16>
    %cst_248 = arith.constant dense<0.000000e+00> : vector<8x8xf32>
    %722 = tpu.matmul %720, %721, %cst_248 {dimension_numbers = #tpu.dot_dimension_numbers<[1], [0], [0], [1], [0, 0, 1, 1], [], []>} : vector<8x12xbf16>, vector<12x8xbf16>, vector<8x8xf32> -> vector<8x8xf32>
    %723 = vector.extract_strided_slice %699 {offsets = [0, 8], sizes = [8, 8], strides = [1, 1]} : vector<8x32xf32> to vector<8x8xf32>
    %724 = vector.extract_strided_slice %701 {offsets = [0, 8], sizes = [12, 8], strides = [1, 1]} : vector<12x64xf32> to vector<12x8xf32>
    %725 = vector.extract_strided_slice %701 {offsets = [0, 40], sizes = [12, 8], strides = [1, 1]} : vector<12x64xf32> to vector<12x8xf32>
    %726 = vector.shape_cast %17 : vector<1x8x12xf32> to vector<8x12xf32>
    %727 = arith.truncf %723 : vector<8x8xf32> to vector<8x8xbf16>
    %728 = arith.truncf %724 : vector<12x8xf32> to vector<12x8xbf16>
    %cst_249 = arith.constant dense<0.000000e+00> : vector<8x12xf32>
    %729 = tpu.matmul %727, %728, %cst_249 {dimension_numbers = #tpu.dot_dimension_numbers<[1], [1], [0], [0], [0, 0, 1, 0], [], []>} : vector<8x8xbf16>, vector<12x8xbf16>, vector<8x12xf32> -> vector<8x12xf32>
    %730 = arith.addf %729, %726 : vector<8x12xf32>
    %cst_250 = arith.constant dense<0xFF800000> : vector<8xf32>
    %731 = vector.multi_reduction <maximumf>, %730, %cst_250 [1] : vector<8x12xf32> to vector<8xf32>
    %732 = vector.shape_cast %731 : vector<8xf32> to vector<8x1xf32>
    %733 = vector.broadcast %732 : vector<8x1xf32> to vector<8x12xf32>
    %734 = arith.subf %730, %733 : vector<8x12xf32>
    %735 = math.exp %734 : vector<8x12xf32>
    %cst_251 = arith.constant dense<0.000000e+00> : vector<8xf32>
    %736 = vector.multi_reduction <add>, %735, %cst_251 [1] : vector<8x12xf32> to vector<8xf32>
    %737 = vector.shape_cast %736 : vector<8xf32> to vector<8x1xf32>
    %738 = tpu.reciprocal %737 {approx = true} : vector<8x1xf32> -> vector<8x1xf32>
    %739 = vector.broadcast %738 : vector<8x1xf32> to vector<8x12xf32>
    %740 = arith.mulf %735, %739 : vector<8x12xf32>
    %741 = arith.truncf %740 : vector<8x12xf32> to vector<8x12xbf16>
    %742 = arith.truncf %725 : vector<12x8xf32> to vector<12x8xbf16>
    %cst_252 = arith.constant dense<0.000000e+00> : vector<8x8xf32>
    %743 = tpu.matmul %741, %742, %cst_252 {dimension_numbers = #tpu.dot_dimension_numbers<[1], [0], [0], [1], [0, 0, 1, 1], [], []>} : vector<8x12xbf16>, vector<12x8xbf16>, vector<8x8xf32> -> vector<8x8xf32>
    %744 = vector.extract_strided_slice %699 {offsets = [0, 16], sizes = [8, 8], strides = [1, 1]} : vector<8x32xf32> to vector<8x8xf32>
    %745 = vector.extract_strided_slice %701 {offsets = [0, 16], sizes = [12, 8], strides = [1, 1]} : vector<12x64xf32> to vector<12x8xf32>
    %746 = vector.extract_strided_slice %701 {offsets = [0, 48], sizes = [12, 8], strides = [1, 1]} : vector<12x64xf32> to vector<12x8xf32>
    %747 = vector.shape_cast %17 : vector<1x8x12xf32> to vector<8x12xf32>
    %748 = arith.truncf %744 : vector<8x8xf32> to vector<8x8xbf16>
    %749 = arith.truncf %745 : vector<12x8xf32> to vector<12x8xbf16>
    %cst_253 = arith.constant dense<0.000000e+00> : vector<8x12xf32>
    %750 = tpu.matmul %748, %749, %cst_253 {dimension_numbers = #tpu.dot_dimension_numbers<[1], [1], [0], [0], [0, 0, 1, 0], [], []>} : vector<8x8xbf16>, vector<12x8xbf16>, vector<8x12xf32> -> vector<8x12xf32>
    %751 = arith.addf %750, %747 : vector<8x12xf32>
    %cst_254 = arith.constant dense<0xFF800000> : vector<8xf32>
    %752 = vector.multi_reduction <maximumf>, %751, %cst_254 [1] : vector<8x12xf32> to vector<8xf32>
    %753 = vector.shape_cast %752 : vector<8xf32> to vector<8x1xf32>
    %754 = vector.broadcast %753 : vector<8x1xf32> to vector<8x12xf32>
    %755 = arith.subf %751, %754 : vector<8x12xf32>
    %756 = math.exp %755 : vector<8x12xf32>
    %cst_255 = arith.constant dense<0.000000e+00> : vector<8xf32>
    %757 = vector.multi_reduction <add>, %756, %cst_255 [1] : vector<8x12xf32> to vector<8xf32>
    %758 = vector.shape_cast %757 : vector<8xf32> to vector<8x1xf32>
    %759 = tpu.reciprocal %758 {approx = true} : vector<8x1xf32> -> vector<8x1xf32>
    %760 = vector.broadcast %759 : vector<8x1xf32> to vector<8x12xf32>
    %761 = arith.mulf %756, %760 : vector<8x12xf32>
    %762 = arith.truncf %761 : vector<8x12xf32> to vector<8x12xbf16>
    %763 = arith.truncf %746 : vector<12x8xf32> to vector<12x8xbf16>
    %cst_256 = arith.constant dense<0.000000e+00> : vector<8x8xf32>
    %764 = tpu.matmul %762, %763, %cst_256 {dimension_numbers = #tpu.dot_dimension_numbers<[1], [0], [0], [1], [0, 0, 1, 1], [], []>} : vector<8x12xbf16>, vector<12x8xbf16>, vector<8x8xf32> -> vector<8x8xf32>
    %765 = vector.extract_strided_slice %699 {offsets = [0, 24], sizes = [8, 8], strides = [1, 1]} : vector<8x32xf32> to vector<8x8xf32>
    %766 = vector.extract_strided_slice %701 {offsets = [0, 24], sizes = [12, 8], strides = [1, 1]} : vector<12x64xf32> to vector<12x8xf32>
    %767 = vector.extract_strided_slice %701 {offsets = [0, 56], sizes = [12, 8], strides = [1, 1]} : vector<12x64xf32> to vector<12x8xf32>
    %768 = vector.shape_cast %17 : vector<1x8x12xf32> to vector<8x12xf32>
    %769 = arith.truncf %765 : vector<8x8xf32> to vector<8x8xbf16>
    %770 = arith.truncf %766 : vector<12x8xf32> to vector<12x8xbf16>
    %cst_257 = arith.constant dense<0.000000e+00> : vector<8x12xf32>
    %771 = tpu.matmul %769, %770, %cst_257 {dimension_numbers = #tpu.dot_dimension_numbers<[1], [1], [0], [0], [0, 0, 1, 0], [], []>} : vector<8x8xbf16>, vector<12x8xbf16>, vector<8x12xf32> -> vector<8x12xf32>
    %772 = arith.addf %771, %768 : vector<8x12xf32>
    %cst_258 = arith.constant dense<0xFF800000> : vector<8xf32>
    %773 = vector.multi_reduction <maximumf>, %772, %cst_258 [1] : vector<8x12xf32> to vector<8xf32>
    %774 = vector.shape_cast %773 : vector<8xf32> to vector<8x1xf32>
    %775 = vector.broadcast %774 : vector<8x1xf32> to vector<8x12xf32>
    %776 = arith.subf %772, %775 : vector<8x12xf32>
    %777 = math.exp %776 : vector<8x12xf32>
    %cst_259 = arith.constant dense<0.000000e+00> : vector<8xf32>
    %778 = vector.multi_reduction <add>, %777, %cst_259 [1] : vector<8x12xf32> to vector<8xf32>
    %779 = vector.shape_cast %778 : vector<8xf32> to vector<8x1xf32>
    %780 = tpu.reciprocal %779 {approx = true} : vector<8x1xf32> -> vector<8x1xf32>
    %781 = vector.broadcast %780 : vector<8x1xf32> to vector<8x12xf32>
    %782 = arith.mulf %777, %781 : vector<8x12xf32>
    %783 = arith.truncf %782 : vector<8x12xf32> to vector<8x12xbf16>
    %784 = arith.truncf %767 : vector<12x8xf32> to vector<12x8xbf16>
    %cst_260 = arith.constant dense<0.000000e+00> : vector<8x8xf32>
    %785 = tpu.matmul %783, %784, %cst_260 {dimension_numbers = #tpu.dot_dimension_numbers<[1], [0], [0], [1], [0, 0, 1, 1], [], []>} : vector<8x12xbf16>, vector<12x8xbf16>, vector<8x8xf32> -> vector<8x8xf32>
    %786 = tpu.concatenate %722, %743, %764, %785 in 1 : vector<8x8xf32>, vector<8x8xf32>, vector<8x8xf32>, vector<8x8xf32> -> vector<8x32xf32>
    %787 = arith.truncf %786 : vector<8x32xf32> to vector<8x32xbf16>
    %cst_261 = arith.constant dense<0.000000e+00> : vector<8x32xf32>
    %788 = tpu.matmul %787, %697, %cst_261 {dimension_numbers = #tpu.dot_dimension_numbers<[1], [0], [0], [1], [0, 0, 1, 1], [], []>} : vector<8x32xbf16>, vector<32x32xbf16>, vector<8x32xf32> -> vector<8x32xf32>
    %789 = arith.addf %677, %788 : vector<8x32xf32>
    %c1_262 = arith.constant 1 : index
    %c2_263 = arith.constant 2 : index
    %c0_264 = arith.constant 0 : index
    %c0_265 = arith.constant 0 : index
    %790 = vector.load %arg13[%c1_262, %c2_263, %c0_264, %c0_265] : memref<2x3x1x32xf32, #tpu.memory_space<vmem>>, vector<1x1x1x32xf32>
    %791 = vector.shape_cast %790 : vector<1x1x1x32xf32> to vector<1x32xf32>
    %792 = arith.mulf %789, %789 : vector<8x32xf32>
    %cst_266 = arith.constant dense<0.000000e+00> : vector<8xf32>
    %793 = vector.multi_reduction <add>, %792, %cst_266 [1] : vector<8x32xf32> to vector<8xf32>
    %794 = vector.shape_cast %793 : vector<8xf32> to vector<8x1xf32>
    %cst_267 = arith.constant 3.200000e+01 : f32
    %795 = vector.broadcast %cst_267 : f32 to vector<8x1xf32>
    %796 = arith.divf %794, %795 : vector<8x1xf32>
    %cst_268 = arith.constant 9.99999997E-7 : f32
    %797 = vector.broadcast %cst_268 : f32 to vector<8x1xf32>
    %798 = arith.addf %796, %797 : vector<8x1xf32>
    %799 = math.rsqrt %798 : vector<8x1xf32>
    %800 = vector.broadcast %799 : vector<8x1xf32> to vector<8x32xf32>
    %801 = arith.mulf %789, %800 : vector<8x32xf32>
    %802 = vector.broadcast %791 : vector<1x32xf32> to vector<8x32xf32>
    %803 = arith.mulf %801, %802 : vector<8x32xf32>
    %c1_269 = arith.constant 1 : index
    %c0_270 = arith.constant 0 : index
    %c0_271 = arith.constant 0 : index
    %804 = vector.load %arg19[%c1_269, %c0_270, %c0_271] : memref<2x32x64xbf16, #tpu.memory_space<vmem>>, vector<1x32x64xbf16>
    %805 = vector.shape_cast %804 : vector<1x32x64xbf16> to vector<32x64xbf16>
    %806 = arith.truncf %803 : vector<8x32xf32> to vector<8x32xbf16>
    %cst_272 = arith.constant dense<0.000000e+00> : vector<8x64xf32>
    %807 = tpu.matmul %806, %805, %cst_272 {dimension_numbers = #tpu.dot_dimension_numbers<[1], [0], [0], [1], [0, 0, 1, 1], [], []>} : vector<8x32xbf16>, vector<32x64xbf16>, vector<8x64xf32> -> vector<8x64xf32>
    %cst_273 = arith.constant 0.000000e+00 : f32
    %808 = vector.broadcast %cst_273 : f32 to vector<8x64xf32>
    %809 = arith.maximumf %807, %808 : vector<8x64xf32>
    %c1_274 = arith.constant 1 : index
    %c0_275 = arith.constant 0 : index
    %c0_276 = arith.constant 0 : index
    %810 = vector.load %arg20[%c1_274, %c0_275, %c0_276] : memref<2x64x32xbf16, #tpu.memory_space<vmem>>, vector<1x64x32xbf16>
    %811 = vector.shape_cast %810 : vector<1x64x32xbf16> to vector<64x32xbf16>
    %812 = arith.truncf %809 : vector<8x64xf32> to vector<8x64xbf16>
    %cst_277 = arith.constant dense<0.000000e+00> : vector<8x32xf32>
    %813 = tpu.matmul %812, %811, %cst_277 {dimension_numbers = #tpu.dot_dimension_numbers<[1], [0], [0], [1], [0, 0, 1, 1], [], []>} : vector<8x64xbf16>, vector<64x32xbf16>, vector<8x32xf32> -> vector<8x32xf32>
    %814 = arith.addf %789, %813 : vector<8x32xf32>
    %c0_278 = arith.constant 0 : index
    %c0_279 = arith.constant 0 : index
    %815 = vector.load %arg21[%c0_278, %c0_279] : memref<1x32xf32, #tpu.memory_space<vmem>>, vector<1x32xf32>
    %816 = arith.mulf %814, %814 : vector<8x32xf32>
    %cst_280 = arith.constant dense<0.000000e+00> : vector<8xf32>
    %817 = vector.multi_reduction <add>, %816, %cst_280 [1] : vector<8x32xf32> to vector<8xf32>
    %818 = vector.shape_cast %817 : vector<8xf32> to vector<8x1xf32>
    %cst_281 = arith.constant 3.200000e+01 : f32
    %819 = vector.broadcast %cst_281 : f32 to vector<8x1xf32>
    %820 = arith.divf %818, %819 : vector<8x1xf32>
    %cst_282 = arith.constant 9.99999997E-7 : f32
    %821 = vector.broadcast %cst_282 : f32 to vector<8x1xf32>
    %822 = arith.addf %820, %821 : vector<8x1xf32>
    %823 = math.rsqrt %822 : vector<8x1xf32>
    %824 = vector.broadcast %823 : vector<8x1xf32> to vector<8x32xf32>
    %825 = arith.mulf %814, %824 : vector<8x32xf32>
    %826 = vector.broadcast %815 : vector<1x32xf32> to vector<8x32xf32>
    %827 = arith.mulf %825, %826 : vector<8x32xf32>
    %cst_283 = arith.constant 0.176776692 : f32
    %828 = vector.broadcast %cst_283 : f32 to vector<8x32xf32>
    %829 = arith.mulf %827, %828 : vector<8x32xf32>
    %c0_284 = arith.constant 0 : index
    %c0_285 = arith.constant 0 : index
    %830 = vector.load %arg22[%c0_284, %c0_285] : memref<128x32xbf16, #tpu.memory_space<vmem>>, vector<128x32xbf16>
    %831 = arith.truncf %829 : vector<8x32xf32> to vector<8x32xbf16>
    %cst_286 = arith.constant dense<0.000000e+00> : vector<8x128xf32>
    %832 = tpu.matmul %831, %830, %cst_286 {dimension_numbers = #tpu.dot_dimension_numbers<[1], [1], [0], [0], [0, 0, 1, 0], [], []>} : vector<8x32xbf16>, vector<128x32xbf16>, vector<8x128xf32> -> vector<8x128xf32>
    %833 = arith.addf %832, %7 : vector<8x128xf32>
    %c0_287 = arith.constant 0 : index
    %c0_288 = arith.constant 0 : index
    %c0_289 = arith.constant 0 : index
    %834 = vector.load %arg23[%c0_287, %c0_288, %c0_289] : memref<2x8x128xf32, #tpu.memory_space<vmem>>, vector<1x8x128xf32>
    %835 = vector.shape_cast %834 : vector<1x8x128xf32> to vector<8x128xf32>
    %836 = vector.shape_cast %833 : vector<8x128xf32> to vector<1x8x128xf32>
    tpu.vector_store %arg23[%c0_287, %c0_288, %c0_289], %836 {strides = array<i32>} : memref<2x8x128xf32, #tpu.memory_space<vmem>>, vector<1x8x128xf32>,
    %c0_290 = arith.constant 0 : index
    %c0_291 = arith.constant 0 : index
    %c0_292 = arith.constant 0 : index
    %837 = vector.load %arg6[%c0_290, %c0_291, %c0_292] : memref<2x8x1xi32, #tpu.memory_space<vmem>>, vector<1x8x1xi32>
    %838 = vector.shape_cast %837 : vector<1x8x1xi32> to vector<8x1xi32>
    %cst_293 = arith.constant dense<0xFF800000> : vector<8xf32>
    %839 = vector.multi_reduction <maximumf>, %833, %cst_293 [1] : vector<8x128xf32> to vector<8xf32>
    %840 = vector.shape_cast %839 : vector<8xf32> to vector<8x1xf32>
    %841 = vector.broadcast %840 : vector<8x1xf32> to vector<8x128xf32>
    %842 = arith.subf %833, %841 : vector<8x128xf32>
    %843 = math.exp %842 : vector<8x128xf32>
    %cst_294 = arith.constant dense<0.000000e+00> : vector<8xf32>
    %844 = vector.multi_reduction <add>, %843, %cst_294 [1] : vector<8x128xf32> to vector<8xf32>
    %845 = vector.shape_cast %844 : vector<8xf32> to vector<8x1xf32>
    %846 = math.log %845 : vector<8x1xf32>
    %847 = arith.addf %846, %840 : vector<8x1xf32>
    %848 = vector.broadcast %838 : vector<8x1xi32> to vector<8x128xi32>
    %849 = arith.cmpi eq, %2, %848 : vector<8x128xi32>
    %850 = arith.extui %849 : vector<8x128xi1> to vector<8x128xi32>
    %851 = arith.sitofp %850 : vector<8x128xi32> to vector<8x128xf32>
    %852 = arith.mulf %833, %851 : vector<8x128xf32>
    %cst_295 = arith.constant dense<0.000000e+00> : vector<8xf32>
    %853 = vector.multi_reduction <add>, %852, %cst_295 [1] : vector<8x128xf32> to vector<8xf32>
    %854 = vector.shape_cast %853 : vector<8xf32> to vector<8x1xf32>
    %c0_i32 = arith.constant 0 : i32
    %855 = vector.broadcast %c0_i32 : i32 to vector<8x1xi32>
    %856 = arith.cmpi ne, %838, %855 : vector<8x1xi32>
    %857 = arith.extui %856 : vector<8x1xi1> to vector<8x1xi32>
    %858 = arith.sitofp %857 : vector<8x1xi32> to vector<8x1xf32>
    %859 = arith.subf %847, %854 : vector<8x1xf32>
    %860 = arith.mulf %859, %858 : vector<8x1xf32>
    %861 = vector.shape_cast %860 : vector<8x1xf32> to vector<1x8x1xf32>
    %cst_296 = arith.constant dense<0.000000e+00> : vector<1xf32>
    %862 = vector.multi_reduction <add>, %861, %cst_296 [1, 2] : vector<1x8x1xf32> to vector<1xf32>
    %863 = vector.shape_cast %862 : vector<1xf32> to vector<1x1x1xf32>
    %864 = vector.extract %863[0, 0, 0] : f32 from vector<1x1x1xf32>
    %865 = vector.broadcast %864 : f32 to vector<1x1xf32>
    %866 = arith.addf %8, %865 : vector<1x1xf32>
    %867 = vector.shape_cast %858 : vector<8x1xf32> to vector<1x8x1xf32>
    %cst_297 = arith.constant dense<0.000000e+00> : vector<1xf32>
    %868 = vector.multi_reduction <add>, %867, %cst_297 [1, 2] : vector<1x8x1xf32> to vector<1xf32>
    %869 = vector.shape_cast %868 : vector<1xf32> to vector<1x1x1xf32>
    %870 = vector.extract %869[0, 0, 0] : f32 from vector<1x1x1xf32>
    %871 = vector.broadcast %870 : f32 to vector<1x1xf32>
    %872 = arith.addf %9, %871 : vector<1x1xf32>
    %c1_298 = arith.constant 1 : index
    %c0_299 = arith.constant 0 : index
    %c0_300 = arith.constant 0 : index
    %873 = vector.load %arg3[%c1_298, %c0_299, %c0_300] : memref<2x1x12xf32, #tpu.memory_space<vmem>>, vector<1x1x12xf32>
    %874 = vector.shape_cast %873 : vector<1x1x12xf32> to vector<1x12xf32>
    %875 = vector.shape_cast %874 : vector<1x12xf32> to vector<1x1x12xf32>
    %876 = vector.broadcast %875 : vector<1x1x12xf32> to vector<4x12x12xf32>
    %877 = arith.addf %0, %876 : vector<4x12x12xf32>
    %878 = vector.shape_cast %874 : vector<1x12xf32> to vector<1x12xf32>
    %879 = vector.broadcast %878 : vector<1x12xf32> to vector<8x12xf32>
    %880 = vector.shape_cast %879 : vector<8x12xf32> to vector<1x8x12xf32>
    %c1_301 = arith.constant 1 : index
    %c0_302 = arith.constant 0 : index
    %c0_303 = arith.constant 0 : index
    %881 = vector.load %arg1[%c1_301, %c0_302, %c0_303] : memref<2x12x32xf32, #tpu.memory_space<vmem>>, vector<1x12x32xf32>
    %882 = vector.shape_cast %881 : vector<1x12x32xf32> to vector<12x32xf32>
    %c0_304 = arith.constant 0 : index
    %c0_305 = arith.constant 0 : index
    %c0_306 = arith.constant 0 : index
    %c0_307 = arith.constant 0 : index
    %883 = vector.load %arg7[%c0_304, %c0_305, %c0_306, %c0_307] : memref<2x2x1x32xf32, #tpu.memory_space<vmem>>, vector<1x1x1x32xf32>
    %884 = vector.shape_cast %883 : vector<1x1x1x32xf32> to vector<1x32xf32>
    %885 = arith.mulf %882, %882 : vector<12x32xf32>
    %cst_308 = arith.constant dense<0.000000e+00> : vector<12xf32>
    %886 = vector.multi_reduction <add>, %885, %cst_308 [1] : vector<12x32xf32> to vector<12xf32>
    %887 = vector.shape_cast %886 : vector<12xf32> to vector<12x1xf32>
    %cst_309 = arith.constant 3.200000e+01 : f32
    %888 = vector.broadcast %cst_309 : f32 to vector<12x1xf32>
    %889 = arith.divf %887, %888 : vector<12x1xf32>
    %cst_310 = arith.constant 9.99999997E-7 : f32
    %890 = vector.broadcast %cst_310 : f32 to vector<12x1xf32>
    %891 = arith.addf %889, %890 : vector<12x1xf32>
    %892 = math.rsqrt %891 : vector<12x1xf32>
    %893 = vector.broadcast %892 : vector<12x1xf32> to vector<12x32xf32>
    %894 = arith.mulf %882, %893 : vector<12x32xf32>
    %895 = vector.broadcast %884 : vector<1x32xf32> to vector<12x32xf32>
    %896 = arith.mulf %894, %895 : vector<12x32xf32>
    %c0_311 = arith.constant 0 : index
    %c0_312 = arith.constant 0 : index
    %c0_313 = arith.constant 0 : index
    %897 = vector.load %arg8[%c0_311, %c0_312, %c0_313] : memref<2x32x96xbf16, #tpu.memory_space<vmem>>, vector<1x32x96xbf16>
    %898 = vector.shape_cast %897 : vector<1x32x96xbf16> to vector<32x96xbf16>
    %c0_314 = arith.constant 0 : index
    %c0_315 = arith.constant 0 : index
    %c0_316 = arith.constant 0 : index
    %899 = vector.load %arg9[%c0_314, %c0_315, %c0_316] : memref<2x32x32xbf16, #tpu.memory_space<vmem>>, vector<1x32x32xbf16>
    %900 = vector.shape_cast %899 : vector<1x32x32xbf16> to vector<32x32xbf16>
    %901 = arith.truncf %896 : vector<12x32xf32> to vector<12x32xbf16>
    %cst_317 = arith.constant dense<0.000000e+00> : vector<12x96xf32>
    %902 = tpu.matmul %901, %898, %cst_317 {dimension_numbers = #tpu.dot_dimension_numbers<[1], [0], [0], [1], [0, 0, 1, 1], [], []>} : vector<12x32xbf16>, vector<32x96xbf16>, vector<12x96xf32> -> vector<12x96xf32>
    %903 = vector.extract_strided_slice %902 {offsets = [0, 0], sizes = [12, 32], strides = [1, 1]} : vector<12x96xf32> to vector<12x32xf32>
    %904 = vector.extract_strided_slice %902 {offsets = [0, 32], sizes = [12, 64], strides = [1, 1]} : vector<12x96xf32> to vector<12x64xf32>
    %905 = vector.extract_strided_slice %903 {offsets = [0, 0], sizes = [12, 8], strides = [1, 1]} : vector<12x32xf32> to vector<12x8xf32>
    %906 = vector.extract_strided_slice %904 {offsets = [0, 0], sizes = [12, 8], strides = [1, 1]} : vector<12x64xf32> to vector<12x8xf32>
    %907 = vector.extract_strided_slice %904 {offsets = [0, 32], sizes = [12, 8], strides = [1, 1]} : vector<12x64xf32> to vector<12x8xf32>
    %908 = vector.extract_strided_slice %877 {offsets = [0, 0, 0], sizes = [1, 12, 12], strides = [1, 1, 1]} : vector<4x12x12xf32> to vector<1x12x12xf32>
    %909 = vector.shape_cast %908 : vector<1x12x12xf32> to vector<12x12xf32>
    %910 = arith.truncf %905 : vector<12x8xf32> to vector<12x8xbf16>
    %911 = arith.truncf %906 : vector<12x8xf32> to vector<12x8xbf16>
    %cst_318 = arith.constant dense<0.000000e+00> : vector<12x12xf32>
    %912 = tpu.matmul %910, %911, %cst_318 {dimension_numbers = #tpu.dot_dimension_numbers<[1], [1], [0], [0], [0, 0, 1, 0], [], []>} : vector<12x8xbf16>, vector<12x8xbf16>, vector<12x12xf32> -> vector<12x12xf32>
    %913 = arith.addf %912, %909 : vector<12x12xf32>
    %cst_319 = arith.constant dense<0xFF800000> : vector<12xf32>
    %914 = vector.multi_reduction <maximumf>, %913, %cst_319 [1] : vector<12x12xf32> to vector<12xf32>
    %915 = vector.shape_cast %914 : vector<12xf32> to vector<12x1xf32>
    %916 = vector.broadcast %915 : vector<12x1xf32> to vector<12x12xf32>
    %917 = arith.subf %913, %916 : vector<12x12xf32>
    %918 = math.exp %917 : vector<12x12xf32>
    %cst_320 = arith.constant dense<0.000000e+00> : vector<12xf32>
    %919 = vector.multi_reduction <add>, %918, %cst_320 [1] : vector<12x12xf32> to vector<12xf32>
    %920 = vector.shape_cast %919 : vector<12xf32> to vector<12x1xf32>
    %921 = tpu.reciprocal %920 {approx = true} : vector<12x1xf32> -> vector<12x1xf32>
    %922 = vector.broadcast %921 : vector<12x1xf32> to vector<12x12xf32>
    %923 = arith.mulf %918, %922 : vector<12x12xf32>
    %924 = arith.truncf %923 : vector<12x12xf32> to vector<12x12xbf16>
    %925 = arith.truncf %907 : vector<12x8xf32> to vector<12x8xbf16>
    %cst_321 = arith.constant dense<0.000000e+00> : vector<12x8xf32>
    %926 = tpu.matmul %924, %925, %cst_321 {dimension_numbers = #tpu.dot_dimension_numbers<[1], [0], [0], [1], [0, 0, 1, 1], [], []>} : vector<12x12xbf16>, vector<12x8xbf16>, vector<12x8xf32> -> vector<12x8xf32>
    %927 = vector.extract_strided_slice %903 {offsets = [0, 8], sizes = [12, 8], strides = [1, 1]} : vector<12x32xf32> to vector<12x8xf32>
    %928 = vector.extract_strided_slice %904 {offsets = [0, 8], sizes = [12, 8], strides = [1, 1]} : vector<12x64xf32> to vector<12x8xf32>
    %929 = vector.extract_strided_slice %904 {offsets = [0, 40], sizes = [12, 8], strides = [1, 1]} : vector<12x64xf32> to vector<12x8xf32>
    %930 = vector.extract_strided_slice %877 {offsets = [1, 0, 0], sizes = [1, 12, 12], strides = [1, 1, 1]} : vector<4x12x12xf32> to vector<1x12x12xf32>
    %931 = vector.shape_cast %930 : vector<1x12x12xf32> to vector<12x12xf32>
    %932 = arith.truncf %927 : vector<12x8xf32> to vector<12x8xbf16>
    %933 = arith.truncf %928 : vector<12x8xf32> to vector<12x8xbf16>
    %cst_322 = arith.constant dense<0.000000e+00> : vector<12x12xf32>
    %934 = tpu.matmul %932, %933, %cst_322 {dimension_numbers = #tpu.dot_dimension_numbers<[1], [1], [0], [0], [0, 0, 1, 0], [], []>} : vector<12x8xbf16>, vector<12x8xbf16>, vector<12x12xf32> -> vector<12x12xf32>
    %935 = arith.addf %934, %931 : vector<12x12xf32>
    %cst_323 = arith.constant dense<0xFF800000> : vector<12xf32>
    %936 = vector.multi_reduction <maximumf>, %935, %cst_323 [1] : vector<12x12xf32> to vector<12xf32>
    %937 = vector.shape_cast %936 : vector<12xf32> to vector<12x1xf32>
    %938 = vector.broadcast %937 : vector<12x1xf32> to vector<12x12xf32>
    %939 = arith.subf %935, %938 : vector<12x12xf32>
    %940 = math.exp %939 : vector<12x12xf32>
    %cst_324 = arith.constant dense<0.000000e+00> : vector<12xf32>
    %941 = vector.multi_reduction <add>, %940, %cst_324 [1] : vector<12x12xf32> to vector<12xf32>
    %942 = vector.shape_cast %941 : vector<12xf32> to vector<12x1xf32>
    %943 = tpu.reciprocal %942 {approx = true} : vector<12x1xf32> -> vector<12x1xf32>
    %944 = vector.broadcast %943 : vector<12x1xf32> to vector<12x12xf32>
    %945 = arith.mulf %940, %944 : vector<12x12xf32>
    %946 = arith.truncf %945 : vector<12x12xf32> to vector<12x12xbf16>
    %947 = arith.truncf %929 : vector<12x8xf32> to vector<12x8xbf16>
    %cst_325 = arith.constant dense<0.000000e+00> : vector<12x8xf32>
    %948 = tpu.matmul %946, %947, %cst_325 {dimension_numbers = #tpu.dot_dimension_numbers<[1], [0], [0], [1], [0, 0, 1, 1], [], []>} : vector<12x12xbf16>, vector<12x8xbf16>, vector<12x8xf32> -> vector<12x8xf32>
    %949 = vector.extract_strided_slice %903 {offsets = [0, 16], sizes = [12, 8], strides = [1, 1]} : vector<12x32xf32> to vector<12x8xf32>
    %950 = vector.extract_strided_slice %904 {offsets = [0, 16], sizes = [12, 8], strides = [1, 1]} : vector<12x64xf32> to vector<12x8xf32>
    %951 = vector.extract_strided_slice %904 {offsets = [0, 48], sizes = [12, 8], strides = [1, 1]} : vector<12x64xf32> to vector<12x8xf32>
    %952 = vector.extract_strided_slice %877 {offsets = [2, 0, 0], sizes = [1, 12, 12], strides = [1, 1, 1]} : vector<4x12x12xf32> to vector<1x12x12xf32>
    %953 = vector.shape_cast %952 : vector<1x12x12xf32> to vector<12x12xf32>
    %954 = arith.truncf %949 : vector<12x8xf32> to vector<12x8xbf16>
    %955 = arith.truncf %950 : vector<12x8xf32> to vector<12x8xbf16>
    %cst_326 = arith.constant dense<0.000000e+00> : vector<12x12xf32>
    %956 = tpu.matmul %954, %955, %cst_326 {dimension_numbers = #tpu.dot_dimension_numbers<[1], [1], [0], [0], [0, 0, 1, 0], [], []>} : vector<12x8xbf16>, vector<12x8xbf16>, vector<12x12xf32> -> vector<12x12xf32>
    %957 = arith.addf %956, %953 : vector<12x12xf32>
    %cst_327 = arith.constant dense<0xFF800000> : vector<12xf32>
    %958 = vector.multi_reduction <maximumf>, %957, %cst_327 [1] : vector<12x12xf32> to vector<12xf32>
    %959 = vector.shape_cast %958 : vector<12xf32> to vector<12x1xf32>
    %960 = vector.broadcast %959 : vector<12x1xf32> to vector<12x12xf32>
    %961 = arith.subf %957, %960 : vector<12x12xf32>
    %962 = math.exp %961 : vector<12x12xf32>
    %cst_328 = arith.constant dense<0.000000e+00> : vector<12xf32>
    %963 = vector.multi_reduction <add>, %962, %cst_328 [1] : vector<12x12xf32> to vector<12xf32>
    %964 = vector.shape_cast %963 : vector<12xf32> to vector<12x1xf32>
    %965 = tpu.reciprocal %964 {approx = true} : vector<12x1xf32> -> vector<12x1xf32>
    %966 = vector.broadcast %965 : vector<12x1xf32> to vector<12x12xf32>
    %967 = arith.mulf %962, %966 : vector<12x12xf32>
    %968 = arith.truncf %967 : vector<12x12xf32> to vector<12x12xbf16>
    %969 = arith.truncf %951 : vector<12x8xf32> to vector<12x8xbf16>
    %cst_329 = arith.constant dense<0.000000e+00> : vector<12x8xf32>
    %970 = tpu.matmul %968, %969, %cst_329 {dimension_numbers = #tpu.dot_dimension_numbers<[1], [0], [0], [1], [0, 0, 1, 1], [], []>} : vector<12x12xbf16>, vector<12x8xbf16>, vector<12x8xf32> -> vector<12x8xf32>
    %971 = vector.extract_strided_slice %903 {offsets = [0, 24], sizes = [12, 8], strides = [1, 1]} : vector<12x32xf32> to vector<12x8xf32>
    %972 = vector.extract_strided_slice %904 {offsets = [0, 24], sizes = [12, 8], strides = [1, 1]} : vector<12x64xf32> to vector<12x8xf32>
    %973 = vector.extract_strided_slice %904 {offsets = [0, 56], sizes = [12, 8], strides = [1, 1]} : vector<12x64xf32> to vector<12x8xf32>
    %974 = vector.extract_strided_slice %877 {offsets = [3, 0, 0], sizes = [1, 12, 12], strides = [1, 1, 1]} : vector<4x12x12xf32> to vector<1x12x12xf32>
    %975 = vector.shape_cast %974 : vector<1x12x12xf32> to vector<12x12xf32>
    %976 = arith.truncf %971 : vector<12x8xf32> to vector<12x8xbf16>
    %977 = arith.truncf %972 : vector<12x8xf32> to vector<12x8xbf16>
    %cst_330 = arith.constant dense<0.000000e+00> : vector<12x12xf32>
    %978 = tpu.matmul %976, %977, %cst_330 {dimension_numbers = #tpu.dot_dimension_numbers<[1], [1], [0], [0], [0, 0, 1, 0], [], []>} : vector<12x8xbf16>, vector<12x8xbf16>, vector<12x12xf32> -> vector<12x12xf32>
    %979 = arith.addf %978, %975 : vector<12x12xf32>
    %cst_331 = arith.constant dense<0xFF800000> : vector<12xf32>
    %980 = vector.multi_reduction <maximumf>, %979, %cst_331 [1] : vector<12x12xf32> to vector<12xf32>
    %981 = vector.shape_cast %980 : vector<12xf32> to vector<12x1xf32>
    %982 = vector.broadcast %981 : vector<12x1xf32> to vector<12x12xf32>
    %983 = arith.subf %979, %982 : vector<12x12xf32>
    %984 = math.exp %983 : vector<12x12xf32>
    %cst_332 = arith.constant dense<0.000000e+00> : vector<12xf32>
    %985 = vector.multi_reduction <add>, %984, %cst_332 [1] : vector<12x12xf32> to vector<12xf32>
    %986 = vector.shape_cast %985 : vector<12xf32> to vector<12x1xf32>
    %987 = tpu.reciprocal %986 {approx = true} : vector<12x1xf32> -> vector<12x1xf32>
    %988 = vector.broadcast %987 : vector<12x1xf32> to vector<12x12xf32>
    %989 = arith.mulf %984, %988 : vector<12x12xf32>
    %990 = arith.truncf %989 : vector<12x12xf32> to vector<12x12xbf16>
    %991 = arith.truncf %973 : vector<12x8xf32> to vector<12x8xbf16>
    %cst_333 = arith.constant dense<0.000000e+00> : vector<12x8xf32>
    %992 = tpu.matmul %990, %991, %cst_333 {dimension_numbers = #tpu.dot_dimension_numbers<[1], [0], [0], [1], [0, 0, 1, 1], [], []>} : vector<12x12xbf16>, vector<12x8xbf16>, vector<12x8xf32> -> vector<12x8xf32>
    %993 = tpu.concatenate %926, %948, %970, %992 in 1 : vector<12x8xf32>, vector<12x8xf32>, vector<12x8xf32>, vector<12x8xf32> -> vector<12x32xf32>
    %994 = arith.truncf %993 : vector<12x32xf32> to vector<12x32xbf16>
    %cst_334 = arith.constant dense<0.000000e+00> : vector<12x32xf32>
    %995 = tpu.matmul %994, %900, %cst_334 {dimension_numbers = #tpu.dot_dimension_numbers<[1], [0], [0], [1], [0, 0, 1, 1], [], []>} : vector<12x32xbf16>, vector<32x32xbf16>, vector<12x32xf32> -> vector<12x32xf32>
    %996 = arith.addf %882, %995 : vector<12x32xf32>
    %c0_335 = arith.constant 0 : index
    %c1_336 = arith.constant 1 : index
    %c0_337 = arith.constant 0 : index
    %c0_338 = arith.constant 0 : index
    %997 = vector.load %arg7[%c0_335, %c1_336, %c0_337, %c0_338] : memref<2x2x1x32xf32, #tpu.memory_space<vmem>>, vector<1x1x1x32xf32>
    %998 = vector.shape_cast %997 : vector<1x1x1x32xf32> to vector<1x32xf32>
    %999 = arith.mulf %996, %996 : vector<12x32xf32>
    %cst_339 = arith.constant dense<0.000000e+00> : vector<12xf32>
    %1000 = vector.multi_reduction <add>, %999, %cst_339 [1] : vector<12x32xf32> to vector<12xf32>
    %1001 = vector.shape_cast %1000 : vector<12xf32> to vector<12x1xf32>
    %cst_340 = arith.constant 3.200000e+01 : f32
    %1002 = vector.broadcast %cst_340 : f32 to vector<12x1xf32>
    %1003 = arith.divf %1001, %1002 : vector<12x1xf32>
    %cst_341 = arith.constant 9.99999997E-7 : f32
    %1004 = vector.broadcast %cst_341 : f32 to vector<12x1xf32>
    %1005 = arith.addf %1003, %1004 : vector<12x1xf32>
    %1006 = math.rsqrt %1005 : vector<12x1xf32>
    %1007 = vector.broadcast %1006 : vector<12x1xf32> to vector<12x32xf32>
    %1008 = arith.mulf %996, %1007 : vector<12x32xf32>
    %1009 = vector.broadcast %998 : vector<1x32xf32> to vector<12x32xf32>
    %1010 = arith.mulf %1008, %1009 : vector<12x32xf32>
    %c0_342 = arith.constant 0 : index
    %c0_343 = arith.constant 0 : index
    %c0_344 = arith.constant 0 : index
    %1011 = vector.load %arg10[%c0_342, %c0_343, %c0_344] : memref<2x32x64xbf16, #tpu.memory_space<vmem>>, vector<1x32x64xbf16>
    %1012 = vector.shape_cast %1011 : vector<1x32x64xbf16> to vector<32x64xbf16>
    %1013 = arith.truncf %1010 : vector<12x32xf32> to vector<12x32xbf16>
    %cst_345 = arith.constant dense<0.000000e+00> : vector<12x64xf32>
    %1014 = tpu.matmul %1013, %1012, %cst_345 {dimension_numbers = #tpu.dot_dimension_numbers<[1], [0], [0], [1], [0, 0, 1, 1], [], []>} : vector<12x32xbf16>, vector<32x64xbf16>, vector<12x64xf32> -> vector<12x64xf32>
    %cst_346 = arith.constant 0.000000e+00 : f32
    %1015 = vector.broadcast %cst_346 : f32 to vector<12x64xf32>
    %1016 = arith.maximumf %1014, %1015 : vector<12x64xf32>
    %c0_347 = arith.constant 0 : index
    %c0_348 = arith.constant 0 : index
    %c0_349 = arith.constant 0 : index
    %1017 = vector.load %arg11[%c0_347, %c0_348, %c0_349] : memref<2x64x32xbf16, #tpu.memory_space<vmem>>, vector<1x64x32xbf16>
    %1018 = vector.shape_cast %1017 : vector<1x64x32xbf16> to vector<64x32xbf16>
    %1019 = arith.truncf %1016 : vector<12x64xf32> to vector<12x64xbf16>
    %cst_350 = arith.constant dense<0.000000e+00> : vector<12x32xf32>
    %1020 = tpu.matmul %1019, %1018, %cst_350 {dimension_numbers = #tpu.dot_dimension_numbers<[1], [0], [0], [1], [0, 0, 1, 1], [], []>} : vector<12x64xbf16>, vector<64x32xbf16>, vector<12x32xf32> -> vector<12x32xf32>
    %1021 = arith.addf %996, %1020 : vector<12x32xf32>
    %c1_351 = arith.constant 1 : index
    %c0_352 = arith.constant 0 : index
    %c0_353 = arith.constant 0 : index
    %c0_354 = arith.constant 0 : index
    %1022 = vector.load %arg7[%c1_351, %c0_352, %c0_353, %c0_354] : memref<2x2x1x32xf32, #tpu.memory_space<vmem>>, vector<1x1x1x32xf32>
    %1023 = vector.shape_cast %1022 : vector<1x1x1x32xf32> to vector<1x32xf32>
    %1024 = arith.mulf %1021, %1021 : vector<12x32xf32>
    %cst_355 = arith.constant dense<0.000000e+00> : vector<12xf32>
    %1025 = vector.multi_reduction <add>, %1024, %cst_355 [1] : vector<12x32xf32> to vector<12xf32>
    %1026 = vector.shape_cast %1025 : vector<12xf32> to vector<12x1xf32>
    %cst_356 = arith.constant 3.200000e+01 : f32
    %1027 = vector.broadcast %cst_356 : f32 to vector<12x1xf32>
    %1028 = arith.divf %1026, %1027 : vector<12x1xf32>
    %cst_357 = arith.constant 9.99999997E-7 : f32
    %1029 = vector.broadcast %cst_357 : f32 to vector<12x1xf32>
    %1030 = arith.addf %1028, %1029 : vector<12x1xf32>
    %1031 = math.rsqrt %1030 : vector<12x1xf32>
    %1032 = vector.broadcast %1031 : vector<12x1xf32> to vector<12x32xf32>
    %1033 = arith.mulf %1021, %1032 : vector<12x32xf32>
    %1034 = vector.broadcast %1023 : vector<1x32xf32> to vector<12x32xf32>
    %1035 = arith.mulf %1033, %1034 : vector<12x32xf32>
    %c1_358 = arith.constant 1 : index
    %c0_359 = arith.constant 0 : index
    %c0_360 = arith.constant 0 : index
    %1036 = vector.load %arg8[%c1_358, %c0_359, %c0_360] : memref<2x32x96xbf16, #tpu.memory_space<vmem>>, vector<1x32x96xbf16>
    %1037 = vector.shape_cast %1036 : vector<1x32x96xbf16> to vector<32x96xbf16>
    %c1_361 = arith.constant 1 : index
    %c0_362 = arith.constant 0 : index
    %c0_363 = arith.constant 0 : index
    %1038 = vector.load %arg9[%c1_361, %c0_362, %c0_363] : memref<2x32x32xbf16, #tpu.memory_space<vmem>>, vector<1x32x32xbf16>
    %1039 = vector.shape_cast %1038 : vector<1x32x32xbf16> to vector<32x32xbf16>
    %1040 = arith.truncf %1035 : vector<12x32xf32> to vector<12x32xbf16>
    %cst_364 = arith.constant dense<0.000000e+00> : vector<12x96xf32>
    %1041 = tpu.matmul %1040, %1037, %cst_364 {dimension_numbers = #tpu.dot_dimension_numbers<[1], [0], [0], [1], [0, 0, 1, 1], [], []>} : vector<12x32xbf16>, vector<32x96xbf16>, vector<12x96xf32> -> vector<12x96xf32>
    %1042 = vector.extract_strided_slice %1041 {offsets = [0, 0], sizes = [12, 32], strides = [1, 1]} : vector<12x96xf32> to vector<12x32xf32>
    %1043 = vector.extract_strided_slice %1041 {offsets = [0, 32], sizes = [12, 64], strides = [1, 1]} : vector<12x96xf32> to vector<12x64xf32>
    %1044 = vector.extract_strided_slice %1042 {offsets = [0, 0], sizes = [12, 8], strides = [1, 1]} : vector<12x32xf32> to vector<12x8xf32>
    %1045 = vector.extract_strided_slice %1043 {offsets = [0, 0], sizes = [12, 8], strides = [1, 1]} : vector<12x64xf32> to vector<12x8xf32>
    %1046 = vector.extract_strided_slice %1043 {offsets = [0, 32], sizes = [12, 8], strides = [1, 1]} : vector<12x64xf32> to vector<12x8xf32>
    %1047 = vector.extract_strided_slice %877 {offsets = [0, 0, 0], sizes = [1, 12, 12], strides = [1, 1, 1]} : vector<4x12x12xf32> to vector<1x12x12xf32>
    %1048 = vector.shape_cast %1047 : vector<1x12x12xf32> to vector<12x12xf32>
    %1049 = arith.truncf %1044 : vector<12x8xf32> to vector<12x8xbf16>
    %1050 = arith.truncf %1045 : vector<12x8xf32> to vector<12x8xbf16>
    %cst_365 = arith.constant dense<0.000000e+00> : vector<12x12xf32>
    %1051 = tpu.matmul %1049, %1050, %cst_365 {dimension_numbers = #tpu.dot_dimension_numbers<[1], [1], [0], [0], [0, 0, 1, 0], [], []>} : vector<12x8xbf16>, vector<12x8xbf16>, vector<12x12xf32> -> vector<12x12xf32>
    %1052 = arith.addf %1051, %1048 : vector<12x12xf32>
    %cst_366 = arith.constant dense<0xFF800000> : vector<12xf32>
    %1053 = vector.multi_reduction <maximumf>, %1052, %cst_366 [1] : vector<12x12xf32> to vector<12xf32>
    %1054 = vector.shape_cast %1053 : vector<12xf32> to vector<12x1xf32>
    %1055 = vector.broadcast %1054 : vector<12x1xf32> to vector<12x12xf32>
    %1056 = arith.subf %1052, %1055 : vector<12x12xf32>
    %1057 = math.exp %1056 : vector<12x12xf32>
    %cst_367 = arith.constant dense<0.000000e+00> : vector<12xf32>
    %1058 = vector.multi_reduction <add>, %1057, %cst_367 [1] : vector<12x12xf32> to vector<12xf32>
    %1059 = vector.shape_cast %1058 : vector<12xf32> to vector<12x1xf32>
    %1060 = tpu.reciprocal %1059 {approx = true} : vector<12x1xf32> -> vector<12x1xf32>
    %1061 = vector.broadcast %1060 : vector<12x1xf32> to vector<12x12xf32>
    %1062 = arith.mulf %1057, %1061 : vector<12x12xf32>
    %1063 = arith.truncf %1062 : vector<12x12xf32> to vector<12x12xbf16>
    %1064 = arith.truncf %1046 : vector<12x8xf32> to vector<12x8xbf16>
    %cst_368 = arith.constant dense<0.000000e+00> : vector<12x8xf32>
    %1065 = tpu.matmul %1063, %1064, %cst_368 {dimension_numbers = #tpu.dot_dimension_numbers<[1], [0], [0], [1], [0, 0, 1, 1], [], []>} : vector<12x12xbf16>, vector<12x8xbf16>, vector<12x8xf32> -> vector<12x8xf32>
    %1066 = vector.extract_strided_slice %1042 {offsets = [0, 8], sizes = [12, 8], strides = [1, 1]} : vector<12x32xf32> to vector<12x8xf32>
    %1067 = vector.extract_strided_slice %1043 {offsets = [0, 8], sizes = [12, 8], strides = [1, 1]} : vector<12x64xf32> to vector<12x8xf32>
    %1068 = vector.extract_strided_slice %1043 {offsets = [0, 40], sizes = [12, 8], strides = [1, 1]} : vector<12x64xf32> to vector<12x8xf32>
    %1069 = vector.extract_strided_slice %877 {offsets = [1, 0, 0], sizes = [1, 12, 12], strides = [1, 1, 1]} : vector<4x12x12xf32> to vector<1x12x12xf32>
    %1070 = vector.shape_cast %1069 : vector<1x12x12xf32> to vector<12x12xf32>
    %1071 = arith.truncf %1066 : vector<12x8xf32> to vector<12x8xbf16>
    %1072 = arith.truncf %1067 : vector<12x8xf32> to vector<12x8xbf16>
    %cst_369 = arith.constant dense<0.000000e+00> : vector<12x12xf32>
    %1073 = tpu.matmul %1071, %1072, %cst_369 {dimension_numbers = #tpu.dot_dimension_numbers<[1], [1], [0], [0], [0, 0, 1, 0], [], []>} : vector<12x8xbf16>, vector<12x8xbf16>, vector<12x12xf32> -> vector<12x12xf32>
    %1074 = arith.addf %1073, %1070 : vector<12x12xf32>
    %cst_370 = arith.constant dense<0xFF800000> : vector<12xf32>
    %1075 = vector.multi_reduction <maximumf>, %1074, %cst_370 [1] : vector<12x12xf32> to vector<12xf32>
    %1076 = vector.shape_cast %1075 : vector<12xf32> to vector<12x1xf32>
    %1077 = vector.broadcast %1076 : vector<12x1xf32> to vector<12x12xf32>
    %1078 = arith.subf %1074, %1077 : vector<12x12xf32>
    %1079 = math.exp %1078 : vector<12x12xf32>
    %cst_371 = arith.constant dense<0.000000e+00> : vector<12xf32>
    %1080 = vector.multi_reduction <add>, %1079, %cst_371 [1] : vector<12x12xf32> to vector<12xf32>
    %1081 = vector.shape_cast %1080 : vector<12xf32> to vector<12x1xf32>
    %1082 = tpu.reciprocal %1081 {approx = true} : vector<12x1xf32> -> vector<12x1xf32>
    %1083 = vector.broadcast %1082 : vector<12x1xf32> to vector<12x12xf32>
    %1084 = arith.mulf %1079, %1083 : vector<12x12xf32>
    %1085 = arith.truncf %1084 : vector<12x12xf32> to vector<12x12xbf16>
    %1086 = arith.truncf %1068 : vector<12x8xf32> to vector<12x8xbf16>
    %cst_372 = arith.constant dense<0.000000e+00> : vector<12x8xf32>
    %1087 = tpu.matmul %1085, %1086, %cst_372 {dimension_numbers = #tpu.dot_dimension_numbers<[1], [0], [0], [1], [0, 0, 1, 1], [], []>} : vector<12x12xbf16>, vector<12x8xbf16>, vector<12x8xf32> -> vector<12x8xf32>
    %1088 = vector.extract_strided_slice %1042 {offsets = [0, 16], sizes = [12, 8], strides = [1, 1]} : vector<12x32xf32> to vector<12x8xf32>
    %1089 = vector.extract_strided_slice %1043 {offsets = [0, 16], sizes = [12, 8], strides = [1, 1]} : vector<12x64xf32> to vector<12x8xf32>
    %1090 = vector.extract_strided_slice %1043 {offsets = [0, 48], sizes = [12, 8], strides = [1, 1]} : vector<12x64xf32> to vector<12x8xf32>
    %1091 = vector.extract_strided_slice %877 {offsets = [2, 0, 0], sizes = [1, 12, 12], strides = [1, 1, 1]} : vector<4x12x12xf32> to vector<1x12x12xf32>
    %1092 = vector.shape_cast %1091 : vector<1x12x12xf32> to vector<12x12xf32>
    %1093 = arith.truncf %1088 : vector<12x8xf32> to vector<12x8xbf16>
    %1094 = arith.truncf %1089 : vector<12x8xf32> to vector<12x8xbf16>
    %cst_373 = arith.constant dense<0.000000e+00> : vector<12x12xf32>
    %1095 = tpu.matmul %1093, %1094, %cst_373 {dimension_numbers = #tpu.dot_dimension_numbers<[1], [1], [0], [0], [0, 0, 1, 0], [], []>} : vector<12x8xbf16>, vector<12x8xbf16>, vector<12x12xf32> -> vector<12x12xf32>
    %1096 = arith.addf %1095, %1092 : vector<12x12xf32>
    %cst_374 = arith.constant dense<0xFF800000> : vector<12xf32>
    %1097 = vector.multi_reduction <maximumf>, %1096, %cst_374 [1] : vector<12x12xf32> to vector<12xf32>
    %1098 = vector.shape_cast %1097 : vector<12xf32> to vector<12x1xf32>
    %1099 = vector.broadcast %1098 : vector<12x1xf32> to vector<12x12xf32>
    %1100 = arith.subf %1096, %1099 : vector<12x12xf32>
    %1101 = math.exp %1100 : vector<12x12xf32>
    %cst_375 = arith.constant dense<0.000000e+00> : vector<12xf32>
    %1102 = vector.multi_reduction <add>, %1101, %cst_375 [1] : vector<12x12xf32> to vector<12xf32>
    %1103 = vector.shape_cast %1102 : vector<12xf32> to vector<12x1xf32>
    %1104 = tpu.reciprocal %1103 {approx = true} : vector<12x1xf32> -> vector<12x1xf32>
    %1105 = vector.broadcast %1104 : vector<12x1xf32> to vector<12x12xf32>
    %1106 = arith.mulf %1101, %1105 : vector<12x12xf32>
    %1107 = arith.truncf %1106 : vector<12x12xf32> to vector<12x12xbf16>
    %1108 = arith.truncf %1090 : vector<12x8xf32> to vector<12x8xbf16>
    %cst_376 = arith.constant dense<0.000000e+00> : vector<12x8xf32>
    %1109 = tpu.matmul %1107, %1108, %cst_376 {dimension_numbers = #tpu.dot_dimension_numbers<[1], [0], [0], [1], [0, 0, 1, 1], [], []>} : vector<12x12xbf16>, vector<12x8xbf16>, vector<12x8xf32> -> vector<12x8xf32>
    %1110 = vector.extract_strided_slice %1042 {offsets = [0, 24], sizes = [12, 8], strides = [1, 1]} : vector<12x32xf32> to vector<12x8xf32>
    %1111 = vector.extract_strided_slice %1043 {offsets = [0, 24], sizes = [12, 8], strides = [1, 1]} : vector<12x64xf32> to vector<12x8xf32>
    %1112 = vector.extract_strided_slice %1043 {offsets = [0, 56], sizes = [12, 8], strides = [1, 1]} : vector<12x64xf32> to vector<12x8xf32>
    %1113 = vector.extract_strided_slice %877 {offsets = [3, 0, 0], sizes = [1, 12, 12], strides = [1, 1, 1]} : vector<4x12x12xf32> to vector<1x12x12xf32>
    %1114 = vector.shape_cast %1113 : vector<1x12x12xf32> to vector<12x12xf32>
    %1115 = arith.truncf %1110 : vector<12x8xf32> to vector<12x8xbf16>
    %1116 = arith.truncf %1111 : vector<12x8xf32> to vector<12x8xbf16>
    %cst_377 = arith.constant dense<0.000000e+00> : vector<12x12xf32>
    %1117 = tpu.matmul %1115, %1116, %cst_377 {dimension_numbers = #tpu.dot_dimension_numbers<[1], [1], [0], [0], [0, 0, 1, 0], [], []>} : vector<12x8xbf16>, vector<12x8xbf16>, vector<12x12xf32> -> vector<12x12xf32>
    %1118 = arith.addf %1117, %1114 : vector<12x12xf32>
    %cst_378 = arith.constant dense<0xFF800000> : vector<12xf32>
    %1119 = vector.multi_reduction <maximumf>, %1118, %cst_378 [1] : vector<12x12xf32> to vector<12xf32>
    %1120 = vector.shape_cast %1119 : vector<12xf32> to vector<12x1xf32>
    %1121 = vector.broadcast %1120 : vector<12x1xf32> to vector<12x12xf32>
    %1122 = arith.subf %1118, %1121 : vector<12x12xf32>
    %1123 = math.exp %1122 : vector<12x12xf32>
    %cst_379 = arith.constant dense<0.000000e+00> : vector<12xf32>
    %1124 = vector.multi_reduction <add>, %1123, %cst_379 [1] : vector<12x12xf32> to vector<12xf32>
    %1125 = vector.shape_cast %1124 : vector<12xf32> to vector<12x1xf32>
    %1126 = tpu.reciprocal %1125 {approx = true} : vector<12x1xf32> -> vector<12x1xf32>
    %1127 = vector.broadcast %1126 : vector<12x1xf32> to vector<12x12xf32>
    %1128 = arith.mulf %1123, %1127 : vector<12x12xf32>
    %1129 = arith.truncf %1128 : vector<12x12xf32> to vector<12x12xbf16>
    %1130 = arith.truncf %1112 : vector<12x8xf32> to vector<12x8xbf16>
    %cst_380 = arith.constant dense<0.000000e+00> : vector<12x8xf32>
    %1131 = tpu.matmul %1129, %1130, %cst_380 {dimension_numbers = #tpu.dot_dimension_numbers<[1], [0], [0], [1], [0, 0, 1, 1], [], []>} : vector<12x12xbf16>, vector<12x8xbf16>, vector<12x8xf32> -> vector<12x8xf32>
    %1132 = tpu.concatenate %1065, %1087, %1109, %1131 in 1 : vector<12x8xf32>, vector<12x8xf32>, vector<12x8xf32>, vector<12x8xf32> -> vector<12x32xf32>
    %1133 = arith.truncf %1132 : vector<12x32xf32> to vector<12x32xbf16>
    %cst_381 = arith.constant dense<0.000000e+00> : vector<12x32xf32>
    %1134 = tpu.matmul %1133, %1039, %cst_381 {dimension_numbers = #tpu.dot_dimension_numbers<[1], [0], [0], [1], [0, 0, 1, 1], [], []>} : vector<12x32xbf16>, vector<32x32xbf16>, vector<12x32xf32> -> vector<12x32xf32>
    %1135 = arith.addf %1021, %1134 : vector<12x32xf32>
    %c1_382 = arith.constant 1 : index
    %c1_383 = arith.constant 1 : index
    %c0_384 = arith.constant 0 : index
    %c0_385 = arith.constant 0 : index
    %1136 = vector.load %arg7[%c1_382, %c1_383, %c0_384, %c0_385] : memref<2x2x1x32xf32, #tpu.memory_space<vmem>>, vector<1x1x1x32xf32>
    %1137 = vector.shape_cast %1136 : vector<1x1x1x32xf32> to vector<1x32xf32>
    %1138 = arith.mulf %1135, %1135 : vector<12x32xf32>
    %cst_386 = arith.constant dense<0.000000e+00> : vector<12xf32>
    %1139 = vector.multi_reduction <add>, %1138, %cst_386 [1] : vector<12x32xf32> to vector<12xf32>
    %1140 = vector.shape_cast %1139 : vector<12xf32> to vector<12x1xf32>
    %cst_387 = arith.constant 3.200000e+01 : f32
    %1141 = vector.broadcast %cst_387 : f32 to vector<12x1xf32>
    %1142 = arith.divf %1140, %1141 : vector<12x1xf32>
    %cst_388 = arith.constant 9.99999997E-7 : f32
    %1143 = vector.broadcast %cst_388 : f32 to vector<12x1xf32>
    %1144 = arith.addf %1142, %1143 : vector<12x1xf32>
    %1145 = math.rsqrt %1144 : vector<12x1xf32>
    %1146 = vector.broadcast %1145 : vector<12x1xf32> to vector<12x32xf32>
    %1147 = arith.mulf %1135, %1146 : vector<12x32xf32>
    %1148 = vector.broadcast %1137 : vector<1x32xf32> to vector<12x32xf32>
    %1149 = arith.mulf %1147, %1148 : vector<12x32xf32>
    %c1_389 = arith.constant 1 : index
    %c0_390 = arith.constant 0 : index
    %c0_391 = arith.constant 0 : index
    %1150 = vector.load %arg10[%c1_389, %c0_390, %c0_391] : memref<2x32x64xbf16, #tpu.memory_space<vmem>>, vector<1x32x64xbf16>
    %1151 = vector.shape_cast %1150 : vector<1x32x64xbf16> to vector<32x64xbf16>
    %1152 = arith.truncf %1149 : vector<12x32xf32> to vector<12x32xbf16>
    %cst_392 = arith.constant dense<0.000000e+00> : vector<12x64xf32>
    %1153 = tpu.matmul %1152, %1151, %cst_392 {dimension_numbers = #tpu.dot_dimension_numbers<[1], [0], [0], [1], [0, 0, 1, 1], [], []>} : vector<12x32xbf16>, vector<32x64xbf16>, vector<12x64xf32> -> vector<12x64xf32>
    %cst_393 = arith.constant 0.000000e+00 : f32
    %1154 = vector.broadcast %cst_393 : f32 to vector<12x64xf32>
    %1155 = arith.maximumf %1153, %1154 : vector<12x64xf32>
    %c1_394 = arith.constant 1 : index
    %c0_395 = arith.constant 0 : index
    %c0_396 = arith.constant 0 : index
    %1156 = vector.load %arg11[%c1_394, %c0_395, %c0_396] : memref<2x64x32xbf16, #tpu.memory_space<vmem>>, vector<1x64x32xbf16>
    %1157 = vector.shape_cast %1156 : vector<1x64x32xbf16> to vector<64x32xbf16>
    %1158 = arith.truncf %1155 : vector<12x64xf32> to vector<12x64xbf16>
    %cst_397 = arith.constant dense<0.000000e+00> : vector<12x32xf32>
    %1159 = tpu.matmul %1158, %1157, %cst_397 {dimension_numbers = #tpu.dot_dimension_numbers<[1], [0], [0], [1], [0, 0, 1, 1], [], []>} : vector<12x64xbf16>, vector<64x32xbf16>, vector<12x32xf32> -> vector<12x32xf32>
    %1160 = arith.addf %1135, %1159 : vector<12x32xf32>
    %c0_398 = arith.constant 0 : index
    %c0_399 = arith.constant 0 : index
    %1161 = vector.load %arg12[%c0_398, %c0_399] : memref<1x32xf32, #tpu.memory_space<vmem>>, vector<1x32xf32>
    %1162 = arith.mulf %1160, %1160 : vector<12x32xf32>
    %cst_400 = arith.constant dense<0.000000e+00> : vector<12xf32>
    %1163 = vector.multi_reduction <add>, %1162, %cst_400 [1] : vector<12x32xf32> to vector<12xf32>
    %1164 = vector.shape_cast %1163 : vector<12xf32> to vector<12x1xf32>
    %cst_401 = arith.constant 3.200000e+01 : f32
    %1165 = vector.broadcast %cst_401 : f32 to vector<12x1xf32>
    %1166 = arith.divf %1164, %1165 : vector<12x1xf32>
    %cst_402 = arith.constant 9.99999997E-7 : f32
    %1167 = vector.broadcast %cst_402 : f32 to vector<12x1xf32>
    %1168 = arith.addf %1166, %1167 : vector<12x1xf32>
    %1169 = math.rsqrt %1168 : vector<12x1xf32>
    %1170 = vector.broadcast %1169 : vector<12x1xf32> to vector<12x32xf32>
    %1171 = arith.mulf %1160, %1170 : vector<12x32xf32>
    %1172 = vector.broadcast %1161 : vector<1x32xf32> to vector<12x32xf32>
    %1173 = arith.mulf %1171, %1172 : vector<12x32xf32>
    %c1_403 = arith.constant 1 : index
    %c0_404 = arith.constant 0 : index
    %c0_405 = arith.constant 0 : index
    %1174 = vector.load %arg2[%c1_403, %c0_404, %c0_405] : memref<2x8x32xf32, #tpu.memory_space<vmem>>, vector<1x8x32xf32>
    %1175 = vector.shape_cast %1174 : vector<1x8x32xf32> to vector<8x32xf32>
    %c0_406 = arith.constant 0 : index
    %c0_407 = arith.constant 0 : index
    %c0_408 = arith.constant 0 : index
    %c0_409 = arith.constant 0 : index
    %1176 = vector.load %arg13[%c0_406, %c0_407, %c0_408, %c0_409] : memref<2x3x1x32xf32, #tpu.memory_space<vmem>>, vector<1x1x1x32xf32>
    %1177 = vector.shape_cast %1176 : vector<1x1x1x32xf32> to vector<1x32xf32>
    %1178 = arith.mulf %1175, %1175 : vector<8x32xf32>
    %cst_410 = arith.constant dense<0.000000e+00> : vector<8xf32>
    %1179 = vector.multi_reduction <add>, %1178, %cst_410 [1] : vector<8x32xf32> to vector<8xf32>
    %1180 = vector.shape_cast %1179 : vector<8xf32> to vector<8x1xf32>
    %cst_411 = arith.constant 3.200000e+01 : f32
    %1181 = vector.broadcast %cst_411 : f32 to vector<8x1xf32>
    %1182 = arith.divf %1180, %1181 : vector<8x1xf32>
    %cst_412 = arith.constant 9.99999997E-7 : f32
    %1183 = vector.broadcast %cst_412 : f32 to vector<8x1xf32>
    %1184 = arith.addf %1182, %1183 : vector<8x1xf32>
    %1185 = math.rsqrt %1184 : vector<8x1xf32>
    %1186 = vector.broadcast %1185 : vector<8x1xf32> to vector<8x32xf32>
    %1187 = arith.mulf %1175, %1186 : vector<8x32xf32>
    %1188 = vector.broadcast %1177 : vector<1x32xf32> to vector<8x32xf32>
    %1189 = arith.mulf %1187, %1188 : vector<8x32xf32>
    %c0_413 = arith.constant 0 : index
    %c0_414 = arith.constant 0 : index
    %c0_415 = arith.constant 0 : index
    %1190 = vector.load %arg14[%c0_413, %c0_414, %c0_415] : memref<2x32x96xbf16, #tpu.memory_space<vmem>>, vector<1x32x96xbf16>
    %1191 = vector.shape_cast %1190 : vector<1x32x96xbf16> to vector<32x96xbf16>
    %c0_416 = arith.constant 0 : index
    %c0_417 = arith.constant 0 : index
    %c0_418 = arith.constant 0 : index
    %1192 = vector.load %arg15[%c0_416, %c0_417, %c0_418] : memref<2x32x32xbf16, #tpu.memory_space<vmem>>, vector<1x32x32xbf16>
    %1193 = vector.shape_cast %1192 : vector<1x32x32xbf16> to vector<32x32xbf16>
    %1194 = arith.truncf %1189 : vector<8x32xf32> to vector<8x32xbf16>
    %cst_419 = arith.constant dense<0.000000e+00> : vector<8x96xf32>
    %1195 = tpu.matmul %1194, %1191, %cst_419 {dimension_numbers = #tpu.dot_dimension_numbers<[1], [0], [0], [1], [0, 0, 1, 1], [], []>} : vector<8x32xbf16>, vector<32x96xbf16>, vector<8x96xf32> -> vector<8x96xf32>
    %1196 = vector.extract_strided_slice %1195 {offsets = [0, 0], sizes = [8, 32], strides = [1, 1]} : vector<8x96xf32> to vector<8x32xf32>
    %1197 = vector.extract_strided_slice %1195 {offsets = [0, 32], sizes = [8, 64], strides = [1, 1]} : vector<8x96xf32> to vector<8x64xf32>
    %1198 = vector.extract_strided_slice %1196 {offsets = [0, 0], sizes = [8, 8], strides = [1, 1]} : vector<8x32xf32> to vector<8x8xf32>
    %1199 = vector.extract_strided_slice %1197 {offsets = [0, 0], sizes = [8, 8], strides = [1, 1]} : vector<8x64xf32> to vector<8x8xf32>
    %1200 = vector.extract_strided_slice %1197 {offsets = [0, 32], sizes = [8, 8], strides = [1, 1]} : vector<8x64xf32> to vector<8x8xf32>
    %1201 = vector.extract_strided_slice %1 {offsets = [0, 0, 0], sizes = [1, 8, 8], strides = [1, 1, 1]} : vector<4x8x8xf32> to vector<1x8x8xf32>
    %1202 = vector.shape_cast %1201 : vector<1x8x8xf32> to vector<8x8xf32>
    %1203 = arith.truncf %1198 : vector<8x8xf32> to vector<8x8xbf16>
    %1204 = arith.truncf %1199 : vector<8x8xf32> to vector<8x8xbf16>
    %cst_420 = arith.constant dense<0.000000e+00> : vector<8x8xf32>
    %1205 = tpu.matmul %1203, %1204, %cst_420 {dimension_numbers = #tpu.dot_dimension_numbers<[1], [1], [0], [0], [0, 0, 1, 0], [], []>} : vector<8x8xbf16>, vector<8x8xbf16>, vector<8x8xf32> -> vector<8x8xf32>
    %1206 = arith.addf %1205, %1202 : vector<8x8xf32>
    %cst_421 = arith.constant dense<0xFF800000> : vector<8xf32>
    %1207 = vector.multi_reduction <maximumf>, %1206, %cst_421 [1] : vector<8x8xf32> to vector<8xf32>
    %1208 = vector.shape_cast %1207 : vector<8xf32> to vector<8x1xf32>
    %1209 = vector.broadcast %1208 : vector<8x1xf32> to vector<8x8xf32>
    %1210 = arith.subf %1206, %1209 : vector<8x8xf32>
    %1211 = math.exp %1210 : vector<8x8xf32>
    %cst_422 = arith.constant dense<0.000000e+00> : vector<8xf32>
    %1212 = vector.multi_reduction <add>, %1211, %cst_422 [1] : vector<8x8xf32> to vector<8xf32>
    %1213 = vector.shape_cast %1212 : vector<8xf32> to vector<8x1xf32>
    %1214 = tpu.reciprocal %1213 {approx = true} : vector<8x1xf32> -> vector<8x1xf32>
    %1215 = vector.broadcast %1214 : vector<8x1xf32> to vector<8x8xf32>
    %1216 = arith.mulf %1211, %1215 : vector<8x8xf32>
    %1217 = arith.truncf %1216 : vector<8x8xf32> to vector<8x8xbf16>
    %1218 = arith.truncf %1200 : vector<8x8xf32> to vector<8x8xbf16>
    %cst_423 = arith.constant dense<0.000000e+00> : vector<8x8xf32>
    %1219 = tpu.matmul %1217, %1218, %cst_423 {dimension_numbers = #tpu.dot_dimension_numbers<[1], [0], [0], [1], [0, 0, 1, 1], [], []>} : vector<8x8xbf16>, vector<8x8xbf16>, vector<8x8xf32> -> vector<8x8xf32>
    %1220 = vector.extract_strided_slice %1196 {offsets = [0, 8], sizes = [8, 8], strides = [1, 1]} : vector<8x32xf32> to vector<8x8xf32>
    %1221 = vector.extract_strided_slice %1197 {offsets = [0, 8], sizes = [8, 8], strides = [1, 1]} : vector<8x64xf32> to vector<8x8xf32>
    %1222 = vector.extract_strided_slice %1197 {offsets = [0, 40], sizes = [8, 8], strides = [1, 1]} : vector<8x64xf32> to vector<8x8xf32>
    %1223 = vector.extract_strided_slice %1 {offsets = [1, 0, 0], sizes = [1, 8, 8], strides = [1, 1, 1]} : vector<4x8x8xf32> to vector<1x8x8xf32>
    %1224 = vector.shape_cast %1223 : vector<1x8x8xf32> to vector<8x8xf32>
    %1225 = arith.truncf %1220 : vector<8x8xf32> to vector<8x8xbf16>
    %1226 = arith.truncf %1221 : vector<8x8xf32> to vector<8x8xbf16>
    %cst_424 = arith.constant dense<0.000000e+00> : vector<8x8xf32>
    %1227 = tpu.matmul %1225, %1226, %cst_424 {dimension_numbers = #tpu.dot_dimension_numbers<[1], [1], [0], [0], [0, 0, 1, 0], [], []>} : vector<8x8xbf16>, vector<8x8xbf16>, vector<8x8xf32> -> vector<8x8xf32>
    %1228 = arith.addf %1227, %1224 : vector<8x8xf32>
    %cst_425 = arith.constant dense<0xFF800000> : vector<8xf32>
    %1229 = vector.multi_reduction <maximumf>, %1228, %cst_425 [1] : vector<8x8xf32> to vector<8xf32>
    %1230 = vector.shape_cast %1229 : vector<8xf32> to vector<8x1xf32>
    %1231 = vector.broadcast %1230 : vector<8x1xf32> to vector<8x8xf32>
    %1232 = arith.subf %1228, %1231 : vector<8x8xf32>
    %1233 = math.exp %1232 : vector<8x8xf32>
    %cst_426 = arith.constant dense<0.000000e+00> : vector<8xf32>
    %1234 = vector.multi_reduction <add>, %1233, %cst_426 [1] : vector<8x8xf32> to vector<8xf32>
    %1235 = vector.shape_cast %1234 : vector<8xf32> to vector<8x1xf32>
    %1236 = tpu.reciprocal %1235 {approx = true} : vector<8x1xf32> -> vector<8x1xf32>
    %1237 = vector.broadcast %1236 : vector<8x1xf32> to vector<8x8xf32>
    %1238 = arith.mulf %1233, %1237 : vector<8x8xf32>
    %1239 = arith.truncf %1238 : vector<8x8xf32> to vector<8x8xbf16>
    %1240 = arith.truncf %1222 : vector<8x8xf32> to vector<8x8xbf16>
    %cst_427 = arith.constant dense<0.000000e+00> : vector<8x8xf32>
    %1241 = tpu.matmul %1239, %1240, %cst_427 {dimension_numbers = #tpu.dot_dimension_numbers<[1], [0], [0], [1], [0, 0, 1, 1], [], []>} : vector<8x8xbf16>, vector<8x8xbf16>, vector<8x8xf32> -> vector<8x8xf32>
    %1242 = vector.extract_strided_slice %1196 {offsets = [0, 16], sizes = [8, 8], strides = [1, 1]} : vector<8x32xf32> to vector<8x8xf32>
    %1243 = vector.extract_strided_slice %1197 {offsets = [0, 16], sizes = [8, 8], strides = [1, 1]} : vector<8x64xf32> to vector<8x8xf32>
    %1244 = vector.extract_strided_slice %1197 {offsets = [0, 48], sizes = [8, 8], strides = [1, 1]} : vector<8x64xf32> to vector<8x8xf32>
    %1245 = vector.extract_strided_slice %1 {offsets = [2, 0, 0], sizes = [1, 8, 8], strides = [1, 1, 1]} : vector<4x8x8xf32> to vector<1x8x8xf32>
    %1246 = vector.shape_cast %1245 : vector<1x8x8xf32> to vector<8x8xf32>
    %1247 = arith.truncf %1242 : vector<8x8xf32> to vector<8x8xbf16>
    %1248 = arith.truncf %1243 : vector<8x8xf32> to vector<8x8xbf16>
    %cst_428 = arith.constant dense<0.000000e+00> : vector<8x8xf32>
    %1249 = tpu.matmul %1247, %1248, %cst_428 {dimension_numbers = #tpu.dot_dimension_numbers<[1], [1], [0], [0], [0, 0, 1, 0], [], []>} : vector<8x8xbf16>, vector<8x8xbf16>, vector<8x8xf32> -> vector<8x8xf32>
    %1250 = arith.addf %1249, %1246 : vector<8x8xf32>
    %cst_429 = arith.constant dense<0xFF800000> : vector<8xf32>
    %1251 = vector.multi_reduction <maximumf>, %1250, %cst_429 [1] : vector<8x8xf32> to vector<8xf32>
    %1252 = vector.shape_cast %1251 : vector<8xf32> to vector<8x1xf32>
    %1253 = vector.broadcast %1252 : vector<8x1xf32> to vector<8x8xf32>
    %1254 = arith.subf %1250, %1253 : vector<8x8xf32>
    %1255 = math.exp %1254 : vector<8x8xf32>
    %cst_430 = arith.constant dense<0.000000e+00> : vector<8xf32>
    %1256 = vector.multi_reduction <add>, %1255, %cst_430 [1] : vector<8x8xf32> to vector<8xf32>
    %1257 = vector.shape_cast %1256 : vector<8xf32> to vector<8x1xf32>
    %1258 = tpu.reciprocal %1257 {approx = true} : vector<8x1xf32> -> vector<8x1xf32>
    %1259 = vector.broadcast %1258 : vector<8x1xf32> to vector<8x8xf32>
    %1260 = arith.mulf %1255, %1259 : vector<8x8xf32>
    %1261 = arith.truncf %1260 : vector<8x8xf32> to vector<8x8xbf16>
    %1262 = arith.truncf %1244 : vector<8x8xf32> to vector<8x8xbf16>
    %cst_431 = arith.constant dense<0.000000e+00> : vector<8x8xf32>
    %1263 = tpu.matmul %1261, %1262, %cst_431 {dimension_numbers = #tpu.dot_dimension_numbers<[1], [0], [0], [1], [0, 0, 1, 1], [], []>} : vector<8x8xbf16>, vector<8x8xbf16>, vector<8x8xf32> -> vector<8x8xf32>
    %1264 = vector.extract_strided_slice %1196 {offsets = [0, 24], sizes = [8, 8], strides = [1, 1]} : vector<8x32xf32> to vector<8x8xf32>
    %1265 = vector.extract_strided_slice %1197 {offsets = [0, 24], sizes = [8, 8], strides = [1, 1]} : vector<8x64xf32> to vector<8x8xf32>
    %1266 = vector.extract_strided_slice %1197 {offsets = [0, 56], sizes = [8, 8], strides = [1, 1]} : vector<8x64xf32> to vector<8x8xf32>
    %1267 = vector.extract_strided_slice %1 {offsets = [3, 0, 0], sizes = [1, 8, 8], strides = [1, 1, 1]} : vector<4x8x8xf32> to vector<1x8x8xf32>
    %1268 = vector.shape_cast %1267 : vector<1x8x8xf32> to vector<8x8xf32>
    %1269 = arith.truncf %1264 : vector<8x8xf32> to vector<8x8xbf16>
    %1270 = arith.truncf %1265 : vector<8x8xf32> to vector<8x8xbf16>
    %cst_432 = arith.constant dense<0.000000e+00> : vector<8x8xf32>
    %1271 = tpu.matmul %1269, %1270, %cst_432 {dimension_numbers = #tpu.dot_dimension_numbers<[1], [1], [0], [0], [0, 0, 1, 0], [], []>} : vector<8x8xbf16>, vector<8x8xbf16>, vector<8x8xf32> -> vector<8x8xf32>
    %1272 = arith.addf %1271, %1268 : vector<8x8xf32>
    %cst_433 = arith.constant dense<0xFF800000> : vector<8xf32>
    %1273 = vector.multi_reduction <maximumf>, %1272, %cst_433 [1] : vector<8x8xf32> to vector<8xf32>
    %1274 = vector.shape_cast %1273 : vector<8xf32> to vector<8x1xf32>
    %1275 = vector.broadcast %1274 : vector<8x1xf32> to vector<8x8xf32>
    %1276 = arith.subf %1272, %1275 : vector<8x8xf32>
    %1277 = math.exp %1276 : vector<8x8xf32>
    %cst_434 = arith.constant dense<0.000000e+00> : vector<8xf32>
    %1278 = vector.multi_reduction <add>, %1277, %cst_434 [1] : vector<8x8xf32> to vector<8xf32>
    %1279 = vector.shape_cast %1278 : vector<8xf32> to vector<8x1xf32>
    %1280 = tpu.reciprocal %1279 {approx = true} : vector<8x1xf32> -> vector<8x1xf32>
    %1281 = vector.broadcast %1280 : vector<8x1xf32> to vector<8x8xf32>
    %1282 = arith.mulf %1277, %1281 : vector<8x8xf32>
    %1283 = arith.truncf %1282 : vector<8x8xf32> to vector<8x8xbf16>
    %1284 = arith.truncf %1266 : vector<8x8xf32> to vector<8x8xbf16>
    %cst_435 = arith.constant dense<0.000000e+00> : vector<8x8xf32>
    %1285 = tpu.matmul %1283, %1284, %cst_435 {dimension_numbers = #tpu.dot_dimension_numbers<[1], [0], [0], [1], [0, 0, 1, 1], [], []>} : vector<8x8xbf16>, vector<8x8xbf16>, vector<8x8xf32> -> vector<8x8xf32>
    %1286 = tpu.concatenate %1219, %1241, %1263, %1285 in 1 : vector<8x8xf32>, vector<8x8xf32>, vector<8x8xf32>, vector<8x8xf32> -> vector<8x32xf32>
    %1287 = arith.truncf %1286 : vector<8x32xf32> to vector<8x32xbf16>
    %cst_436 = arith.constant dense<0.000000e+00> : vector<8x32xf32>
    %1288 = tpu.matmul %1287, %1193, %cst_436 {dimension_numbers = #tpu.dot_dimension_numbers<[1], [0], [0], [1], [0, 0, 1, 1], [], []>} : vector<8x32xbf16>, vector<32x32xbf16>, vector<8x32xf32> -> vector<8x32xf32>
    %1289 = arith.addf %1175, %1288 : vector<8x32xf32>
    %c0_437 = arith.constant 0 : index
    %c1_438 = arith.constant 1 : index
    %c0_439 = arith.constant 0 : index
    %c0_440 = arith.constant 0 : index
    %1290 = vector.load %arg13[%c0_437, %c1_438, %c0_439, %c0_440] : memref<2x3x1x32xf32, #tpu.memory_space<vmem>>, vector<1x1x1x32xf32>
    %1291 = vector.shape_cast %1290 : vector<1x1x1x32xf32> to vector<1x32xf32>
    %1292 = arith.mulf %1289, %1289 : vector<8x32xf32>
    %cst_441 = arith.constant dense<0.000000e+00> : vector<8xf32>
    %1293 = vector.multi_reduction <add>, %1292, %cst_441 [1] : vector<8x32xf32> to vector<8xf32>
    %1294 = vector.shape_cast %1293 : vector<8xf32> to vector<8x1xf32>
    %cst_442 = arith.constant 3.200000e+01 : f32
    %1295 = vector.broadcast %cst_442 : f32 to vector<8x1xf32>
    %1296 = arith.divf %1294, %1295 : vector<8x1xf32>
    %cst_443 = arith.constant 9.99999997E-7 : f32
    %1297 = vector.broadcast %cst_443 : f32 to vector<8x1xf32>
    %1298 = arith.addf %1296, %1297 : vector<8x1xf32>
    %1299 = math.rsqrt %1298 : vector<8x1xf32>
    %1300 = vector.broadcast %1299 : vector<8x1xf32> to vector<8x32xf32>
    %1301 = arith.mulf %1289, %1300 : vector<8x32xf32>
    %1302 = vector.broadcast %1291 : vector<1x32xf32> to vector<8x32xf32>
    %1303 = arith.mulf %1301, %1302 : vector<8x32xf32>
    %c0_444 = arith.constant 0 : index
    %c0_445 = arith.constant 0 : index
    %c0_446 = arith.constant 0 : index
    %1304 = vector.load %arg16[%c0_444, %c0_445, %c0_446] : memref<2x32x32xbf16, #tpu.memory_space<vmem>>, vector<1x32x32xbf16>
    %1305 = vector.shape_cast %1304 : vector<1x32x32xbf16> to vector<32x32xbf16>
    %c0_447 = arith.constant 0 : index
    %c0_448 = arith.constant 0 : index
    %c0_449 = arith.constant 0 : index
    %1306 = vector.load %arg17[%c0_447, %c0_448, %c0_449] : memref<2x32x64xbf16, #tpu.memory_space<vmem>>, vector<1x32x64xbf16>
    %1307 = vector.shape_cast %1306 : vector<1x32x64xbf16> to vector<32x64xbf16>
    %c0_450 = arith.constant 0 : index
    %c0_451 = arith.constant 0 : index
    %c0_452 = arith.constant 0 : index
    %1308 = vector.load %arg18[%c0_450, %c0_451, %c0_452] : memref<2x32x32xbf16, #tpu.memory_space<vmem>>, vector<1x32x32xbf16>
    %1309 = vector.shape_cast %1308 : vector<1x32x32xbf16> to vector<32x32xbf16>
    %1310 = arith.truncf %1303 : vector<8x32xf32> to vector<8x32xbf16>
    %cst_453 = arith.constant dense<0.000000e+00> : vector<8x32xf32>
    %1311 = tpu.matmul %1310, %1305, %cst_453 {dimension_numbers = #tpu.dot_dimension_numbers<[1], [0], [0], [1], [0, 0, 1, 1], [], []>} : vector<8x32xbf16>, vector<32x32xbf16>, vector<8x32xf32> -> vector<8x32xf32>
    %1312 = arith.truncf %1173 : vector<12x32xf32> to vector<12x32xbf16>
    %cst_454 = arith.constant dense<0.000000e+00> : vector<12x64xf32>
    %1313 = tpu.matmul %1312, %1307, %cst_454 {dimension_numbers = #tpu.dot_dimension_numbers<[1], [0], [0], [1], [0, 0, 1, 1], [], []>} : vector<12x32xbf16>, vector<32x64xbf16>, vector<12x64xf32> -> vector<12x64xf32>
    %1314 = vector.extract_strided_slice %1311 {offsets = [0, 0], sizes = [8, 8], strides = [1, 1]} : vector<8x32xf32> to vector<8x8xf32>
    %1315 = vector.extract_strided_slice %1313 {offsets = [0, 0], sizes = [12, 8], strides = [1, 1]} : vector<12x64xf32> to vector<12x8xf32>
    %1316 = vector.extract_strided_slice %1313 {offsets = [0, 32], sizes = [12, 8], strides = [1, 1]} : vector<12x64xf32> to vector<12x8xf32>
    %1317 = vector.shape_cast %880 : vector<1x8x12xf32> to vector<8x12xf32>
    %1318 = arith.truncf %1314 : vector<8x8xf32> to vector<8x8xbf16>
    %1319 = arith.truncf %1315 : vector<12x8xf32> to vector<12x8xbf16>
    %cst_455 = arith.constant dense<0.000000e+00> : vector<8x12xf32>
    %1320 = tpu.matmul %1318, %1319, %cst_455 {dimension_numbers = #tpu.dot_dimension_numbers<[1], [1], [0], [0], [0, 0, 1, 0], [], []>} : vector<8x8xbf16>, vector<12x8xbf16>, vector<8x12xf32> -> vector<8x12xf32>
    %1321 = arith.addf %1320, %1317 : vector<8x12xf32>
    %cst_456 = arith.constant dense<0xFF800000> : vector<8xf32>
    %1322 = vector.multi_reduction <maximumf>, %1321, %cst_456 [1] : vector<8x12xf32> to vector<8xf32>
    %1323 = vector.shape_cast %1322 : vector<8xf32> to vector<8x1xf32>
    %1324 = vector.broadcast %1323 : vector<8x1xf32> to vector<8x12xf32>
    %1325 = arith.subf %1321, %1324 : vector<8x12xf32>
    %1326 = math.exp %1325 : vector<8x12xf32>
    %cst_457 = arith.constant dense<0.000000e+00> : vector<8xf32>
    %1327 = vector.multi_reduction <add>, %1326, %cst_457 [1] : vector<8x12xf32> to vector<8xf32>
    %1328 = vector.shape_cast %1327 : vector<8xf32> to vector<8x1xf32>
    %1329 = tpu.reciprocal %1328 {approx = true} : vector<8x1xf32> -> vector<8x1xf32>
    %1330 = vector.broadcast %1329 : vector<8x1xf32> to vector<8x12xf32>
    %1331 = arith.mulf %1326, %1330 : vector<8x12xf32>
    %1332 = arith.truncf %1331 : vector<8x12xf32> to vector<8x12xbf16>
    %1333 = arith.truncf %1316 : vector<12x8xf32> to vector<12x8xbf16>
    %cst_458 = arith.constant dense<0.000000e+00> : vector<8x8xf32>
    %1334 = tpu.matmul %1332, %1333, %cst_458 {dimension_numbers = #tpu.dot_dimension_numbers<[1], [0], [0], [1], [0, 0, 1, 1], [], []>} : vector<8x12xbf16>, vector<12x8xbf16>, vector<8x8xf32> -> vector<8x8xf32>
    %1335 = vector.extract_strided_slice %1311 {offsets = [0, 8], sizes = [8, 8], strides = [1, 1]} : vector<8x32xf32> to vector<8x8xf32>
    %1336 = vector.extract_strided_slice %1313 {offsets = [0, 8], sizes = [12, 8], strides = [1, 1]} : vector<12x64xf32> to vector<12x8xf32>
    %1337 = vector.extract_strided_slice %1313 {offsets = [0, 40], sizes = [12, 8], strides = [1, 1]} : vector<12x64xf32> to vector<12x8xf32>
    %1338 = vector.shape_cast %880 : vector<1x8x12xf32> to vector<8x12xf32>
    %1339 = arith.truncf %1335 : vector<8x8xf32> to vector<8x8xbf16>
    %1340 = arith.truncf %1336 : vector<12x8xf32> to vector<12x8xbf16>
    %cst_459 = arith.constant dense<0.000000e+00> : vector<8x12xf32>
    %1341 = tpu.matmul %1339, %1340, %cst_459 {dimension_numbers = #tpu.dot_dimension_numbers<[1], [1], [0], [0], [0, 0, 1, 0], [], []>} : vector<8x8xbf16>, vector<12x8xbf16>, vector<8x12xf32> -> vector<8x12xf32>
    %1342 = arith.addf %1341, %1338 : vector<8x12xf32>
    %cst_460 = arith.constant dense<0xFF800000> : vector<8xf32>
    %1343 = vector.multi_reduction <maximumf>, %1342, %cst_460 [1] : vector<8x12xf32> to vector<8xf32>
    %1344 = vector.shape_cast %1343 : vector<8xf32> to vector<8x1xf32>
    %1345 = vector.broadcast %1344 : vector<8x1xf32> to vector<8x12xf32>
    %1346 = arith.subf %1342, %1345 : vector<8x12xf32>
    %1347 = math.exp %1346 : vector<8x12xf32>
    %cst_461 = arith.constant dense<0.000000e+00> : vector<8xf32>
    %1348 = vector.multi_reduction <add>, %1347, %cst_461 [1] : vector<8x12xf32> to vector<8xf32>
    %1349 = vector.shape_cast %1348 : vector<8xf32> to vector<8x1xf32>
    %1350 = tpu.reciprocal %1349 {approx = true} : vector<8x1xf32> -> vector<8x1xf32>
    %1351 = vector.broadcast %1350 : vector<8x1xf32> to vector<8x12xf32>
    %1352 = arith.mulf %1347, %1351 : vector<8x12xf32>
    %1353 = arith.truncf %1352 : vector<8x12xf32> to vector<8x12xbf16>
    %1354 = arith.truncf %1337 : vector<12x8xf32> to vector<12x8xbf16>
    %cst_462 = arith.constant dense<0.000000e+00> : vector<8x8xf32>
    %1355 = tpu.matmul %1353, %1354, %cst_462 {dimension_numbers = #tpu.dot_dimension_numbers<[1], [0], [0], [1], [0, 0, 1, 1], [], []>} : vector<8x12xbf16>, vector<12x8xbf16>, vector<8x8xf32> -> vector<8x8xf32>
    %1356 = vector.extract_strided_slice %1311 {offsets = [0, 16], sizes = [8, 8], strides = [1, 1]} : vector<8x32xf32> to vector<8x8xf32>
    %1357 = vector.extract_strided_slice %1313 {offsets = [0, 16], sizes = [12, 8], strides = [1, 1]} : vector<12x64xf32> to vector<12x8xf32>
    %1358 = vector.extract_strided_slice %1313 {offsets = [0, 48], sizes = [12, 8], strides = [1, 1]} : vector<12x64xf32> to vector<12x8xf32>
    %1359 = vector.shape_cast %880 : vector<1x8x12xf32> to vector<8x12xf32>
    %1360 = arith.truncf %1356 : vector<8x8xf32> to vector<8x8xbf16>
    %1361 = arith.truncf %1357 : vector<12x8xf32> to vector<12x8xbf16>
    %cst_463 = arith.constant dense<0.000000e+00> : vector<8x12xf32>
    %1362 = tpu.matmul %1360, %1361, %cst_463 {dimension_numbers = #tpu.dot_dimension_numbers<[1], [1], [0], [0], [0, 0, 1, 0], [], []>} : vector<8x8xbf16>, vector<12x8xbf16>, vector<8x12xf32> -> vector<8x12xf32>
    %1363 = arith.addf %1362, %1359 : vector<8x12xf32>
    %cst_464 = arith.constant dense<0xFF800000> : vector<8xf32>
    %1364 = vector.multi_reduction <maximumf>, %1363, %cst_464 [1] : vector<8x12xf32> to vector<8xf32>
    %1365 = vector.shape_cast %1364 : vector<8xf32> to vector<8x1xf32>
    %1366 = vector.broadcast %1365 : vector<8x1xf32> to vector<8x12xf32>
    %1367 = arith.subf %1363, %1366 : vector<8x12xf32>
    %1368 = math.exp %1367 : vector<8x12xf32>
    %cst_465 = arith.constant dense<0.000000e+00> : vector<8xf32>
    %1369 = vector.multi_reduction <add>, %1368, %cst_465 [1] : vector<8x12xf32> to vector<8xf32>
    %1370 = vector.shape_cast %1369 : vector<8xf32> to vector<8x1xf32>
    %1371 = tpu.reciprocal %1370 {approx = true} : vector<8x1xf32> -> vector<8x1xf32>
    %1372 = vector.broadcast %1371 : vector<8x1xf32> to vector<8x12xf32>
    %1373 = arith.mulf %1368, %1372 : vector<8x12xf32>
    %1374 = arith.truncf %1373 : vector<8x12xf32> to vector<8x12xbf16>
    %1375 = arith.truncf %1358 : vector<12x8xf32> to vector<12x8xbf16>
    %cst_466 = arith.constant dense<0.000000e+00> : vector<8x8xf32>
    %1376 = tpu.matmul %1374, %1375, %cst_466 {dimension_numbers = #tpu.dot_dimension_numbers<[1], [0], [0], [1], [0, 0, 1, 1], [], []>} : vector<8x12xbf16>, vector<12x8xbf16>, vector<8x8xf32> -> vector<8x8xf32>
    %1377 = vector.extract_strided_slice %1311 {offsets = [0, 24], sizes = [8, 8], strides = [1, 1]} : vector<8x32xf32> to vector<8x8xf32>
    %1378 = vector.extract_strided_slice %1313 {offsets = [0, 24], sizes = [12, 8], strides = [1, 1]} : vector<12x64xf32> to vector<12x8xf32>
    %1379 = vector.extract_strided_slice %1313 {offsets = [0, 56], sizes = [12, 8], strides = [1, 1]} : vector<12x64xf32> to vector<12x8xf32>
    %1380 = vector.shape_cast %880 : vector<1x8x12xf32> to vector<8x12xf32>
    %1381 = arith.truncf %1377 : vector<8x8xf32> to vector<8x8xbf16>
    %1382 = arith.truncf %1378 : vector<12x8xf32> to vector<12x8xbf16>
    %cst_467 = arith.constant dense<0.000000e+00> : vector<8x12xf32>
    %1383 = tpu.matmul %1381, %1382, %cst_467 {dimension_numbers = #tpu.dot_dimension_numbers<[1], [1], [0], [0], [0, 0, 1, 0], [], []>} : vector<8x8xbf16>, vector<12x8xbf16>, vector<8x12xf32> -> vector<8x12xf32>
    %1384 = arith.addf %1383, %1380 : vector<8x12xf32>
    %cst_468 = arith.constant dense<0xFF800000> : vector<8xf32>
    %1385 = vector.multi_reduction <maximumf>, %1384, %cst_468 [1] : vector<8x12xf32> to vector<8xf32>
    %1386 = vector.shape_cast %1385 : vector<8xf32> to vector<8x1xf32>
    %1387 = vector.broadcast %1386 : vector<8x1xf32> to vector<8x12xf32>
    %1388 = arith.subf %1384, %1387 : vector<8x12xf32>
    %1389 = math.exp %1388 : vector<8x12xf32>
    %cst_469 = arith.constant dense<0.000000e+00> : vector<8xf32>
    %1390 = vector.multi_reduction <add>, %1389, %cst_469 [1] : vector<8x12xf32> to vector<8xf32>
    %1391 = vector.shape_cast %1390 : vector<8xf32> to vector<8x1xf32>
    %1392 = tpu.reciprocal %1391 {approx = true} : vector<8x1xf32> -> vector<8x1xf32>
    %1393 = vector.broadcast %1392 : vector<8x1xf32> to vector<8x12xf32>
    %1394 = arith.mulf %1389, %1393 : vector<8x12xf32>
    %1395 = arith.truncf %1394 : vector<8x12xf32> to vector<8x12xbf16>
    %1396 = arith.truncf %1379 : vector<12x8xf32> to vector<12x8xbf16>
    %cst_470 = arith.constant dense<0.000000e+00> : vector<8x8xf32>
    %1397 = tpu.matmul %1395, %1396, %cst_470 {dimension_numbers = #tpu.dot_dimension_numbers<[1], [0], [0], [1], [0, 0, 1, 1], [], []>} : vector<8x12xbf16>, vector<12x8xbf16>, vector<8x8xf32> -> vector<8x8xf32>
    %1398 = tpu.concatenate %1334, %1355, %1376, %1397 in 1 : vector<8x8xf32>, vector<8x8xf32>, vector<8x8xf32>, vector<8x8xf32> -> vector<8x32xf32>
    %1399 = arith.truncf %1398 : vector<8x32xf32> to vector<8x32xbf16>
    %cst_471 = arith.constant dense<0.000000e+00> : vector<8x32xf32>
    %1400 = tpu.matmul %1399, %1309, %cst_471 {dimension_numbers = #tpu.dot_dimension_numbers<[1], [0], [0], [1], [0, 0, 1, 1], [], []>} : vector<8x32xbf16>, vector<32x32xbf16>, vector<8x32xf32> -> vector<8x32xf32>
    %1401 = arith.addf %1289, %1400 : vector<8x32xf32>
    %c0_472 = arith.constant 0 : index
    %c2_473 = arith.constant 2 : index
    %c0_474 = arith.constant 0 : index
    %c0_475 = arith.constant 0 : index
    %1402 = vector.load %arg13[%c0_472, %c2_473, %c0_474, %c0_475] : memref<2x3x1x32xf32, #tpu.memory_space<vmem>>, vector<1x1x1x32xf32>
    %1403 = vector.shape_cast %1402 : vector<1x1x1x32xf32> to vector<1x32xf32>
    %1404 = arith.mulf %1401, %1401 : vector<8x32xf32>
    %cst_476 = arith.constant dense<0.000000e+00> : vector<8xf32>
    %1405 = vector.multi_reduction <add>, %1404, %cst_476 [1] : vector<8x32xf32> to vector<8xf32>
    %1406 = vector.shape_cast %1405 : vector<8xf32> to vector<8x1xf32>
    %cst_477 = arith.constant 3.200000e+01 : f32
    %1407 = vector.broadcast %cst_477 : f32 to vector<8x1xf32>
    %1408 = arith.divf %1406, %1407 : vector<8x1xf32>
    %cst_478 = arith.constant 9.99999997E-7 : f32
    %1409 = vector.broadcast %cst_478 : f32 to vector<8x1xf32>
    %1410 = arith.addf %1408, %1409 : vector<8x1xf32>
    %1411 = math.rsqrt %1410 : vector<8x1xf32>
    %1412 = vector.broadcast %1411 : vector<8x1xf32> to vector<8x32xf32>
    %1413 = arith.mulf %1401, %1412 : vector<8x32xf32>
    %1414 = vector.broadcast %1403 : vector<1x32xf32> to vector<8x32xf32>
    %1415 = arith.mulf %1413, %1414 : vector<8x32xf32>
    %c0_479 = arith.constant 0 : index
    %c0_480 = arith.constant 0 : index
    %c0_481 = arith.constant 0 : index
    %1416 = vector.load %arg19[%c0_479, %c0_480, %c0_481] : memref<2x32x64xbf16, #tpu.memory_space<vmem>>, vector<1x32x64xbf16>
    %1417 = vector.shape_cast %1416 : vector<1x32x64xbf16> to vector<32x64xbf16>
    %1418 = arith.truncf %1415 : vector<8x32xf32> to vector<8x32xbf16>
    %cst_482 = arith.constant dense<0.000000e+00> : vector<8x64xf32>
    %1419 = tpu.matmul %1418, %1417, %cst_482 {dimension_numbers = #tpu.dot_dimension_numbers<[1], [0], [0], [1], [0, 0, 1, 1], [], []>} : vector<8x32xbf16>, vector<32x64xbf16>, vector<8x64xf32> -> vector<8x64xf32>
    %cst_483 = arith.constant 0.000000e+00 : f32
    %1420 = vector.broadcast %cst_483 : f32 to vector<8x64xf32>
    %1421 = arith.maximumf %1419, %1420 : vector<8x64xf32>
    %c0_484 = arith.constant 0 : index
    %c0_485 = arith.constant 0 : index
    %c0_486 = arith.constant 0 : index
    %1422 = vector.load %arg20[%c0_484, %c0_485, %c0_486] : memref<2x64x32xbf16, #tpu.memory_space<vmem>>, vector<1x64x32xbf16>
    %1423 = vector.shape_cast %1422 : vector<1x64x32xbf16> to vector<64x32xbf16>
    %1424 = arith.truncf %1421 : vector<8x64xf32> to vector<8x64xbf16>
    %cst_487 = arith.constant dense<0.000000e+00> : vector<8x32xf32>
    %1425 = tpu.matmul %1424, %1423, %cst_487 {dimension_numbers = #tpu.dot_dimension_numbers<[1], [0], [0], [1], [0, 0, 1, 1], [], []>} : vector<8x64xbf16>, vector<64x32xbf16>, vector<8x32xf32> -> vector<8x32xf32>
    %1426 = arith.addf %1401, %1425 : vector<8x32xf32>
    %c1_488 = arith.constant 1 : index
    %c0_489 = arith.constant 0 : index
    %c0_490 = arith.constant 0 : index
    %c0_491 = arith.constant 0 : index
    %1427 = vector.load %arg13[%c1_488, %c0_489, %c0_490, %c0_491] : memref<2x3x1x32xf32, #tpu.memory_space<vmem>>, vector<1x1x1x32xf32>
    %1428 = vector.shape_cast %1427 : vector<1x1x1x32xf32> to vector<1x32xf32>
    %1429 = arith.mulf %1426, %1426 : vector<8x32xf32>
    %cst_492 = arith.constant dense<0.000000e+00> : vector<8xf32>
    %1430 = vector.multi_reduction <add>, %1429, %cst_492 [1] : vector<8x32xf32> to vector<8xf32>
    %1431 = vector.shape_cast %1430 : vector<8xf32> to vector<8x1xf32>
    %cst_493 = arith.constant 3.200000e+01 : f32
    %1432 = vector.broadcast %cst_493 : f32 to vector<8x1xf32>
    %1433 = arith.divf %1431, %1432 : vector<8x1xf32>
    %cst_494 = arith.constant 9.99999997E-7 : f32
    %1434 = vector.broadcast %cst_494 : f32 to vector<8x1xf32>
    %1435 = arith.addf %1433, %1434 : vector<8x1xf32>
    %1436 = math.rsqrt %1435 : vector<8x1xf32>
    %1437 = vector.broadcast %1436 : vector<8x1xf32> to vector<8x32xf32>
    %1438 = arith.mulf %1426, %1437 : vector<8x32xf32>
    %1439 = vector.broadcast %1428 : vector<1x32xf32> to vector<8x32xf32>
    %1440 = arith.mulf %1438, %1439 : vector<8x32xf32>
    %c1_495 = arith.constant 1 : index
    %c0_496 = arith.constant 0 : index
    %c0_497 = arith.constant 0 : index
    %1441 = vector.load %arg14[%c1_495, %c0_496, %c0_497] : memref<2x32x96xbf16, #tpu.memory_space<vmem>>, vector<1x32x96xbf16>
    %1442 = vector.shape_cast %1441 : vector<1x32x96xbf16> to vector<32x96xbf16>
    %c1_498 = arith.constant 1 : index
    %c0_499 = arith.constant 0 : index
    %c0_500 = arith.constant 0 : index
    %1443 = vector.load %arg15[%c1_498, %c0_499, %c0_500] : memref<2x32x32xbf16, #tpu.memory_space<vmem>>, vector<1x32x32xbf16>
    %1444 = vector.shape_cast %1443 : vector<1x32x32xbf16> to vector<32x32xbf16>
    %1445 = arith.truncf %1440 : vector<8x32xf32> to vector<8x32xbf16>
    %cst_501 = arith.constant dense<0.000000e+00> : vector<8x96xf32>
    %1446 = tpu.matmul %1445, %1442, %cst_501 {dimension_numbers = #tpu.dot_dimension_numbers<[1], [0], [0], [1], [0, 0, 1, 1], [], []>} : vector<8x32xbf16>, vector<32x96xbf16>, vector<8x96xf32> -> vector<8x96xf32>
    %1447 = vector.extract_strided_slice %1446 {offsets = [0, 0], sizes = [8, 32], strides = [1, 1]} : vector<8x96xf32> to vector<8x32xf32>
    %1448 = vector.extract_strided_slice %1446 {offsets = [0, 32], sizes = [8, 64], strides = [1, 1]} : vector<8x96xf32> to vector<8x64xf32>
    %1449 = vector.extract_strided_slice %1447 {offsets = [0, 0], sizes = [8, 8], strides = [1, 1]} : vector<8x32xf32> to vector<8x8xf32>
    %1450 = vector.extract_strided_slice %1448 {offsets = [0, 0], sizes = [8, 8], strides = [1, 1]} : vector<8x64xf32> to vector<8x8xf32>
    %1451 = vector.extract_strided_slice %1448 {offsets = [0, 32], sizes = [8, 8], strides = [1, 1]} : vector<8x64xf32> to vector<8x8xf32>
    %1452 = vector.extract_strided_slice %1 {offsets = [0, 0, 0], sizes = [1, 8, 8], strides = [1, 1, 1]} : vector<4x8x8xf32> to vector<1x8x8xf32>
    %1453 = vector.shape_cast %1452 : vector<1x8x8xf32> to vector<8x8xf32>
    %1454 = arith.truncf %1449 : vector<8x8xf32> to vector<8x8xbf16>
    %1455 = arith.truncf %1450 : vector<8x8xf32> to vector<8x8xbf16>
    %cst_502 = arith.constant dense<0.000000e+00> : vector<8x8xf32>
    %1456 = tpu.matmul %1454, %1455, %cst_502 {dimension_numbers = #tpu.dot_dimension_numbers<[1], [1], [0], [0], [0, 0, 1, 0], [], []>} : vector<8x8xbf16>, vector<8x8xbf16>, vector<8x8xf32> -> vector<8x8xf32>
    %1457 = arith.addf %1456, %1453 : vector<8x8xf32>
    %cst_503 = arith.constant dense<0xFF800000> : vector<8xf32>
    %1458 = vector.multi_reduction <maximumf>, %1457, %cst_503 [1] : vector<8x8xf32> to vector<8xf32>
    %1459 = vector.shape_cast %1458 : vector<8xf32> to vector<8x1xf32>
    %1460 = vector.broadcast %1459 : vector<8x1xf32> to vector<8x8xf32>
    %1461 = arith.subf %1457, %1460 : vector<8x8xf32>
    %1462 = math.exp %1461 : vector<8x8xf32>
    %cst_504 = arith.constant dense<0.000000e+00> : vector<8xf32>
    %1463 = vector.multi_reduction <add>, %1462, %cst_504 [1] : vector<8x8xf32> to vector<8xf32>
    %1464 = vector.shape_cast %1463 : vector<8xf32> to vector<8x1xf32>
    %1465 = tpu.reciprocal %1464 {approx = true} : vector<8x1xf32> -> vector<8x1xf32>
    %1466 = vector.broadcast %1465 : vector<8x1xf32> to vector<8x8xf32>
    %1467 = arith.mulf %1462, %1466 : vector<8x8xf32>
    %1468 = arith.truncf %1467 : vector<8x8xf32> to vector<8x8xbf16>
    %1469 = arith.truncf %1451 : vector<8x8xf32> to vector<8x8xbf16>
    %cst_505 = arith.constant dense<0.000000e+00> : vector<8x8xf32>
    %1470 = tpu.matmul %1468, %1469, %cst_505 {dimension_numbers = #tpu.dot_dimension_numbers<[1], [0], [0], [1], [0, 0, 1, 1], [], []>} : vector<8x8xbf16>, vector<8x8xbf16>, vector<8x8xf32> -> vector<8x8xf32>
    %1471 = vector.extract_strided_slice %1447 {offsets = [0, 8], sizes = [8, 8], strides = [1, 1]} : vector<8x32xf32> to vector<8x8xf32>
    %1472 = vector.extract_strided_slice %1448 {offsets = [0, 8], sizes = [8, 8], strides = [1, 1]} : vector<8x64xf32> to vector<8x8xf32>
    %1473 = vector.extract_strided_slice %1448 {offsets = [0, 40], sizes = [8, 8], strides = [1, 1]} : vector<8x64xf32> to vector<8x8xf32>
    %1474 = vector.extract_strided_slice %1 {offsets = [1, 0, 0], sizes = [1, 8, 8], strides = [1, 1, 1]} : vector<4x8x8xf32> to vector<1x8x8xf32>
    %1475 = vector.shape_cast %1474 : vector<1x8x8xf32> to vector<8x8xf32>
    %1476 = arith.truncf %1471 : vector<8x8xf32> to vector<8x8xbf16>
    %1477 = arith.truncf %1472 : vector<8x8xf32> to vector<8x8xbf16>
    %cst_506 = arith.constant dense<0.000000e+00> : vector<8x8xf32>
    %1478 = tpu.matmul %1476, %1477, %cst_506 {dimension_numbers = #tpu.dot_dimension_numbers<[1], [1], [0], [0], [0, 0, 1, 0], [], []>} : vector<8x8xbf16>, vector<8x8xbf16>, vector<8x8xf32> -> vector<8x8xf32>
    %1479 = arith.addf %1478, %1475 : vector<8x8xf32>
    %cst_507 = arith.constant dense<0xFF800000> : vector<8xf32>
    %1480 = vector.multi_reduction <maximumf>, %1479, %cst_507 [1] : vector<8x8xf32> to vector<8xf32>
    %1481 = vector.shape_cast %1480 : vector<8xf32> to vector<8x1xf32>
    %1482 = vector.broadcast %1481 : vector<8x1xf32> to vector<8x8xf32>
    %1483 = arith.subf %1479, %1482 : vector<8x8xf32>
    %1484 = math.exp %1483 : vector<8x8xf32>
    %cst_508 = arith.constant dense<0.000000e+00> : vector<8xf32>
    %1485 = vector.multi_reduction <add>, %1484, %cst_508 [1] : vector<8x8xf32> to vector<8xf32>
    %1486 = vector.shape_cast %1485 : vector<8xf32> to vector<8x1xf32>
    %1487 = tpu.reciprocal %1486 {approx = true} : vector<8x1xf32> -> vector<8x1xf32>
    %1488 = vector.broadcast %1487 : vector<8x1xf32> to vector<8x8xf32>
    %1489 = arith.mulf %1484, %1488 : vector<8x8xf32>
    %1490 = arith.truncf %1489 : vector<8x8xf32> to vector<8x8xbf16>
    %1491 = arith.truncf %1473 : vector<8x8xf32> to vector<8x8xbf16>
    %cst_509 = arith.constant dense<0.000000e+00> : vector<8x8xf32>
    %1492 = tpu.matmul %1490, %1491, %cst_509 {dimension_numbers = #tpu.dot_dimension_numbers<[1], [0], [0], [1], [0, 0, 1, 1], [], []>} : vector<8x8xbf16>, vector<8x8xbf16>, vector<8x8xf32> -> vector<8x8xf32>
    %1493 = vector.extract_strided_slice %1447 {offsets = [0, 16], sizes = [8, 8], strides = [1, 1]} : vector<8x32xf32> to vector<8x8xf32>
    %1494 = vector.extract_strided_slice %1448 {offsets = [0, 16], sizes = [8, 8], strides = [1, 1]} : vector<8x64xf32> to vector<8x8xf32>
    %1495 = vector.extract_strided_slice %1448 {offsets = [0, 48], sizes = [8, 8], strides = [1, 1]} : vector<8x64xf32> to vector<8x8xf32>
    %1496 = vector.extract_strided_slice %1 {offsets = [2, 0, 0], sizes = [1, 8, 8], strides = [1, 1, 1]} : vector<4x8x8xf32> to vector<1x8x8xf32>
    %1497 = vector.shape_cast %1496 : vector<1x8x8xf32> to vector<8x8xf32>
    %1498 = arith.truncf %1493 : vector<8x8xf32> to vector<8x8xbf16>
    %1499 = arith.truncf %1494 : vector<8x8xf32> to vector<8x8xbf16>
    %cst_510 = arith.constant dense<0.000000e+00> : vector<8x8xf32>
    %1500 = tpu.matmul %1498, %1499, %cst_510 {dimension_numbers = #tpu.dot_dimension_numbers<[1], [1], [0], [0], [0, 0, 1, 0], [], []>} : vector<8x8xbf16>, vector<8x8xbf16>, vector<8x8xf32> -> vector<8x8xf32>
    %1501 = arith.addf %1500, %1497 : vector<8x8xf32>
    %cst_511 = arith.constant dense<0xFF800000> : vector<8xf32>
    %1502 = vector.multi_reduction <maximumf>, %1501, %cst_511 [1] : vector<8x8xf32> to vector<8xf32>
    %1503 = vector.shape_cast %1502 : vector<8xf32> to vector<8x1xf32>
    %1504 = vector.broadcast %1503 : vector<8x1xf32> to vector<8x8xf32>
    %1505 = arith.subf %1501, %1504 : vector<8x8xf32>
    %1506 = math.exp %1505 : vector<8x8xf32>
    %cst_512 = arith.constant dense<0.000000e+00> : vector<8xf32>
    %1507 = vector.multi_reduction <add>, %1506, %cst_512 [1] : vector<8x8xf32> to vector<8xf32>
    %1508 = vector.shape_cast %1507 : vector<8xf32> to vector<8x1xf32>
    %1509 = tpu.reciprocal %1508 {approx = true} : vector<8x1xf32> -> vector<8x1xf32>
    %1510 = vector.broadcast %1509 : vector<8x1xf32> to vector<8x8xf32>
    %1511 = arith.mulf %1506, %1510 : vector<8x8xf32>
    %1512 = arith.truncf %1511 : vector<8x8xf32> to vector<8x8xbf16>
    %1513 = arith.truncf %1495 : vector<8x8xf32> to vector<8x8xbf16>
    %cst_513 = arith.constant dense<0.000000e+00> : vector<8x8xf32>
    %1514 = tpu.matmul %1512, %1513, %cst_513 {dimension_numbers = #tpu.dot_dimension_numbers<[1], [0], [0], [1], [0, 0, 1, 1], [], []>} : vector<8x8xbf16>, vector<8x8xbf16>, vector<8x8xf32> -> vector<8x8xf32>
    %1515 = vector.extract_strided_slice %1447 {offsets = [0, 24], sizes = [8, 8], strides = [1, 1]} : vector<8x32xf32> to vector<8x8xf32>
    %1516 = vector.extract_strided_slice %1448 {offsets = [0, 24], sizes = [8, 8], strides = [1, 1]} : vector<8x64xf32> to vector<8x8xf32>
    %1517 = vector.extract_strided_slice %1448 {offsets = [0, 56], sizes = [8, 8], strides = [1, 1]} : vector<8x64xf32> to vector<8x8xf32>
    %1518 = vector.extract_strided_slice %1 {offsets = [3, 0, 0], sizes = [1, 8, 8], strides = [1, 1, 1]} : vector<4x8x8xf32> to vector<1x8x8xf32>
    %1519 = vector.shape_cast %1518 : vector<1x8x8xf32> to vector<8x8xf32>
    %1520 = arith.truncf %1515 : vector<8x8xf32> to vector<8x8xbf16>
    %1521 = arith.truncf %1516 : vector<8x8xf32> to vector<8x8xbf16>
    %cst_514 = arith.constant dense<0.000000e+00> : vector<8x8xf32>
    %1522 = tpu.matmul %1520, %1521, %cst_514 {dimension_numbers = #tpu.dot_dimension_numbers<[1], [1], [0], [0], [0, 0, 1, 0], [], []>} : vector<8x8xbf16>, vector<8x8xbf16>, vector<8x8xf32> -> vector<8x8xf32>
    %1523 = arith.addf %1522, %1519 : vector<8x8xf32>
    %cst_515 = arith.constant dense<0xFF800000> : vector<8xf32>
    %1524 = vector.multi_reduction <maximumf>, %1523, %cst_515 [1] : vector<8x8xf32> to vector<8xf32>
    %1525 = vector.shape_cast %1524 : vector<8xf32> to vector<8x1xf32>
    %1526 = vector.broadcast %1525 : vector<8x1xf32> to vector<8x8xf32>
    %1527 = arith.subf %1523, %1526 : vector<8x8xf32>
    %1528 = math.exp %1527 : vector<8x8xf32>
    %cst_516 = arith.constant dense<0.000000e+00> : vector<8xf32>
    %1529 = vector.multi_reduction <add>, %1528, %cst_516 [1] : vector<8x8xf32> to vector<8xf32>
    %1530 = vector.shape_cast %1529 : vector<8xf32> to vector<8x1xf32>
    %1531 = tpu.reciprocal %1530 {approx = true} : vector<8x1xf32> -> vector<8x1xf32>
    %1532 = vector.broadcast %1531 : vector<8x1xf32> to vector<8x8xf32>
    %1533 = arith.mulf %1528, %1532 : vector<8x8xf32>
    %1534 = arith.truncf %1533 : vector<8x8xf32> to vector<8x8xbf16>
    %1535 = arith.truncf %1517 : vector<8x8xf32> to vector<8x8xbf16>
    %cst_517 = arith.constant dense<0.000000e+00> : vector<8x8xf32>
    %1536 = tpu.matmul %1534, %1535, %cst_517 {dimension_numbers = #tpu.dot_dimension_numbers<[1], [0], [0], [1], [0, 0, 1, 1], [], []>} : vector<8x8xbf16>, vector<8x8xbf16>, vector<8x8xf32> -> vector<8x8xf32>
    %1537 = tpu.concatenate %1470, %1492, %1514, %1536 in 1 : vector<8x8xf32>, vector<8x8xf32>, vector<8x8xf32>, vector<8x8xf32> -> vector<8x32xf32>
    %1538 = arith.truncf %1537 : vector<8x32xf32> to vector<8x32xbf16>
    %cst_518 = arith.constant dense<0.000000e+00> : vector<8x32xf32>
    %1539 = tpu.matmul %1538, %1444, %cst_518 {dimension_numbers = #tpu.dot_dimension_numbers<[1], [0], [0], [1], [0, 0, 1, 1], [], []>} : vector<8x32xbf16>, vector<32x32xbf16>, vector<8x32xf32> -> vector<8x32xf32>
    %1540 = arith.addf %1426, %1539 : vector<8x32xf32>
    %c1_519 = arith.constant 1 : index
    %c1_520 = arith.constant 1 : index
    %c0_521 = arith.constant 0 : index
    %c0_522 = arith.constant 0 : index
    %1541 = vector.load %arg13[%c1_519, %c1_520, %c0_521, %c0_522] : memref<2x3x1x32xf32, #tpu.memory_space<vmem>>, vector<1x1x1x32xf32>
    %1542 = vector.shape_cast %1541 : vector<1x1x1x32xf32> to vector<1x32xf32>
    %1543 = arith.mulf %1540, %1540 : vector<8x32xf32>
    %cst_523 = arith.constant dense<0.000000e+00> : vector<8xf32>
    %1544 = vector.multi_reduction <add>, %1543, %cst_523 [1] : vector<8x32xf32> to vector<8xf32>
    %1545 = vector.shape_cast %1544 : vector<8xf32> to vector<8x1xf32>
    %cst_524 = arith.constant 3.200000e+01 : f32
    %1546 = vector.broadcast %cst_524 : f32 to vector<8x1xf32>
    %1547 = arith.divf %1545, %1546 : vector<8x1xf32>
    %cst_525 = arith.constant 9.99999997E-7 : f32
    %1548 = vector.broadcast %cst_525 : f32 to vector<8x1xf32>
    %1549 = arith.addf %1547, %1548 : vector<8x1xf32>
    %1550 = math.rsqrt %1549 : vector<8x1xf32>
    %1551 = vector.broadcast %1550 : vector<8x1xf32> to vector<8x32xf32>
    %1552 = arith.mulf %1540, %1551 : vector<8x32xf32>
    %1553 = vector.broadcast %1542 : vector<1x32xf32> to vector<8x32xf32>
    %1554 = arith.mulf %1552, %1553 : vector<8x32xf32>
    %c1_526 = arith.constant 1 : index
    %c0_527 = arith.constant 0 : index
    %c0_528 = arith.constant 0 : index
    %1555 = vector.load %arg16[%c1_526, %c0_527, %c0_528] : memref<2x32x32xbf16, #tpu.memory_space<vmem>>, vector<1x32x32xbf16>
    %1556 = vector.shape_cast %1555 : vector<1x32x32xbf16> to vector<32x32xbf16>
    %c1_529 = arith.constant 1 : index
    %c0_530 = arith.constant 0 : index
    %c0_531 = arith.constant 0 : index
    %1557 = vector.load %arg17[%c1_529, %c0_530, %c0_531] : memref<2x32x64xbf16, #tpu.memory_space<vmem>>, vector<1x32x64xbf16>
    %1558 = vector.shape_cast %1557 : vector<1x32x64xbf16> to vector<32x64xbf16>
    %c1_532 = arith.constant 1 : index
    %c0_533 = arith.constant 0 : index
    %c0_534 = arith.constant 0 : index
    %1559 = vector.load %arg18[%c1_532, %c0_533, %c0_534] : memref<2x32x32xbf16, #tpu.memory_space<vmem>>, vector<1x32x32xbf16>
    %1560 = vector.shape_cast %1559 : vector<1x32x32xbf16> to vector<32x32xbf16>
    %1561 = arith.truncf %1554 : vector<8x32xf32> to vector<8x32xbf16>
    %cst_535 = arith.constant dense<0.000000e+00> : vector<8x32xf32>
    %1562 = tpu.matmul %1561, %1556, %cst_535 {dimension_numbers = #tpu.dot_dimension_numbers<[1], [0], [0], [1], [0, 0, 1, 1], [], []>} : vector<8x32xbf16>, vector<32x32xbf16>, vector<8x32xf32> -> vector<8x32xf32>
    %1563 = arith.truncf %1173 : vector<12x32xf32> to vector<12x32xbf16>
    %cst_536 = arith.constant dense<0.000000e+00> : vector<12x64xf32>
    %1564 = tpu.matmul %1563, %1558, %cst_536 {dimension_numbers = #tpu.dot_dimension_numbers<[1], [0], [0], [1], [0, 0, 1, 1], [], []>} : vector<12x32xbf16>, vector<32x64xbf16>, vector<12x64xf32> -> vector<12x64xf32>
    %1565 = vector.extract_strided_slice %1562 {offsets = [0, 0], sizes = [8, 8], strides = [1, 1]} : vector<8x32xf32> to vector<8x8xf32>
    %1566 = vector.extract_strided_slice %1564 {offsets = [0, 0], sizes = [12, 8], strides = [1, 1]} : vector<12x64xf32> to vector<12x8xf32>
    %1567 = vector.extract_strided_slice %1564 {offsets = [0, 32], sizes = [12, 8], strides = [1, 1]} : vector<12x64xf32> to vector<12x8xf32>
    %1568 = vector.shape_cast %880 : vector<1x8x12xf32> to vector<8x12xf32>
    %1569 = arith.truncf %1565 : vector<8x8xf32> to vector<8x8xbf16>
    %1570 = arith.truncf %1566 : vector<12x8xf32> to vector<12x8xbf16>
    %cst_537 = arith.constant dense<0.000000e+00> : vector<8x12xf32>
    %1571 = tpu.matmul %1569, %1570, %cst_537 {dimension_numbers = #tpu.dot_dimension_numbers<[1], [1], [0], [0], [0, 0, 1, 0], [], []>} : vector<8x8xbf16>, vector<12x8xbf16>, vector<8x12xf32> -> vector<8x12xf32>
    %1572 = arith.addf %1571, %1568 : vector<8x12xf32>
    %cst_538 = arith.constant dense<0xFF800000> : vector<8xf32>
    %1573 = vector.multi_reduction <maximumf>, %1572, %cst_538 [1] : vector<8x12xf32> to vector<8xf32>
    %1574 = vector.shape_cast %1573 : vector<8xf32> to vector<8x1xf32>
    %1575 = vector.broadcast %1574 : vector<8x1xf32> to vector<8x12xf32>
    %1576 = arith.subf %1572, %1575 : vector<8x12xf32>
    %1577 = math.exp %1576 : vector<8x12xf32>
    %cst_539 = arith.constant dense<0.000000e+00> : vector<8xf32>
    %1578 = vector.multi_reduction <add>, %1577, %cst_539 [1] : vector<8x12xf32> to vector<8xf32>
    %1579 = vector.shape_cast %1578 : vector<8xf32> to vector<8x1xf32>
    %1580 = tpu.reciprocal %1579 {approx = true} : vector<8x1xf32> -> vector<8x1xf32>
    %1581 = vector.broadcast %1580 : vector<8x1xf32> to vector<8x12xf32>
    %1582 = arith.mulf %1577, %1581 : vector<8x12xf32>
    %1583 = arith.truncf %1582 : vector<8x12xf32> to vector<8x12xbf16>
    %1584 = arith.truncf %1567 : vector<12x8xf32> to vector<12x8xbf16>
    %cst_540 = arith.constant dense<0.000000e+00> : vector<8x8xf32>
    %1585 = tpu.matmul %1583, %1584, %cst_540 {dimension_numbers = #tpu.dot_dimension_numbers<[1], [0], [0], [1], [0, 0, 1, 1], [], []>} : vector<8x12xbf16>, vector<12x8xbf16>, vector<8x8xf32> -> vector<8x8xf32>
    %1586 = vector.extract_strided_slice %1562 {offsets = [0, 8], sizes = [8, 8], strides = [1, 1]} : vector<8x32xf32> to vector<8x8xf32>
    %1587 = vector.extract_strided_slice %1564 {offsets = [0, 8], sizes = [12, 8], strides = [1, 1]} : vector<12x64xf32> to vector<12x8xf32>
    %1588 = vector.extract_strided_slice %1564 {offsets = [0, 40], sizes = [12, 8], strides = [1, 1]} : vector<12x64xf32> to vector<12x8xf32>
    %1589 = vector.shape_cast %880 : vector<1x8x12xf32> to vector<8x12xf32>
    %1590 = arith.truncf %1586 : vector<8x8xf32> to vector<8x8xbf16>
    %1591 = arith.truncf %1587 : vector<12x8xf32> to vector<12x8xbf16>
    %cst_541 = arith.constant dense<0.000000e+00> : vector<8x12xf32>
    %1592 = tpu.matmul %1590, %1591, %cst_541 {dimension_numbers = #tpu.dot_dimension_numbers<[1], [1], [0], [0], [0, 0, 1, 0], [], []>} : vector<8x8xbf16>, vector<12x8xbf16>, vector<8x12xf32> -> vector<8x12xf32>
    %1593 = arith.addf %1592, %1589 : vector<8x12xf32>
    %cst_542 = arith.constant dense<0xFF800000> : vector<8xf32>
    %1594 = vector.multi_reduction <maximumf>, %1593, %cst_542 [1] : vector<8x12xf32> to vector<8xf32>
    %1595 = vector.shape_cast %1594 : vector<8xf32> to vector<8x1xf32>
    %1596 = vector.broadcast %1595 : vector<8x1xf32> to vector<8x12xf32>
    %1597 = arith.subf %1593, %1596 : vector<8x12xf32>
    %1598 = math.exp %1597 : vector<8x12xf32>
    %cst_543 = arith.constant dense<0.000000e+00> : vector<8xf32>
    %1599 = vector.multi_reduction <add>, %1598, %cst_543 [1] : vector<8x12xf32> to vector<8xf32>
    %1600 = vector.shape_cast %1599 : vector<8xf32> to vector<8x1xf32>
    %1601 = tpu.reciprocal %1600 {approx = true} : vector<8x1xf32> -> vector<8x1xf32>
    %1602 = vector.broadcast %1601 : vector<8x1xf32> to vector<8x12xf32>
    %1603 = arith.mulf %1598, %1602 : vector<8x12xf32>
    %1604 = arith.truncf %1603 : vector<8x12xf32> to vector<8x12xbf16>
    %1605 = arith.truncf %1588 : vector<12x8xf32> to vector<12x8xbf16>
    %cst_544 = arith.constant dense<0.000000e+00> : vector<8x8xf32>
    %1606 = tpu.matmul %1604, %1605, %cst_544 {dimension_numbers = #tpu.dot_dimension_numbers<[1], [0], [0], [1], [0, 0, 1, 1], [], []>} : vector<8x12xbf16>, vector<12x8xbf16>, vector<8x8xf32> -> vector<8x8xf32>
    %1607 = vector.extract_strided_slice %1562 {offsets = [0, 16], sizes = [8, 8], strides = [1, 1]} : vector<8x32xf32> to vector<8x8xf32>
    %1608 = vector.extract_strided_slice %1564 {offsets = [0, 16], sizes = [12, 8], strides = [1, 1]} : vector<12x64xf32> to vector<12x8xf32>
    %1609 = vector.extract_strided_slice %1564 {offsets = [0, 48], sizes = [12, 8], strides = [1, 1]} : vector<12x64xf32> to vector<12x8xf32>
    %1610 = vector.shape_cast %880 : vector<1x8x12xf32> to vector<8x12xf32>
    %1611 = arith.truncf %1607 : vector<8x8xf32> to vector<8x8xbf16>
    %1612 = arith.truncf %1608 : vector<12x8xf32> to vector<12x8xbf16>
    %cst_545 = arith.constant dense<0.000000e+00> : vector<8x12xf32>
    %1613 = tpu.matmul %1611, %1612, %cst_545 {dimension_numbers = #tpu.dot_dimension_numbers<[1], [1], [0], [0], [0, 0, 1, 0], [], []>} : vector<8x8xbf16>, vector<12x8xbf16>, vector<8x12xf32> -> vector<8x12xf32>
    %1614 = arith.addf %1613, %1610 : vector<8x12xf32>
    %cst_546 = arith.constant dense<0xFF800000> : vector<8xf32>
    %1615 = vector.multi_reduction <maximumf>, %1614, %cst_546 [1] : vector<8x12xf32> to vector<8xf32>
    %1616 = vector.shape_cast %1615 : vector<8xf32> to vector<8x1xf32>
    %1617 = vector.broadcast %1616 : vector<8x1xf32> to vector<8x12xf32>
    %1618 = arith.subf %1614, %1617 : vector<8x12xf32>
    %1619 = math.exp %1618 : vector<8x12xf32>
    %cst_547 = arith.constant dense<0.000000e+00> : vector<8xf32>
    %1620 = vector.multi_reduction <add>, %1619, %cst_547 [1] : vector<8x12xf32> to vector<8xf32>
    %1621 = vector.shape_cast %1620 : vector<8xf32> to vector<8x1xf32>
    %1622 = tpu.reciprocal %1621 {approx = true} : vector<8x1xf32> -> vector<8x1xf32>
    %1623 = vector.broadcast %1622 : vector<8x1xf32> to vector<8x12xf32>
    %1624 = arith.mulf %1619, %1623 : vector<8x12xf32>
    %1625 = arith.truncf %1624 : vector<8x12xf32> to vector<8x12xbf16>
    %1626 = arith.truncf %1609 : vector<12x8xf32> to vector<12x8xbf16>
    %cst_548 = arith.constant dense<0.000000e+00> : vector<8x8xf32>
    %1627 = tpu.matmul %1625, %1626, %cst_548 {dimension_numbers = #tpu.dot_dimension_numbers<[1], [0], [0], [1], [0, 0, 1, 1], [], []>} : vector<8x12xbf16>, vector<12x8xbf16>, vector<8x8xf32> -> vector<8x8xf32>
    %1628 = vector.extract_strided_slice %1562 {offsets = [0, 24], sizes = [8, 8], strides = [1, 1]} : vector<8x32xf32> to vector<8x8xf32>
    %1629 = vector.extract_strided_slice %1564 {offsets = [0, 24], sizes = [12, 8], strides = [1, 1]} : vector<12x64xf32> to vector<12x8xf32>
    %1630 = vector.extract_strided_slice %1564 {offsets = [0, 56], sizes = [12, 8], strides = [1, 1]} : vector<12x64xf32> to vector<12x8xf32>
    %1631 = vector.shape_cast %880 : vector<1x8x12xf32> to vector<8x12xf32>
    %1632 = arith.truncf %1628 : vector<8x8xf32> to vector<8x8xbf16>
    %1633 = arith.truncf %1629 : vector<12x8xf32> to vector<12x8xbf16>
    %cst_549 = arith.constant dense<0.000000e+00> : vector<8x12xf32>
    %1634 = tpu.matmul %1632, %1633, %cst_549 {dimension_numbers = #tpu.dot_dimension_numbers<[1], [1], [0], [0], [0, 0, 1, 0], [], []>} : vector<8x8xbf16>, vector<12x8xbf16>, vector<8x12xf32> -> vector<8x12xf32>
    %1635 = arith.addf %1634, %1631 : vector<8x12xf32>
    %cst_550 = arith.constant dense<0xFF800000> : vector<8xf32>
    %1636 = vector.multi_reduction <maximumf>, %1635, %cst_550 [1] : vector<8x12xf32> to vector<8xf32>
    %1637 = vector.shape_cast %1636 : vector<8xf32> to vector<8x1xf32>
    %1638 = vector.broadcast %1637 : vector<8x1xf32> to vector<8x12xf32>
    %1639 = arith.subf %1635, %1638 : vector<8x12xf32>
    %1640 = math.exp %1639 : vector<8x12xf32>
    %cst_551 = arith.constant dense<0.000000e+00> : vector<8xf32>
    %1641 = vector.multi_reduction <add>, %1640, %cst_551 [1] : vector<8x12xf32> to vector<8xf32>
    %1642 = vector.shape_cast %1641 : vector<8xf32> to vector<8x1xf32>
    %1643 = tpu.reciprocal %1642 {approx = true} : vector<8x1xf32> -> vector<8x1xf32>
    %1644 = vector.broadcast %1643 : vector<8x1xf32> to vector<8x12xf32>
    %1645 = arith.mulf %1640, %1644 : vector<8x12xf32>
    %1646 = arith.truncf %1645 : vector<8x12xf32> to vector<8x12xbf16>
    %1647 = arith.truncf %1630 : vector<12x8xf32> to vector<12x8xbf16>
    %cst_552 = arith.constant dense<0.000000e+00> : vector<8x8xf32>
    %1648 = tpu.matmul %1646, %1647, %cst_552 {dimension_numbers = #tpu.dot_dimension_numbers<[1], [0], [0], [1], [0, 0, 1, 1], [], []>} : vector<8x12xbf16>, vector<12x8xbf16>, vector<8x8xf32> -> vector<8x8xf32>
    %1649 = tpu.concatenate %1585, %1606, %1627, %1648 in 1 : vector<8x8xf32>, vector<8x8xf32>, vector<8x8xf32>, vector<8x8xf32> -> vector<8x32xf32>
    %1650 = arith.truncf %1649 : vector<8x32xf32> to vector<8x32xbf16>
    %cst_553 = arith.constant dense<0.000000e+00> : vector<8x32xf32>
    %1651 = tpu.matmul %1650, %1560, %cst_553 {dimension_numbers = #tpu.dot_dimension_numbers<[1], [0], [0], [1], [0, 0, 1, 1], [], []>} : vector<8x32xbf16>, vector<32x32xbf16>, vector<8x32xf32> -> vector<8x32xf32>
    %1652 = arith.addf %1540, %1651 : vector<8x32xf32>
    %c1_554 = arith.constant 1 : index
    %c2_555 = arith.constant 2 : index
    %c0_556 = arith.constant 0 : index
    %c0_557 = arith.constant 0 : index
    %1653 = vector.load %arg13[%c1_554, %c2_555, %c0_556, %c0_557] : memref<2x3x1x32xf32, #tpu.memory_space<vmem>>, vector<1x1x1x32xf32>
    %1654 = vector.shape_cast %1653 : vector<1x1x1x32xf32> to vector<1x32xf32>
    %1655 = arith.mulf %1652, %1652 : vector<8x32xf32>
    %cst_558 = arith.constant dense<0.000000e+00> : vector<8xf32>
    %1656 = vector.multi_reduction <add>, %1655, %cst_558 [1] : vector<8x32xf32> to vector<8xf32>
    %1657 = vector.shape_cast %1656 : vector<8xf32> to vector<8x1xf32>
    %cst_559 = arith.constant 3.200000e+01 : f32
    %1658 = vector.broadcast %cst_559 : f32 to vector<8x1xf32>
    %1659 = arith.divf %1657, %1658 : vector<8x1xf32>
    %cst_560 = arith.constant 9.99999997E-7 : f32
    %1660 = vector.broadcast %cst_560 : f32 to vector<8x1xf32>
    %1661 = arith.addf %1659, %1660 : vector<8x1xf32>
    %1662 = math.rsqrt %1661 : vector<8x1xf32>
    %1663 = vector.broadcast %1662 : vector<8x1xf32> to vector<8x32xf32>
    %1664 = arith.mulf %1652, %1663 : vector<8x32xf32>
    %1665 = vector.broadcast %1654 : vector<1x32xf32> to vector<8x32xf32>
    %1666 = arith.mulf %1664, %1665 : vector<8x32xf32>
    %c1_561 = arith.constant 1 : index
    %c0_562 = arith.constant 0 : index
    %c0_563 = arith.constant 0 : index
    %1667 = vector.load %arg19[%c1_561, %c0_562, %c0_563] : memref<2x32x64xbf16, #tpu.memory_space<vmem>>, vector<1x32x64xbf16>
    %1668 = vector.shape_cast %1667 : vector<1x32x64xbf16> to vector<32x64xbf16>
    %1669 = arith.truncf %1666 : vector<8x32xf32> to vector<8x32xbf16>
    %cst_564 = arith.constant dense<0.000000e+00> : vector<8x64xf32>
    %1670 = tpu.matmul %1669, %1668, %cst_564 {dimension_numbers = #tpu.dot_dimension_numbers<[1], [0], [0], [1], [0, 0, 1, 1], [], []>} : vector<8x32xbf16>, vector<32x64xbf16>, vector<8x64xf32> -> vector<8x64xf32>
    %cst_565 = arith.constant 0.000000e+00 : f32
    %1671 = vector.broadcast %cst_565 : f32 to vector<8x64xf32>
    %1672 = arith.maximumf %1670, %1671 : vector<8x64xf32>
    %c1_566 = arith.constant 1 : index
    %c0_567 = arith.constant 0 : index
    %c0_568 = arith.constant 0 : index
    %1673 = vector.load %arg20[%c1_566, %c0_567, %c0_568] : memref<2x64x32xbf16, #tpu.memory_space<vmem>>, vector<1x64x32xbf16>
    %1674 = vector.shape_cast %1673 : vector<1x64x32xbf16> to vector<64x32xbf16>
    %1675 = arith.truncf %1672 : vector<8x64xf32> to vector<8x64xbf16>
    %cst_569 = arith.constant dense<0.000000e+00> : vector<8x32xf32>
    %1676 = tpu.matmul %1675, %1674, %cst_569 {dimension_numbers = #tpu.dot_dimension_numbers<[1], [0], [0], [1], [0, 0, 1, 1], [], []>} : vector<8x64xbf16>, vector<64x32xbf16>, vector<8x32xf32> -> vector<8x32xf32>
    %1677 = arith.addf %1652, %1676 : vector<8x32xf32>
    %c0_570 = arith.constant 0 : index
    %c0_571 = arith.constant 0 : index
    %1678 = vector.load %arg21[%c0_570, %c0_571] : memref<1x32xf32, #tpu.memory_space<vmem>>, vector<1x32xf32>
    %1679 = arith.mulf %1677, %1677 : vector<8x32xf32>
    %cst_572 = arith.constant dense<0.000000e+00> : vector<8xf32>
    %1680 = vector.multi_reduction <add>, %1679, %cst_572 [1] : vector<8x32xf32> to vector<8xf32>
    %1681 = vector.shape_cast %1680 : vector<8xf32> to vector<8x1xf32>
    %cst_573 = arith.constant 3.200000e+01 : f32
    %1682 = vector.broadcast %cst_573 : f32 to vector<8x1xf32>
    %1683 = arith.divf %1681, %1682 : vector<8x1xf32>
    %cst_574 = arith.constant 9.99999997E-7 : f32
    %1684 = vector.broadcast %cst_574 : f32 to vector<8x1xf32>
    %1685 = arith.addf %1683, %1684 : vector<8x1xf32>
    %1686 = math.rsqrt %1685 : vector<8x1xf32>
    %1687 = vector.broadcast %1686 : vector<8x1xf32> to vector<8x32xf32>
    %1688 = arith.mulf %1677, %1687 : vector<8x32xf32>
    %1689 = vector.broadcast %1678 : vector<1x32xf32> to vector<8x32xf32>
    %1690 = arith.mulf %1688, %1689 : vector<8x32xf32>
    %cst_575 = arith.constant 0.176776692 : f32
    %1691 = vector.broadcast %cst_575 : f32 to vector<8x32xf32>
    %1692 = arith.mulf %1690, %1691 : vector<8x32xf32>
    %c0_576 = arith.constant 0 : index
    %c0_577 = arith.constant 0 : index
    %1693 = vector.load %arg22[%c0_576, %c0_577] : memref<128x32xbf16, #tpu.memory_space<vmem>>, vector<128x32xbf16>
    %1694 = arith.truncf %1692 : vector<8x32xf32> to vector<8x32xbf16>
    %cst_578 = arith.constant dense<0.000000e+00> : vector<8x128xf32>
    %1695 = tpu.matmul %1694, %1693, %cst_578 {dimension_numbers = #tpu.dot_dimension_numbers<[1], [1], [0], [0], [0, 0, 1, 0], [], []>} : vector<8x32xbf16>, vector<128x32xbf16>, vector<8x128xf32> -> vector<8x128xf32>
    %1696 = arith.addf %1695, %7 : vector<8x128xf32>
    %c1_579 = arith.constant 1 : index
    %c0_580 = arith.constant 0 : index
    %c0_581 = arith.constant 0 : index
    %1697 = vector.load %arg23[%c1_579, %c0_580, %c0_581] : memref<2x8x128xf32, #tpu.memory_space<vmem>>, vector<1x8x128xf32>
    %1698 = vector.shape_cast %1697 : vector<1x8x128xf32> to vector<8x128xf32>
    %1699 = vector.shape_cast %1696 : vector<8x128xf32> to vector<1x8x128xf32>
    tpu.vector_store %arg23[%c1_579, %c0_580, %c0_581], %1699 {strides = array<i32>} : memref<2x8x128xf32, #tpu.memory_space<vmem>>, vector<1x8x128xf32>,
    %c1_582 = arith.constant 1 : index
    %c0_583 = arith.constant 0 : index
    %c0_584 = arith.constant 0 : index
    %1700 = vector.load %arg6[%c1_582, %c0_583, %c0_584] : memref<2x8x1xi32, #tpu.memory_space<vmem>>, vector<1x8x1xi32>
    %1701 = vector.shape_cast %1700 : vector<1x8x1xi32> to vector<8x1xi32>
    %cst_585 = arith.constant dense<0xFF800000> : vector<8xf32>
    %1702 = vector.multi_reduction <maximumf>, %1696, %cst_585 [1] : vector<8x128xf32> to vector<8xf32>
    %1703 = vector.shape_cast %1702 : vector<8xf32> to vector<8x1xf32>
    %1704 = vector.broadcast %1703 : vector<8x1xf32> to vector<8x128xf32>
    %1705 = arith.subf %1696, %1704 : vector<8x128xf32>
    %1706 = math.exp %1705 : vector<8x128xf32>
    %cst_586 = arith.constant dense<0.000000e+00> : vector<8xf32>
    %1707 = vector.multi_reduction <add>, %1706, %cst_586 [1] : vector<8x128xf32> to vector<8xf32>
    %1708 = vector.shape_cast %1707 : vector<8xf32> to vector<8x1xf32>
    %1709 = math.log %1708 : vector<8x1xf32>
    %1710 = arith.addf %1709, %1703 : vector<8x1xf32>
    %1711 = vector.broadcast %1701 : vector<8x1xi32> to vector<8x128xi32>
    %1712 = arith.cmpi eq, %2, %1711 : vector<8x128xi32>
    %1713 = arith.extui %1712 : vector<8x128xi1> to vector<8x128xi32>
    %1714 = arith.sitofp %1713 : vector<8x128xi32> to vector<8x128xf32>
    %1715 = arith.mulf %1696, %1714 : vector<8x128xf32>
    %cst_587 = arith.constant dense<0.000000e+00> : vector<8xf32>
    %1716 = vector.multi_reduction <add>, %1715, %cst_587 [1] : vector<8x128xf32> to vector<8xf32>
    %1717 = vector.shape_cast %1716 : vector<8xf32> to vector<8x1xf32>
    %c0_i32_588 = arith.constant 0 : i32
    %1718 = vector.broadcast %c0_i32_588 : i32 to vector<8x1xi32>
    %1719 = arith.cmpi ne, %1701, %1718 : vector<8x1xi32>
    %1720 = arith.extui %1719 : vector<8x1xi1> to vector<8x1xi32>
    %1721 = arith.sitofp %1720 : vector<8x1xi32> to vector<8x1xf32>
    %1722 = arith.subf %1710, %1717 : vector<8x1xf32>
    %1723 = arith.mulf %1722, %1721 : vector<8x1xf32>
    %1724 = vector.shape_cast %1723 : vector<8x1xf32> to vector<1x8x1xf32>
    %cst_589 = arith.constant dense<0.000000e+00> : vector<1xf32>
    %1725 = vector.multi_reduction <add>, %1724, %cst_589 [1, 2] : vector<1x8x1xf32> to vector<1xf32>
    %1726 = vector.shape_cast %1725 : vector<1xf32> to vector<1x1x1xf32>
    %1727 = vector.extract %1726[0, 0, 0] : f32 from vector<1x1x1xf32>
    %1728 = vector.broadcast %1727 : f32 to vector<1x1xf32>
    %1729 = arith.addf %866, %1728 : vector<1x1xf32>
    %1730 = vector.shape_cast %1721 : vector<8x1xf32> to vector<1x8x1xf32>
    %cst_590 = arith.constant dense<0.000000e+00> : vector<1xf32>
    %1731 = vector.multi_reduction <add>, %1730, %cst_590 [1, 2] : vector<1x8x1xf32> to vector<1xf32>
    %1732 = vector.shape_cast %1731 : vector<1xf32> to vector<1x1x1xf32>
    %1733 = vector.extract %1732[0, 0, 0] : f32 from vector<1x1x1xf32>
    %1734 = vector.broadcast %1733 : f32 to vector<1x1xf32>
    %1735 = arith.addf %872, %1734 : vector<1x1xf32>
    %1736 = tpu.concatenate %1729, %1735 in 1 : vector<1x1xf32>, vector<1x1xf32> -> vector<1x2xf32>
    %1737 = vector.shape_cast %1736 : vector<1x2xf32> to vector<1x1x2xf32>
    %c0_591 = arith.constant 0 : index
    %c0_592 = arith.constant 0 : index
    %c0_593 = arith.constant 0 : index
    %1738 = vector.load %arg24[%c0_591, %c0_592, %c0_593] : memref<1x1x2xf32, #tpu.memory_space<vmem>>, vector<1x1x2xf32>
    tpu.vector_store %arg24[%c0_591, %c0_592, %c0_593], %1737 {strides = array<i32>} : memref<1x1x2xf32, #tpu.memory_space<vmem>>, vector<1x1x2xf32>,
    return
  }
  func.func @transform_0(%arg0: i32) -> (i32, i32, i32) {
    %c0_i32 = arith.constant 0 : i32
    %c0_i32_0 = arith.constant 0 : i32
    %c0_i32_1 = arith.constant 0 : i32
    return %arg0, %c0_i32, %c0_i32_0 : i32, i32, i32
  }
  func.func @transform_1(%arg0: i32) -> (i32, i32, i32) {
    %c0_i32 = arith.constant 0 : i32
    %c0_i32_0 = arith.constant 0 : i32
    %c0_i32_1 = arith.constant 0 : i32
    return %arg0, %c0_i32, %c0_i32_0 : i32, i32, i32
  }
  func.func @transform_2(%arg0: i32) -> (i32, i32, i32) {
    %c0_i32 = arith.constant 0 : i32
    %c0_i32_0 = arith.constant 0 : i32
    %c0_i32_1 = arith.constant 0 : i32
    return %arg0, %c0_i32, %c0_i32_0 : i32, i32, i32
  }
  func.func @transform_3(%arg0: i32) -> (i32, i32, i32) {
    %c0_i32 = arith.constant 0 : i32
    %c0_i32_0 = arith.constant 0 : i32
    %c0_i32_1 = arith.constant 0 : i32
    %c0_i32_2 = arith.constant 0 : i32
    return %c0_i32, %c0_i32_0, %c0_i32_1 : i32, i32, i32
  }
  func.func @transform_4(%arg0: i32) -> (i32, i32, i32) {
    %c0_i32 = arith.constant 0 : i32
    %c0_i32_0 = arith.constant 0 : i32
    %c0_i32_1 = arith.constant 0 : i32
    %c0_i32_2 = arith.constant 0 : i32
    return %c0_i32, %c0_i32_0, %c0_i32_1 : i32, i32, i32
  }
  func.func @transform_5(%arg0: i32) -> (i32, i32, i32) {
    %c0_i32 = arith.constant 0 : i32
    %c0_i32_0 = arith.constant 0 : i32
    %c0_i32_1 = arith.constant 0 : i32
    return %arg0, %c0_i32, %c0_i32_0 : i32, i32, i32
  }
  func.func @transform_6(%arg0: i32) -> (i32, i32, i32, i32) {
    %c0_i32 = arith.constant 0 : i32
    %c0_i32_0 = arith.constant 0 : i32
    %c0_i32_1 = arith.constant 0 : i32
    %c0_i32_2 = arith.constant 0 : i32
    %c0_i32_3 = arith.constant 0 : i32
    return %c0_i32, %c0_i32_0, %c0_i32_1, %c0_i32_2 : i32, i32, i32, i32
  }
  func.func @transform_7(%arg0: i32) -> (i32, i32, i32) {
    %c0_i32 = arith.constant 0 : i32
    %c0_i32_0 = arith.constant 0 : i32
    %c0_i32_1 = arith.constant 0 : i32
    %c0_i32_2 = arith.constant 0 : i32
    return %c0_i32, %c0_i32_0, %c0_i32_1 : i32, i32, i32
  }
  func.func @transform_8(%arg0: i32) -> (i32, i32, i32) {
    %c0_i32 = arith.constant 0 : i32
    %c0_i32_0 = arith.constant 0 : i32
    %c0_i32_1 = arith.constant 0 : i32
    %c0_i32_2 = arith.constant 0 : i32
    return %c0_i32, %c0_i32_0, %c0_i32_1 : i32, i32, i32
  }
  func.func @transform_9(%arg0: i32) -> (i32, i32, i32) {
    %c0_i32 = arith.constant 0 : i32
    %c0_i32_0 = arith.constant 0 : i32
    %c0_i32_1 = arith.constant 0 : i32
    %c0_i32_2 = arith.constant 0 : i32
    return %c0_i32, %c0_i32_0, %c0_i32_1 : i32, i32, i32
  }
  func.func @transform_10(%arg0: i32) -> (i32, i32, i32) {
    %c0_i32 = arith.constant 0 : i32
    %c0_i32_0 = arith.constant 0 : i32
    %c0_i32_1 = arith.constant 0 : i32
    %c0_i32_2 = arith.constant 0 : i32
    return %c0_i32, %c0_i32_0, %c0_i32_1 : i32, i32, i32
  }
  func.func @transform_11(%arg0: i32) -> (i32, i32) {
    %c0_i32 = arith.constant 0 : i32
    %c0_i32_0 = arith.constant 0 : i32
    %c0_i32_1 = arith.constant 0 : i32
    return %c0_i32, %c0_i32_0 : i32, i32
  }
  func.func @transform_12(%arg0: i32) -> (i32, i32, i32, i32) {
    %c0_i32 = arith.constant 0 : i32
    %c0_i32_0 = arith.constant 0 : i32
    %c0_i32_1 = arith.constant 0 : i32
    %c0_i32_2 = arith.constant 0 : i32
    %c0_i32_3 = arith.constant 0 : i32
    return %c0_i32, %c0_i32_0, %c0_i32_1, %c0_i32_2 : i32, i32, i32, i32
  }
  func.func @transform_13(%arg0: i32) -> (i32, i32, i32) {
    %c0_i32 = arith.constant 0 : i32
    %c0_i32_0 = arith.constant 0 : i32
    %c0_i32_1 = arith.constant 0 : i32
    %c0_i32_2 = arith.constant 0 : i32
    return %c0_i32, %c0_i32_0, %c0_i32_1 : i32, i32, i32
  }
  func.func @transform_14(%arg0: i32) -> (i32, i32, i32) {
    %c0_i32 = arith.constant 0 : i32
    %c0_i32_0 = arith.constant 0 : i32
    %c0_i32_1 = arith.constant 0 : i32
    %c0_i32_2 = arith.constant 0 : i32
    return %c0_i32, %c0_i32_0, %c0_i32_1 : i32, i32, i32
  }
  func.func @transform_15(%arg0: i32) -> (i32, i32, i32) {
    %c0_i32 = arith.constant 0 : i32
    %c0_i32_0 = arith.constant 0 : i32
    %c0_i32_1 = arith.constant 0 : i32
    %c0_i32_2 = arith.constant 0 : i32
    return %c0_i32, %c0_i32_0, %c0_i32_1 : i32, i32, i32
  }
  func.func @transform_16(%arg0: i32) -> (i32, i32, i32) {
    %c0_i32 = arith.constant 0 : i32
    %c0_i32_0 = arith.constant 0 : i32
    %c0_i32_1 = arith.constant 0 : i32
    %c0_i32_2 = arith.constant 0 : i32
    return %c0_i32, %c0_i32_0, %c0_i32_1 : i32, i32, i32
  }
  func.func @transform_17(%arg0: i32) -> (i32, i32, i32) {
    %c0_i32 = arith.constant 0 : i32
    %c0_i32_0 = arith.constant 0 : i32
    %c0_i32_1 = arith.constant 0 : i32
    %c0_i32_2 = arith.constant 0 : i32
    return %c0_i32, %c0_i32_0, %c0_i32_1 : i32, i32, i32
  }
  func.func @transform_18(%arg0: i32) -> (i32, i32, i32) {
    %c0_i32 = arith.constant 0 : i32
    %c0_i32_0 = arith.constant 0 : i32
    %c0_i32_1 = arith.constant 0 : i32
    %c0_i32_2 = arith.constant 0 : i32
    return %c0_i32, %c0_i32_0, %c0_i32_1 : i32, i32, i32
  }
  func.func @transform_19(%arg0: i32) -> (i32, i32, i32) {
    %c0_i32 = arith.constant 0 : i32
    %c0_i32_0 = arith.constant 0 : i32
    %c0_i32_1 = arith.constant 0 : i32
    %c0_i32_2 = arith.constant 0 : i32
    return %c0_i32, %c0_i32_0, %c0_i32_1 : i32, i32, i32
  }
  func.func @transform_20(%arg0: i32) -> (i32, i32) {
    %c0_i32 = arith.constant 0 : i32
    %c0_i32_0 = arith.constant 0 : i32
    %c0_i32_1 = arith.constant 0 : i32
    return %c0_i32, %c0_i32_0 : i32, i32
  }
  func.func @transform_21(%arg0: i32) -> (i32, i32) {
    %c0_i32 = arith.constant 0 : i32
    %c0_i32_0 = arith.constant 0 : i32
    %c0_i32_1 = arith.constant 0 : i32
    return %c0_i32, %c0_i32_0 : i32, i32
  }
  func.func @transform_22(%arg0: i32) -> (i32, i32, i32) {
    %c0_i32 = arith.constant 0 : i32
    %c0_i32_0 = arith.constant 0 : i32
    %c0_i32_1 = arith.constant 0 : i32
    return %arg0, %c0_i32, %c0_i32_0 : i32, i32, i32
  }
  func.func @transform_23(%arg0: i32) -> (i32, i32, i32) {
    %c0_i32 = arith.constant 0 : i32
    %c0_i32_0 = arith.constant 0 : i32
    %c0_i32_1 = arith.constant 0 : i32
    return %arg0, %c0_i32, %c0_i32_0 : i32, i32, i32
  }
}

</mosaic_0001>

<bundles_post_ra>
// kernel: prompt_t5_forward.1
= control target key start
LH: loop header
LB: loop body
LE: loop exit
PB: predicated region body
PF: predicated region fallthrough
CT: control target
= control target key end

     0   :  { %s14207_s0 = inlined_call_operand.vmem [shape: f32[2,12,32], index: 0, kind: input, shape index: {}]   ;;  %s14208_s1 = inlined_call_operand.vmem [shape: f32[2,8,32], index: 1, kind: input, shape index: {}]   ;;  %s14209_s2 = inlined_call_operand.vmem [shape: f32[2,1,12], index: 2, kind: input, shape index: {}]   ;;  %s14210_s3 = inlined_call_operand.vmem [shape: f32[4,12,12], index: 3, kind: input, shape index: {}]   ;;  %s14211_s4 = inlined_call_operand.vmem [shape: f32[4,8,8], index: 4, kind: input, shape index: {}]   ;;  %s14212_s5 = inlined_call_operand.vmem [shape: s32[2,8,1], index: 5, kind: input, shape index: {}]   ;;  %s14213_s6 = inlined_call_operand.vmem [shape: f32[2,2,1,32], index: 6, kind: input, shape index: {}]   ;;  %s14214_s7 = inlined_call_operand.vmem [shape: bf16[2,32,96], index: 7, kind: input, shape index: {}]   ;;  %s14215_s8 = inlined_call_operand.vmem [shape: bf16[2,32,32], index: 8, kind: input, shape index: {}]   ;;  %s14216_s9 = inlined_call_operand.vmem [shape: bf16[2,32,64], index: 9, kind: input, shape index: {}]   ;;  %s14217_s10 = inlined_call_operand.vmem [shape: bf16[2,64,32], index: 10, kind: input, shape index: {}]   ;;  %s14218_s11 = inlined_call_operand.vmem [shape: f32[1,32], index: 11, kind: input, shape index: {}]   ;;  %s14219_s12 = inlined_call_operand.vmem [shape: f32[2,3,1,32], index: 12, kind: input, shape index: {}]   ;;  %s14220_s13 = inlined_call_operand.vmem [shape: bf16[2,32,96], index: 13, kind: input, shape index: {}]   ;;  %s14221_s14 = inlined_call_operand.vmem [shape: bf16[2,32,32], index: 14, kind: input, shape index: {}]   ;;  %s14222_s15 = inlined_call_operand.vmem [shape: bf16[2,32,32], index: 15, kind: input, shape index: {}]   ;;  %s14223_s16 = inlined_call_operand.vmem [shape: bf16[2,32,64], index: 16, kind: input, shape index: {}]   ;;  %s14224_s17 = inlined_call_operand.vmem [shape: bf16[2,32,32], index: 17, kind: input, shape index: {}]   ;;  %s14225_s18 = inlined_call_operand.vmem [shape: bf16[2,32,64], index: 18, kind: input, shape index: {}]   ;;  %s14226_s19 = inlined_call_operand.vmem [shape: bf16[2,64,32], index: 19, kind: input, shape index: {}]   ;;  %s14227_s20 = inlined_call_operand.vmem [shape: f32[1,32], index: 20, kind: input, shape index: {}]   ;;  %s14228_s21 = inlined_call_operand.vmem [shape: bf16[128,32], index: 21, kind: input, shape index: {}]   ;;  %s14229_s22 = inlined_call_operand.hbm [shape: f32[2,8,128], index: 22, kind: output, shape index: {0}]   ;;  %s14230_s23 = inlined_call_operand.vmem [shape: f32[1,1,2], index: 23, kind: output, shape index: {1}]  }
   0x1   :  { %14291 = sst [smem:[#allocation5_spill]] %s14207_s0 }
   0x2   :  { %14292 = sst [smem:[#allocation6_spill]] %s14208_s1 }
   0x3   :  { %14293 = sst [smem:[#allocation7_spill]] %s14209_s2 }
   0x4   :  { %14294 = sst [smem:[#allocation8_spill]] %s14210_s3 }
   0x5   :  { %14295 = sst [smem:[#allocation9_spill]] %s14211_s4 }
   0x6   :  { %14296 = sst [smem:[#allocation10_spill]] %s14212_s5 }
   0x7   :  { %14297 = sst [smem:[#allocation11_spill]] %s14213_s6 }
   0x8   :  { %14298 = sst [smem:[#allocation12_spill]] %s14214_s7 }
   0x9   :  { %14299 = sst [smem:[#allocation13_spill]] %s14215_s8 }
   0xa   :  { %14300 = sst [smem:[#allocation14_spill]] %s14216_s9 }
   0xb   :  { %14301 = sst [smem:[#allocation15_spill]] %s14217_s10 }
   0xc   :  { %14302 = sst [smem:[#allocation16_spill]] %s14218_s11 }
   0xd   :  { %14303 = sst [smem:[#allocation17_spill]] %s14222_s15 }
   0xe   :  { %14304 = sst [smem:[#allocation18_spill]] %s14224_s17 }
   0xf   :  { %14305 = sst [smem:[#allocation19_spill]] %s14225_s18 }
  0x10   :  { %14306 = sst [smem:[#allocation20_spill]] %s14226_s19 }
  0x11   :  { %14307 = sst [smem:[#allocation21_spill]] %s14227_s20 }
  0x12   :  { %14308 = sst [smem:[#allocation22_spill]] %s14228_s21 }
  0x13   :  { %14309 = sst [smem:[#allocation23_spill]] %s14229_s22 }
  0x14   :  { %14310 = sst [smem:[#allocation24_spill]] %s14230_s23 }
  0x15   :  { %s14311_s24 = sld [smem:[#allocation5_spill]]  ;;  %vm111_vm0 = vcmask 261120   ;;  %vm115_vm1 = vcmask 257024   ;;  %s14312_s2 = sld [smem:[#allocation12_spill]]  ;;  %v11916_v8 = vmov 0.0   ;;  %vm11917_vm2 = vmmov 0  }
  0x16   :  { %10333 = vmatprep.subr.bf16.mxu0 %v11916_v8  ;;  %10337 = vmatprep.mubr.msk.bf16.mxu0 %vm11917_vm2, %v11916_v8 }
  0x17   :  { %10353 = vmatprep.subr.bf16.mxu1 %v11916_v8  ;;  %10355 = vmatprep.mubr.msk.bf16.mxu1 %vm11917_vm2, %v11916_v8 }
  0x1b   :  { %v106_v0 = vld [vmem:[%s14311_s24] sm:$0xff]  ;;  %v107_v1 = vld [vmem:[%s14311_s24 + $0x8] sm:$0xf] }
  0x1c   :  { %v109_v2 = vmul.f32 %v106_v0, %v106_v0  ;;  %v110_v3 = vmul.f32 %v107_v1, %v107_v1  ;;  %v11423_v6 = vld [vmem:[%s14312_s2] sm:$0xff]   ;;  %v11424_v7 = vld [vmem:[%s14312_s2 + $0x8] sm:$0xff]  }
  0x1d   :  { %10334 = vmatpush3.bf16.msra.mxu0 %v11423_v6 }
  0x1e   :  { %v112_v4 = vsel %vm111_vm0, %v109_v2, 0.0  ;;  %v116_v5 = vsel %vm115_vm1, %v110_v3, 0.0  ;;  %10335 = vmatprep.subr.bf16.mxu0 %v11916_v8 }
  0x1f   :  { %113 = vadd.xlane.f32.xlu0 %v112_v4 }
  0x21   :  { %10336 = vmatpush3.bf16.msra.mxu0 %v11424_v7 }
  0x22   :  { %10341 = vmatprep.subr.bf16.mxu0 %v11916_v8 }
  0x23   :  { %117 = vadd.xlane.f32.xlu0 %v116_v5 }
  0x24   :  { %29 = vsyncpa [#allocation3], 0  ;;  %s14313_s29 = sld [smem:[#allocation11_spill]]  ;;  %s14247_s3 = smov 120   ;;  %vm205_vm3 = vcmask 64512   ;;  %vm253_vm4 = vcmask 97280  }
  0x25   :  { %s14263_s0 = smov 96   ;;  %s14265_s4 = smov 88   ;;  %vm257_vm5 = vcmask 93184   ;;  %vm283_vm6 = vcmask 1045504   ;;  %vm723_vm7 = vcmask 130048   ;;  %vm726_vm8 = vcmask 195584  }
  0x26   :  { %s14245_s30 = smov 80   ;;  %s14243_s25 = smov 112   ;;  %vm910_vm9 = vcmask 523264   ;;  %vm1974_vm10 = vcmask 1043456   ;;  %vm4801_vm14 = vcmask 7168  }
  0x27   :  { %s14241_s5 = smov 72   ;;  %s14239_s1 = smov 104  }
  0x28   :  { %s14314_s27 = sld [smem:[#allocation8_spill]]  ;;  %s14255_s26 = smov 8  }
  0x29   :  { %s14253_s7 = smov 16   ;;  %s14251_s28 = smov 24  }
  0x2a   :  { %v9559_v18 = vld [vmem:[%s14313_s29] ss:$0 sm:$0xff]  ;;  %s14317_s6 = smov 80   ;;  %s14330_s21 = smov 64  }
  0x2b   :  { %s14333_s23 = sld [smem:[#allocation12_spill]]  ;;  %s14334_s22 = sld [smem:[#allocation7_spill]] }
  0x2e   :  { %v75_v39 = vld [vmem:[%s14314_s27] sm:$0xff]  ;;  %v76_v41 = vld [vmem:[%s14314_s27 + $0x8] sm:$0xf]  ;;  %v77_v43 = vld [vmem:[%s14314_s27 + $0x10] sm:$0xff] }
  0x2f   :  { %v78_v46 = vld [vmem:[%s14314_s27 + $0x18] sm:$0xf]  ;;  %v79_v60 = vld [vmem:[%s14314_s27 + $0x20] sm:$0xff] }
  0xac   :  { %v114_v9 = vpop.xlane.xlu0 %113 }
  0xad   :  { %v120_v10 = vmul.f32 0.03125, %v114_v9  ;;  %v81_v9 = vld [vmem:[%s14314_s27 + $0x30] sm:$0xff] }
  0xaf   :  { %v122_v11 = vadd.f32 1e-06, %v120_v10 }
  0xb0   :  { %v118_v12 = vpop.xlane.xlu0 %117 }
  0xb1   :  { %11543 = vrsqrt.f32 %v122_v11  ;;  %v121_v13 = vmul.f32 0.03125, %v118_v12 }
  0xb3   :  { %v123_v14 = vadd.f32 1e-06, %v121_v13  ;;  %v82_v13 = vld [vmem:[%s14314_s27 + $0x38] sm:$0xf] }
  0xb5   :  { %11545 = vrsqrt.f32 %v123_v14 }
  0xbb   :  { %v11544_v15 = vpop.eup %11543 }
  0xbc   :  { %v126_v16 = vmul.f32 %v11544_v15, %v106_v0  ;;  %v80_v0 = vld [vmem:[%s14314_s27 + $0x28] sm:$0xf]  ;;  %s14328_s27 = smov 96  }
  0xbe   :  { %v134_v20 = vmul.f32 %v9559_v18, %v126_v16 }
  0xbf   :  { %v11546_v17 = vpop.eup %11545 }
  0xc0   :  { %v127_v19 = vmul.f32 %v11546_v17, %v107_v1 }
  0xc2   :  { %v135_v21 = vmul.f32 %v9559_v18, %v127_v19 }
  0xc4   :  { %v144_v22 = vpack.c.bf16 %v135_v21, %v134_v20 }
  0xc6   :  { %10338 = vmatmul.mubr.msk.bf16.vlgmr.msra.gmra.mrb[0].mxu0 %vm111_vm0, %v144_v22 }
  0xc7   :  { %10343 = vmatprep.mubr.msk.bf16.mxu0 %vm11917_vm2, %v11916_v8 }
 0x199   :  { %v194_v23 = vpop.f32.mrb[0].mxu0 }
 0x19a   :  { %v10339_v24 = vpop.f32.mrb[1].mxu0 }
 0x19b   :  { %v197_v25 = vpop.f32.mrb[2].mxu0 }
 0x19c   :  { %v12084_v26 = vpack.c.bf16 %v197_v25, %v194_v23  ;;  %v10340_v27 = vpop.f32.mrb[3].mxu0 }
 0x19e   :  { %328 = vrot.lane.b32.xlu0 %v12084_v26, %s14247_s3  ;;  %203 = vrot.lane.b32.xlu1 %v12084_v26, %s14263_s0  ;;  %s14259_s3 = smov 64  }
 0x1a2   :  { %330 = vrot.lane.b32.xlu1 %v12084_v26, %s14265_s4 }
 0x1a6   :  { %453 = vrot.lane.b32.xlu1 %v12084_v26, %s14245_s30  ;;  %s14261_s30 = smov 48  }
 0x1aa   :  { %451 = vrot.lane.b32.xlu1 %v12084_v26, %s14243_s25  ;;  %s14257_s25 = smov 40  }
 0x1ae   :  { %576 = vrot.lane.b32.xlu1 %v12084_v26, %s14241_s5  ;;  %s14249_s5 = smov 56  }
 0x1b2   :  { %574 = vrot.lane.b32.xlu1 %v12084_v26, %s14239_s1  ;;  %s14315_s1 = sld [smem:[#allocation7_spill]] }
 0x1b8   :  { %v9558_v40 = vld [vmem:[%s14315_s1] ss:$0 sm:$0xff] }
 0x1b9   :  { %v12130_v42 = vadd.f32 %v9558_v40, %v75_v39  ;;  %v12135_v44 = vadd.f32 %v9558_v40, %v76_v41  ;;  %v12141_v49 = vadd.f32 %v9558_v40, %v77_v43  ;;  %v12145_v54 = vadd.f32 %v9558_v40, %v78_v46 }
 0x1ba   :  { %v12158_v2 = vadd.f32 %v9558_v40, %v79_v60  ;;  %v12160_v3 = vadd.f32 %v9558_v40, %v80_v0  ;;  %v12172_v15 = vadd.f32 %v9558_v40, %v81_v9  ;;  %v12174_v16 = vadd.f32 %v9558_v40, %v82_v13 }
 0x210   :  { %v204_v28 = vpop.permute.xlu1 %203  ;;  %v329_v33 = vpop.permute.xlu0 %328 }
 0x211   :  { %v210_v29 = vsel %vm205_vm3, %v204_v28, 0 }
 0x212   :  { %10342 = vmatpush3.bf16.xpose.msra.mxu0 %v210_v29 }
 0x213   :  { %10347 = vmatprep.subr.bf16.mxu0 %v11916_v8 }
 0x214   :  { %v331_v30 = vpop.permute.xlu1 %330 }
 0x215   :  { %v336_v31 = vsel %vm205_vm3, %v331_v30, 0 }
 0x216   :  { %10354 = vmatpush3.bf16.xpose.msra.mxu1 %v336_v31 }
 0x217   :  { %10365 = vmatprep.subr.bf16.mxu1 %v11916_v8 }
 0x218   :  { %v454_v32 = vpop.permute.xlu1 %453 }
 0x219   :  { %10344 = vmatmul.mubr.msk.bf16.vlgmr.msra.gmra.mrb[4].mxu0 %vm205_vm3, %v12084_v26  ;;  %v459_v35 = vsel %vm205_vm3, %v454_v32, 0 }
 0x21a   :  { %10349 = vmatprep.mubr.msk.bf16.mxu0 %vm11917_vm2, %v11916_v8 }
 0x21c   :  { %v452_v34 = vpop.permute.xlu1 %451 }
 0x21d   :  { %10356 = vmatmul.mubr.msk.bf16.vlgmr.msra.gmra.mrb[0].mxu1 %vm205_vm3, %v329_v33 }
 0x21e   :  { %10366 = vmatpush3.bf16.xpose.msra.mxu1 %v459_v35  ;;  %10367 = vmatprep.mubr.msk.bf16.mxu1 %vm11917_vm2, %v11916_v8 }
 0x21f   :  { %10377 = vmatprep.subr.bf16.mxu1 %v11916_v8 }
 0x220   :  { %v577_v36 = vpop.permute.xlu1 %576 }
 0x221   :  { %v582_v37 = vsel %vm205_vm3, %v577_v36, 0 }
 0x224   :  { %v575_v38 = vpop.permute.xlu1 %574 }
 0x225   :  { %10368 = vmatmul.mubr.msk.bf16.vlgmr.msra.gmra.mrb[4].mxu1 %vm205_vm3, %v452_v34 }
 0x226   :  { %10378 = vmatpush3.bf16.xpose.msra.mxu1 %v582_v37  ;;  %10379 = vmatprep.mubr.msk.bf16.mxu1 %vm11917_vm2, %v11916_v8 }
 0x227   :  { %10389 = vmatprep.subr.bf16.mxu1 %v11916_v8 }
 0x22d   :  { %10380 = vmatmul.mubr.msk.bf16.vlgmr.msra.gmra.mrb[8].mxu1 %vm205_vm3, %v575_v38 }
 0x22e   :  { %10393 = vmatprep.mubr.msk.bf16.mxu1 %vm11917_vm2, %v11916_v8 }
 0x2ec   :  { %v246_v45 = vpop.f32.mrb[4].mxu0 }
 0x2ed   :  { %v10345_v47 = vpop.f32.mrb[5].mxu0  ;;  %v247_v48 = vadd.f32 %v246_v45, %v12130_v42 }
 0x2ee   :  { %v249_v50 = vpop.f32.mrb[6].mxu0 }
 0x2ef   :  { %v10346_v51 = vpop.f32.mrb[7].mxu0  ;;  %v254_v52 = vsel %vm253_vm4, %v247_v48, -inf  ;;  %v250_v53 = vadd.f32 %v249_v50, %v12135_v44 }
 0x2f0   :  { %v372_v55 = vpop.f32.mrb[0].mxu1  ;;  %255 = vmax.xlane.f32.xlu1 %v254_v52 }
 0x2f1   :  { %v10357_v56 = vpop.f32.mrb[1].mxu1  ;;  %v258_v57 = vsel %vm257_vm5, %v250_v53, -inf  ;;  %v373_v58 = vadd.f32 %v372_v55, %v12141_v49 }
 0x2f2   :  { %v375_v59 = vpop.f32.mrb[2].mxu1  ;;  %259 = vmax.xlane.f32.xlu0 %v258_v57 }
 0x2f3   :  { %v10358_v61 = vpop.f32.mrb[3].mxu1  ;;  %v379_v62 = vsel %vm253_vm4, %v373_v58, -inf  ;;  %v376_v63 = vadd.f32 %v375_v59, %v12145_v54 }
 0x2f4   :  { %380 = vmax.xlane.f32.xlu1 %v379_v62 }
 0x2f5   :  { %v382_v1 = vsel %vm257_vm5, %v376_v63, -inf }
 0x2f6   :  { %383 = vmax.xlane.f32.xlu0 %v382_v1 }
 0x2f8   :  { %v495_v4 = vpop.f32.mrb[4].mxu1 }
 0x2f9   :  { %v10369_v5 = vpop.f32.mrb[5].mxu1  ;;  %v496_v6 = vadd.f32 %v495_v4, %v12158_v2 }
 0x2fa   :  { %v498_v7 = vpop.f32.mrb[6].mxu1 }
 0x2fb   :  { %v10370_v10 = vpop.f32.mrb[7].mxu1  ;;  %v502_v11 = vsel %vm253_vm4, %v496_v6, -inf  ;;  %v499_v12 = vadd.f32 %v498_v7, %v12160_v3 }
 0x2fc   :  { %503 = vmax.xlane.f32.xlu1 %v502_v11 }
 0x2fd   :  { %v505_v14 = vsel %vm257_vm5, %v499_v12, -inf }
 0x2fe   :  { %506 = vmax.xlane.f32.xlu0 %v505_v14 }
 0x300   :  { %v618_v17 = vpop.f32.mrb[8].mxu1 }
 0x301   :  { %v10381_v18 = vpop.f32.mrb[9].mxu1  ;;  %v619_v19 = vadd.f32 %v618_v17, %v12172_v15 }
 0x302   :  { %v621_v20 = vpop.f32.mrb[10].mxu1 }
 0x303   :  { %v10382_v21 = vpop.f32.mrb[11].mxu1  ;;  %v625_v22 = vsel %vm253_vm4, %v619_v19, -inf  ;;  %v622_v23 = vadd.f32 %v621_v20, %v12174_v16 }
 0x304   :  { %626 = vmax.xlane.f32.xlu1 %v625_v22 }
 0x305   :  { %v628_v24 = vsel %vm257_vm5, %v622_v23, -inf }
 0x306   :  { %629 = vmax.xlane.f32.xlu0 %v628_v24 }
 0x315   :  { %278 = vrot.lane.b32.xlu1 %v12084_v26, %s14259_s3 }
 0x37d   :  { %v256_v25 = vpop.xlane.xlu1 %255 }
 0x37e   :  { %v261_v27 = vsub.f32 %v247_v48, %v256_v25 }
 0x37f   :  { %v260_v28 = vpop.xlane.xlu0 %259 }
 0x380   :  { %v263_v29 = vmul.f32 1.442695, %v261_v27  ;;  %v262_v30 = vsub.f32 %v250_v53, %v260_v28 }
 0x381   :  { %v381_v31 = vpop.xlane.xlu1 %380 }
 0x382   :  { %11547 = vpow2.f32 %v263_v29  ;;  %v265_v32 = vmul.f32 1.442695, %v262_v30  ;;  %v385_v33 = vsub.f32 %v373_v58, %v381_v31 }
 0x383   :  { %v384_v34 = vpop.xlane.xlu0 %383 }
 0x384   :  { %11549 = vpow2.f32 %v265_v32  ;;  %v387_v35 = vmul.f32 1.442695, %v385_v33  ;;  %v386_v36 = vsub.f32 %v376_v63, %v384_v34 }
 0x386   :  { %11551 = vpow2.f32 %v387_v35  ;;  %v389_v37 = vmul.f32 1.442695, %v386_v36 }
 0x388   :  { %11553 = vpow2.f32 %v389_v37 }
 0x389   :  { %v504_v38 = vpop.xlane.xlu1 %503 }
 0x38a   :  { %v508_v39 = vsub.f32 %v496_v6, %v504_v38 }
 0x38b   :  { %v507_v40 = vpop.xlane.xlu0 %506 }
 0x38c   :  { %v11548_v41 = vpop.eup %11547  ;;  %v510_v43 = vmul.f32 1.442695, %v508_v39  ;;  %v509_v45 = vsub.f32 %v499_v12, %v507_v40 }
 0x38d   :  { %v267_v46 = vsel %vm253_vm4, %v11548_v41, 0.0 }
 0x38e   :  { %v11550_v47 = vpop.eup %11549  ;;  %11555 = vpow2.f32 %v510_v43  ;;  %v512_v48 = vmul.f32 1.442695, %v509_v45  ;;  %268 = vadd.xlane.f32.xlu1 %v267_v46 }
 0x38f   :  { %v270_v50 = vsel %vm257_vm5, %v11550_v47, 0.0 }
 0x390   :  { %v12184_v51 = vpop.eup %11551  ;;  %11557 = vpow2.f32 %v512_v48  ;;  %271 = vadd.xlane.f32.xlu0 %v270_v50 }
 0x391   :  { %v627_v52 = vpop.xlane.xlu1 %626  ;;  %v391_v53 = vsel %vm253_vm4, %v12184_v51, 0.0 }
 0x392   :  { %v11554_v55 = vpop.eup %11553  ;;  %v631_v56 = vsub.f32 %v619_v19, %v627_v52  ;;  %392 = vadd.xlane.f32.xlu1 %v391_v53 }
 0x393   :  { %v630_v57 = vpop.xlane.xlu0 %629  ;;  %v394_v58 = vsel %vm257_vm5, %v11554_v55, 0.0 }
 0x394   :  { %v633_v59 = vmul.f32 1.442695, %v631_v56  ;;  %v632_v60 = vsub.f32 %v622_v23, %v630_v57  ;;  %395 = vadd.xlane.f32.xlu0 %v394_v58  ;;  %v11425_v58 = vld [vmem:[%s14215_s8] sm:$0xff]  }
 0x395   :  { %v279_v61 = vpop.permute.xlu1 %278  ;;  %10390 = vmatpush3.bf16.msra.mxu1 %v11425_v58 }
 0x396   :  { %11559 = vpow2.f32 %v633_v59  ;;  %v635_v62 = vmul.f32 1.442695, %v632_v60  ;;  %v285_v63 = vsel %vm283_vm6, %v279_v61, 0  ;;  %10391 = vmatprep.subr.bf16.mxu1 %v11916_v8 }
 0x397   :  { %10348 = vmatpush3.bf16.msra.mxu0 %v285_v63  ;;  %v11426_v63 = vld [vmem:[%s14215_s8 + $0x8] sm:$0xff]  }
 0x398   :  { %v11556_v0 = vpop.eup %11555  ;;  %11561 = vpow2.f32 %v635_v62  ;;  %10359 = vmatprep.subr.bf16.mxu0 %v11916_v8 }
 0x399   :  { %v514_v1 = vsel %vm253_vm4, %v11556_v0, 0.0  ;;  %10392 = vmatpush3.bf16.msra.mxu1 %v11426_v63  ;;  %v11431_v63 = vld [vmem:[%s14217_s10 + $0x10] sm:$0xff]  }
 0x39a   :  { %v11558_v4 = vpop.eup %11557  ;;  %515 = vadd.xlane.f32.xlu1 %v514_v1  ;;  %10431 = vmatprep.subr.bf16.mxu1 %v11916_v8 }
 0x39b   :  { %v517_v5 = vsel %vm257_vm5, %v11558_v4, 0.0 }
 0x39c   :  { %518 = vadd.xlane.f32.xlu0 %v517_v5 }
 0x3a0   :  { %v12193_v6 = vpop.eup %11559 }
 0x3a1   :  { %v637_v7 = vsel %vm253_vm4, %v12193_v6, 0.0 }
 0x3a2   :  { %v11562_v9 = vpop.eup %11561  ;;  %638 = vadd.xlane.f32.xlu1 %v637_v7 }
 0x3a3   :  { %v640_v10 = vsel %vm257_vm5, %v11562_v9, 0.0 }
 0x3a4   :  { %641 = vadd.xlane.f32.xlu0 %v640_v10 }
 0x3b3   :  { %525 = vrot.lane.b32.xlu1 %v12084_v26, %s14261_s30 }
 0x3b7   :  { %648 = vrot.lane.b32.xlu1 %v12084_v26, %s14257_s25  ;;  %s14320_s25 = smov 104  }
 0x3ba   :  { %402 = vrot.lane.b32.xlu0 %v12084_v26, %s14249_s5  ;;  %s14316_s5 = smov 120  }
 0x41b   :  { %v269_v11 = vpop.xlane.xlu1 %268 }
 0x41c   :  { %11563 = vrcp.f32 %v269_v11 }
 0x41d   :  { %v272_v12 = vpop.xlane.xlu0 %271 }
 0x41e   :  { %11565 = vrcp.f32 %v272_v12 }
 0x41f   :  { %v393_v17 = vpop.xlane.xlu1 %392 }
 0x421   :  { %v396_v13 = vpop.xlane.xlu0 %395 }
 0x422   :  { %11567 = vrcp.f32 %v396_v13 }
 0x423   :  { %11569 = vrcp.f32 %v393_v17 }
 0x426   :  { %v11564_v14 = vpop.eup %11563 }
 0x427   :  { %v275_v19 = vmul.f32 %v11564_v14, %v11548_v41  ;;  %v516_v23 = vpop.xlane.xlu1 %515 }
 0x428   :  { %v11566_v18 = vpop.eup %11565 }
 0x429   :  { %v276_v20 = vmul.f32 %v11566_v18, %v11550_v47  ;;  %v519_v22 = vpop.xlane.xlu0 %518 }
 0x42a   :  { %11571 = vrcp.f32 %v519_v22 }
 0x42b   :  { %v277_v21 = vpack.c.bf16 %v276_v20, %v275_v19  ;;  %11573 = vrcp.f32 %v516_v23 }
 0x42c   :  { %v11568_v26 = vpop.eup %11567 }
 0x42d   :  { %10350 = vmatmul.mubr.msk.bf16.vlgmr.msra.gmra.mrb[8].mxu0 %vm253_vm4, %v277_v21  ;;  %v11570_v27 = vpop.eup %11569  ;;  %v400_v28 = vmul.f32 %v11568_v26, %v11554_v55 }
 0x42e   :  { %10361 = vmatprep.mubr.msk.bf16.mxu0 %vm11917_vm2, %v11916_v8  ;;  %v399_v30 = vmul.f32 %v11570_v27, %v12184_v51 }
 0x42f   :  { %v639_v24 = vpop.xlane.xlu1 %638 }
 0x430   :  { %v401_v33 = vpack.c.bf16 %v400_v28, %v399_v30  ;;  %v11875_v30 = vld [vmem:[%s14311_s24] sm:$0xff] }
 0x431   :  { %v642_v25 = vpop.xlane.xlu0 %641 }
 0x432   :  { %11575 = vrcp.f32 %v642_v25 }
 0x433   :  { %v526_v32 = vpop.permute.xlu1 %525  ;;  %11577 = vrcp.f32 %v639_v24 }
 0x434   :  { %v11572_v34 = vpop.eup %11571  ;;  %v531_v35 = vsel %vm283_vm6, %v526_v32, 0 }
 0x435   :  { %v403_v29 = vpop.permute.xlu0 %402  ;;  %v11574_v36 = vpop.eup %11573  ;;  %v523_v37 = vmul.f32 %v11572_v34, %v11558_v4  ;;  %v11876_v34 = vld [vmem:[%s14311_s24 + $0x8] sm:$0xf]  ;;  %s14331_s24 = smov 48  }
 0x436   :  { %v408_v31 = vsel %vm283_vm6, %v403_v29, 0  ;;  %v522_v38 = vmul.f32 %v11574_v36, %v11556_v0 }
 0x437   :  { %10360 = vmatpush3.bf16.msra.mxu0 %v408_v31  ;;  %v649_v39 = vpop.permute.xlu1 %648 }
 0x438   :  { %10371 = vmatprep.subr.bf16.mxu0 %v11916_v8  ;;  %v524_v40 = vpack.c.bf16 %v523_v37, %v522_v38  ;;  %v654_v43 = vsel %vm283_vm6, %v649_v39, 0 }
 0x43a   :  { %10362 = vmatmul.mubr.msk.bf16.vlgmr.msra.gmra.mrb[12].mxu0 %vm253_vm4, %v401_v33 }
 0x43b   :  { %10372 = vmatpush3.bf16.msra.mxu0 %v531_v35  ;;  %10373 = vmatprep.mubr.msk.bf16.mxu0 %vm11917_vm2, %v11916_v8 }
 0x43c   :  { %10383 = vmatprep.subr.bf16.mxu0 %v11916_v8  ;;  %v11576_v41 = vpop.eup %11575 }
 0x43d   :  { %v11578_v45 = vpop.eup %11577  ;;  %v646_v46 = vmul.f32 %v11576_v41, %v11562_v9  ;;  %v11427_v41 = vld [vmem:[%s14216_s9] sm:$0xff]  }
 0x43e   :  { %v645_v47 = vmul.f32 %v11578_v45, %v12193_v6 }
 0x440   :  { %v647_v48 = vpack.c.bf16 %v646_v46, %v645_v47 }
 0x442   :  { %10374 = vmatmul.mubr.msk.bf16.vlgmr.msra.gmra.mrb[16].mxu0 %vm253_vm4, %v524_v40 }
 0x443   :  { %10384 = vmatpush3.bf16.msra.mxu0 %v654_v43  ;;  %10385 = vmatprep.mubr.msk.bf16.mxu0 %vm11917_vm2, %v11916_v8  ;;  %v11428_v43 = vld [vmem:[%s14216_s9 + $0x8] sm:$0xff]  }
 0x444   :  { %10397 = vmatprep.subr.bf16.mxu0 %v11916_v8 }
 0x44a   :  { %10386 = vmatmul.mubr.msk.bf16.vlgmr.msra.gmra.mrb[20].mxu0 %vm253_vm4, %v647_v48 }
 0x44b   :  { %10401 = vmatprep.mubr.msk.bf16.mxu0 %vm11917_vm2, %v11916_v8  ;;  %10398 = vmatpush3.bf16.msra.mxu0 %v11427_v41 }
 0x44c   :  { %10399 = vmatprep.subr.bf16.mxu0 %v11916_v8 }
 0x44f   :  { %10400 = vmatpush3.bf16.msra.mxu0 %v11428_v43 }
 0x450   :  { %10405 = vmatprep.subr.bf16.mxu0 %v11916_v8 }
 0x500   :  { %v321_v50 = vpop.f32.mrb[8].mxu0 }
 0x501   :  { %v10351_v51 = vpop.f32.mrb[9].mxu0 }
 0x502   :  { %v324_v52 = vpop.f32.mrb[10].mxu0 }
 0x503   :  { %v10352_v53 = vpop.f32.mrb[11].mxu0 }
 0x50d   :  { %v444_v55 = vpop.f32.mrb[12].mxu0 }
 0x50e   :  { %v10363_v56 = vpop.f32.mrb[13].mxu0 }
 0x50f   :  { %v447_v57 = vpop.f32.mrb[14].mxu0  ;;  %v9575_v56 = vld [vmem:[%s14313_s29 + $0x1] ss:$0 sm:$0xff] }
 0x510   :  { %v11361_v59 = vpack.i.bf16 %v447_v57, %v444_v55  ;;  %v10364_v60 = vpop.f32.mrb[15].mxu0 }
 0x511   :  { %v11429_v60 = vld [vmem:[%s14217_s10] sm:$0xff]  }
 0x512   :  { %11362 = vrot.lane.b32.xlu0 %v11361_v59, %s14255_s26  ;;  %s14318_s26 = smov 112  }
 0x515   :  { %v567_v61 = vpop.f32.mrb[16].mxu0 }
 0x516   :  { %v10375_v62 = vpop.f32.mrb[17].mxu0 }
 0x517   :  { %v570_v0 = vpop.f32.mrb[18].mxu0  ;;  %v11430_v62 = vld [vmem:[%s14217_s10 + $0x8] sm:$0xff]  }
 0x518   :  { %v11366_v1 = vpack.i.bf16 %v570_v0, %v567_v61  ;;  %v10376_v4 = vpop.f32.mrb[19].mxu0  ;;  %v11432_v0 = vld [vmem:[%s14217_s10 + $0x18] sm:$0xff]  }
 0x51a   :  { %11367 = vrot.lane.b32.xlu1 %v11366_v1, %s14253_s7  ;;  %s14319_s7 = smov 72  }
 0x51d   :  { %v690_v5 = vpop.f32.mrb[20].mxu0 }
 0x51e   :  { %v10387_v6 = vpop.f32.mrb[21].mxu0 }
 0x51f   :  { %v693_v7 = vpop.f32.mrb[22].mxu0 }
 0x520   :  { %v11371_v9 = vpack.i.bf16 %v693_v7, %v690_v5  ;;  %v10388_v10 = vpop.f32.mrb[23].mxu0 }
 0x522   :  { %11372 = vrot.lane.b32.xlu0 %v11371_v9, %s14251_s28  ;;  %s14321_s28 = smov 40  }
 0x584   :  { %v11363_v11 = vpop.permute.xlu0 %11362 }
 0x585   :  { %v11365_v13 = vunpack.i.h.bf16 %v11363_v11  ;;  %v11364_v14 = vunpack.i.l.bf16 %v11363_v11 }
 0x587   :  { %v722_v20 = vsel %vm205_vm3, %v324_v52, %v11365_v13  ;;  %v721_v21 = vsel %vm205_vm3, %v321_v50, %v11364_v14 }
 0x58c   :  { %v11368_v12 = vpop.permute.xlu1 %11367 }
 0x58d   :  { %v11370_v17 = vunpack.i.h.bf16 %v11368_v12  ;;  %v11369_v18 = vunpack.i.l.bf16 %v11368_v12 }
 0x58f   :  { %v725_v26 = vsel %vm723_vm7, %v722_v20, %v11370_v17  ;;  %v724_v24 = vsel %vm723_vm7, %v721_v21, %v11369_v18 }
 0x594   :  { %v11373_v19 = vpop.permute.xlu0 %11372 }
 0x595   :  { %v11375_v22 = vunpack.i.h.bf16 %v11373_v19  ;;  %v11374_v23 = vunpack.i.l.bf16 %v11373_v19 }
 0x597   :  { %v727_v25 = vsel %vm726_vm8, %v724_v24, %v11374_v23  ;;  %v728_v27 = vsel %vm726_vm8, %v725_v26, %v11375_v22  ;;  %v11433_v23 = vld [vmem:[%s14312_s2 + $0x10] sm:$0xff]   ;;  %v11434_v26 = vld [vmem:[%s14312_s2 + $0x18] sm:$0xff]   ;;  %s14327_s2 = smov 88  }
 0x598   :  { %v729_v28 = vpack.c.bf16 %v728_v27, %v727_v25 }
 0x59a   :  { %10394 = vmatmul.mubr.msk.bf16.vlgmr.msra.gmra.mrb[12].mxu1 %vm111_vm0, %v729_v28 }
 0x59b   :  { %10433 = vmatprep.mubr.msk.bf16.mxu1 %vm11917_vm2, %v11916_v8 }
 0x66d   :  { %v779_v29 = vpop.f32.mrb[12].mxu1 }
 0x66e   :  { %v786_v31 = vadd.f32 %v11875_v30, %v779_v29  ;;  %v10395_v32 = vpop.f32.mrb[13].mxu1 }
 0x66f   :  { %v782_v33 = vpop.f32.mrb[14].mxu1 }
 0x670   :  { %v787_v35 = vadd.f32 %v11876_v34, %v782_v33  ;;  %v10396_v36 = vpop.f32.mrb[15].mxu1  ;;  %v790_v37 = vmul.f32 %v786_v31, %v786_v31  ;;  %v9585_v34 = vld [vmem:[%s14313_s29 + $0x2] ss:$0 sm:$0xff] }
 0x672   :  { %v792_v38 = vsel %vm111_vm0, %v790_v37, 0.0  ;;  %v791_v39 = vmul.f32 %v787_v35, %v787_v35 }
 0x673   :  { %793 = vadd.xlane.f32.xlu1 %v792_v38 }
 0x674   :  { %v795_v40 = vsel %vm115_vm1, %v791_v39, 0.0 }
 0x675   :  { %796 = vadd.xlane.f32.xlu0 %v795_v40 }
 0x700   :  { %v794_v45 = vpop.xlane.xlu1 %793 }
 0x701   :  { %v798_v46 = vmul.f32 0.03125, %v794_v45 }
 0x702   :  { %v797_v47 = vpop.xlane.xlu0 %796 }
 0x703   :  { %v800_v48 = vadd.f32 1e-06, %v798_v46  ;;  %v799_v50 = vmul.f32 0.03125, %v797_v47 }
 0x705   :  { %11579 = vrsqrt.f32 %v800_v48  ;;  %v801_v51 = vadd.f32 1e-06, %v799_v50 }
 0x707   :  { %11581 = vrsqrt.f32 %v801_v51 }
 0x70f   :  { %v11580_v52 = vpop.eup %11579 }
 0x710   :  { %v804_v53 = vmul.f32 %v11580_v52, %v786_v31 }
 0x711   :  { %v11582_v55 = vpop.eup %11581 }
 0x712   :  { %v805_v57 = vmul.f32 %v11582_v55, %v787_v35  ;;  %v812_v58 = vmul.f32 %v9575_v56, %v804_v53 }
 0x714   :  { %v813_v59 = vmul.f32 %v9575_v56, %v805_v57 }
 0x716   :  { %v818_v61 = vpack.c.bf16 %v813_v59, %v812_v58 }
 0x718   :  { %10402 = vmatmul.mubr.msk.bf16.vlgmr.msra.gmra.mrb[24].mxu0 %vm111_vm0, %v818_v61 }
 0x719   :  { %10406 = vmatpush3.bf16.msra.mxu0 %v11429_v60  ;;  %10413 = vmatprep.mubr.msk.bf16.mxu0 %vm11917_vm2, %v11916_v8 }
 0x71a   :  { %10407 = vmatprep.subr.bf16.mxu0 %v11916_v8 }
 0x71d   :  { %10408 = vmatpush3.bf16.msra.mxu0 %v11430_v62 }
 0x71e   :  { %10409 = vmatprep.subr.bf16.mxu0 %v11916_v8 }
 0x721   :  { %10410 = vmatpush3.bf16.msra.mxu0 %v11431_v63 }
 0x722   :  { %10411 = vmatprep.subr.bf16.mxu0 %v11916_v8 }
 0x725   :  { %10412 = vmatpush3.bf16.msra.mxu0 %v11432_v0 }
 0x726   :  { %10417 = vmatprep.subr.bf16.mxu0 %v11916_v8 }
 0x7eb   :  { %v868_v1 = vpop.f32.mrb[24].mxu0 }
 0x7ec   :  { %v10403_v4 = vpop.f32.mrb[25].mxu0  ;;  %v875_v6 = vmax.f32 %v868_v1, 0.0 }
 0x7ed   :  { %v871_v5 = vpop.f32.mrb[26].mxu0 }
 0x7ee   :  { %v876_v7 = vmax.f32 %v871_v5, 0.0  ;;  %v10404_v9 = vpop.f32.mrb[27].mxu0 }
 0x7f0   :  { %v885_v10 = vpack.c.bf16 %v876_v7, %v875_v6 }
 0x7f2   :  { %10414 = vmatmul.mubr.msk.bf16.vlgmr.msra.gmra.mrb[28].mxu0 %vm910_vm9, %v885_v10 }
 0x7f3   :  { %10421 = vmatprep.mubr.msk.bf16.mxu0 %vm11917_vm2, %v11916_v8  ;;  %10418 = vmatpush3.bf16.msra.mxu0 %v11433_v23 }
 0x7f4   :  { %10419 = vmatprep.subr.bf16.mxu0 %v11916_v8 }
 0x7f7   :  { %10420 = vmatpush3.bf16.msra.mxu0 %v11434_v26 }
 0x7f8   :  { %10425 = vmatprep.subr.bf16.mxu0 %v11916_v8 }
 0x8c5   :  { %v948_v11 = vpop.f32.mrb[28].mxu0 }
 0x8c6   :  { %v12285_v12 = vadd.f32 %v948_v11, %v786_v31  ;;  %v10415_v13 = vpop.f32.mrb[29].mxu0 }
 0x8c7   :  { %v951_v14 = vpop.f32.mrb[30].mxu0 }
 0x8c8   :  { %v12287_v17 = vadd.f32 %v951_v14, %v787_v35  ;;  %v10416_v18 = vpop.f32.mrb[31].mxu0  ;;  %v959_v19 = vmul.f32 %v12285_v12, %v12285_v12 }
 0x8ca   :  { %v961_v20 = vsel %vm111_vm0, %v959_v19, 0.0  ;;  %v960_v21 = vmul.f32 %v12287_v17, %v12287_v17 }
 0x8cb   :  { %962 = vadd.xlane.f32.xlu0 %v961_v20 }
 0x8cc   :  { %v964_v22 = vsel %vm115_vm1, %v960_v21, 0.0 }
 0x8cd   :  { %965 = vadd.xlane.f32.xlu1 %v964_v22 }
 0x958   :  { %v963_v24 = vpop.xlane.xlu0 %962 }
 0x959   :  { %v967_v25 = vmul.f32 0.03125, %v963_v24 }
 0x95a   :  { %v966_v27 = vpop.xlane.xlu1 %965 }
 0x95b   :  { %v969_v28 = vadd.f32 1e-06, %v967_v25  ;;  %v968_v29 = vmul.f32 0.03125, %v966_v27 }
 0x95d   :  { %11583 = vrsqrt.f32 %v969_v28  ;;  %v970_v30 = vadd.f32 1e-06, %v968_v29 }
 0x95f   :  { %11585 = vrsqrt.f32 %v970_v30 }
 0x967   :  { %v11584_v31 = vpop.eup %11583 }
 0x968   :  { %v973_v32 = vmul.f32 %v11584_v31, %v12285_v12 }
 0x969   :  { %v11586_v33 = vpop.eup %11585 }
 0x96a   :  { %v974_v35 = vmul.f32 %v11586_v33, %v12287_v17  ;;  %v981_v36 = vmul.f32 %v9585_v34, %v973_v32 }
 0x96c   :  { %v982_v37 = vmul.f32 %v9585_v34, %v974_v35 }
 0x96e   :  { %v993_v38 = vpack.c.bf16 %v982_v37, %v981_v36 }
 0x970   :  { %10422 = vmatmul.mubr.msk.bf16.vlgmr.msra.gmra.mrb[32].mxu0 %vm111_vm0, %v993_v38 }
 0x971   :  { %10427 = vmatprep.mubr.msk.bf16.mxu0 %vm11917_vm2, %v11916_v8 }
 0xa43   :  { %v1043_v39 = vpop.f32.mrb[32].mxu0 }
 0xa44   :  { %v10423_v40 = vpop.f32.mrb[33].mxu0 }
 0xa45   :  { %v1046_v41 = vpop.f32.mrb[34].mxu0 }
 0xa46   :  { %v12311_v43 = vpack.c.bf16 %v1046_v41, %v1043_v39  ;;  %v10424_v45 = vpop.f32.mrb[35].mxu0 }
 0xa48   :  { %1175 = vrot.lane.b32.xlu1 %v12311_v43, %s14265_s4  ;;  %1052 = vrot.lane.b32.xlu0 %v12311_v43, %s14263_s0  ;;  %s14323_s4 = smov 8   ;;  %s14324_s0 = smov 16  }
 0xa4c   :  { %1173 = vrot.lane.b32.xlu1 %v12311_v43, %s14316_s5  ;;  %1298 = vrot.lane.b32.xlu0 %v12311_v43, %s14317_s6 }
 0xa50   :  { %1296 = vrot.lane.b32.xlu1 %v12311_v43, %s14318_s26  ;;  %1421 = vrot.lane.b32.xlu0 %v12311_v43, %s14319_s7 }
 0xa54   :  { %1419 = vrot.lane.b32.xlu1 %v12311_v43, %s14320_s25 }
 0xaba   :  { %v1053_v46 = vpop.permute.xlu0 %1052  ;;  %v1176_v48 = vpop.permute.xlu1 %1175 }
 0xabb   :  { %v1058_v47 = vsel %vm205_vm3, %v1053_v46, 0  ;;  %v1181_v50 = vsel %vm205_vm3, %v1176_v48, 0 }
 0xabc   :  { %10426 = vmatpush3.bf16.xpose.msra.mxu0 %v1058_v47 }
 0xabd   :  { %10437 = vmatprep.subr.bf16.mxu0 %v11916_v8 }
 0xabe   :  { %v1299_v51 = vpop.permute.xlu0 %1298  ;;  %v1174_v52 = vpop.permute.xlu1 %1173 }
 0xabf   :  { %v1304_v53 = vsel %vm205_vm3, %v1299_v51, 0 }
 0xac2   :  { %v1422_v55 = vpop.permute.xlu0 %1421  ;;  %v1297_v56 = vpop.permute.xlu1 %1296 }
 0xac3   :  { %10428 = vmatmul.mubr.msk.bf16.vlgmr.msra.gmra.mrb[36].mxu0 %vm205_vm3, %v12311_v43  ;;  %v1427_v57 = vsel %vm205_vm3, %v1422_v55, 0 }
 0xac4   :  { %10438 = vmatpush3.bf16.xpose.msra.mxu0 %v1181_v50  ;;  %10439 = vmatprep.mubr.msk.bf16.mxu0 %vm11917_vm2, %v11916_v8 }
 0xac5   :  { %10449 = vmatprep.subr.bf16.mxu0 %v11916_v8 }
 0xac6   :  { %v1420_v58 = vpop.permute.xlu1 %1419 }
 0xacb   :  { %10440 = vmatmul.mubr.msk.bf16.vlgmr.msra.gmra.mrb[40].mxu0 %vm205_vm3, %v1174_v52 }
 0xacc   :  { %10450 = vmatpush3.bf16.xpose.msra.mxu0 %v1304_v53  ;;  %10451 = vmatprep.mubr.msk.bf16.mxu0 %vm11917_vm2, %v11916_v8 }
 0xacd   :  { %10461 = vmatprep.subr.bf16.mxu0 %v11916_v8 }
 0xad3   :  { %10452 = vmatmul.mubr.msk.bf16.vlgmr.msra.gmra.mrb[44].mxu0 %vm205_vm3, %v1297_v56 }
 0xad4   :  { %10462 = vmatpush3.bf16.xpose.msra.mxu0 %v1427_v57  ;;  %10463 = vmatprep.mubr.msk.bf16.mxu0 %vm11917_vm2, %v11916_v8 }
 0xad5   :  { %10473 = vmatprep.subr.bf16.mxu0 %v11916_v8 }
 0xadb   :  { %10464 = vmatmul.mubr.msk.bf16.vlgmr.msra.gmra.mrb[48].mxu0 %vm205_vm3, %v1420_v58 }
 0xadc   :  { %10477 = vmatprep.mubr.msk.bf16.mxu0 %vm11917_vm2, %v11916_v8 }
 0xb96   :  { %v1094_v59 = vpop.f32.mrb[36].mxu0 }
 0xb97   :  { %v10429_v60 = vpop.f32.mrb[37].mxu0  ;;  %v1095_v61 = vadd.f32 %v1094_v59, %v12130_v42 }
 0xb98   :  { %v1097_v62 = vpop.f32.mrb[38].mxu0 }
 0xb99   :  { %v10430_v63 = vpop.f32.mrb[39].mxu0  ;;  %v1101_v0 = vsel %vm253_vm4, %v1095_v61, -inf  ;;  %v1098_v1 = vadd.f32 %v1097_v62, %v12135_v44 }
 0xb9a   :  { %1102 = vmax.xlane.f32.xlu0 %v1101_v0 }
 0xb9b   :  { %v1104_v4 = vsel %vm257_vm5, %v1098_v1, -inf }
 0xb9c   :  { %1105 = vmax.xlane.f32.xlu1 %v1104_v4 }
 0xb9e   :  { %v1217_v5 = vpop.f32.mrb[40].mxu0 }
 0xb9f   :  { %v10441_v6 = vpop.f32.mrb[41].mxu0  ;;  %v1218_v7 = vadd.f32 %v1217_v5, %v12141_v49 }
 0xba0   :  { %v1220_v9 = vpop.f32.mrb[42].mxu0 }
 0xba1   :  { %v10442_v10 = vpop.f32.mrb[43].mxu0  ;;  %v1224_v11 = vsel %vm253_vm4, %v1218_v7, -inf  ;;  %v1221_v42 = vadd.f32 %v1220_v9, %v12145_v54 }
 0xba2   :  { %1225 = vmax.xlane.f32.xlu0 %v1224_v11 }
 0xba3   :  { %v1227_v13 = vsel %vm257_vm5, %v1221_v42, -inf }
 0xba6   :  { %1228 = vmax.xlane.f32.xlu0 %v1227_v13  ;;  %v1340_v14 = vpop.f32.mrb[44].mxu0 }
 0xba7   :  { %v1341_v44 = vadd.f32 %v1340_v14, %v12158_v2  ;;  %v10453_v18 = vpop.f32.mrb[45].mxu0 }
 0xba8   :  { %v1343_v19 = vpop.f32.mrb[46].mxu0 }
 0xba9   :  { %v1344_v20 = vadd.f32 %v1343_v19, %v12160_v3  ;;  %v10454_v21 = vpop.f32.mrb[47].mxu0  ;;  %v1347_v49 = vsel %vm253_vm4, %v1341_v44, -inf }
 0xbaa   :  { %1348 = vmax.xlane.f32.xlu1 %v1347_v49 }
 0xbab   :  { %v1350_v22 = vsel %vm257_vm5, %v1344_v20, -inf }
 0xbac   :  { %1351 = vmax.xlane.f32.xlu0 %v1350_v22 }
 0xbae   :  { %v1463_v23 = vpop.f32.mrb[48].mxu0 }
 0xbaf   :  { %v1464_v54 = vadd.f32 %v1463_v23, %v12172_v15  ;;  %v10465_v26 = vpop.f32.mrb[49].mxu0 }
 0xbb0   :  { %v1466_v24 = vpop.f32.mrb[50].mxu0 }
 0xbb1   :  { %v1467_v25 = vadd.f32 %v1466_v24, %v12174_v16  ;;  %v10466_v27 = vpop.f32.mrb[51].mxu0  ;;  %v1470_v2 = vsel %vm253_vm4, %v1464_v54, -inf }
 0xbb2   :  { %1471 = vmax.xlane.f32.xlu1 %v1470_v2 }
 0xbb3   :  { %v1473_v3 = vsel %vm257_vm5, %v1467_v25, -inf }
 0xbb4   :  { %1474 = vmax.xlane.f32.xlu0 %v1473_v3 }
 0xbc3   :  { %1124 = vrot.lane.b32.xlu1 %v12311_v43, %s14259_s3  ;;  %s14322_s3 = smov 56  }
 0xc27   :  { %v1103_v28 = vpop.xlane.xlu0 %1102 }
 0xc28   :  { %v1107_v29 = vsub.f32 %v1095_v61, %v1103_v28 }
 0xc29   :  { %v1106_v30 = vpop.xlane.xlu1 %1105 }
 0xc2a   :  { %v1109_v31 = vmul.f32 1.442695, %v1107_v29  ;;  %v1108_v32 = vsub.f32 %v1098_v1, %v1106_v30 }
 0xc2c   :  { %11587 = vpow2.f32 %v1109_v31  ;;  %v1111_v15 = vmul.f32 1.442695, %v1108_v32 }
 0xc2e   :  { %11589 = vpow2.f32 %v1111_v15 }
 0xc2f   :  { %v1226_v33 = vpop.xlane.xlu0 %1225 }
 0xc30   :  { %v1230_v16 = vsub.f32 %v1218_v7, %v1226_v33 }
 0xc32   :  { %v1232_v34 = vmul.f32 1.442695, %v1230_v16 }
 0xc33   :  { %v1229_v35 = vpop.xlane.xlu0 %1228 }
 0xc34   :  { %11591 = vpow2.f32 %v1232_v34  ;;  %v1231_v36 = vsub.f32 %v1221_v42, %v1229_v35 }
 0xc36   :  { %v11588_v37 = vpop.eup %11587  ;;  %v1234_v38 = vmul.f32 1.442695, %v1231_v36 }
 0xc37   :  { %v1349_v39 = vpop.xlane.xlu1 %1348  ;;  %v1113_v40 = vsel %vm253_vm4, %v11588_v37, 0.0 }
 0xc38   :  { %v11590_v41 = vpop.eup %11589  ;;  %11593 = vpow2.f32 %v1234_v38  ;;  %v1353_v45 = vsub.f32 %v1341_v44, %v1349_v39  ;;  %1114 = vadd.xlane.f32.xlu1 %v1113_v40 }
 0xc39   :  { %v1352_v46 = vpop.xlane.xlu0 %1351  ;;  %v1116_v47 = vsel %vm257_vm5, %v11590_v41, 0.0 }
 0xc3a   :  { %v1355_v48 = vmul.f32 1.442695, %v1353_v45  ;;  %v1354_v50 = vsub.f32 %v1344_v20, %v1352_v46  ;;  %1117 = vadd.xlane.f32.xlu0 %v1116_v47 }
 0xc3c   :  { %11595 = vpow2.f32 %v1355_v48  ;;  %v1357_v51 = vmul.f32 1.442695, %v1354_v50 }
 0xc3e   :  { %v11592_v52 = vpop.eup %11591  ;;  %11597 = vpow2.f32 %v1357_v51 }
 0xc3f   :  { %v1472_v53 = vpop.xlane.xlu1 %1471  ;;  %v1236_v55 = vsel %vm253_vm4, %v11592_v52, 0.0 }
 0xc40   :  { %v1476_v56 = vsub.f32 %v1464_v54, %v1472_v53  ;;  %1237 = vadd.xlane.f32.xlu1 %v1236_v55 }
 0xc41   :  { %v1475_v57 = vpop.xlane.xlu0 %1474 }
 0xc42   :  { %v11594_v58 = vpop.eup %11593  ;;  %v1478_v59 = vmul.f32 1.442695, %v1476_v56  ;;  %v1477_v60 = vsub.f32 %v1467_v25, %v1475_v57 }
 0xc43   :  { %v1125_v61 = vpop.permute.xlu1 %1124  ;;  %v1239_v62 = vsel %vm257_vm5, %v11594_v58, 0.0 }
 0xc44   :  { %11599 = vpow2.f32 %v1478_v59  ;;  %v1480_v63 = vmul.f32 1.442695, %v1477_v60  ;;  %v1130_v0 = vsel %vm283_vm6, %v1125_v61, 0  ;;  %1240 = vadd.xlane.f32.xlu0 %v1239_v62 }
 0xc45   :  { %10432 = vmatpush3.bf16.msra.mxu1 %v1130_v0 }
 0xc46   :  { %v11596_v1 = vpop.eup %11595  ;;  %11601 = vpow2.f32 %v1480_v63  ;;  %10443 = vmatprep.subr.bf16.mxu1 %v11916_v8 }
 0xc47   :  { %v1359_v4 = vsel %vm253_vm4, %v11596_v1, 0.0 }
 0xc48   :  { %v11598_v5 = vpop.eup %11597  ;;  %1360 = vadd.xlane.f32.xlu1 %v1359_v4 }
 0xc49   :  { %v1362_v6 = vsel %vm257_vm5, %v11598_v5, 0.0 }
 0xc4a   :  { %1363 = vadd.xlane.f32.xlu0 %v1362_v6 }
 0xc4e   :  { %v11600_v7 = vpop.eup %11599 }
 0xc4f   :  { %v1482_v9 = vsel %vm253_vm4, %v11600_v7, 0.0 }
 0xc50   :  { %v11602_v10 = vpop.eup %11601  ;;  %1483 = vadd.xlane.f32.xlu1 %v1482_v9 }
 0xc51   :  { %v1485_v11 = vsel %vm257_vm5, %v11602_v10, 0.0 }
 0xc52   :  { %1486 = vadd.xlane.f32.xlu0 %v1485_v11 }
 0xc61   :  { %1370 = vrot.lane.b32.xlu1 %v12311_v43, %s14261_s30  ;;  %s14325_s30 = smov 24  }
 0xc65   :  { %1493 = vrot.lane.b32.xlu1 %v12311_v43, %s14321_s28 }
 0xc68   :  { %1247 = vrot.lane.b32.xlu0 %v12311_v43, %s14322_s3 }
 0xcc5   :  { %v1115_v42 = vpop.xlane.xlu1 %1114 }
 0xcc6   :  { %11603 = vrcp.f32 %v1115_v42 }
 0xcc7   :  { %v1118_v13 = vpop.xlane.xlu0 %1117 }
 0xcc8   :  { %11605 = vrcp.f32 %v1118_v13 }
 0xccd   :  { %v1238_v21 = vpop.xlane.xlu1 %1237 }
 0xcd0   :  { %v11604_v14 = vpop.eup %11603 }
 0xcd1   :  { %v1241_v18 = vpop.xlane.xlu0 %1240  ;;  %v1121_v19 = vmul.f32 %v11604_v14, %v11588_v37 }
 0xcd2   :  { %v11606_v44 = vpop.eup %11605  ;;  %11607 = vrcp.f32 %v1241_v18 }
 0xcd3   :  { %v1122_v20 = vmul.f32 %v11606_v44, %v11590_v41  ;;  %11609 = vrcp.f32 %v1238_v21 }
 0xcd5   :  { %v1123_v49 = vpack.c.bf16 %v1122_v20, %v1121_v19  ;;  %v1361_v43 = vpop.xlane.xlu1 %1360 }
 0xcd7   :  { %10434 = vmatmul.mubr.msk.bf16.vlgmr.msra.gmra.mrb[16].mxu1 %vm253_vm4, %v1123_v49  ;;  %v1364_v22 = vpop.xlane.xlu0 %1363 }
 0xcd8   :  { %10445 = vmatprep.mubr.msk.bf16.mxu1 %vm11917_vm2, %v11916_v8  ;;  %11611 = vrcp.f32 %v1364_v22 }
 0xcd9   :  { %11613 = vrcp.f32 %v1361_v43 }
 0xcdc   :  { %v11608_v23 = vpop.eup %11607 }
 0xcdd   :  { %v1484_v54 = vpop.xlane.xlu1 %1483  ;;  %v11610_v24 = vpop.eup %11609  ;;  %v1245_v25 = vmul.f32 %v11608_v23, %v11594_v58  ;;  %v11436_v58 = vld [vmem:[%s14215_s8 + $0x18] sm:$0xff]  }
 0xcde   :  { %v1244_v2 = vmul.f32 %v11610_v24, %v11592_v52  ;;  %v11435_v52 = vld [vmem:[%s14215_s8 + $0x10] sm:$0xff]   ;;  %s14326_s8 = sld [smem:[#allocation6_spill]] }
 0xcdf   :  { %v1487_v26 = vpop.xlane.xlu0 %1486  ;;  %10474 = vmatpush3.bf16.msra.mxu0 %v11435_v52 }
 0xce0   :  { %11615 = vrcp.f32 %v1487_v26  ;;  %v1246_v29 = vpack.c.bf16 %v1245_v25, %v1244_v2  ;;  %10475 = vmatprep.subr.bf16.mxu0 %v11916_v8 }
 0xce1   :  { %v1371_v28 = vpop.permute.xlu1 %1370  ;;  %11617 = vrcp.f32 %v1484_v54 }
 0xce2   :  { %v11612_v30 = vpop.eup %11611  ;;  %v1376_v31 = vsel %vm283_vm6, %v1371_v28, 0 }
 0xce3   :  { %v1248_v27 = vpop.permute.xlu0 %1247  ;;  %v11614_v32 = vpop.eup %11613  ;;  %v1368_v15 = vmul.f32 %v11612_v30, %v11598_v5  ;;  %10476 = vmatpush3.bf16.msra.mxu0 %v11436_v58 }
 0xce4   :  { %v1253_v3 = vsel %vm283_vm6, %v1248_v27, 0  ;;  %v1367_v33 = vmul.f32 %v11614_v32, %v11596_v1  ;;  %10489 = vmatprep.subr.bf16.mxu0 %v11916_v8  ;;  %v12426_v24 = vld [vmem:[%s14326_s8] sm:$0xff]  ;;  %s14329_s8 = sld [smem:[#allocation9_spill]] }
 0xce5   :  { %10444 = vmatpush3.bf16.msra.mxu1 %v1253_v3  ;;  %v1494_v16 = vpop.permute.xlu1 %1493  ;;  %v1828_v28 = vmul.f32 %v12426_v24, %v12426_v24  ;;  %v11441_v32 = vld [vmem:[%s14217_s10 + $0x20] sm:$0xff]  }
 0xce6   :  { %10455 = vmatprep.subr.bf16.mxu1 %v11916_v8  ;;  %v1369_v34 = vpack.c.bf16 %v1368_v15, %v1367_v33  ;;  %v1499_v36 = vsel %vm283_vm6, %v1494_v16, 0  ;;  %v11442_v15 = vld [vmem:[%s14217_s10 + $0x28] sm:$0xff]  }
 0xce7   :  { %v1829_v30 = vsel %vm111_vm0, %v1828_v28, 0.0 }
 0xce8   :  { %10446 = vmatmul.mubr.msk.bf16.vlgmr.msra.gmra.mrb[20].mxu1 %vm253_vm4, %v1246_v29 }
 0xce9   :  { %10456 = vmatpush3.bf16.msra.mxu1 %v1376_v31  ;;  %10457 = vmatprep.mubr.msk.bf16.mxu1 %vm11917_vm2, %v11916_v8  ;;  %v11438_v31 = vld [vmem:[%s14216_s9 + $0x18] sm:$0xff]  }
 0xcea   :  { %10467 = vmatprep.subr.bf16.mxu1 %v11916_v8  ;;  %v11616_v35 = vpop.eup %11615  ;;  %v12534_v28 = vld [vmem:[%s14329_s8] sm:$0xff] }
 0xceb   :  { %v11618_v37 = vpop.eup %11617  ;;  %v1491_v38 = vmul.f32 %v11616_v35, %v11602_v10 }
 0xcec   :  { %v1490_v39 = vmul.f32 %v11618_v37, %v11600_v7 }
 0xcee   :  { %v1492_v40 = vpack.c.bf16 %v1491_v38, %v1490_v39 }
 0xcf0   :  { %10458 = vmatmul.mubr.msk.bf16.vlgmr.msra.gmra.mrb[24].mxu1 %vm253_vm4, %v1369_v34 }
 0xcf1   :  { %10468 = vmatpush3.bf16.msra.mxu1 %v1499_v36  ;;  %10469 = vmatprep.mubr.msk.bf16.mxu1 %vm11917_vm2, %v11916_v8 }
 0xcf2   :  { %10481 = vmatprep.subr.bf16.mxu1 %v11916_v8 }
 0xcf8   :  { %10470 = vmatmul.mubr.msk.bf16.vlgmr.msra.gmra.mrb[28].mxu1 %vm253_vm4, %v1492_v40 }
 0xcf9   :  { %10485 = vmatprep.mubr.msk.bf16.mxu1 %vm11917_vm2, %v11916_v8 }
 0xdaa   :  { %v1166_v41 = vpop.f32.mrb[16].mxu1 }
 0xdab   :  { %v10435_v45 = vpop.f32.mrb[17].mxu1 }
 0xdac   :  { %v1169_v46 = vpop.f32.mrb[18].mxu1 }
 0xdad   :  { %v10436_v47 = vpop.f32.mrb[19].mxu1 }
 0xdae   :  { %v9609_v47 = vld [vmem:[%s14313_s29 + $0x3] ss:$0 sm:$0xff] }
 0xdbb   :  { %v1289_v48 = vpop.f32.mrb[20].mxu1 }
 0xdbc   :  { %v10447_v50 = vpop.f32.mrb[21].mxu1 }
 0xdbd   :  { %v1292_v51 = vpop.f32.mrb[22].mxu1 }
 0xdbe   :  { %v11376_v53 = vpack.i.bf16 %v1292_v51, %v1289_v48  ;;  %v10448_v55 = vpop.f32.mrb[23].mxu1 }
 0xdbf   :  { %v9631_v55 = vld [vmem:[%s14219_s12] ss:$0 sm:$0xff] }
 0xdc0   :  { %11377 = vrot.lane.b32.xlu0 %v11376_v53, %s14323_s4  ;;  %v11439_v53 = vld [vmem:[%s14220_s13] sm:$0xff]  }
 0xdc3   :  { %v1412_v56 = vpop.f32.mrb[24].mxu1 }
 0xdc4   :  { %v10459_v57 = vpop.f32.mrb[25].mxu1 }
 0xdc5   :  { %v1415_v59 = vpop.f32.mrb[26].mxu1 }
 0xdc6   :  { %v11381_v60 = vpack.i.bf16 %v1415_v59, %v1412_v56  ;;  %v10460_v61 = vpop.f32.mrb[27].mxu1  ;;  %v11440_v59 = vld [vmem:[%s14220_s13 + $0x8] sm:$0xff]  }
 0xdc7   :  { %v11443_v61 = vld [vmem:[%s14217_s10 + $0x30] sm:$0xff]  }
 0xdc8   :  { %11382 = vrot.lane.b32.xlu1 %v11381_v60, %s14324_s0 }
 0xdcb   :  { %v1535_v62 = vpop.f32.mrb[28].mxu1 }
 0xdcc   :  { %v10471_v63 = vpop.f32.mrb[29].mxu1 }
 0xdcd   :  { %v1538_v0 = vpop.f32.mrb[30].mxu1 }
 0xdce   :  { %v11386_v1 = vpack.i.bf16 %v1538_v0, %v1535_v62  ;;  %v10472_v4 = vpop.f32.mrb[31].mxu1  ;;  %v11444_v62 = vld [vmem:[%s14217_s10 + $0x38] sm:$0xff]   ;;  %s14335_s10 = sld [smem:[#allocation8_spill]] }
 0xdd0   :  { %11387 = vrot.lane.b32.xlu0 %v11386_v1, %s14325_s30 }
 0xe32   :  { %v11378_v5 = vpop.permute.xlu0 %11377 }
 0xe33   :  { %v11380_v7 = vunpack.i.h.bf16 %v11378_v5  ;;  %v11379_v9 = vunpack.i.l.bf16 %v11378_v5 }
 0xe35   :  { %v1567_v13 = vsel %vm205_vm3, %v1169_v46, %v11380_v7  ;;  %v1566_v14 = vsel %vm205_vm3, %v1166_v41, %v11379_v9 }
 0xe3a   :  { %v11383_v6 = vpop.permute.xlu1 %11382 }
 0xe3b   :  { %v11385_v10 = vunpack.i.h.bf16 %v11383_v6  ;;  %v11384_v11 = vunpack.i.l.bf16 %v11383_v6 }
 0xe3d   :  { %v1569_v19 = vsel %vm723_vm7, %v1567_v13, %v11385_v10  ;;  %v1568_v20 = vsel %vm723_vm7, %v1566_v14, %v11384_v11 }
 0xe42   :  { %v11388_v42 = vpop.permute.xlu0 %11387 }
 0xe43   :  { %v11390_v44 = vunpack.i.h.bf16 %v11388_v42  ;;  %v11389_v18 = vunpack.i.l.bf16 %v11388_v42 }
 0xe45   :  { %v1571_v21 = vsel %vm726_vm8, %v1569_v19, %v11390_v44  ;;  %v1570_v49 = vsel %vm726_vm8, %v1568_v20, %v11389_v18 }
 0xe46   :  { %v1572_v22 = vpack.c.bf16 %v1571_v21, %v1570_v49 }
 0xe48   :  { %10478 = vmatmul.mubr.msk.bf16.vlgmr.msra.gmra.mrb[52].mxu0 %vm111_vm0, %v1572_v22 }
 0xe49   :  { %10497 = vmatprep.mubr.msk.bf16.mxu0 %vm11917_vm2, %v11916_v8  ;;  %10490 = vmatpush3.bf16.msra.mxu0 %v11441_v32 }
 0xe4a   :  { %10491 = vmatprep.subr.bf16.mxu0 %v11916_v8 }
 0xe4d   :  { %10492 = vmatpush3.bf16.msra.mxu0 %v11442_v15 }
 0xe4e   :  { %10493 = vmatprep.subr.bf16.mxu0 %v11916_v8 }
 0xe51   :  { %10494 = vmatpush3.bf16.msra.mxu0 %v11443_v61 }
 0xe52   :  { %10495 = vmatprep.subr.bf16.mxu0 %v11916_v8 }
 0xe55   :  { %10496 = vmatpush3.bf16.msra.mxu0 %v11444_v62 }
 0xe56   :  { %10515 = vmatprep.subr.bf16.mxu0 %v11916_v8 }
 0xf1b   :  { %v1622_v43 = vpop.f32.mrb[52].mxu0 }
 0xf1c   :  { %v12421_v23 = vadd.f32 %v1622_v43, %v12285_v12  ;;  %v10479_v54 = vpop.f32.mrb[53].mxu0 }
 0xf1d   :  { %v1625_v26 = vpop.f32.mrb[54].mxu0 }
 0xf1e   :  { %v12429_v25 = vadd.f32 %v1625_v26, %v12287_v17  ;;  %v10480_v27 = vpop.f32.mrb[55].mxu0  ;;  %v1633_v2 = vmul.f32 %v12421_v23, %v12421_v23  ;;  %v11437_v17 = vld [vmem:[%s14216_s9 + $0x10] sm:$0xff]   ;;  %s14342_s9 = sld [smem:[#allocation9_spill]] }
 0xf1f   :  { %10482 = vmatpush3.bf16.msra.mxu1 %v11437_v17 }
 0xf20   :  { %v1635_v3 = vsel %vm111_vm0, %v1633_v2, 0.0  ;;  %v1634_v12 = vmul.f32 %v12429_v25, %v12429_v25  ;;  %10483 = vmatprep.subr.bf16.mxu1 %v11916_v8 }
 0xf21   :  { %1636 = vadd.xlane.f32.xlu1 %v1635_v3 }
 0xf22   :  { %v1638_v29 = vsel %vm115_vm1, %v1634_v12, 0.0 }
 0xf23   :  { %1639 = vadd.xlane.f32.xlu0 %v1638_v29  ;;  %10484 = vmatpush3.bf16.msra.mxu1 %v11438_v31 }
 0xf24   :  { %10501 = vmatprep.subr.bf16.mxu1 %v11916_v8 }
 0xf27   :  { %1830 = vadd.xlane.f32.xlu0 %v1829_v30 }
 0xfae   :  { %v1637_v33 = vpop.xlane.xlu1 %1636 }
 0xfaf   :  { %v1641_v16 = vmul.f32 0.03125, %v1637_v33  ;;  %v12541_v33 = vld [vmem:[%s14329_s8 + $0x8] sm:$0xff] }
 0xfb0   :  { %v1640_v34 = vpop.xlane.xlu0 %1639 }
 0xfb1   :  { %v1643_v35 = vadd.f32 1e-06, %v1641_v16  ;;  %v1642_v36 = vmul.f32 0.03125, %v1640_v34 }
 0xfb3   :  { %11619 = vrsqrt.f32 %v1643_v35  ;;  %v1644_v37 = vadd.f32 1e-06, %v1642_v36 }
 0xfb4   :  { %v1831_v38 = vpop.xlane.xlu0 %1830 }
 0xfb5   :  { %11621 = vrsqrt.f32 %v1644_v37  ;;  %v1832_v39 = vmul.f32 0.03125, %v1831_v38 }
 0xfb7   :  { %v1833_v40 = vadd.f32 1e-06, %v1832_v39  ;;  %v12548_v39 = vld [vmem:[%s14329_s8 + $0x10] sm:$0xff] }
 0xfb9   :  { %11623 = vrsqrt.f32 %v1833_v40 }
 0xfbd   :  { %v11620_v41 = vpop.eup %11619 }
 0xfbe   :  { %v1647_v45 = vmul.f32 %v11620_v41, %v12421_v23 }
 0xfbf   :  { %v11622_v46 = vpop.eup %11621 }
 0xfc0   :  { %v1648_v48 = vmul.f32 %v11622_v46, %v12429_v25  ;;  %v1655_v50 = vmul.f32 %v9609_v47, %v1647_v45 }
 0xfc2   :  { %v1656_v51 = vmul.f32 %v9609_v47, %v1648_v48 }
 0xfc3   :  { %v11624_v52 = vpop.eup %11623 }
 0xfc4   :  { %v1835_v56 = vmul.f32 %v11624_v52, %v12426_v24  ;;  %v1662_v57 = vpack.c.bf16 %v1656_v51, %v1655_v50  ;;  %v12555_v50 = vld [vmem:[%s14329_s8 + $0x18] sm:$0xff]  ;;  %s14338_s8 = sld [smem:[#allocation13_spill]] }
 0xfc6   :  { %10486 = vmatmul.mubr.msk.bf16.vlgmr.msra.gmra.mrb[32].mxu1 %vm111_vm0, %v1662_v57  ;;  %v1842_v58 = vmul.f32 %v9631_v55, %v1835_v56 }
 0xfc7   :  { %10502 = vmatpush3.bf16.msra.mxu1 %v11439_v53  ;;  %10505 = vmatprep.mubr.msk.bf16.mxu1 %vm11917_vm2, %v11916_v8 }
 0xfc8   :  { %10503 = vmatprep.subr.bf16.mxu1 %v11916_v8  ;;  %v1851_v60 = vpack.c.bf16 %v1842_v58, %v1842_v58 }
 0xfcb   :  { %10504 = vmatpush3.bf16.msra.mxu1 %v11440_v59 }
 0xfcc   :  { %10509 = vmatprep.subr.bf16.mxu1 %v11916_v8 }
 0xfce   :  { %10506 = vmatmul.mubr.msk.bf16.vlgmr.msra.gmra.mrb[36].mxu1 %vm111_vm0, %v1851_v60 }
 0xfcf   :  { %10511 = vmatprep.mubr.msk.bf16.mxu1 %vm11917_vm2, %v11916_v8 }
0x1099   :  { %v1712_v63 = vpop.f32.mrb[32].mxu1 }
0x109a   :  { %v10487_v0 = vpop.f32.mrb[33].mxu1  ;;  %v1719_v4 = vmax.f32 %v1712_v63, 0.0 }
0x109b   :  { %v1715_v1 = vpop.f32.mrb[34].mxu1 }
0x109c   :  { %v1720_v5 = vmax.f32 %v1715_v1, 0.0  ;;  %v10488_v6 = vpop.f32.mrb[35].mxu1 }
0x109e   :  { %v1730_v7 = vpack.c.bf16 %v1720_v5, %v1719_v4 }
0x10a0   :  { %10498 = vmatmul.mubr.msk.bf16.vlgmr.msra.gmra.mrb[56].mxu0 %vm910_vm9, %v1730_v7 }
0x10a1   :  { %v1901_v9 = vpop.f32.mrb[36].mxu1  ;;  %10517 = vmatprep.mubr.msk.bf16.mxu0 %vm11917_vm2, %v11916_v8 }
0x10a2   :  { %v12490_v10 = vpack.c.bf16 %v1901_v9, %v1901_v9  ;;  %v10507_v11 = vpop.f32.mrb[37].mxu1 }
0x10a3   :  { %v1904_v42 = vpop.f32.mrb[38].mxu1 }
0x10a4   :  { %2020 = vrot.lane.b32.xlu0 %v12490_v10, %s14327_s2  ;;  %1909 = vrot.lane.b32.xlu1 %v12490_v10, %s14328_s27  ;;  %v10508_v13 = vpop.f32.mrb[39].mxu1 }
0x10a8   :  { %2128 = vrot.lane.b32.xlu0 %v12490_v10, %s14318_s26  ;;  %2018 = vrot.lane.b32.xlu1 %v12490_v10, %s14316_s5 }
0x10ac   :  { %2238 = vrot.lane.b32.xlu0 %v12490_v10, %s14320_s25  ;;  %2130 = vrot.lane.b32.xlu1 %v12490_v10, %s14317_s6 }
0x10b0   :  { %2240 = vrot.lane.b32.xlu1 %v12490_v10, %s14319_s7 }
0x1116   :  { %v1910_v14 = vpop.permute.xlu1 %1909  ;;  %v2021_v18 = vpop.permute.xlu0 %2020 }
0x1117   :  { %v1915_v44 = vsel %vm205_vm3, %v1910_v14, 0  ;;  %v2026_v20 = vsel %vm205_vm3, %v2021_v18, 0 }
0x1118   :  { %10510 = vmatpush3.bf16.xpose.msra.mxu1 %v1915_v44 }
0x1119   :  { %10521 = vmatprep.subr.bf16.mxu1 %v11916_v8 }
0x111a   :  { %v2019_v19 = vpop.permute.xlu1 %2018  ;;  %v2129_v43 = vpop.permute.xlu0 %2128 }
0x111e   :  { %v2131_v21 = vpop.permute.xlu1 %2130  ;;  %v2239_v26 = vpop.permute.xlu0 %2238 }
0x111f   :  { %10512 = vmatmul.mubr.msk.bf16.vlgmr.msra.gmra.mrb[40].mxu1 %vm205_vm3, %v12490_v10  ;;  %v2136_v49 = vsel %vm205_vm3, %v2131_v21, 0 }
0x1120   :  { %10522 = vmatpush3.bf16.xpose.msra.mxu1 %v2026_v20  ;;  %10523 = vmatprep.mubr.msk.bf16.mxu1 %vm11917_vm2, %v11916_v8 }
0x1121   :  { %10533 = vmatprep.subr.bf16.mxu1 %v11916_v8 }
0x1122   :  { %v2241_v22 = vpop.permute.xlu1 %2240 }
0x1123   :  { %v2246_v54 = vsel %vm205_vm3, %v2241_v22, 0 }
0x1127   :  { %10524 = vmatmul.mubr.msk.bf16.vlgmr.msra.gmra.mrb[44].mxu1 %vm205_vm3, %v2019_v19 }
0x1128   :  { %10534 = vmatpush3.bf16.xpose.msra.mxu1 %v2136_v49  ;;  %10535 = vmatprep.mubr.msk.bf16.mxu1 %vm11917_vm2, %v11916_v8 }
0x1129   :  { %10545 = vmatprep.subr.bf16.mxu1 %v11916_v8 }
0x112f   :  { %10536 = vmatmul.mubr.msk.bf16.vlgmr.msra.gmra.mrb[48].mxu1 %vm205_vm3, %v2129_v43 }
0x1130   :  { %10546 = vmatpush3.bf16.xpose.msra.mxu1 %v2246_v54  ;;  %10547 = vmatprep.mubr.msk.bf16.mxu1 %vm11917_vm2, %v11916_v8 }
0x1131   :  { %10557 = vmatprep.subr.bf16.mxu1 %v11916_v8 }
0x1137   :  { %10548 = vmatmul.mubr.msk.bf16.vlgmr.msra.gmra.mrb[52].mxu1 %vm205_vm3, %v2239_v26 }
0x1138   :  { %10561 = vmatprep.mubr.msk.bf16.mxu1 %vm11917_vm2, %v11916_v8 }
0x1173   :  { %v12527_v27 = vpop.f32.mrb[56].mxu0 }
0x1174   :  { %v10499_v2 = vpop.f32.mrb[57].mxu0 }
0x1175   :  { %v12529_v3 = vpop.f32.mrb[58].mxu0 }
0x1176   :  { %v10500_v12 = vpop.f32.mrb[59].mxu0 }
0x11f2   :  { %v1951_v29 = vpop.f32.mrb[40].mxu1 }
0x11f3   :  { %v1952_v30 = vadd.f32 %v1951_v29, %v12534_v28  ;;  %v10513_v17 = vpop.f32.mrb[41].mxu1 }
0x11f4   :  { %v1954_v31 = vpop.f32.mrb[42].mxu1 }
0x11f5   :  { %v10514_v32 = vpop.f32.mrb[43].mxu1  ;;  %v1957_v15 = vsel %vm205_vm3, %v1952_v30, -inf }
0x11f6   :  { %1958 = vmax.xlane.f32.xlu1 %v1957_v15 }
0x11fa   :  { %v2062_v16 = vpop.f32.mrb[44].mxu1 }
0x11fb   :  { %v2063_v34 = vadd.f32 %v2062_v16, %v12541_v33  ;;  %v10525_v35 = vpop.f32.mrb[45].mxu1 }
0x11fc   :  { %v2065_v36 = vpop.f32.mrb[46].mxu1 }
0x11fd   :  { %v10526_v37 = vpop.f32.mrb[47].mxu1  ;;  %v2068_v38 = vsel %vm205_vm3, %v2063_v34, -inf }
0x11fe   :  { %2069 = vmax.xlane.f32.xlu0 %v2068_v38 }
0x1202   :  { %v2172_v40 = vpop.f32.mrb[48].mxu1 }
0x1203   :  { %v2173_v41 = vadd.f32 %v2172_v40, %v12548_v39  ;;  %v10537_v45 = vpop.f32.mrb[49].mxu1 }
0x1204   :  { %v2175_v46 = vpop.f32.mrb[50].mxu1 }
0x1205   :  { %v10538_v47 = vpop.f32.mrb[51].mxu1  ;;  %v2178_v48 = vsel %vm205_vm3, %v2173_v41, -inf }
0x1206   :  { %2179 = vmax.xlane.f32.xlu0 %v2178_v48 }
0x120a   :  { %v2282_v51 = vpop.f32.mrb[52].mxu1 }
0x120b   :  { %v2283_v52 = vadd.f32 %v2282_v51, %v12555_v50  ;;  %v10549_v53 = vpop.f32.mrb[53].mxu1 }
0x120c   :  { %v2285_v55 = vpop.f32.mrb[54].mxu1 }
0x120d   :  { %v10550_v56 = vpop.f32.mrb[55].mxu1  ;;  %v2288_v57 = vsel %vm205_vm3, %v2283_v52, -inf }
0x120e   :  { %2289 = vmax.xlane.f32.xlu1 %v2288_v57  ;;  %v11445_v56 = vld [vmem:[%s14221_s14] sm:$0xff]   ;;  %v11446_v57 = vld [vmem:[%s14221_s14 + $0x8] sm:$0xff]  }
0x120f   :  { %10558 = vmatpush3.bf16.msra.mxu1 %v11445_v56 }
0x1210   :  { %10559 = vmatprep.subr.bf16.mxu1 %v11916_v8 }
0x1213   :  { %10560 = vmatpush3.bf16.msra.mxu1 %v11446_v57 }
0x1214   :  { %10573 = vmatprep.subr.bf16.mxu1 %v11916_v8 }
0x1283   :  { %v1959_v58 = vpop.xlane.xlu1 %1958 }
0x1284   :  { %v1960_v59 = vsub.f32 %v1952_v30, %v1959_v58 }
0x1286   :  { %v1961_v60 = vmul.f32 1.442695, %v1960_v59 }
0x1288   :  { %11625 = vpow2.f32 %v1961_v60 }
0x128b   :  { %v2070_v61 = vpop.xlane.xlu0 %2069 }
0x128c   :  { %v2071_v62 = vsub.f32 %v2063_v34, %v2070_v61 }
0x128e   :  { %v2072_v63 = vmul.f32 1.442695, %v2071_v62 }
0x1290   :  { %11627 = vpow2.f32 %v2072_v63 }
0x1292   :  { %v11626_v0 = vpop.eup %11625 }
0x1293   :  { %v2180_v1 = vpop.xlane.xlu0 %2179  ;;  %v1963_v4 = vsel %vm205_vm3, %v11626_v0, 0.0 }
0x1294   :  { %v2181_v5 = vsub.f32 %v2173_v41, %v2180_v1  ;;  %1964 = vadd.xlane.f32.xlu0 %v1963_v4  ;;  %v1799_v4 = vadd.f32 %v12527_v27, %v12421_v23  ;;  %v11447_v27 = vld [vmem:[%s14223_s16] sm:$0xff]  }
0x1296   :  { %v2182_v6 = vmul.f32 1.442695, %v2181_v5  ;;  %v1802_v5 = vmul.f32 %v1799_v4, %v1799_v4 }
0x1298   :  { %11629 = vpow2.f32 %v2182_v6  ;;  %v1804_v6 = vsel %vm111_vm0, %v1802_v5, 0.0 }
0x129a   :  { %v11628_v7 = vpop.eup %11627 }
0x129b   :  { %v2074_v9 = vsel %vm205_vm3, %v11628_v7, 0.0  ;;  %v2290_v13 = vpop.xlane.xlu1 %2289 }
0x129c   :  { %2075 = vadd.xlane.f32.xlu1 %v2074_v9  ;;  %v2291_v14 = vsub.f32 %v2283_v52, %v2290_v13 }
0x129e   :  { %v2292_v44 = vmul.f32 1.442695, %v2291_v14 }
0x12a0   :  { %11631 = vpow2.f32 %v2292_v44 }
0x12a2   :  { %v11630_v11 = vpop.eup %11629 }
0x12a3   :  { %v2184_v42 = vsel %vm205_vm3, %v11630_v11, 0.0 }
0x12a4   :  { %2185 = vadd.xlane.f32.xlu0 %v2184_v42 }
0x12aa   :  { %v11632_v18 = vpop.eup %11631 }
0x12ab   :  { %v2294_v19 = vsel %vm205_vm3, %v11632_v18, 0.0 }
0x12ad   :  { %2080 = vrot.lane.b32.xlu1 %v12490_v10, %s14322_s3 }
0x12ba   :  { %1969 = vrot.lane.b32.xlu0 %v12490_v10, %s14330_s21 }
0x12be   :  { %2300 = vrot.lane.b32.xlu0 %v12490_v10, %s14321_s28 }
0x12d1   :  { %2295 = vadd.xlane.f32.xlu1 %v2294_v19 }
0x12e2   :  { %2190 = vrot.lane.b32.xlu1 %v12490_v10, %s14331_s24 }
0x1321   :  { %v1965_v20 = vpop.xlane.xlu0 %1964 }
0x1322   :  { %11633 = vrcp.f32 %v1965_v20 }
0x1329   :  { %v2076_v21 = vpop.xlane.xlu1 %2075 }
0x132a   :  { %11635 = vrcp.f32 %v2076_v21 }
0x132c   :  { %v11634_v49 = vpop.eup %11633 }
0x132d   :  { %v1967_v43 = vmul.f32 %v11634_v49, %v11626_v0  ;;  %v2081_v2 = vpop.permute.xlu1 %2080 }
0x132e   :  { %v2086_v30 = vsel %vm1974_vm10, %v2081_v2, 0 }
0x132f   :  { %v1968_v12 = vpack.c.bf16 %v1967_v43, %v1967_v43 }
0x1331   :  { %v2186_v22 = vpop.xlane.xlu0 %2185 }
0x1332   :  { %11637 = vrcp.f32 %v2186_v22 }
0x1334   :  { %v11636_v29 = vpop.eup %11635 }
0x1335   :  { %v1970_v54 = vpop.permute.xlu0 %1969  ;;  %v2078_v10 = vmul.f32 %v11636_v29, %v11628_v7  ;;  %v1800_v7 = vadd.f32 %v12529_v3, %v12429_v25  ;;  %v11448_v25 = vld [vmem:[%s14223_s16 + $0x8] sm:$0xff]  }
0x1336   :  { %v1976_v26 = vsel %vm1974_vm10, %v1970_v54, 0 }
0x1337   :  { %10516 = vmatpush3.bf16.msra.mxu0 %v1976_v26  ;;  %v2079_v17 = vpack.c.bf16 %v2078_v10, %v2078_v10  ;;  %v1803_v9 = vmul.f32 %v1800_v7, %v1800_v7 }
0x1338   :  { %10527 = vmatprep.subr.bf16.mxu0 %v11916_v8 }
0x1339   :  { %v2301_v35 = vpop.permute.xlu0 %2300 }
0x133a   :  { %10518 = vmatmul.mubr.msk.bf16.vlgmr.msra.gmra.mrb[60].mxu0 %vm205_vm3, %v1968_v12  ;;  %v2306_v37 = vsel %vm1974_vm10, %v2301_v35, 0  ;;  %v9630_v12 = vld [vmem:[%s14218_s11] ss:$0 sm:$0xff]  ;;  %s14332_s11 = sld [smem:[#allocation5_spill]] }
0x133b   :  { %10528 = vmatpush3.bf16.msra.mxu0 %v2086_v30  ;;  %10529 = vmatprep.mubr.msk.bf16.mxu0 %vm11917_vm2, %v11916_v8 }
0x133c   :  { %10539 = vmatprep.subr.bf16.mxu0 %v11916_v8  ;;  %v11638_v31 = vpop.eup %11637 }
0x133d   :  { %v2188_v15 = vmul.f32 %v11638_v31, %v11630_v11  ;;  %v1807_v11 = vsel %vm115_vm1, %v1803_v9, 0.0 }
0x133f   :  { %v2189_v36 = vpack.c.bf16 %v2188_v15, %v2188_v15 }
0x1342   :  { %10530 = vmatmul.mubr.msk.bf16.vlgmr.msra.gmra.mrb[64].mxu0 %vm205_vm3, %v2079_v17 }
0x1343   :  { %10541 = vmatprep.mubr.msk.bf16.mxu0 %vm11917_vm2, %v11916_v8 }
0x135e   :  { %v2296_v32 = vpop.xlane.xlu1 %2295 }
0x135f   :  { %11639 = vrcp.f32 %v2296_v32 }
0x1362   :  { %v2191_v16 = vpop.permute.xlu1 %2190 }
0x1363   :  { %v2196_v34 = vsel %vm1974_vm10, %v2191_v16, 0 }
0x1364   :  { %10540 = vmatpush3.bf16.msra.mxu0 %v2196_v34 }
0x1365   :  { %10551 = vmatprep.subr.bf16.mxu0 %v11916_v8 }
0x1367   :  { %10542 = vmatmul.mubr.msk.bf16.vlgmr.msra.gmra.mrb[68].mxu0 %vm205_vm3, %v2189_v36 }
0x1368   :  { %10552 = vmatpush3.bf16.msra.mxu0 %v2306_v37  ;;  %10553 = vmatprep.mubr.msk.bf16.mxu0 %vm11917_vm2, %v11916_v8  ;;  %v11449_v37 = vld [vmem:[%s14222_s15] sm:$0xff]  }
0x1369   :  { %v11640_v38 = vpop.eup %11639  ;;  %10565 = vmatprep.subr.bf16.mxu0 %v11916_v8 }
0x136a   :  { %v2298_v40 = vmul.f32 %v11640_v38, %v11632_v18 }
0x136c   :  { %v2299_v41 = vpack.c.bf16 %v2298_v40, %v2298_v40 }
0x136f   :  { %10554 = vmatmul.mubr.msk.bf16.vlgmr.msra.gmra.mrb[72].mxu0 %vm205_vm3, %v2299_v41 }
0x1370   :  { %10569 = vmatprep.mubr.msk.bf16.mxu0 %vm11917_vm2, %v11916_v8  ;;  %10566 = vmatpush3.bf16.msra.mxu0 %v11449_v37 }
0x1371   :  { %10567 = vmatprep.subr.bf16.mxu0 %v11916_v8 }
0x140d   :  { %v2012_v45 = vpop.f32.mrb[60].mxu0 }
0x140e   :  { %v10519_v46 = vpop.f32.mrb[61].mxu0 }
0x140f   :  { %v2015_v47 = vpop.f32.mrb[62].mxu0 }
0x1410   :  { %v10520_v48 = vpop.f32.mrb[63].mxu0 }
0x1415   :  { %v2122_v51 = vpop.f32.mrb[64].mxu0 }
0x1416   :  { %2349 = vrot.lane.b32.xlu1 %v2122_v51, %s14323_s4  ;;  %v10531_v52 = vpop.f32.mrb[65].mxu0 }
0x1417   :  { %v2125_v53 = vpop.f32.mrb[66].mxu0 }
0x1418   :  { %v10532_v55 = vpop.f32.mrb[67].mxu0  ;;  %v9647_v53 = vld [vmem:[%s14219_s12 + $0x1] ss:$0 sm:$0xff] }
0x143a   :  { %v2232_v58 = vpop.f32.mrb[68].mxu0 }
0x143b   :  { %2353 = vrot.lane.b32.xlu0 %v2232_v58, %s14324_s0  ;;  %v10543_v59 = vpop.f32.mrb[69].mxu0 }
0x143c   :  { %v2235_v60 = vpop.f32.mrb[70].mxu0 }
0x143d   :  { %v10544_v61 = vpop.f32.mrb[71].mxu0 }
0x1442   :  { %v2342_v62 = vpop.f32.mrb[72].mxu0 }
0x1443   :  { %2357 = vrot.lane.b32.xlu1 %v2342_v62, %s14325_s30  ;;  %v10555_v63 = vpop.f32.mrb[73].mxu0 }
0x1444   :  { %v2345_v0 = vpop.f32.mrb[74].mxu0 }
0x1445   :  { %v10556_v1 = vpop.f32.mrb[75].mxu0 }
0x145a   :  { %1805 = vadd.xlane.f32.xlu0 %v1804_v6 }
0x1467   :  { %1808 = vadd.xlane.f32.xlu1 %v1807_v11 }
0x1488   :  { %v2350_v42 = vpop.permute.xlu1 %2349 }
0x1489   :  { %v2360_v14 = vsel %vm205_vm3, %v2012_v45, %v2350_v42 }
0x14ad   :  { %v2354_v13 = vpop.permute.xlu0 %2353 }
0x14ae   :  { %v2361_v44 = vsel %vm723_vm7, %v2360_v14, %v2354_v13  ;;  %v12687_v14 = vld [vmem:[%s14315_s1] ss:$0 sm:$0xff]  ;;  %s14344_s1 = sld [smem:[#allocation17_spill]] }
0x14b5   :  { %v2358_v18 = vpop.permute.xlu1 %2357 }
0x14b6   :  { %v2362_v23 = vsel %vm726_vm8, %v2361_v44, %v2358_v18 }
0x14b7   :  { %v2363_v19 = vpack.c.bf16 %v2362_v23, %v2362_v23 }
0x14b9   :  { %10562 = vmatmul.mubr.msk.bf16.vlgmr.msra.gmra.mrb[56].mxu1 %vm111_vm0, %v2363_v19 }
0x14ba   :  { %10574 = vmatpush3.bf16.msra.mxu1 %v11447_v27  ;;  %10577 = vmatprep.mubr.msk.bf16.mxu1 %vm11917_vm2, %v11916_v8 }
0x14bb   :  { %10575 = vmatprep.subr.bf16.mxu1 %v11916_v8 }
0x14be   :  { %10576 = vmatpush3.bf16.msra.mxu1 %v11448_v25 }
0x14bf   :  { %10587 = vmatprep.subr.bf16.mxu1 %v11916_v8 }
0x14e7   :  { %v1806_v3 = vpop.xlane.xlu0 %1805 }
0x14e8   :  { %v1810_v20 = vmul.f32 0.03125, %v1806_v3 }
0x14ea   :  { %v1812_v21 = vadd.f32 1e-06, %v1810_v20 }
0x14ec   :  { %11641 = vrsqrt.f32 %v1812_v21 }
0x14f4   :  { %v1809_v49 = vpop.xlane.xlu1 %1808 }
0x14f5   :  { %v1811_v22 = vmul.f32 0.03125, %v1809_v49 }
0x14f6   :  { %v11642_v54 = vpop.eup %11641 }
0x14f7   :  { %v1813_v43 = vadd.f32 1e-06, %v1811_v22  ;;  %v1816_v26 = vmul.f32 %v11642_v54, %v1799_v4 }
0x14f9   :  { %11643 = vrsqrt.f32 %v1813_v43  ;;  %v1824_v30 = vmul.f32 %v9630_v12, %v1816_v26 }
0x1503   :  { %v11644_v2 = vpop.eup %11643 }
0x1504   :  { %v1817_v29 = vmul.f32 %v11644_v2, %v1800_v7 }
0x1506   :  { %v1825_v10 = vmul.f32 %v9630_v12, %v1817_v29 }
0x1508   :  { %v12625_v17 = vpack.c.bf16 %v1825_v10, %v1824_v30 }
0x150a   :  { %10578 = vmatmul.mubr.msk.bf16.vlgmr.msra.gmra.mrb[60].mxu1 %vm111_vm0, %v12625_v17 }
0x150b   :  { %10589 = vmatprep.mubr.msk.bf16.mxu1 %vm11917_vm2, %v11916_v8 }
0x158c   :  { %v2413_v31 = vpop.f32.mrb[56].mxu1 }
0x158d   :  { %v12632_v32 = vadd.f32 %v2413_v31, %v12426_v24  ;;  %v10563_v15 = vpop.f32.mrb[57].mxu1  ;;  %v11450_v24 = vld [vmem:[%s14222_s15 + $0x8] sm:$0xff]  }
0x158e   :  { %v2416_v16 = vpop.f32.mrb[58].mxu1  ;;  %10568 = vmatpush3.bf16.msra.mxu0 %v11450_v24 }
0x158f   :  { %v10564_v34 = vpop.f32.mrb[59].mxu1  ;;  %v2422_v35 = vmul.f32 %v12632_v32, %v12632_v32  ;;  %10581 = vmatprep.subr.bf16.mxu0 %v11916_v8 }
0x1591   :  { %v2423_v36 = vsel %vm111_vm0, %v2422_v35, 0.0 }
0x1592   :  { %2424 = vadd.xlane.f32.xlu0 %v2423_v36 }
0x15dd   :  { %v2555_v38 = vpop.f32.mrb[60].mxu1 }
0x15de   :  { %v10579_v40 = vpop.f32.mrb[61].mxu1 }
0x15df   :  { %v2558_v41 = vpop.f32.mrb[62].mxu1 }
0x15e0   :  { %v12645_v45 = vpack.c.bf16 %v2558_v41, %v2555_v38  ;;  %v10580_v46 = vpop.f32.mrb[63].mxu1 }
0x15e2   :  { %2674 = vrot.lane.b32.xlu0 %v12645_v45, %s14316_s5  ;;  %v2568_v58 = vsel %vm205_vm3, %v12645_v45, 0 }
0x161f   :  { %v2425_v47 = vpop.xlane.xlu0 %2424 }
0x1620   :  { %v2426_v48 = vmul.f32 0.03125, %v2425_v47 }
0x1622   :  { %v2427_v51 = vadd.f32 1e-06, %v2426_v48 }
0x1624   :  { %11645 = vrsqrt.f32 %v2427_v51 }
0x162e   :  { %v11646_v52 = vpop.eup %11645 }
0x162f   :  { %v2429_v55 = vmul.f32 %v11646_v52, %v12632_v32 }
0x1631   :  { %v2436_v56 = vmul.f32 %v9647_v53, %v2429_v55 }
0x1633   :  { %v2449_v57 = vpack.c.bf16 %v2436_v56, %v2436_v56 }
0x1635   :  { %10570 = vmatmul.mubr.msk.bf16.vlgmr.msra.gmra.mrb[76].mxu0 %vm111_vm0, %v2449_v57 }
0x1636   :  { %10582 = vmatpush3.bf16.xpose.msra.mxu0 %v2568_v58  ;;  %10583 = vmatprep.mubr.msk.bf16.mxu0 %vm11917_vm2, %v11916_v8 }
0x1637   :  { %10593 = vmatprep.subr.bf16.mxu0 %v11916_v8 }
0x1654   :  { %v2675_v60 = vpop.permute.xlu0 %2674 }
0x1655   :  { %v2680_v1 = vsel %vm205_vm3, %v2675_v60, 0 }
0x1708   :  { %v2499_v59 = vpop.f32.mrb[76].mxu0 }
0x1709   :  { %v2562_v61 = vpack.c.bf16 %v2499_v59, %v2499_v59  ;;  %v10571_v62 = vpop.f32.mrb[77].mxu0 }
0x170a   :  { %v2502_v63 = vpop.f32.mrb[78].mxu0 }
0x170b   :  { %2672 = vrot.lane.b32.xlu1 %v2562_v61, %s14316_s5  ;;  %v10572_v0 = vpop.f32.mrb[79].mxu0  ;;  %2782 = vrot.lane.b32.xlu0 %v2562_v61, %s14318_s26 }
0x170c   :  { %10584 = vmatmul.mubr.msk.bf16.vlgmr.msra.gmra.mrb[80].mxu0 %vm205_vm3, %v2562_v61 }
0x170d   :  { %10594 = vmatpush3.bf16.xpose.msra.mxu0 %v2680_v1  ;;  %10595 = vmatprep.mubr.msk.bf16.mxu0 %vm11917_vm2, %v11916_v8 }
0x170e   :  { %10605 = vmatprep.subr.bf16.mxu0 %v11916_v8 }
0x170f   :  { %2784 = vrot.lane.b32.xlu1 %v12645_v45, %s14318_s26  ;;  %2892 = vrot.lane.b32.xlu0 %v2562_v61, %s14320_s25 }
0x1713   :  { %2894 = vrot.lane.b32.xlu1 %v12645_v45, %s14320_s25 }
0x177d   :  { %v2673_v4 = vpop.permute.xlu1 %2672  ;;  %v2783_v9 = vpop.permute.xlu0 %2782 }
0x177e   :  { %10596 = vmatmul.mubr.msk.bf16.vlgmr.msra.gmra.mrb[84].mxu0 %vm205_vm3, %v2673_v4 }
0x177f   :  { %10607 = vmatprep.mubr.msk.bf16.mxu0 %vm11917_vm2, %v11916_v8 }
0x1781   :  { %v2785_v5 = vpop.permute.xlu1 %2784  ;;  %v2893_v42 = vpop.permute.xlu0 %2892 }
0x1782   :  { %v2790_v6 = vsel %vm205_vm3, %v2785_v5, 0 }
0x1783   :  { %10606 = vmatpush3.bf16.xpose.msra.mxu0 %v2790_v6 }
0x1784   :  { %10617 = vmatprep.subr.bf16.mxu0 %v11916_v8 }
0x1785   :  { %v2895_v7 = vpop.permute.xlu1 %2894 }
0x1786   :  { %v2900_v11 = vsel %vm205_vm3, %v2895_v7, 0 }
0x178a   :  { %10608 = vmatmul.mubr.msk.bf16.vlgmr.msra.gmra.mrb[88].mxu0 %vm205_vm3, %v2783_v9 }
0x178b   :  { %10618 = vmatpush3.bf16.xpose.msra.mxu0 %v2900_v11  ;;  %10619 = vmatprep.mubr.msk.bf16.mxu0 %vm11917_vm2, %v11916_v8 }
0x178c   :  { %10629 = vmatprep.subr.bf16.mxu0 %v11916_v8 }
0x1792   :  { %10620 = vmatmul.mubr.msk.bf16.vlgmr.msra.gmra.mrb[92].mxu0 %vm205_vm3, %v2893_v42 }
0x1793   :  { %10633 = vmatprep.mubr.msk.bf16.mxu0 %vm11917_vm2, %v11916_v8 }
0x17df   :  { %v2604_v13 = vpop.f32.mrb[80].mxu0 }
0x17e0   :  { %v2605_v44 = vadd.f32 %v12687_v14, %v2604_v13  ;;  %v10585_v18 = vpop.f32.mrb[81].mxu0 }
0x17e1   :  { %v2607_v23 = vpop.f32.mrb[82].mxu0 }
0x17e2   :  { %v10586_v27 = vpop.f32.mrb[83].mxu0  ;;  %v2610_v19 = vsel %vm253_vm4, %v2605_v44, -inf }
0x17e3   :  { %2611 = vmax.xlane.f32.xlu1 %v2610_v19 }
0x1851   :  { %v2716_v25 = vpop.f32.mrb[84].mxu0 }
0x1852   :  { %v2717_v3 = vadd.f32 %v12687_v14, %v2716_v25  ;;  %v10597_v20 = vpop.f32.mrb[85].mxu0 }
0x1853   :  { %v2719_v21 = vpop.f32.mrb[86].mxu0 }
0x1854   :  { %v10598_v49 = vpop.f32.mrb[87].mxu0  ;;  %v2722_v22 = vsel %vm253_vm4, %v2717_v3, -inf }
0x1855   :  { %2723 = vmax.xlane.f32.xlu0 %v2722_v22 }
0x185d   :  { %v2826_v43 = vpop.f32.mrb[88].mxu0 }
0x185e   :  { %v2827_v54 = vadd.f32 %v12687_v14, %v2826_v43  ;;  %v10609_v26 = vpop.f32.mrb[89].mxu0 }
0x185f   :  { %v2829_v2 = vpop.f32.mrb[90].mxu0 }
0x1860   :  { %v10610_v12 = vpop.f32.mrb[91].mxu0  ;;  %v2832_v29 = vsel %vm253_vm4, %v2827_v54, -inf }
0x1861   :  { %2833 = vmax.xlane.f32.xlu0 %v2832_v29 }
0x1865   :  { %v2936_v30 = vpop.f32.mrb[92].mxu0 }
0x1866   :  { %v2937_v10 = vadd.f32 %v12687_v14, %v2936_v30  ;;  %v10621_v31 = vpop.f32.mrb[93].mxu0 }
0x1867   :  { %v2939_v15 = vpop.f32.mrb[94].mxu0  ;;  %v11451_v31 = vld [vmem:[%s14224_s17] sm:$0xff]  }
0x1868   :  { %v10622_v16 = vpop.f32.mrb[95].mxu0  ;;  %v2942_v34 = vsel %vm253_vm4, %v2937_v10, -inf  ;;  %10630 = vmatpush3.bf16.msra.mxu0 %v11451_v31  ;;  %v11452_v15 = vld [vmem:[%s14224_s17 + $0x8] sm:$0xff]   ;;  %v9676_v31 = vld [vmem:[%s14219_s12 + $0x3] ss:$0 sm:$0xff] }
0x1869   :  { %2943 = vmax.xlane.f32.xlu1 %v2942_v34  ;;  %10631 = vmatprep.subr.bf16.mxu0 %v11916_v8 }
0x186c   :  { %10632 = vmatpush3.bf16.msra.mxu0 %v11452_v15 }
0x186d   :  { %10645 = vmatprep.subr.bf16.mxu0 %v11916_v8 }
0x1870   :  { %v2612_v35 = vpop.xlane.xlu1 %2611 }
0x1871   :  { %v2613_v36 = vsub.f32 %v2605_v44, %v2612_v35 }
0x1873   :  { %v2614_v37 = vmul.f32 1.442695, %v2613_v36 }
0x1875   :  { %11647 = vpow2.f32 %v2614_v37 }
0x187f   :  { %v11648_v24 = vpop.eup %11647 }
0x1880   :  { %v2616_v38 = vsel %vm253_vm4, %v11648_v24, 0.0 }
0x1881   :  { %2617 = vadd.xlane.f32.xlu0 %v2616_v38 }
0x18e2   :  { %v2724_v40 = vpop.xlane.xlu0 %2723 }
0x18e3   :  { %v2725_v41 = vsub.f32 %v2717_v3, %v2724_v40 }
0x18e5   :  { %v2726_v46 = vmul.f32 1.442695, %v2725_v41 }
0x18e7   :  { %11649 = vpow2.f32 %v2726_v46 }
0x18ee   :  { %v2834_v47 = vpop.xlane.xlu0 %2833 }
0x18ef   :  { %v2835_v48 = vsub.f32 %v2827_v54, %v2834_v47 }
0x18f1   :  { %v11650_v51 = vpop.eup %11649  ;;  %v2836_v52 = vmul.f32 1.442695, %v2835_v48 }
0x18f2   :  { %v2728_v53 = vsel %vm253_vm4, %v11650_v51, 0.0 }
0x18f3   :  { %11651 = vpow2.f32 %v2836_v52  ;;  %2729 = vadd.xlane.f32.xlu1 %v2728_v53 }
0x18f6   :  { %v2944_v57 = vpop.xlane.xlu1 %2943 }
0x18f7   :  { %v2945_v58 = vsub.f32 %v2937_v10, %v2944_v57 }
0x18f9   :  { %v2946_v59 = vmul.f32 1.442695, %v2945_v58 }
0x18fb   :  { %11653 = vpow2.f32 %v2946_v59 }
0x18fd   :  { %v11652_v55 = vpop.eup %11651 }
0x18fe   :  { %v2838_v56 = vsel %vm253_vm4, %v11652_v55, 0.0 }
0x18ff   :  { %2839 = vadd.xlane.f32.xlu0 %v2838_v56 }
0x1904   :  { %2734 = vrot.lane.b32.xlu1 %v12645_v45, %s14327_s2 }
0x1905   :  { %v11654_v60 = vpop.eup %11653 }
0x1906   :  { %v2948_v61 = vsel %vm253_vm4, %v11654_v60, 0.0 }
0x190e   :  { %v2618_v62 = vpop.xlane.xlu0 %2617 }
0x190f   :  { %11655 = vrcp.f32 %v2618_v62  ;;  %v11453_v62 = vld [vmem:[%s14225_s18] sm:$0xff]  }
0x1915   :  { %2623 = vrot.lane.b32.xlu0 %v12645_v45, %s14328_s27 }
0x1919   :  { %2954 = vrot.lane.b32.xlu0 %v12645_v45, %s14319_s7  ;;  %v11656_v0 = vpop.eup %11655 }
0x191a   :  { %v2620_v4 = vmul.f32 %v11656_v0, %v11648_v24  ;;  %v11456_v0 = vld [vmem:[%s14226_s19 + $0x8] sm:$0xff]  }
0x191c   :  { %v2621_v9 = vpack.c.bf16 %v2620_v4, %v2620_v4 }
0x1928   :  { %2949 = vadd.xlane.f32.xlu1 %v2948_v61 }
0x1939   :  { %2844 = vrot.lane.b32.xlu1 %v12645_v45, %s14317_s6 }
0x1980   :  { %v2730_v63 = vpop.xlane.xlu1 %2729 }
0x1981   :  { %11657 = vrcp.f32 %v2730_v63  ;;  %v11454_v63 = vld [vmem:[%s14225_s18 + $0x8] sm:$0xff]  }
0x1984   :  { %v2735_v7 = vpop.permute.xlu1 %2734 }
0x1985   :  { %v2740_v42 = vsel %vm283_vm6, %v2735_v7, 0 }
0x198b   :  { %v11658_v11 = vpop.eup %11657 }
0x198c   :  { %v2840_v1 = vpop.xlane.xlu0 %2839  ;;  %v2732_v45 = vmul.f32 %v11658_v11, %v11650_v51 }
0x198d   :  { %11659 = vrcp.f32 %v2840_v1  ;;  %v11457_v1 = vld [vmem:[%s14226_s19 + $0x10] sm:$0xff]  }
0x198e   :  { %v2733_v13 = vpack.c.bf16 %v2732_v45, %v2732_v45 }
0x1990   :  { %v2624_v5 = vpop.permute.xlu0 %2623 }
0x1991   :  { %v2629_v6 = vsel %vm283_vm6, %v2624_v5, 0 }
0x1992   :  { %10588 = vmatpush3.bf16.msra.mxu1 %v2629_v6 }
0x1993   :  { %10599 = vmatprep.subr.bf16.mxu1 %v11916_v8 }
0x1994   :  { %v2955_v25 = vpop.permute.xlu0 %2954 }
0x1995   :  { %10590 = vmatmul.mubr.msk.bf16.vlgmr.msra.gmra.mrb[64].mxu1 %vm253_vm4, %v2621_v9  ;;  %v2960_v20 = vsel %vm283_vm6, %v2955_v25, 0  ;;  %v9666_v9 = vld [vmem:[%s14219_s12 + $0x2] ss:$0 sm:$0xff] }
0x1996   :  { %10600 = vmatpush3.bf16.msra.mxu1 %v2740_v42  ;;  %10601 = vmatprep.mubr.msk.bf16.mxu1 %vm11917_vm2, %v11916_v8 }
0x1997   :  { %10611 = vmatprep.subr.bf16.mxu1 %v11916_v8  ;;  %v11660_v44 = vpop.eup %11659 }
0x1998   :  { %v2842_v23 = vmul.f32 %v11660_v44, %v11652_v55 }
0x199a   :  { %v2843_v3 = vpack.c.bf16 %v2842_v23, %v2842_v23 }
0x199d   :  { %10602 = vmatmul.mubr.msk.bf16.vlgmr.msra.gmra.mrb[68].mxu1 %vm253_vm4, %v2733_v13  ;;  %v11458_v13 = vld [vmem:[%s14226_s19 + $0x18] sm:$0xff]  }
0x199e   :  { %10613 = vmatprep.mubr.msk.bf16.mxu1 %vm11917_vm2, %v11916_v8 }
0x19b5   :  { %v2950_v18 = vpop.xlane.xlu1 %2949 }
0x19b6   :  { %11661 = vrcp.f32 %v2950_v18 }
0x19b9   :  { %v2845_v27 = vpop.permute.xlu1 %2844 }
0x19ba   :  { %v2850_v19 = vsel %vm283_vm6, %v2845_v27, 0 }
0x19bb   :  { %10612 = vmatpush3.bf16.msra.mxu1 %v2850_v19 }
0x19bc   :  { %10623 = vmatprep.subr.bf16.mxu1 %v11916_v8 }
0x19be   :  { %10614 = vmatmul.mubr.msk.bf16.vlgmr.msra.gmra.mrb[72].mxu1 %vm253_vm4, %v2843_v3 }
0x19bf   :  { %10624 = vmatpush3.bf16.msra.mxu1 %v2960_v20  ;;  %10625 = vmatprep.mubr.msk.bf16.mxu1 %vm11917_vm2, %v11916_v8 }
0x19c0   :  { %v11662_v21 = vpop.eup %11661  ;;  %10637 = vmatprep.subr.bf16.mxu1 %v11916_v8 }
0x19c1   :  { %v2952_v49 = vmul.f32 %v11662_v21, %v11654_v60 }
0x19c3   :  { %v2953_v22 = vpack.c.bf16 %v2952_v49, %v2952_v49 }
0x19c6   :  { %10626 = vmatmul.mubr.msk.bf16.vlgmr.msra.gmra.mrb[76].mxu1 %vm253_vm4, %v2953_v22 }
0x19c7   :  { %10641 = vmatprep.mubr.msk.bf16.mxu1 %vm11917_vm2, %v11916_v8  ;;  %10638 = vmatpush3.bf16.msra.mxu1 %v11453_v62 }
0x19c8   :  { %10639 = vmatprep.subr.bf16.mxu1 %v11916_v8 }
0x19cb   :  { %10640 = vmatpush3.bf16.msra.mxu1 %v11454_v63 }
0x19cc   :  { %10657 = vmatprep.subr.bf16.mxu1 %v11916_v8 }
0x1a68   :  { %v2665_v43 = vpop.f32.mrb[64].mxu1 }
0x1a69   :  { %v10591_v54 = vpop.f32.mrb[65].mxu1 }
0x1a6a   :  { %v2668_v26 = vpop.f32.mrb[66].mxu1 }
0x1a6b   :  { %v10592_v2 = vpop.f32.mrb[67].mxu1  ;;  %v11459_v26 = vld [vmem:[%s14220_s13 + $0x10] sm:$0xff]  }
0x1a6c   :  { %v11460_v2 = vld [vmem:[%s14220_s13 + $0x18] sm:$0xff]  }
0x1a70   :  { %v2776_v12 = vpop.f32.mrb[68].mxu1 }
0x1a71   :  { %3003 = vrot.lane.b32.xlu1 %v2776_v12, %s14323_s4  ;;  %v10603_v29 = vpop.f32.mrb[69].mxu1 }
0x1a72   :  { %v2779_v30 = vpop.f32.mrb[70].mxu1 }
0x1a73   :  { %v10604_v10 = vpop.f32.mrb[71].mxu1 }
0x1a91   :  { %v2886_v16 = vpop.f32.mrb[72].mxu1 }
0x1a92   :  { %3007 = vrot.lane.b32.xlu0 %v2886_v16, %s14324_s0  ;;  %v10615_v34 = vpop.f32.mrb[73].mxu1 }
0x1a93   :  { %v2889_v35 = vpop.f32.mrb[74].mxu1 }
0x1a94   :  { %v10616_v36 = vpop.f32.mrb[75].mxu1 }
0x1a99   :  { %v2996_v37 = vpop.f32.mrb[76].mxu1 }
0x1a9a   :  { %3011 = vrot.lane.b32.xlu1 %v2996_v37, %s14325_s30  ;;  %v10627_v24 = vpop.f32.mrb[77].mxu1 }
0x1a9b   :  { %v2999_v38 = vpop.f32.mrb[78].mxu1 }
0x1a9c   :  { %v10628_v40 = vpop.f32.mrb[79].mxu1 }
0x1ae3   :  { %v3004_v41 = vpop.permute.xlu1 %3003 }
0x1ae4   :  { %v3014_v47 = vsel %vm205_vm3, %v2665_v43, %v3004_v41 }
0x1b04   :  { %v3008_v46 = vpop.permute.xlu0 %3007 }
0x1b05   :  { %v3015_v48 = vsel %vm723_vm7, %v3014_v47, %v3008_v46 }
0x1b0c   :  { %v3012_v51 = vpop.permute.xlu1 %3011 }
0x1b0d   :  { %v3016_v52 = vsel %vm726_vm8, %v3015_v48, %v3012_v51 }
0x1b0e   :  { %v3017_v53 = vpack.c.bf16 %v3016_v52, %v3016_v52 }
0x1b10   :  { %10634 = vmatmul.mubr.msk.bf16.vlgmr.msra.gmra.mrb[96].mxu0 %vm111_vm0, %v3017_v53 }
0x1b11   :  { %10653 = vmatprep.mubr.msk.bf16.mxu0 %vm11917_vm2, %v11916_v8 }
0x1be3   :  { %v3067_v55 = vpop.f32.mrb[96].mxu0 }
0x1be4   :  { %v3073_v56 = vadd.f32 %v3067_v55, %v12632_v32  ;;  %v10635_v57 = vpop.f32.mrb[97].mxu0  ;;  %v11455_v32 = vld [vmem:[%s14226_s19] sm:$0xff]  }
0x1be5   :  { %v3070_v58 = vpop.f32.mrb[98].mxu0  ;;  %10646 = vmatpush3.bf16.msra.mxu0 %v11455_v32 }
0x1be6   :  { %v10636_v59 = vpop.f32.mrb[99].mxu0  ;;  %v3076_v60 = vmul.f32 %v3073_v56, %v3073_v56  ;;  %10647 = vmatprep.subr.bf16.mxu0 %v11916_v8 }
0x1be8   :  { %v3077_v61 = vsel %vm111_vm0, %v3076_v60, 0.0 }
0x1be9   :  { %3078 = vadd.xlane.f32.xlu0 %v3077_v61  ;;  %10648 = vmatpush3.bf16.msra.mxu0 %v11456_v0 }
0x1bea   :  { %10649 = vmatprep.subr.bf16.mxu0 %v11916_v8 }
0x1bed   :  { %10650 = vmatpush3.bf16.msra.mxu0 %v11457_v1 }
0x1bee   :  { %10651 = vmatprep.subr.bf16.mxu0 %v11916_v8 }
0x1bf1   :  { %10652 = vmatpush3.bf16.msra.mxu0 %v11458_v13 }
0x1bf2   :  { %10671 = vmatprep.subr.bf16.mxu0 %v11916_v8 }
0x1c76   :  { %v3079_v4 = vpop.xlane.xlu0 %3078 }
0x1c77   :  { %v3080_v5 = vmul.f32 0.03125, %v3079_v4 }
0x1c79   :  { %v3081_v6 = vadd.f32 1e-06, %v3080_v5 }
0x1c7b   :  { %11663 = vrsqrt.f32 %v3081_v6 }
0x1c85   :  { %v11664_v7 = vpop.eup %11663 }
0x1c86   :  { %v3083_v11 = vmul.f32 %v11664_v7, %v3073_v56 }
0x1c88   :  { %v3090_v42 = vmul.f32 %v9666_v9, %v3083_v11 }
0x1c8a   :  { %v3095_v45 = vpack.c.bf16 %v3090_v42, %v3090_v42 }
0x1c8c   :  { %10642 = vmatmul.mubr.msk.bf16.vlgmr.msra.gmra.mrb[80].mxu1 %vm111_vm0, %v3095_v45 }
0x1c8d   :  { %10661 = vmatprep.mubr.msk.bf16.mxu1 %vm11917_vm2, %v11916_v8  ;;  %10658 = vmatpush3.bf16.msra.mxu1 %v11459_v26 }
0x1c8e   :  { %10659 = vmatprep.subr.bf16.mxu1 %v11916_v8 }
0x1c91   :  { %10660 = vmatpush3.bf16.msra.mxu1 %v11460_v2 }
0x1c92   :  { %10665 = vmatprep.subr.bf16.mxu1 %v11916_v8 }
0x1d5f   :  { %v3145_v44 = vpop.f32.mrb[80].mxu1 }
0x1d60   :  { %v3151_v18 = vmax.f32 %v3145_v44, 0.0  ;;  %v10643_v23 = vpop.f32.mrb[81].mxu1 }
0x1d61   :  { %v3148_v27 = vpop.f32.mrb[82].mxu1 }
0x1d62   :  { %v3160_v19 = vpack.c.bf16 %v3151_v18, %v3151_v18  ;;  %v10644_v25 = vpop.f32.mrb[83].mxu1 }
0x1d64   :  { %10654 = vmatmul.mubr.msk.bf16.vlgmr.msra.gmra.mrb[100].mxu0 %vm910_vm9, %v3160_v19 }
0x1d65   :  { %10673 = vmatprep.mubr.msk.bf16.mxu0 %vm11917_vm2, %v11916_v8 }
0x1e37   :  { %v3222_v3 = vpop.f32.mrb[100].mxu0 }
0x1e38   :  { %v12781_v20 = vadd.f32 %v3222_v3, %v3073_v56  ;;  %v10655_v21 = vpop.f32.mrb[101].mxu0 }
0x1e39   :  { %v3225_v49 = vpop.f32.mrb[102].mxu0 }
0x1e3a   :  { %v10656_v22 = vpop.f32.mrb[103].mxu0  ;;  %v3231_v43 = vmul.f32 %v12781_v20, %v12781_v20 }
0x1e3c   :  { %v3232_v54 = vsel %vm111_vm0, %v3231_v43, 0.0 }
0x1e3d   :  { %3233 = vadd.xlane.f32.xlu1 %v3232_v54 }
0x1eca   :  { %v3234_v12 = vpop.xlane.xlu1 %3233 }
0x1ecb   :  { %v3235_v29 = vmul.f32 0.03125, %v3234_v12 }
0x1ecd   :  { %v3236_v30 = vadd.f32 1e-06, %v3235_v29 }
0x1ecf   :  { %11665 = vrsqrt.f32 %v3236_v30 }
0x1ed9   :  { %v11666_v10 = vpop.eup %11665 }
0x1eda   :  { %v3238_v15 = vmul.f32 %v11666_v10, %v12781_v20 }
0x1edc   :  { %v3245_v16 = vmul.f32 %v9676_v31, %v3238_v15 }
0x1ede   :  { %v3256_v34 = vpack.c.bf16 %v3245_v16, %v3245_v16 }
0x1ee0   :  { %10662 = vmatmul.mubr.msk.bf16.vlgmr.msra.gmra.mrb[84].mxu1 %vm111_vm0, %v3256_v34 }
0x1ee1   :  { %10667 = vmatprep.mubr.msk.bf16.mxu1 %vm11917_vm2, %v11916_v8 }
0x1fb3   :  { %v3306_v35 = vpop.f32.mrb[84].mxu1 }
0x1fb4   :  { %v12801_v36 = vpack.c.bf16 %v3306_v35, %v3306_v35  ;;  %v10663_v37 = vpop.f32.mrb[85].mxu1 }
0x1fb5   :  { %v3309_v24 = vpop.f32.mrb[86].mxu1 }
0x1fb6   :  { %3424 = vrot.lane.b32.xlu1 %v12801_v36, %s14327_s2  ;;  %3314 = vrot.lane.b32.xlu0 %v12801_v36, %s14328_s27  ;;  %v10664_v38 = vpop.f32.mrb[87].mxu1 }
0x1fba   :  { %3534 = vrot.lane.b32.xlu1 %v12801_v36, %s14317_s6  ;;  %3422 = vrot.lane.b32.xlu0 %v12801_v36, %s14316_s5 }
0x1fbe   :  { %3644 = vrot.lane.b32.xlu1 %v12801_v36, %s14319_s7  ;;  %3532 = vrot.lane.b32.xlu0 %v12801_v36, %s14318_s26 }
0x1fc2   :  { %3642 = vrot.lane.b32.xlu0 %v12801_v36, %s14320_s25 }
0x2028   :  { %v3315_v40 = vpop.permute.xlu0 %3314  ;;  %v3425_v46 = vpop.permute.xlu1 %3424 }
0x2029   :  { %v3320_v41 = vsel %vm205_vm3, %v3315_v40, 0  ;;  %v3430_v47 = vsel %vm205_vm3, %v3425_v46, 0 }
0x202a   :  { %10666 = vmatpush3.bf16.xpose.msra.mxu1 %v3320_v41 }
0x202b   :  { %10677 = vmatprep.subr.bf16.mxu1 %v11916_v8 }
0x202c   :  { %v3535_v48 = vpop.permute.xlu1 %3534  ;;  %v3423_v51 = vpop.permute.xlu0 %3422 }
0x202d   :  { %v3540_v52 = vsel %vm205_vm3, %v3535_v48, 0 }
0x2030   :  { %v3645_v53 = vpop.permute.xlu1 %3644  ;;  %v3533_v55 = vpop.permute.xlu0 %3532 }
0x2031   :  { %10668 = vmatmul.mubr.msk.bf16.vlgmr.msra.gmra.mrb[88].mxu1 %vm205_vm3, %v12801_v36  ;;  %v3650_v56 = vsel %vm205_vm3, %v3645_v53, 0 }
0x2032   :  { %10678 = vmatpush3.bf16.xpose.msra.mxu1 %v3430_v47  ;;  %10679 = vmatprep.mubr.msk.bf16.mxu1 %vm11917_vm2, %v11916_v8 }
0x2033   :  { %10689 = vmatprep.subr.bf16.mxu1 %v11916_v8 }
0x2034   :  { %v3643_v57 = vpop.permute.xlu0 %3642 }
0x2039   :  { %10680 = vmatmul.mubr.msk.bf16.vlgmr.msra.gmra.mrb[92].mxu1 %vm205_vm3, %v3423_v51 }
0x203a   :  { %10690 = vmatpush3.bf16.xpose.msra.mxu1 %v3540_v52  ;;  %10691 = vmatprep.mubr.msk.bf16.mxu1 %vm11917_vm2, %v11916_v8 }
0x203b   :  { %10701 = vmatprep.subr.bf16.mxu1 %v11916_v8 }
0x2041   :  { %10692 = vmatmul.mubr.msk.bf16.vlgmr.msra.gmra.mrb[96].mxu1 %vm205_vm3, %v3533_v55 }
0x2042   :  { %10702 = vmatpush3.bf16.xpose.msra.mxu1 %v3650_v56  ;;  %10703 = vmatprep.mubr.msk.bf16.mxu1 %vm11917_vm2, %v11916_v8 }
0x2043   :  { %10713 = vmatprep.subr.bf16.mxu1 %v11916_v8 }
0x2049   :  { %10704 = vmatmul.mubr.msk.bf16.vlgmr.msra.gmra.mrb[100].mxu1 %vm205_vm3, %v3643_v57 }
0x204a   :  { %10717 = vmatprep.mubr.msk.bf16.mxu1 %vm11917_vm2, %v11916_v8 }
0x2104   :  { %v3356_v58 = vpop.f32.mrb[88].mxu1 }
0x2105   :  { %v3357_v59 = vadd.f32 %v3356_v58, %v12534_v28  ;;  %v10669_v60 = vpop.f32.mrb[89].mxu1 }
0x2106   :  { %v3359_v61 = vpop.f32.mrb[90].mxu1 }
0x2107   :  { %v10670_v62 = vpop.f32.mrb[91].mxu1  ;;  %v3362_v63 = vsel %vm205_vm3, %v3357_v59, -inf }
0x2108   :  { %3363 = vmax.xlane.f32.xlu1 %v3362_v63 }
0x210c   :  { %v3466_v32 = vpop.f32.mrb[92].mxu1 }
0x210d   :  { %v3467_v0 = vadd.f32 %v3466_v32, %v12541_v33  ;;  %v10681_v1 = vpop.f32.mrb[93].mxu1 }
0x210e   :  { %v3469_v4 = vpop.f32.mrb[94].mxu1 }
0x210f   :  { %v10682_v5 = vpop.f32.mrb[95].mxu1  ;;  %v3472_v6 = vsel %vm205_vm3, %v3467_v0, -inf }
0x2110   :  { %3473 = vmax.xlane.f32.xlu0 %v3472_v6 }
0x2114   :  { %v3576_v7 = vpop.f32.mrb[96].mxu1 }
0x2115   :  { %v3577_v9 = vadd.f32 %v3576_v7, %v12548_v39  ;;  %v10693_v11 = vpop.f32.mrb[97].mxu1 }
0x2116   :  { %v3579_v28 = vpop.f32.mrb[98].mxu1 }
0x2117   :  { %v10694_v42 = vpop.f32.mrb[99].mxu1  ;;  %v3582_v45 = vsel %vm205_vm3, %v3577_v9, -inf }
0x2118   :  { %3583 = vmax.xlane.f32.xlu0 %v3582_v45  ;;  %v11461_v42 = vld [vmem:[%s14221_s14 + $0x10] sm:$0xff]   ;;  %v11462_v45 = vld [vmem:[%s14221_s14 + $0x18] sm:$0xff]  }
0x2119   :  { %10714 = vmatpush3.bf16.msra.mxu1 %v11461_v42 }
0x211a   :  { %10715 = vmatprep.subr.bf16.mxu1 %v11916_v8 }
0x211c   :  { %v3686_v13 = vpop.f32.mrb[100].mxu1 }
0x211d   :  { %v3687_v44 = vadd.f32 %v3686_v13, %v12555_v50  ;;  %v10705_v18 = vpop.f32.mrb[101].mxu1  ;;  %10716 = vmatpush3.bf16.msra.mxu1 %v11462_v45 }
0x211e   :  { %v3689_v33 = vpop.f32.mrb[102].mxu1  ;;  %10729 = vmatprep.subr.bf16.mxu1 %v11916_v8 }
0x211f   :  { %v10706_v23 = vpop.f32.mrb[103].mxu1  ;;  %v3692_v27 = vsel %vm205_vm3, %v3687_v44, -inf }
0x2120   :  { %3693 = vmax.xlane.f32.xlu1 %v3692_v27 }
0x2195   :  { %v3364_v19 = vpop.xlane.xlu1 %3363 }
0x2196   :  { %v3365_v25 = vsub.f32 %v3357_v59, %v3364_v19 }
0x2198   :  { %v3366_v3 = vmul.f32 1.442695, %v3365_v25 }
0x219a   :  { %11667 = vpow2.f32 %v3366_v3 }
0x219d   :  { %v3474_v39 = vpop.xlane.xlu0 %3473 }
0x219e   :  { %v3475_v21 = vsub.f32 %v3467_v0, %v3474_v39 }
0x21a0   :  { %v3476_v49 = vmul.f32 1.442695, %v3475_v21 }
0x21a2   :  { %11669 = vpow2.f32 %v3476_v49 }
0x21a4   :  { %v11668_v22 = vpop.eup %11667 }
0x21a5   :  { %v3584_v43 = vpop.xlane.xlu0 %3583  ;;  %v3368_v54 = vsel %vm205_vm3, %v11668_v22, 0.0 }
0x21a6   :  { %v3585_v26 = vsub.f32 %v3577_v9, %v3584_v43  ;;  %3369 = vadd.xlane.f32.xlu0 %v3368_v54  ;;  %v11463_v54 = vld [vmem:[%s14223_s16 + $0x10] sm:$0xff]  }
0x21a8   :  { %v3586_v50 = vmul.f32 1.442695, %v3585_v26 }
0x21aa   :  { %11671 = vpow2.f32 %v3586_v50  ;;  %v11464_v50 = vld [vmem:[%s14223_s16 + $0x18] sm:$0xff]  }
0x21ac   :  { %v11670_v2 = vpop.eup %11669 }
0x21ad   :  { %v3478_v12 = vsel %vm205_vm3, %v11670_v2, 0.0  ;;  %v3694_v10 = vpop.xlane.xlu1 %3693 }
0x21ae   :  { %3479 = vadd.xlane.f32.xlu1 %v3478_v12  ;;  %v3695_v31 = vsub.f32 %v3687_v44, %v3694_v10 }
0x21b0   :  { %v3696_v15 = vmul.f32 1.442695, %v3695_v31 }
0x21b2   :  { %11673 = vpow2.f32 %v3696_v15 }
0x21b4   :  { %v11672_v29 = vpop.eup %11671 }
0x21b5   :  { %v3588_v30 = vsel %vm205_vm3, %v11672_v29, 0.0 }
0x21b6   :  { %3589 = vadd.xlane.f32.xlu0 %v3588_v30 }
0x21bc   :  { %v11674_v16 = vpop.eup %11673 }
0x21bd   :  { %v3698_v34 = vsel %vm205_vm3, %v11674_v16, 0.0 }
0x21bf   :  { %3484 = vrot.lane.b32.xlu1 %v12801_v36, %s14322_s3 }
0x21cc   :  { %3374 = vrot.lane.b32.xlu0 %v12801_v36, %s14330_s21 }
0x21d0   :  { %3704 = vrot.lane.b32.xlu0 %v12801_v36, %s14321_s28 }
0x21e3   :  { %3699 = vadd.xlane.f32.xlu1 %v3698_v34 }
0x21f4   :  { %3594 = vrot.lane.b32.xlu1 %v12801_v36, %s14331_s24 }
0x2233   :  { %v3370_v35 = vpop.xlane.xlu0 %3369 }
0x2234   :  { %11675 = vrcp.f32 %v3370_v35 }
0x223b   :  { %v3480_v37 = vpop.xlane.xlu1 %3479 }
0x223c   :  { %11677 = vrcp.f32 %v3480_v37 }
0x223e   :  { %v11676_v24 = vpop.eup %11675 }
0x223f   :  { %v3372_v40 = vmul.f32 %v11676_v24, %v11668_v22  ;;  %v3485_v47 = vpop.permute.xlu1 %3484  ;;  %v11466_v24 = vld [vmem:[%s14222_s15 + $0x18] sm:$0xff]  }
0x2240   :  { %v3490_v52 = vsel %vm1974_vm10, %v3485_v47, 0  ;;  %v9700_v47 = vld [vmem:[%s14219_s12 + $0x4] ss:$0 sm:$0xff] }
0x2241   :  { %v3373_v48 = vpack.c.bf16 %v3372_v40, %v3372_v40 }
0x2243   :  { %v3590_v38 = vpop.xlane.xlu0 %3589 }
0x2244   :  { %11679 = vrcp.f32 %v3590_v38 }
0x2246   :  { %v11678_v51 = vpop.eup %11677 }
0x2247   :  { %v3375_v41 = vpop.permute.xlu0 %3374  ;;  %v3482_v36 = vmul.f32 %v11678_v51, %v11670_v2 }
0x2248   :  { %v3380_v46 = vsel %vm1974_vm10, %v3375_v41, 0 }
0x2249   :  { %10672 = vmatpush3.bf16.msra.mxu0 %v3380_v46  ;;  %v3483_v53 = vpack.c.bf16 %v3482_v36, %v3482_v36 }
0x224a   :  { %10683 = vmatprep.subr.bf16.mxu0 %v11916_v8 }
0x224b   :  { %v3705_v60 = vpop.permute.xlu0 %3704 }
0x224c   :  { %10674 = vmatmul.mubr.msk.bf16.vlgmr.msra.gmra.mrb[104].mxu0 %vm205_vm3, %v3373_v48  ;;  %v3710_v62 = vsel %vm1974_vm10, %v3705_v60, 0 }
0x224d   :  { %10684 = vmatpush3.bf16.msra.mxu0 %v3490_v52  ;;  %10685 = vmatprep.mubr.msk.bf16.mxu0 %vm11917_vm2, %v11916_v8 }
0x224e   :  { %10695 = vmatprep.subr.bf16.mxu0 %v11916_v8  ;;  %v11680_v55 = vpop.eup %11679 }
0x224f   :  { %v3592_v57 = vmul.f32 %v11680_v55, %v11672_v29 }
0x2251   :  { %v3593_v61 = vpack.c.bf16 %v3592_v57, %v3592_v57 }
0x2254   :  { %10686 = vmatmul.mubr.msk.bf16.vlgmr.msra.gmra.mrb[108].mxu0 %vm205_vm3, %v3483_v53 }
0x2255   :  { %10697 = vmatprep.mubr.msk.bf16.mxu0 %vm11917_vm2, %v11916_v8 }
0x2270   :  { %v3700_v56 = vpop.xlane.xlu1 %3699 }
0x2271   :  { %11681 = vrcp.f32 %v3700_v56 }
0x2274   :  { %v3595_v58 = vpop.permute.xlu1 %3594 }
0x2275   :  { %v3600_v59 = vsel %vm1974_vm10, %v3595_v58, 0 }
0x2276   :  { %10696 = vmatpush3.bf16.msra.mxu0 %v3600_v59 }
0x2277   :  { %10707 = vmatprep.subr.bf16.mxu0 %v11916_v8 }
0x2279   :  { %10698 = vmatmul.mubr.msk.bf16.vlgmr.msra.gmra.mrb[112].mxu0 %vm205_vm3, %v3593_v61 }
0x227a   :  { %10708 = vmatpush3.bf16.msra.mxu0 %v3710_v62  ;;  %10709 = vmatprep.mubr.msk.bf16.mxu0 %vm11917_vm2, %v11916_v8 }
0x227b   :  { %v11682_v63 = vpop.eup %11681  ;;  %10721 = vmatprep.subr.bf16.mxu0 %v11916_v8 }
0x227c   :  { %v3702_v32 = vmul.f32 %v11682_v63, %v11674_v16 }
0x227e   :  { %v3703_v0 = vpack.c.bf16 %v3702_v32, %v3702_v32 }
0x2281   :  { %10710 = vmatmul.mubr.msk.bf16.vlgmr.msra.gmra.mrb[116].mxu0 %vm205_vm3, %v3703_v0 }
0x2282   :  { %10725 = vmatprep.mubr.msk.bf16.mxu0 %vm11917_vm2, %v11916_v8 }
0x231f   :  { %v3416_v1 = vpop.f32.mrb[104].mxu0 }
0x2320   :  { %v10675_v4 = vpop.f32.mrb[105].mxu0 }
0x2321   :  { %v3419_v5 = vpop.f32.mrb[106].mxu0 }
0x2322   :  { %v10676_v6 = vpop.f32.mrb[107].mxu0 }
0x2327   :  { %v3526_v7 = vpop.f32.mrb[108].mxu0 }
0x2328   :  { %3753 = vrot.lane.b32.xlu1 %v3526_v7, %s14323_s4  ;;  %v10687_v9 = vpop.f32.mrb[109].mxu0 }
0x2329   :  { %v3529_v11 = vpop.f32.mrb[110].mxu0 }
0x232a   :  { %v10688_v28 = vpop.f32.mrb[111].mxu0 }
0x234c   :  { %v3636_v13 = vpop.f32.mrb[112].mxu0 }
0x234d   :  { %3757 = vrot.lane.b32.xlu0 %v3636_v13, %s14324_s0  ;;  %v10699_v44 = vpop.f32.mrb[113].mxu0 }
0x234e   :  { %v3639_v18 = vpop.f32.mrb[114].mxu0 }
0x234f   :  { %v10700_v33 = vpop.f32.mrb[115].mxu0 }
0x2354   :  { %v3746_v23 = vpop.f32.mrb[116].mxu0 }
0x2355   :  { %3761 = vrot.lane.b32.xlu1 %v3746_v23, %s14325_s30  ;;  %v10711_v27 = vpop.f32.mrb[117].mxu0 }
0x2356   :  { %v3749_v19 = vpop.f32.mrb[118].mxu0 }
0x2357   :  { %v10712_v25 = vpop.f32.mrb[119].mxu0 }
0x239a   :  { %v3754_v3 = vpop.permute.xlu1 %3753 }
0x239b   :  { %v3764_v21 = vsel %vm205_vm3, %v3416_v1, %v3754_v3 }
0x23bf   :  { %v3758_v39 = vpop.permute.xlu0 %3757 }
0x23c0   :  { %v3765_v49 = vsel %vm723_vm7, %v3764_v21, %v3758_v39 }
0x23c7   :  { %v3762_v22 = vpop.permute.xlu1 %3761 }
0x23c8   :  { %v3766_v43 = vsel %vm726_vm8, %v3765_v49, %v3762_v22 }
0x23c9   :  { %v3767_v26 = vpack.c.bf16 %v3766_v43, %v3766_v43 }
0x23cb   :  { %10718 = vmatmul.mubr.msk.bf16.vlgmr.msra.gmra.mrb[104].mxu1 %vm111_vm0, %v3767_v26 }
0x23cc   :  { %10730 = vmatpush3.bf16.msra.mxu1 %v11463_v54  ;;  %10733 = vmatprep.mubr.msk.bf16.mxu1 %vm11917_vm2, %v11916_v8 }
0x23cd   :  { %10731 = vmatprep.subr.bf16.mxu1 %v11916_v8 }
0x23d0   :  { %10732 = vmatpush3.bf16.msra.mxu1 %v11464_v50 }
0x23d1   :  { %10743 = vmatprep.subr.bf16.mxu1 %v11916_v8 }
0x23d3   :  { %10734 = vmatmul.mubr.msk.bf16.vlgmr.msra.gmra.mrb[108].mxu1 %vm111_vm0, %v12625_v17 }
0x23d4   :  { %10745 = vmatprep.mubr.msk.bf16.mxu1 %vm11917_vm2, %v11916_v8 }
0x249e   :  { %v3817_v2 = vpop.f32.mrb[104].mxu1 }
0x249f   :  { %v12908_v12 = vadd.f32 %v3817_v2, %v12781_v20  ;;  %v10719_v29 = vpop.f32.mrb[105].mxu1  ;;  %v11465_v20 = vld [vmem:[%s14222_s15 + $0x10] sm:$0xff]  }
0x24a0   :  { %v3820_v30 = vpop.f32.mrb[106].mxu1  ;;  %10722 = vmatpush3.bf16.msra.mxu0 %v11465_v20 }
0x24a1   :  { %v10720_v10 = vpop.f32.mrb[107].mxu1  ;;  %v3826_v31 = vmul.f32 %v12908_v12, %v12908_v12  ;;  %10723 = vmatprep.subr.bf16.mxu0 %v11916_v8 }
0x24a3   :  { %v3827_v15 = vsel %vm111_vm0, %v3826_v31, 0.0 }
0x24a4   :  { %3828 = vadd.xlane.f32.xlu0 %v3827_v15  ;;  %10724 = vmatpush3.bf16.msra.mxu0 %v11466_v24 }
0x24a5   :  { %10737 = vmatprep.subr.bf16.mxu0 %v11916_v8 }
0x24a6   :  { %v3958_v16 = vpop.f32.mrb[108].mxu1 }
0x24a7   :  { %v10735_v34 = vpop.f32.mrb[109].mxu1 }
0x24a8   :  { %v3961_v35 = vpop.f32.mrb[110].mxu1 }
0x24a9   :  { %v12913_v17 = vpack.c.bf16 %v3961_v35, %v3958_v16  ;;  %v10736_v37 = vpop.f32.mrb[111].mxu1 }
0x24ab   :  { %4077 = vrot.lane.b32.xlu1 %v12913_v17, %s14316_s5  ;;  %v3971_v36 = vsel %vm205_vm3, %v12913_v17, 0 }
0x24af   :  { %4187 = vrot.lane.b32.xlu1 %v12913_v17, %s14318_s26 }
0x251d   :  { %v4078_v53 = vpop.permute.xlu1 %4077 }
0x251e   :  { %v4083_v59 = vsel %vm205_vm3, %v4078_v53, 0 }
0x2521   :  { %v4188_v61 = vpop.permute.xlu1 %4187 }
0x2522   :  { %v4193_v63 = vsel %vm205_vm3, %v4188_v61, 0 }
0x2531   :  { %v3829_v38 = vpop.xlane.xlu0 %3828 }
0x2532   :  { %v3830_v40 = vmul.f32 0.03125, %v3829_v38 }
0x2534   :  { %v3831_v41 = vadd.f32 1e-06, %v3830_v40 }
0x2536   :  { %11683 = vrsqrt.f32 %v3831_v41 }
0x2540   :  { %v11684_v46 = vpop.eup %11683 }
0x2541   :  { %v3833_v48 = vmul.f32 %v11684_v46, %v12908_v12 }
0x2543   :  { %v3840_v51 = vmul.f32 %v9700_v47, %v3833_v48 }
0x2545   :  { %v3856_v52 = vpack.c.bf16 %v3840_v51, %v3840_v51 }
0x2547   :  { %10726 = vmatmul.mubr.msk.bf16.vlgmr.msra.gmra.mrb[120].mxu0 %vm111_vm0, %v3856_v52 }
0x2548   :  { %10738 = vmatpush3.bf16.xpose.msra.mxu0 %v3971_v36  ;;  %10739 = vmatprep.mubr.msk.bf16.mxu0 %vm11917_vm2, %v11916_v8 }
0x2549   :  { %10749 = vmatprep.subr.bf16.mxu0 %v11916_v8 }
0x261a   :  { %v3906_v55 = vpop.f32.mrb[120].mxu0 }
0x261b   :  { %v3965_v56 = vpack.c.bf16 %v3906_v55, %v3906_v55  ;;  %v10727_v57 = vpop.f32.mrb[121].mxu0 }
0x261c   :  { %v3909_v58 = vpop.f32.mrb[122].mxu0 }
0x261d   :  { %v10728_v60 = vpop.f32.mrb[123].mxu0  ;;  %4075 = vrot.lane.b32.xlu1 %v3965_v56, %s14316_s5  ;;  %10740 = vmatmul.mubr.msk.bf16.vlgmr.msra.gmra.mrb[124].mxu0 %vm205_vm3, %v3965_v56 }
0x261e   :  { %10750 = vmatpush3.bf16.xpose.msra.mxu0 %v4083_v59  ;;  %10751 = vmatprep.mubr.msk.bf16.mxu0 %vm11917_vm2, %v11916_v8 }
0x261f   :  { %10761 = vmatprep.subr.bf16.mxu0 %v11916_v8 }
0x2621   :  { %4185 = vrot.lane.b32.xlu1 %v3965_v56, %s14318_s26 }
0x2625   :  { %4297 = vrot.lane.b32.xlu1 %v12913_v17, %s14320_s25 }
0x2629   :  { %4295 = vrot.lane.b32.xlu1 %v3965_v56, %s14320_s25 }
0x268f   :  { %v4076_v62 = vpop.permute.xlu1 %4075 }
0x2690   :  { %10752 = vmatmul.mubr.msk.bf16.vlgmr.msra.gmra.mrb[128].mxu0 %vm205_vm3, %v4076_v62 }
0x2691   :  { %10762 = vmatpush3.bf16.xpose.msra.mxu0 %v4193_v63  ;;  %10763 = vmatprep.mubr.msk.bf16.mxu0 %vm11917_vm2, %v11916_v8 }
0x2692   :  { %10773 = vmatprep.subr.bf16.mxu0 %v11916_v8 }
0x2693   :  { %v4186_v32 = vpop.permute.xlu1 %4185 }
0x2697   :  { %v4298_v0 = vpop.permute.xlu1 %4297 }
0x2698   :  { %v4303_v1 = vsel %vm205_vm3, %v4298_v0, 0  ;;  %10764 = vmatmul.mubr.msk.bf16.vlgmr.msra.gmra.mrb[132].mxu0 %vm205_vm3, %v4186_v32 }
0x2699   :  { %10774 = vmatpush3.bf16.xpose.msra.mxu0 %v4303_v1  ;;  %10775 = vmatprep.mubr.msk.bf16.mxu0 %vm11917_vm2, %v11916_v8 }
0x269a   :  { %10785 = vmatprep.subr.bf16.mxu0 %v11916_v8 }
0x269b   :  { %v4296_v4 = vpop.permute.xlu1 %4295 }
0x26a0   :  { %10776 = vmatmul.mubr.msk.bf16.vlgmr.msra.gmra.mrb[136].mxu0 %vm205_vm3, %v4296_v4 }
0x26a1   :  { %10789 = vmatprep.mubr.msk.bf16.mxu0 %vm11917_vm2, %v11916_v8 }
0x26f0   :  { %v4007_v5 = vpop.f32.mrb[124].mxu0 }
0x26f1   :  { %v4008_v6 = vadd.f32 %v12687_v14, %v4007_v5  ;;  %v10741_v7 = vpop.f32.mrb[125].mxu0 }
0x26f2   :  { %v4010_v9 = vpop.f32.mrb[126].mxu0 }
0x26f3   :  { %v10742_v11 = vpop.f32.mrb[127].mxu0  ;;  %v4013_v28 = vsel %vm253_vm4, %v4008_v6, -inf }
0x26f4   :  { %4014 = vmax.xlane.f32.xlu1 %v4013_v28 }
0x2705   :  { %4137 = vrot.lane.b32.xlu1 %v12913_v17, %s14327_s2 }
0x2709   :  { %4247 = vrot.lane.b32.xlu1 %v12913_v17, %s14317_s6 }
0x2763   :  { %v4119_v42 = vpop.f32.mrb[128].mxu0 }
0x2764   :  { %v4120_v45 = vadd.f32 %v12687_v14, %v4119_v42  ;;  %v10753_v13 = vpop.f32.mrb[129].mxu0 }
0x2765   :  { %v4122_v44 = vpop.f32.mrb[130].mxu0 }
0x2766   :  { %v10754_v18 = vpop.f32.mrb[131].mxu0  ;;  %v4125_v33 = vsel %vm253_vm4, %v4120_v45, -inf }
0x2767   :  { %4126 = vmax.xlane.f32.xlu0 %v4125_v33 }
0x276b   :  { %v4229_v23 = vpop.f32.mrb[132].mxu0 }
0x276c   :  { %v4230_v27 = vadd.f32 %v12687_v14, %v4229_v23  ;;  %v10765_v19 = vpop.f32.mrb[133].mxu0 }
0x276d   :  { %v4232_v25 = vpop.f32.mrb[134].mxu0  ;;  %v11467_v19 = vld [vmem:[%s14224_s17 + $0x10] sm:$0xff]  }
0x276e   :  { %v10766_v3 = vpop.f32.mrb[135].mxu0  ;;  %v4235_v39 = vsel %vm253_vm4, %v4230_v27, -inf  ;;  %10786 = vmatpush3.bf16.msra.mxu0 %v11467_v19  ;;  %v11468_v25 = vld [vmem:[%s14224_s17 + $0x18] sm:$0xff]   ;;  %s14336_s17 = sld [smem:[#allocation22_spill]] }
0x276f   :  { %4236 = vmax.xlane.f32.xlu0 %v4235_v39  ;;  %10787 = vmatprep.subr.bf16.mxu0 %v11916_v8 }
0x2772   :  { %10788 = vmatpush3.bf16.msra.mxu0 %v11468_v25  ;;  %v11476_v25 = vld [vmem:[%s14333_s23 + $0x8] sm:$0xff]  }
0x2773   :  { %v4339_v21 = vpop.f32.mrb[136].mxu0  ;;  %10801 = vmatprep.subr.bf16.mxu0 %v11916_v8 }
0x2774   :  { %v4340_v49 = vadd.f32 %v12687_v14, %v4339_v21  ;;  %v10777_v22 = vpop.f32.mrb[137].mxu0 }
0x2775   :  { %v4342_v43 = vpop.f32.mrb[138].mxu0 }
0x2776   :  { %v10778_v54 = vpop.f32.mrb[139].mxu0  ;;  %v4345_v26 = vsel %vm253_vm4, %v4340_v49, -inf }
0x2777   :  { %4346 = vmax.xlane.f32.xlu0 %v4345_v26 }
0x2781   :  { %v4015_v50 = vpop.xlane.xlu1 %4014 }
0x2782   :  { %v4016_v2 = vsub.f32 %v4008_v6, %v4015_v50 }
0x2784   :  { %v4017_v29 = vmul.f32 1.442695, %v4016_v2 }
0x2785   :  { %v4138_v57 = vpop.permute.xlu1 %4137 }
0x2786   :  { %11685 = vpow2.f32 %v4017_v29  ;;  %v4143_v59 = vsel %vm283_vm6, %v4138_v57, 0 }
0x2789   :  { %v4248_v61 = vpop.permute.xlu1 %4247 }
0x278a   :  { %v4253_v63 = vsel %vm283_vm6, %v4248_v61, 0 }
0x2790   :  { %v11686_v30 = vpop.eup %11685 }
0x2791   :  { %v4019_v10 = vsel %vm253_vm4, %v11686_v30, 0.0 }
0x2792   :  { %4020 = vadd.xlane.f32.xlu0 %v4019_v10 }
0x27f4   :  { %v4127_v31 = vpop.xlane.xlu0 %4126 }
0x27f5   :  { %v4128_v15 = vsub.f32 %v4120_v45, %v4127_v31 }
0x27f7   :  { %v4129_v16 = vmul.f32 1.442695, %v4128_v15 }
0x27f9   :  { %11687 = vpow2.f32 %v4129_v16 }
0x27fc   :  { %v4237_v35 = vpop.xlane.xlu0 %4236 }
0x27fd   :  { %v4238_v37 = vsub.f32 %v4230_v27, %v4237_v35 }
0x27ff   :  { %v4239_v24 = vmul.f32 1.442695, %v4238_v37 }
0x2801   :  { %11689 = vpow2.f32 %v4239_v24 }
0x2803   :  { %v11688_v34 = vpop.eup %11687 }
0x2804   :  { %v4131_v14 = vsel %vm253_vm4, %v11688_v34, 0.0  ;;  %v4347_v20 = vpop.xlane.xlu0 %4346 }
0x2805   :  { %4132 = vadd.xlane.f32.xlu0 %v4131_v14  ;;  %v4348_v38 = vsub.f32 %v4340_v49, %v4347_v20 }
0x2807   :  { %v4349_v40 = vmul.f32 1.442695, %v4348_v38  ;;  %v11469_v38 = vld [vmem:[%s14225_s18 + $0x10] sm:$0xff]  }
0x2809   :  { %11691 = vpow2.f32 %v4349_v40  ;;  %v11470_v40 = vld [vmem:[%s14225_s18 + $0x18] sm:$0xff]   ;;  %s14340_s18 = sld [smem:[#allocation15_spill]] }
0x280b   :  { %v11690_v41 = vpop.eup %11689 }
0x280c   :  { %v4241_v46 = vsel %vm253_vm4, %v11690_v41, 0.0 }
0x2813   :  { %v11692_v47 = vpop.eup %11691 }
0x2814   :  { %v4351_v48 = vsel %vm253_vm4, %v11692_v47, 0.0 }
0x281b   :  { %4026 = vrot.lane.b32.xlu0 %v12913_v17, %s14328_s27 }
0x281f   :  { %v4021_v51 = vpop.xlane.xlu0 %4020 }
0x2820   :  { %11693 = vrcp.f32 %v4021_v51 }
0x282a   :  { %v11694_v52 = vpop.eup %11693 }
0x282b   :  { %v4023_v53 = vmul.f32 %v11694_v52, %v11686_v30 }
0x282d   :  { %v4024_v58 = vpack.c.bf16 %v4023_v53, %v4023_v53  ;;  %v11473_v53 = vld [vmem:[%s14226_s19 + $0x30] sm:$0xff]  }
0x283a   :  { %4242 = vadd.xlane.f32.xlu0 %v4241_v46  ;;  %v11471_v46 = vld [vmem:[%s14226_s19 + $0x20] sm:$0xff]  }
0x283e   :  { %4352 = vadd.xlane.f32.xlu0 %v4351_v48 }
0x2854   :  { %4357 = vrot.lane.b32.xlu0 %v12913_v17, %s14319_s7 }
0x2892   :  { %v4133_v36 = vpop.xlane.xlu0 %4132 }
0x2893   :  { %11695 = vrcp.f32 %v4133_v36  ;;  %v11472_v36 = vld [vmem:[%s14226_s19 + $0x28] sm:$0xff]  }
0x2896   :  { %v4027_v55 = vpop.permute.xlu0 %4026 }
0x2897   :  { %v4032_v56 = vsel %vm283_vm6, %v4027_v55, 0 }
0x2898   :  { %10744 = vmatpush3.bf16.msra.mxu1 %v4032_v56 }
0x2899   :  { %10755 = vmatprep.subr.bf16.mxu1 %v11916_v8 }
0x289b   :  { %10746 = vmatmul.mubr.msk.bf16.vlgmr.msra.gmra.mrb[112].mxu1 %vm253_vm4, %v4024_v58 }
0x289c   :  { %10756 = vmatpush3.bf16.msra.mxu1 %v4143_v59  ;;  %10757 = vmatprep.mubr.msk.bf16.mxu1 %vm11917_vm2, %v11916_v8  ;;  %v9731_v59 = vld [vmem:[%s14219_s12 + $0x5] ss:$0 sm:$0xff] }
0x289d   :  { %v11696_v17 = vpop.eup %11695  ;;  %10767 = vmatprep.subr.bf16.mxu1 %v11916_v8 }
0x289e   :  { %v4135_v60 = vmul.f32 %v11696_v17, %v11688_v34 }
0x28a0   :  { %v4136_v62 = vpack.c.bf16 %v4135_v60, %v4135_v60 }
0x28a3   :  { %10758 = vmatmul.mubr.msk.bf16.vlgmr.msra.gmra.mrb[116].mxu1 %vm253_vm4, %v4136_v62  ;;  %v11474_v62 = vld [vmem:[%s14226_s19 + $0x38] sm:$0xff]   ;;  %s14337_s19 = sld [smem:[#allocation21_spill]] }
0x28a4   :  { %10768 = vmatpush3.bf16.msra.mxu1 %v4253_v63  ;;  %10769 = vmatprep.mubr.msk.bf16.mxu1 %vm11917_vm2, %v11916_v8 }
0x28a5   :  { %10779 = vmatprep.subr.bf16.mxu1 %v11916_v8 }
0x28c7   :  { %v4243_v32 = vpop.xlane.xlu0 %4242 }
0x28c8   :  { %11697 = vrcp.f32 %v4243_v32 }
0x28cb   :  { %v4353_v0 = vpop.xlane.xlu0 %4352 }
0x28cc   :  { %11699 = vrcp.f32 %v4353_v0 }
0x28cf   :  { %v4358_v5 = vpop.permute.xlu0 %4357 }
0x28d0   :  { %v4363_v9 = vsel %vm283_vm6, %v4358_v5, 0 }
0x28d2   :  { %v11698_v1 = vpop.eup %11697 }
0x28d3   :  { %v4245_v4 = vmul.f32 %v11698_v1, %v11690_v41  ;;  %v13038_v41 = vld [vmem:[%s14332_s11 + $0x18] sm:$0xf] }
0x28d4   :  { %v4847_v48 = vmul.f32 %v13038_v41, %v13038_v41 }
0x28d5   :  { %v4246_v6 = vpack.c.bf16 %v4245_v4, %v4245_v4 }
0x28d6   :  { %v11700_v7 = vpop.eup %11699  ;;  %v4851_v52 = vsel %vm115_vm1, %v4847_v48, 0.0 }
0x28d7   :  { %10770 = vmatmul.mubr.msk.bf16.vlgmr.msra.gmra.mrb[120].mxu1 %vm253_vm4, %v4246_v6  ;;  %v4355_v11 = vmul.f32 %v11700_v7, %v11692_v47 }
0x28d8   :  { %10780 = vmatpush3.bf16.msra.mxu1 %v4363_v9  ;;  %10781 = vmatprep.mubr.msk.bf16.mxu1 %vm11917_vm2, %v11916_v8 }
0x28d9   :  { %10793 = vmatprep.subr.bf16.mxu1 %v11916_v8  ;;  %v4356_v28 = vpack.c.bf16 %v4355_v11, %v4355_v11 }
0x28df   :  { %10782 = vmatmul.mubr.msk.bf16.vlgmr.msra.gmra.mrb[124].mxu1 %vm253_vm4, %v4356_v28 }
0x28e0   :  { %10797 = vmatprep.mubr.msk.bf16.mxu1 %vm11917_vm2, %v11916_v8  ;;  %10794 = vmatpush3.bf16.msra.mxu1 %v11469_v38 }
0x28e1   :  { %10795 = vmatprep.subr.bf16.mxu1 %v11916_v8 }
0x28e4   :  { %10796 = vmatpush3.bf16.msra.mxu1 %v11470_v40 }
0x28e5   :  { %10813 = vmatprep.subr.bf16.mxu1 %v11916_v8 }
0x296e   :  { %v4068_v42 = vpop.f32.mrb[112].mxu1 }
0x296f   :  { %v10747_v45 = vpop.f32.mrb[113].mxu1 }
0x2970   :  { %v4071_v13 = vpop.f32.mrb[114].mxu1 }
0x2971   :  { %v10748_v44 = vpop.f32.mrb[115].mxu1 }
0x2972   :  { %v11475_v44 = vld [vmem:[%s14333_s23] sm:$0xff]  }
0x2976   :  { %v4179_v18 = vpop.f32.mrb[116].mxu1 }
0x2977   :  { %4406 = vrot.lane.b32.xlu1 %v4179_v18, %s14323_s4  ;;  %v10759_v33 = vpop.f32.mrb[117].mxu1  ;;  %v9768_v18 = vld [vmem:[%s14313_s29] ss:$0 sm:$0xff] }
0x2978   :  { %v4182_v23 = vpop.f32.mrb[118].mxu1 }
0x2979   :  { %v10760_v27 = vpop.f32.mrb[119].mxu1 }
0x29aa   :  { %v4289_v3 = vpop.f32.mrb[120].mxu1 }
0x29ab   :  { %4410 = vrot.lane.b32.xlu0 %v4289_v3, %s14324_s0  ;;  %v10771_v39 = vpop.f32.mrb[121].mxu1 }
0x29ac   :  { %v4292_v21 = vpop.f32.mrb[122].mxu1 }
0x29ad   :  { %v10772_v49 = vpop.f32.mrb[123].mxu1 }
0x29b2   :  { %v4399_v22 = vpop.f32.mrb[124].mxu1 }
0x29b3   :  { %4414 = vrot.lane.b32.xlu1 %v4399_v22, %s14325_s30  ;;  %v10783_v43 = vpop.f32.mrb[125].mxu1 }
0x29b4   :  { %v4402_v54 = vpop.f32.mrb[126].mxu1 }
0x29b5   :  { %v10784_v26 = vpop.f32.mrb[127].mxu1 }
0x29e9   :  { %v4407_v50 = vpop.permute.xlu1 %4406 }
0x29ea   :  { %v4417_v29 = vsel %vm205_vm3, %v4068_v42, %v4407_v50 }
0x2a1d   :  { %v4411_v2 = vpop.permute.xlu0 %4410 }
0x2a1e   :  { %v4418_v30 = vsel %vm723_vm7, %v4417_v29, %v4411_v2 }
0x2a25   :  { %v4415_v10 = vpop.permute.xlu1 %4414 }
0x2a26   :  { %v4419_v31 = vsel %vm726_vm8, %v4418_v30, %v4415_v10  ;;  %v13108_v10 = vld [vmem:[%s14334_s22 + $0x1] ss:$0 sm:$0xff]  ;;  %s14343_s22 = sld [smem:[#allocation16_spill]] }
0x2a27   :  { %v4420_v15 = vpack.c.bf16 %v4419_v31, %v4419_v31  ;;  %v11878_v31 = vld [vmem:[%s14335_s10] sm:$0xff] }
0x2a29   :  { %10790 = vmatmul.mubr.msk.bf16.vlgmr.msra.gmra.mrb[140].mxu0 %vm111_vm0, %v4420_v15  ;;  %v13114_v15 = vadd.f32 %v11878_v31, %v13108_v10 }
0x2a2a   :  { %10809 = vmatprep.mubr.msk.bf16.mxu0 %vm11917_vm2, %v11916_v8  ;;  %10802 = vmatpush3.bf16.msra.mxu0 %v11471_v46 }
0x2a2b   :  { %10803 = vmatprep.subr.bf16.mxu0 %v11916_v8 }
0x2a2e   :  { %10804 = vmatpush3.bf16.msra.mxu0 %v11472_v36 }
0x2a2f   :  { %10805 = vmatprep.subr.bf16.mxu0 %v11916_v8 }
0x2a32   :  { %10806 = vmatpush3.bf16.msra.mxu0 %v11473_v53 }
0x2a33   :  { %10807 = vmatprep.subr.bf16.mxu0 %v11916_v8 }
0x2a36   :  { %10808 = vmatpush3.bf16.msra.mxu0 %v11474_v62 }
0x2a37   :  { %10833 = vmatprep.subr.bf16.mxu0 %v11916_v8 }
0x2afc   :  { %v4470_v16 = vpop.f32.mrb[140].mxu0 }
0x2afd   :  { %v13018_v34 = vadd.f32 %v4470_v16, %v12908_v12  ;;  %v10791_v14 = vpop.f32.mrb[141].mxu0  ;;  %v13033_v12 = vld [vmem:[%s14332_s11 + $0x10] sm:$0xff]  ;;  %v11879_v16 = vld [vmem:[%s14335_s10 + $0x8] sm:$0xf]  ;;  %s14348_s11 = sld [smem:[#allocation20_spill]] }
0x2afe   :  { %v4473_v35 = vpop.f32.mrb[142].mxu0  ;;  %v4846_v47 = vmul.f32 %v13033_v12, %v13033_v12  ;;  %v13120_v14 = vadd.f32 %v11879_v16, %v13108_v10 }
0x2aff   :  { %v10792_v37 = vpop.f32.mrb[143].mxu0  ;;  %v4479_v20 = vmul.f32 %v13018_v34, %v13018_v34 }
0x2b00   :  { %v4848_v51 = vsel %vm111_vm0, %v4846_v47, 0.0 }
0x2b01   :  { %v4480_v24 = vsel %vm111_vm0, %v4479_v20, 0.0  ;;  %4849 = vadd.xlane.f32.xlu1 %v4848_v51 }
0x2b02   :  { %4481 = vadd.xlane.f32.xlu0 %v4480_v24 }
0x2b06   :  { %4852 = vadd.xlane.f32.xlu0 %v4851_v52 }
0x2b8e   :  { %v4850_v32 = vpop.xlane.xlu1 %4849 }
0x2b8f   :  { %v4482_v55 = vpop.xlane.xlu0 %4481  ;;  %v4854_v1 = vmul.f32 0.03125, %v4850_v32 }
0x2b90   :  { %v4483_v56 = vmul.f32 0.03125, %v4482_v55 }
0x2b91   :  { %v4856_v5 = vadd.f32 1e-06, %v4854_v1 }
0x2b92   :  { %v4484_v57 = vadd.f32 1e-06, %v4483_v56 }
0x2b93   :  { %v4853_v63 = vpop.xlane.xlu0 %4852 }
0x2b94   :  { %11701 = vrsqrt.f32 %v4484_v57  ;;  %v4855_v0 = vmul.f32 0.03125, %v4853_v63 }
0x2b96   :  { %v4857_v4 = vadd.f32 1e-06, %v4855_v0 }
0x2b98   :  { %11703 = vrsqrt.f32 %v4857_v4 }
0x2b99   :  { %11705 = vrsqrt.f32 %v4856_v5 }
0x2b9e   :  { %v11702_v58 = vpop.eup %11701 }
0x2b9f   :  { %v4486_v17 = vmul.f32 %v11702_v58, %v13018_v34 }
0x2ba1   :  { %v4493_v60 = vmul.f32 %v9731_v59, %v4486_v17 }
0x2ba2   :  { %v11704_v6 = vpop.eup %11703 }
0x2ba3   :  { %v4499_v61 = vpack.c.bf16 %v4493_v60, %v4493_v60  ;;  %v11706_v7 = vpop.eup %11705  ;;  %v4861_v11 = vmul.f32 %v11704_v6, %v13038_v41 }
0x2ba4   :  { %v4860_v28 = vmul.f32 %v11706_v7, %v13033_v12 }
0x2ba5   :  { %10798 = vmatmul.mubr.msk.bf16.vlgmr.msra.gmra.mrb[128].mxu1 %vm111_vm0, %v4499_v61  ;;  %v4869_v19 = vmul.f32 %v9768_v18, %v4861_v11 }
0x2ba6   :  { %10829 = vmatprep.mubr.msk.bf16.mxu1 %vm11917_vm2, %v11916_v8  ;;  %v4868_v27 = vmul.f32 %v9768_v18, %v4860_v28  ;;  %v11478_v28 = vld [vmem:[%s14336_s17 + $0x8] sm:$0xff]  }
0x2ba8   :  { %v4878_v3 = vpack.c.bf16 %v4869_v19, %v4868_v27 }
0x2c78   :  { %v4549_v9 = vpop.f32.mrb[128].mxu1 }
0x2c79   :  { %v4555_v42 = vmax.f32 %v4549_v9, 0.0  ;;  %v10799_v45 = vpop.f32.mrb[129].mxu1  ;;  %v11477_v9 = vld [vmem:[%s14336_s17] sm:$0xff]  }
0x2c7a   :  { %v4552_v13 = vpop.f32.mrb[130].mxu1  ;;  %v4712_v11 = vsel %vm111_vm0, %v11477_v9, 0  ;;  %v11479_v45 = vld [vmem:[%s14336_s17 + $0x10] sm:$0xff]  }
0x2c7b   :  { %v4565_v33 = vpack.c.bf16 %v4555_v42, %v4555_v42  ;;  %v10800_v23 = vpop.f32.mrb[131].mxu1  ;;  %10814 = vmatpush3.bf16.xpose.msra.mxu1 %v4712_v11  ;;  %v4715_v42 = vsel %vm111_vm0, %v11478_v28, 0  ;;  %v4718_v13 = vsel %vm111_vm0, %v11479_v45, 0 }
0x2c7c   :  { %10815 = vmatprep.subr.bf16.mxu1 %v11916_v8 }
0x2c7d   :  { %10810 = vmatmul.mubr.msk.bf16.vlgmr.msra.gmra.mrb[144].mxu0 %vm910_vm9, %v4565_v33  ;;  %v11481_v33 = vld [vmem:[%s14336_s17 + $0x20] sm:$0xff]  }
0x2c7e   :  { %10834 = vmatpush3.bf16.msra.mxu0 %v11475_v44  ;;  %10837 = vmatprep.mubr.msk.bf16.mxu0 %vm11917_vm2, %v11916_v8  ;;  %v11480_v44 = vld [vmem:[%s14336_s17 + $0x18] sm:$0xff]   ;;  %v4724_v23 = vsel %vm111_vm0, %v11481_v33, 0 }
0x2c7f   :  { %10835 = vmatprep.subr.bf16.mxu0 %v11916_v8  ;;  %v4721_v18 = vsel %vm111_vm0, %v11480_v44, 0 }
0x2c82   :  { %10836 = vmatpush3.bf16.msra.mxu0 %v11476_v25 }
0x2c83   :  { %10841 = vmatprep.subr.bf16.mxu0 %v11916_v8  ;;  %10816 = vmatpush3.bf16.xpose.msra.mxu1 %v4715_v42 }
0x2c84   :  { %10817 = vmatprep.subr.bf16.mxu1 %v11916_v8 }
0x2c85   :  { %10838 = vmatmul.mubr.msk.bf16.vlgmr.msra.gmra.mrb[148].mxu0 %vm111_vm0, %v4878_v3 }
0x2c86   :  { %10843 = vmatprep.mubr.msk.bf16.mxu0 %vm11917_vm2, %v11916_v8 }
0x2c8b   :  { %10818 = vmatpush3.bf16.xpose.msra.mxu1 %v4718_v13 }
0x2c8c   :  { %10819 = vmatprep.subr.bf16.mxu1 %v11916_v8 }
0x2c93   :  { %10820 = vmatpush3.bf16.xpose.msra.mxu1 %v4721_v18 }
0x2c94   :  { %10821 = vmatprep.subr.bf16.mxu1 %v11916_v8 }
0x2c9b   :  { %10822 = vmatpush3.bf16.xpose.msra.mxu1 %v4724_v23 }
0x2c9c   :  { %10823 = vmatprep.subr.bf16.mxu1 %v11916_v8 }
0x2d50   :  { %v13089_v39 = vpop.f32.mrb[144].mxu0 }
0x2d51   :  { %v10811_v21 = vpop.f32.mrb[145].mxu0 }
0x2d52   :  { %v4630_v49 = vpop.f32.mrb[146].mxu0  ;;  %v11880_v21 = vld [vmem:[%s14335_s10 + $0x10] sm:$0xff] }
0x2d53   :  { %v10812_v22 = vpop.f32.mrb[147].mxu0  ;;  %v13173_v49 = vadd.f32 %v11880_v21, %v13108_v10  ;;  %v87_v21 = vlaneseq }
0x2d54   :  { %v4633_v22 = vadd.f32 %v13089_v39, %v13018_v34 }
0x2d56   :  { %v4635_v31 = vmul.f32 %v4633_v22, %v4633_v22 }
0x2d58   :  { %v4928_v43 = vpop.f32.mrb[148].mxu0  ;;  %v4636_v39 = vsel %vm111_vm0, %v4635_v31, 0.0 }
0x2d59   :  { %v10839_v54 = vpop.f32.mrb[149].mxu0 }
0x2d5a   :  { %v4931_v26 = vpop.f32.mrb[150].mxu0 }
0x2d5b   :  { %v13091_v50 = vpack.c.bf16 %v4931_v26, %v4928_v43  ;;  %v10840_v2 = vpop.f32.mrb[151].mxu0  ;;  %v11881_v43 = vld [vmem:[%s14335_s10 + $0x18] sm:$0xf] }
0x2d5c   :  { %v13181_v54 = vadd.f32 %v11881_v43, %v13108_v10  ;;  %v11932_v43 = vmov -1e+09  }
0x2d5d   :  { %4937 = vrot.lane.b32.xlu0 %v13091_v50, %s14328_s27 }
0x2d61   :  { %5060 = vrot.lane.b32.xlu0 %v13091_v50, %s14327_s2 }
0x2d65   :  { %5058 = vrot.lane.b32.xlu0 %v13091_v50, %s14316_s5 }
0x2dcf   :  { %v4938_v29 = vpop.permute.xlu0 %4937 }
0x2dd0   :  { %v4943_v30 = vsel %vm205_vm3, %v4938_v29, 0 }
0x2dd1   :  { %10842 = vmatpush3.bf16.xpose.msra.mxu0 %v4943_v30 }
0x2dd2   :  { %10847 = vmatprep.subr.bf16.mxu0 %v11916_v8 }
0x2dd3   :  { %v5061_v4 = vpop.permute.xlu0 %5060 }
0x2dd4   :  { %v5066_v6 = vsel %vm205_vm3, %v5061_v4, 0 }
0x2dd7   :  { %v5059_v7 = vpop.permute.xlu0 %5058 }
0x2dd8   :  { %10844 = vmatmul.mubr.msk.bf16.vlgmr.msra.gmra.mrb[152].mxu0 %vm205_vm3, %v13091_v50 }
0x2dd9   :  { %10849 = vmatprep.mubr.msk.bf16.mxu0 %vm11917_vm2, %v11916_v8 }
0x2eab   :  { %v4979_v35 = vpop.f32.mrb[152].mxu0 }
0x2eac   :  { %v4980_v37 = vadd.f32 %v4979_v35, %v13114_v15  ;;  %v10845_v20 = vpop.f32.mrb[153].mxu0 }
0x2ead   :  { %v4982_v24 = vpop.f32.mrb[154].mxu0  ;;  %v11482_v20 = vld [vmem:[%s14336_s17 + $0x28] sm:$0xff]  }
0x2eae   :  { %v4983_v38 = vadd.f32 %v4982_v24, %v13120_v14  ;;  %v10846_v40 = vpop.f32.mrb[155].mxu0  ;;  %v4986_v46 = vsel %vm253_vm4, %v4980_v37, -inf  ;;  %v4727_v24 = vsel %vm111_vm0, %v11482_v20, 0 }
0x2eaf   :  { %4987 = vmax.xlane.f32.xlu1 %v4986_v46  ;;  %10824 = vmatpush3.bf16.xpose.msra.mxu1 %v4727_v24  ;;  %v11484_v46 = vld [vmem:[%s14336_s17 + $0x38] sm:$0xff]  }
0x2eb0   :  { %v4989_v47 = vsel %vm257_vm5, %v4983_v38, -inf  ;;  %10825 = vmatprep.subr.bf16.mxu1 %v11916_v8 }
0x2eb3   :  { %4990 = vmax.xlane.f32.xlu1 %v4989_v47  ;;  %v4733_v47 = vsel %vm111_vm0, %v11484_v46, 0 }
0x2f3c   :  { %v4988_v48 = vpop.xlane.xlu1 %4987 }
0x2f3d   :  { %v4992_v51 = vsub.f32 %v4980_v37, %v4988_v48 }
0x2f3f   :  { %v4994_v52 = vmul.f32 1.442695, %v4992_v51 }
0x2f40   :  { %v4991_v36 = vpop.xlane.xlu1 %4990 }
0x2f41   :  { %11707 = vpow2.f32 %v4994_v52  ;;  %v4993_v53 = vsub.f32 %v4983_v38, %v4991_v36  ;;  %v11483_v38 = vld [vmem:[%s14336_s17 + $0x30] sm:$0xff]   ;;  %s14341_s17 = sld [smem:[#allocation6_spill]] }
0x2f42   :  { %v4730_v40 = vsel %vm111_vm0, %v11483_v38, 0 }
0x2f43   :  { %v4996_v55 = vmul.f32 1.442695, %v4993_v53  ;;  %10826 = vmatpush3.bf16.xpose.msra.mxu1 %v4730_v40 }
0x2f44   :  { %10827 = vmatprep.subr.bf16.mxu1 %v11916_v8 }
0x2f45   :  { %11709 = vpow2.f32 %v4996_v55 }
0x2f4b   :  { %v11708_v56 = vpop.eup %11707  ;;  %10828 = vmatpush3.bf16.xpose.msra.mxu1 %v4733_v47  ;;  %v11882_v47 = vld [vmem:[%s14335_s10 + $0x20] sm:$0xff] }
0x2f4c   :  { %v4998_v57 = vsel %vm253_vm4, %v11708_v56, 0.0  ;;  %10877 = vmatprep.subr.bf16.mxu1 %v11916_v8 }
0x2f4d   :  { %4999 = vadd.xlane.f32.xlu1 %v4998_v57 }
0x2f4f   :  { %v11710_v58 = vpop.eup %11709 }
0x2f50   :  { %v5001_v59 = vsel %vm257_vm5, %v11710_v58, 0.0 }
0x2f51   :  { %5002 = vadd.xlane.f32.xlu1 %v5001_v59 }
0x2f62   :  { %5009 = vrot.lane.b32.xlu1 %v13091_v50, %s14330_s21 }
0x2fda   :  { %v5000_v17 = vpop.xlane.xlu1 %4999 }
0x2fdb   :  { %11711 = vrcp.f32 %v5000_v17 }
0x2fde   :  { %v5003_v60 = vpop.xlane.xlu1 %5002 }
0x2fdf   :  { %11713 = vrcp.f32 %v5003_v60 }
0x2fe2   :  { %v5010_v61 = vpop.permute.xlu1 %5009 }
0x2fe3   :  { %v5015_v62 = vsel %vm283_vm6, %v5010_v61, 0 }
0x2fe4   :  { %10848 = vmatpush3.bf16.msra.mxu0 %v5015_v62 }
0x2fe5   :  { %10853 = vmatprep.subr.bf16.mxu0 %v11916_v8  ;;  %v11712_v63 = vpop.eup %11711 }
0x2fe6   :  { %v5006_v0 = vmul.f32 %v11712_v63, %v11708_v56 }
0x2fe9   :  { %v11714_v32 = vpop.eup %11713 }
0x2fea   :  { %v5007_v1 = vmul.f32 %v11714_v32, %v11710_v58 }
0x2fec   :  { %v5008_v5 = vpack.c.bf16 %v5007_v1, %v5006_v0  ;;  %v9752_v0 = vld [vmem:[%s14337_s19] ss:$0 sm:$0xff]  ;;  %s14351_s19 = sld [smem:[#allocation21_spill]] }
0x2fee   :  { %10850 = vmatmul.mubr.msk.bf16.vlgmr.msra.gmra.mrb[156].mxu0 %vm253_vm4, %v5008_v5 }
0x2fef   :  { %10854 = vmatpush3.bf16.xpose.msra.mxu0 %v5066_v6  ;;  %10855 = vmatprep.mubr.msk.bf16.mxu0 %vm11917_vm2, %v11916_v8 }
0x2ff0   :  { %10859 = vmatprep.subr.bf16.mxu0 %v11916_v8 }
0x2ff6   :  { %10856 = vmatmul.mubr.msk.bf16.vlgmr.msra.gmra.mrb[160].mxu0 %vm205_vm3, %v5059_v7 }
0x2ff7   :  { %10861 = vmatprep.mubr.msk.bf16.mxu0 %vm11917_vm2, %v11916_v8 }
0x30c1   :  { %v13165_v27 = vpop.f32.mrb[156].mxu0 }
0x30c2   :  { %v10851_v19 = vpop.f32.mrb[157].mxu0 }
0x30c3   :  { %v13167_v25 = vpop.f32.mrb[158].mxu0 }
0x30c4   :  { %v10852_v3 = vpop.f32.mrb[159].mxu0 }
0x30c9   :  { %v5102_v26 = vpop.f32.mrb[160].mxu0 }
0x30ca   :  { %v5103_v2 = vadd.f32 %v5102_v26, %v13173_v49  ;;  %v10857_v29 = vpop.f32.mrb[161].mxu0 }
0x30cb   :  { %v5105_v30 = vpop.f32.mrb[162].mxu0 }
0x30cc   :  { %v5106_v16 = vadd.f32 %v5105_v30, %v13181_v54  ;;  %v10858_v35 = vpop.f32.mrb[163].mxu0  ;;  %v5109_v37 = vsel %vm253_vm4, %v5103_v2, -inf }
0x30cd   :  { %5110 = vmax.xlane.f32.xlu0 %v5109_v37 }
0x30ce   :  { %v5112_v34 = vsel %vm257_vm5, %v5106_v16, -inf }
0x30cf   :  { %5113 = vmax.xlane.f32.xlu1 %v5112_v34 }
0x30d1   :  { %4637 = vadd.xlane.f32.xlu0 %v4636_v39 }
0x30e0   :  { %5132 = vrot.lane.b32.xlu1 %v13091_v50, %s14322_s3 }
0x30e4   :  { %5181 = vrot.lane.b32.xlu1 %v13091_v50, %s14318_s26 }
0x30e8   :  { %5306 = vrot.lane.b32.xlu1 %v13091_v50, %s14319_s7 }
0x315a   :  { %v5111_v48 = vpop.xlane.xlu0 %5110 }
0x315b   :  { %v5115_v51 = vsub.f32 %v5103_v2, %v5111_v48  ;;  %v13246_v48 = vadd.f32 %v11882_v47, %v13108_v10 }
0x315c   :  { %v5114_v52 = vpop.xlane.xlu1 %5113 }
0x315d   :  { %v5117_v36 = vmul.f32 1.442695, %v5115_v51  ;;  %v5116_v53 = vsub.f32 %v5106_v16, %v5114_v52  ;;  %v11883_v51 = vld [vmem:[%s14335_s10 + $0x38] sm:$0xf] }
0x315e   :  { %v4638_v55 = vpop.xlane.xlu0 %4637  ;;  %v13252_v52 = vadd.f32 %v11883_v51, %v13108_v10 }
0x315f   :  { %11715 = vpow2.f32 %v5117_v36  ;;  %v5119_v56 = vmul.f32 1.442695, %v5116_v53  ;;  %v4639_v57 = vmul.f32 0.03125, %v4638_v55  ;;  %v11884_v36 = vld [vmem:[%s14335_s10 + $0x28] sm:$0xf] }
0x3160   :  { %v5133_v58 = vpop.permute.xlu1 %5132  ;;  %v13258_v53 = vadd.f32 %v11884_v36, %v13108_v10 }
0x3161   :  { %11717 = vpow2.f32 %v5119_v56  ;;  %v4640_v59 = vadd.f32 1e-06, %v4639_v57  ;;  %v5138_v17 = vsel %vm283_vm6, %v5133_v58, 0  ;;  %v11885_v56 = vld [vmem:[%s14335_s10 + $0x30] sm:$0xff]  ;;  %s14339_s10 = sld [smem:[#allocation14_spill]] }
0x3162   :  { %10860 = vmatpush3.bf16.msra.mxu0 %v5138_v17  ;;  %v13264_v57 = vadd.f32 %v11885_v56, %v13108_v10 }
0x3163   :  { %11719 = vrsqrt.f32 %v4640_v59  ;;  %10865 = vmatprep.subr.bf16.mxu0 %v11916_v8 }
0x3164   :  { %v5182_v32 = vpop.permute.xlu1 %5181 }
0x3168   :  { %v5307_v7 = vpop.permute.xlu1 %5306 }
0x3169   :  { %v11716_v60 = vpop.eup %11715  ;;  %v5312_v11 = vsel %vm205_vm3, %v5307_v7, 0 }
0x316a   :  { %v5121_v61 = vsel %vm253_vm4, %v11716_v60, 0.0 }
0x316b   :  { %v11718_v62 = vpop.eup %11717  ;;  %5122 = vadd.xlane.f32.xlu0 %v5121_v61 }
0x316c   :  { %v5124_v4 = vsel %vm257_vm5, %v11718_v62, 0.0 }
0x316d   :  { %v11720_v63 = vpop.eup %11719 }
0x316e   :  { %v4642_v1 = vmul.f32 %v11720_v63, %v4633_v22  ;;  %v13236_v22 = vand.u32 127, %v87_v21 }
0x316f   :  { %5125 = vadd.xlane.f32.xlu0 %v5124_v4 }
0x3170   :  { %v4649_v5 = vmul.f32 %v9752_v0, %v4642_v1  ;;  %vm89_vm11 = vcmp.lt.s32.totalorder %v13236_v22, 64 }
0x3171   :  { %v13239_v26 = vsel %vm89_vm11, 0.0, %v11932_v43 }
0x3172   :  { %v4650_v6 = vmul.f32 0.17677669, %v4649_v5 }
0x3174   :  { %v4667_v9 = vpack.c.bf16 %v4650_v6, %v4650_v6 }
0x3176   :  { %10830 = vmatmul.mubr.msk.bf16.vlgmr.msra.gmra.mrb[132].mxu1 %vm111_vm0, %v4667_v9 }
0x3177   :  { %10878 = vmatpush3.bf16.xpose.msra.mxu1 %v5312_v11  ;;  %10879 = vmatprep.mubr.msk.bf16.mxu1 %vm11917_vm2, %v11916_v8 }
0x3178   :  { %10889 = vmatprep.subr.bf16.mxu1 %v11916_v8 }
0x3185   :  { %5183 = vrot.lane.b32.xlu0 %v13091_v50, %s14317_s6 }
0x3189   :  { %5304 = vrot.lane.b32.xlu0 %v13091_v50, %s14320_s25 }
0x31f8   :  { %v5123_v28 = vpop.xlane.xlu0 %5122 }
0x31f9   :  { %11721 = vrcp.f32 %v5123_v28 }
0x31fc   :  { %v5126_v42 = vpop.xlane.xlu0 %5125 }
0x31fd   :  { %11723 = vrcp.f32 %v5126_v42 }
0x3200   :  { %v5184_v45 = vpop.permute.xlu0 %5183 }
0x3201   :  { %v5189_v3 = vsel %vm205_vm3, %v5184_v45, 0 }
0x3203   :  { %v11722_v44 = vpop.eup %11721 }
0x3204   :  { %v5305_v13 = vpop.permute.xlu0 %5304  ;;  %v5129_v33 = vmul.f32 %v11722_v44, %v11716_v60 }
0x3205   :  { %10880 = vmatmul.mubr.msk.bf16.vlgmr.msra.gmra.mrb[136].mxu1 %vm205_vm3, %v5305_v13 }
0x3206   :  { %10893 = vmatprep.mubr.msk.bf16.mxu1 %vm11917_vm2, %v11916_v8 }
0x3207   :  { %v11724_v18 = vpop.eup %11723 }
0x3208   :  { %v5130_v23 = vmul.f32 %v11724_v18, %v11718_v62 }
0x320a   :  { %v5131_v19 = vpack.c.bf16 %v5130_v23, %v5129_v33 }
0x320c   :  { %10862 = vmatmul.mubr.msk.bf16.vlgmr.msra.gmra.mrb[164].mxu0 %vm253_vm4, %v5131_v19 }
0x320d   :  { %10866 = vmatpush3.bf16.xpose.msra.mxu0 %v5189_v3  ;;  %10867 = vmatprep.mubr.msk.bf16.mxu0 %vm11917_vm2, %v11916_v8 }
0x320e   :  { %10871 = vmatprep.subr.bf16.mxu0 %v11916_v8 }
0x3214   :  { %10868 = vmatmul.mubr.msk.bf16.vlgmr.msra.gmra.mrb[168].mxu0 %vm205_vm3, %v5182_v32 }
0x3215   :  { %10873 = vmatprep.mubr.msk.bf16.mxu0 %vm11917_vm2, %v11916_v8 }
0x3249   :  { %v4769_v2 = vpop.f32.mrb[132].mxu1 }
0x324a   :  { %v4770_v29 = vadd.f32 %v4769_v2, %v13239_v26  ;;  %v10831_v30 = vpop.f32.mrb[133].mxu1 }
0x324b   :  { %v4772_v31 = vpop.f32.mrb[134].mxu1 }
0x324c   :  { %4775 = vst [vmem:[#allocation2] sm:$0xff] %v4770_v29  ;;  %v10832_v16 = vpop.f32.mrb[135].mxu1 }
0x32d8   :  { %v5348_v35 = vpop.f32.mrb[136].mxu1 }
0x32d9   :  { %v10881_v37 = vpop.f32.mrb[137].mxu1  ;;  %v5349_v32 = vadd.f32 %v5348_v35, %v13264_v57 }
0x32da   :  { %v5351_v34 = vpop.f32.mrb[138].mxu1 }
0x32db   :  { %v10882_v39 = vpop.f32.mrb[139].mxu1  ;;  %v5352_v60 = vadd.f32 %v5351_v34, %v13252_v52  ;;  %v5355_v1 = vsel %vm253_vm4, %v5349_v32, -inf }
0x32dd   :  { %v5358_v10 = vsel %vm257_vm5, %v5352_v60, -inf }
0x32df   :  { %v5174_v20 = vpop.f32.mrb[164].mxu0 }
0x32e0   :  { %v10863_v24 = vpop.f32.mrb[165].mxu0 }
0x32e1   :  { %v5177_v38 = vpop.f32.mrb[166].mxu0 }
0x32e2   :  { %v11391_v40 = vpack.i.bf16 %v5177_v38, %v5174_v20  ;;  %v10864_v46 = vpop.f32.mrb[167].mxu0 }
0x32e7   :  { %v5225_v55 = vpop.f32.mrb[168].mxu0 }
0x32e8   :  { %v5226_v58 = vadd.f32 %v5225_v55, %v13246_v48  ;;  %v10869_v59 = vpop.f32.mrb[169].mxu0 }
0x32e9   :  { %v5228_v17 = vpop.f32.mrb[170].mxu0 }
0x32ea   :  { %v5229_v61 = vadd.f32 %v5228_v17, %v13258_v53  ;;  %v10870_v62 = vpop.f32.mrb[171].mxu0  ;;  %v5232_v63 = vsel %vm253_vm4, %v5226_v58, -inf }
0x32eb   :  { %5233 = vmax.xlane.f32.xlu1 %v5232_v63 }
0x32ec   :  { %v5235_v0 = vsel %vm257_vm5, %v5229_v61, -inf }
0x32ed   :  { %5236 = vmax.xlane.f32.xlu0 %v5235_v0 }
0x32ef   :  { %5359 = vmax.xlane.f32.xlu1 %v5358_v10 }
0x32f1   :  { %5356 = vmax.xlane.f32.xlu0 %v5355_v1 }
0x3378   :  { %v5234_v4 = vpop.xlane.xlu1 %5233 }
0x3379   :  { %v5238_v9 = vsub.f32 %v5226_v58, %v5234_v4  ;;  %v11485_v58 = vld [vmem:[%s14338_s8] sm:$0xff]  }
0x337a   :  { %v5237_v5 = vpop.xlane.xlu0 %5236  ;;  %10890 = vmatpush3.bf16.msra.mxu1 %v11485_v58 }
0x337b   :  { %v5239_v6 = vsub.f32 %v5229_v61, %v5237_v5  ;;  %v5240_v44 = vmul.f32 1.442695, %v5238_v9  ;;  %10891 = vmatprep.subr.bf16.mxu1 %v11916_v8  ;;  %v11486_v61 = vld [vmem:[%s14338_s8 + $0x8] sm:$0xff]  }
0x337c   :  { %v5360_v7 = vpop.xlane.xlu1 %5359 }
0x337d   :  { %v5362_v11 = vsub.f32 %v5352_v60, %v5360_v7  ;;  %v5242_v28 = vmul.f32 1.442695, %v5239_v6 }
0x337e   :  { %v5357_v42 = vpop.xlane.xlu0 %5356  ;;  %10892 = vmatpush3.bf16.msra.mxu1 %v11486_v61  ;;  %v11492_v61 = vld [vmem:[%s14340_s18 + $0x18] sm:$0xff]  }
0x337f   :  { %v5365_v45 = vmul.f32 1.442695, %v5362_v11  ;;  %v5361_v13 = vsub.f32 %v5349_v32, %v5357_v42  ;;  %10905 = vmatprep.subr.bf16.mxu1 %v11916_v8 }
0x3381   :  { %11725 = vpow2.f32 %v5365_v45  ;;  %v5363_v18 = vmul.f32 1.442695, %v5361_v13 }
0x3382   :  { %11727 = vpow2.f32 %v5242_v28 }
0x3383   :  { %11729 = vpow2.f32 %v5363_v18 }
0x3384   :  { %11731 = vpow2.f32 %v5240_v44 }
0x338b   :  { %v11726_v33 = vpop.eup %11725 }
0x338c   :  { %v11728_v23 = vpop.eup %11727  ;;  %v5370_v19 = vsel %vm257_vm5, %v11726_v33, 0.0 }
0x338d   :  { %v11730_v3 = vpop.eup %11729  ;;  %5371 = vadd.xlane.f32.xlu1 %v5370_v19  ;;  %v5247_v2 = vsel %vm257_vm5, %v11728_v23, 0.0 }
0x338e   :  { %v5367_v21 = vsel %vm253_vm4, %v11730_v3, 0.0  ;;  %v11732_v43 = vpop.eup %11731 }
0x338f   :  { %5368 = vadd.xlane.f32.xlu0 %v5367_v21  ;;  %v5244_v29 = vsel %vm253_vm4, %v11732_v43, 0.0 }
0x3391   :  { %5248 = vadd.xlane.f32.xlu1 %v5247_v2 }
0x3393   :  { %5245 = vadd.xlane.f32.xlu0 %v5244_v29 }
0x33a2   :  { %5378 = vrot.lane.b32.xlu1 %v13091_v50, %s14321_s28 }
0x33a6   :  { %11392 = vrot.lane.b32.xlu1 %v11391_v40, %s14323_s4 }
0x33a9   :  { %5255 = vrot.lane.b32.xlu0 %v13091_v50, %s14331_s24 }
0x341a   :  { %v5372_v30 = vpop.xlane.xlu1 %5371 }
0x341c   :  { %v5369_v31 = vpop.xlane.xlu0 %5368 }
0x341e   :  { %v5249_v16 = vpop.xlane.xlu1 %5248 }
0x341f   :  { %11733 = vrcp.f32 %v5249_v16 }
0x3420   :  { %v5246_v35 = vpop.xlane.xlu0 %5245 }
0x3421   :  { %11735 = vrcp.f32 %v5246_v35 }
0x3422   :  { %11737 = vrcp.f32 %v5369_v31  ;;  %v5379_v40 = vpop.permute.xlu1 %5378 }
0x3423   :  { %11739 = vrcp.f32 %v5372_v30  ;;  %v5384_v47 = vsel %vm283_vm6, %v5379_v40, 0 }
0x3424   :  { %v5256_v37 = vpop.permute.xlu0 %5255 }
0x3425   :  { %v5261_v34 = vsel %vm283_vm6, %v5256_v37, 0 }
0x3426   :  { %10872 = vmatpush3.bf16.msra.mxu0 %v5261_v34  ;;  %v11393_v5 = vpop.permute.xlu1 %11392  ;;  %v11487_v34 = vld [vmem:[%s14339_s10] sm:$0xff]  }
0x3427   :  { %10883 = vmatprep.subr.bf16.mxu0 %v11916_v8  ;;  %v11395_v7 = vunpack.i.h.bf16 %v11393_v5  ;;  %v11394_v9 = vunpack.i.l.bf16 %v11393_v5 }
0x3429   :  { %v11734_v39 = vpop.eup %11733  ;;  %v5452_v45 = vsel %vm205_vm3, %v13167_v25, %v11395_v7  ;;  %v5451_v13 = vsel %vm205_vm3, %v13165_v27, %v11394_v9 }
0x342a   :  { %v5253_v24 = vmul.f32 %v11734_v39, %v11728_v23  ;;  %v11490_v39 = vld [vmem:[%s14340_s18 + $0x8] sm:$0xff]  }
0x342b   :  { %v11736_v20 = vpop.eup %11735 }
0x342c   :  { %v5252_v38 = vmul.f32 %v11736_v20, %v11732_v43  ;;  %v11738_v46 = vpop.eup %11737 }
0x342d   :  { %v11740_v51 = vpop.eup %11739  ;;  %v5375_v36 = vmul.f32 %v11738_v46, %v11730_v3 }
0x342e   :  { %v5254_v50 = vpack.c.bf16 %v5253_v24, %v5252_v38  ;;  %v5376_v55 = vmul.f32 %v11740_v51, %v11726_v33 }
0x3430   :  { %10874 = vmatmul.mubr.msk.bf16.vlgmr.msra.gmra.mrb[172].mxu0 %vm253_vm4, %v5254_v50  ;;  %v5377_v56 = vpack.c.bf16 %v5376_v55, %v5375_v36  ;;  %v9784_v55 = vld [vmem:[%s14313_s29 + $0x1] ss:$0 sm:$0xff] }
0x3431   :  { %10884 = vmatpush3.bf16.msra.mxu0 %v5384_v47  ;;  %10885 = vmatprep.mubr.msk.bf16.mxu0 %vm11917_vm2, %v11916_v8 }
0x3432   :  { %10897 = vmatprep.subr.bf16.mxu0 %v11916_v8 }
0x3438   :  { %10886 = vmatmul.mubr.msk.bf16.vlgmr.msra.gmra.mrb[176].mxu0 %vm253_vm4, %v5377_v56 }
0x3439   :  { %10901 = vmatprep.mubr.msk.bf16.mxu0 %vm11917_vm2, %v11916_v8  ;;  %10898 = vmatpush3.bf16.msra.mxu0 %v11487_v34 }
0x343a   :  { %10899 = vmatprep.subr.bf16.mxu0 %v11916_v8 }
0x3503   :  { %v5297_v59 = vpop.f32.mrb[172].mxu0 }
0x3504   :  { %v10875_v17 = vpop.f32.mrb[173].mxu0 }
0x3505   :  { %v5300_v60 = vpop.f32.mrb[174].mxu0 }
0x3506   :  { %v11396_v62 = vpack.i.bf16 %v5300_v60, %v5297_v59  ;;  %v10876_v63 = vpop.f32.mrb[175].mxu0  ;;  %v11491_v60 = vld [vmem:[%s14340_s18 + $0x10] sm:$0xff]  }
0x3508   :  { %11397 = vrot.lane.b32.xlu0 %v11396_v62, %s14324_s0 }
0x350b   :  { %v5420_v32 = vpop.f32.mrb[176].mxu0 }
0x350c   :  { %v10887_v0 = vpop.f32.mrb[177].mxu0 }
0x350d   :  { %v5423_v10 = vpop.f32.mrb[178].mxu0 }
0x350e   :  { %v11401_v1 = vpack.i.bf16 %v5423_v10, %v5420_v32  ;;  %v10888_v4 = vpop.f32.mrb[179].mxu0 }
0x3510   :  { %11402 = vrot.lane.b32.xlu1 %v11401_v1, %s14325_s30 }
0x357a   :  { %v11398_v6 = vpop.permute.xlu0 %11397 }
0x357b   :  { %v11400_v11 = vunpack.i.h.bf16 %v11398_v6  ;;  %v11399_v28 = vunpack.i.l.bf16 %v11398_v6 }
0x357d   :  { %v5453_v33 = vsel %vm723_vm7, %v5451_v13, %v11399_v28  ;;  %v5454_v23 = vsel %vm723_vm7, %v5452_v45, %v11400_v11 }
0x3582   :  { %v11403_v42 = vpop.permute.xlu1 %11402 }
0x3583   :  { %v11405_v44 = vunpack.i.h.bf16 %v11403_v42  ;;  %v11404_v18 = vunpack.i.l.bf16 %v11403_v42 }
0x3585   :  { %v5455_v19 = vsel %vm726_vm8, %v5453_v33, %v11404_v18  ;;  %v5456_v3 = vsel %vm726_vm8, %v5454_v23, %v11405_v44  ;;  %v11493_v18 = vld [vmem:[%s14333_s23 + $0x10] sm:$0xff]   ;;  %v11494_v33 = vld [vmem:[%s14333_s23 + $0x18] sm:$0xff]  }
0x3586   :  { %v5457_v21 = vpack.c.bf16 %v5456_v3, %v5455_v19 }
0x3588   :  { %10894 = vmatmul.mubr.msk.bf16.vlgmr.msra.gmra.mrb[140].mxu1 %vm111_vm0, %v5457_v21 }
0x3589   :  { %10913 = vmatprep.mubr.msk.bf16.mxu1 %vm11917_vm2, %v11916_v8 }
0x365b   :  { %v5507_v25 = vpop.f32.mrb[140].mxu1 }
0x365c   :  { %v5514_v43 = vadd.f32 %v13033_v12, %v5507_v25  ;;  %v10895_v27 = vpop.f32.mrb[141].mxu1  ;;  %v11488_v12 = vld [vmem:[%s14339_s10 + $0x8] sm:$0xff]  }
0x365d   :  { %v5510_v2 = vpop.f32.mrb[142].mxu1  ;;  %10900 = vmatpush3.bf16.msra.mxu0 %v11488_v12 }
0x365e   :  { %v5515_v29 = vadd.f32 %v13038_v41, %v5510_v2  ;;  %v10896_v30 = vpop.f32.mrb[143].mxu1  ;;  %v5517_v31 = vmul.f32 %v5514_v43, %v5514_v43  ;;  %v11489_v41 = vld [vmem:[%s14340_s18] sm:$0xff]   ;;  %10917 = vmatprep.subr.bf16.mxu0 %v11916_v8 }
0x365f   :  { %10906 = vmatpush3.bf16.msra.mxu1 %v11489_v41  ;;  %v9794_v30 = vld [vmem:[%s14313_s29 + $0x2] ss:$0 sm:$0xff] }
0x3660   :  { %v5519_v16 = vsel %vm111_vm0, %v5517_v31, 0.0  ;;  %v5518_v35 = vmul.f32 %v5515_v29, %v5515_v29  ;;  %10907 = vmatprep.subr.bf16.mxu1 %v11916_v8 }
0x3661   :  { %5520 = vadd.xlane.f32.xlu0 %v5519_v16 }
0x3662   :  { %v5522_v37 = vsel %vm115_vm1, %v5518_v35, 0.0 }
0x3663   :  { %5523 = vadd.xlane.f32.xlu1 %v5522_v37  ;;  %10908 = vmatpush3.bf16.msra.mxu1 %v11490_v39 }
0x3664   :  { %10909 = vmatprep.subr.bf16.mxu1 %v11916_v8 }
0x3667   :  { %10910 = vmatpush3.bf16.msra.mxu1 %v11491_v60 }
0x3668   :  { %10911 = vmatprep.subr.bf16.mxu1 %v11916_v8 }
0x366b   :  { %10912 = vmatpush3.bf16.msra.mxu1 %v11492_v61 }
0x366c   :  { %10931 = vmatprep.subr.bf16.mxu1 %v11916_v8 }
0x36ee   :  { %v5521_v20 = vpop.xlane.xlu0 %5520 }
0x36ef   :  { %v5525_v24 = vmul.f32 0.03125, %v5521_v20 }
0x36f0   :  { %v5524_v38 = vpop.xlane.xlu1 %5523 }
0x36f1   :  { %v5527_v40 = vadd.f32 1e-06, %v5525_v24  ;;  %v5526_v50 = vmul.f32 0.03125, %v5524_v38 }
0x36f3   :  { %11741 = vrsqrt.f32 %v5527_v40  ;;  %v5528_v46 = vadd.f32 1e-06, %v5526_v50 }
0x36f5   :  { %11743 = vrsqrt.f32 %v5528_v46 }
0x36fd   :  { %v11742_v47 = vpop.eup %11741 }
0x36fe   :  { %v5531_v51 = vmul.f32 %v11742_v47, %v5514_v43 }
0x36ff   :  { %v11744_v36 = vpop.eup %11743 }
0x3700   :  { %v5532_v56 = vmul.f32 %v11744_v36, %v5515_v29  ;;  %v5539_v58 = vmul.f32 %v9784_v55, %v5531_v51 }
0x3702   :  { %v5540_v59 = vmul.f32 %v9784_v55, %v5532_v56 }
0x3704   :  { %v5545_v17 = vpack.c.bf16 %v5540_v59, %v5539_v58 }
0x3706   :  { %10902 = vmatmul.mubr.msk.bf16.vlgmr.msra.gmra.mrb[180].mxu0 %vm111_vm0, %v5545_v17 }
0x3707   :  { %10921 = vmatprep.mubr.msk.bf16.mxu0 %vm11917_vm2, %v11916_v8  ;;  %10918 = vmatpush3.bf16.msra.mxu0 %v11493_v18 }
0x3708   :  { %10919 = vmatprep.subr.bf16.mxu0 %v11916_v8 }
0x370b   :  { %10920 = vmatpush3.bf16.msra.mxu0 %v11494_v33 }
0x370c   :  { %10925 = vmatprep.subr.bf16.mxu0 %v11916_v8 }
0x37d9   :  { %v5595_v62 = vpop.f32.mrb[180].mxu0 }
0x37da   :  { %v10903_v63 = vpop.f32.mrb[181].mxu0  ;;  %v5602_v0 = vmax.f32 %v5595_v62, 0.0 }
0x37db   :  { %v5598_v32 = vpop.f32.mrb[182].mxu0 }
0x37dc   :  { %v5603_v10 = vmax.f32 %v5598_v32, 0.0  ;;  %v10904_v1 = vpop.f32.mrb[183].mxu0 }
0x37de   :  { %v5612_v4 = vpack.c.bf16 %v5603_v10, %v5602_v0 }
0x37e0   :  { %10914 = vmatmul.mubr.msk.bf16.vlgmr.msra.gmra.mrb[144].mxu1 %vm910_vm9, %v5612_v4 }
0x37e1   :  { %10933 = vmatprep.mubr.msk.bf16.mxu1 %vm11917_vm2, %v11916_v8 }
0x38b3   :  { %v5674_v5 = vpop.f32.mrb[144].mxu1 }
0x38b4   :  { %v13351_v6 = vadd.f32 %v5674_v5, %v5514_v43  ;;  %v10915_v7 = vpop.f32.mrb[145].mxu1 }
0x38b5   :  { %v5677_v9 = vpop.f32.mrb[146].mxu1 }
0x38b6   :  { %v13353_v11 = vadd.f32 %v5677_v9, %v5515_v29  ;;  %v10916_v28 = vpop.f32.mrb[147].mxu1  ;;  %v5684_v42 = vmul.f32 %v13351_v6, %v13351_v6 }
0x38b8   :  { %v5686_v45 = vsel %vm111_vm0, %v5684_v42, 0.0  ;;  %v5685_v13 = vmul.f32 %v13353_v11, %v13353_v11 }
0x38b9   :  { %5687 = vadd.xlane.f32.xlu0 %v5686_v45 }
0x38ba   :  { %v5689_v44 = vsel %vm115_vm1, %v5685_v13, 0.0 }
0x38bd   :  { %5690 = vadd.xlane.f32.xlu0 %v5689_v44 }
0x3946   :  { %v5688_v23 = vpop.xlane.xlu0 %5687 }
0x3947   :  { %v5692_v19 = vmul.f32 0.03125, %v5688_v23 }
0x3949   :  { %v5694_v3 = vadd.f32 1e-06, %v5692_v19 }
0x394a   :  { %v5691_v21 = vpop.xlane.xlu0 %5690 }
0x394b   :  { %11745 = vrsqrt.f32 %v5694_v3  ;;  %v5693_v25 = vmul.f32 0.03125, %v5691_v21 }
0x394d   :  { %v5695_v43 = vadd.f32 1e-06, %v5693_v25 }
0x394f   :  { %11747 = vrsqrt.f32 %v5695_v43 }
0x3955   :  { %v11746_v27 = vpop.eup %11745 }
0x3956   :  { %v5698_v2 = vmul.f32 %v11746_v27, %v13351_v6 }
0x3958   :  { %v5706_v16 = vmul.f32 %v9794_v30, %v5698_v2 }
0x3959   :  { %v11748_v29 = vpop.eup %11747 }
0x395a   :  { %v5699_v31 = vmul.f32 %v11748_v29, %v13353_v11 }
0x395c   :  { %v5707_v35 = vmul.f32 %v9794_v30, %v5699_v31 }
0x395e   :  { %v5716_v37 = vpack.c.bf16 %v5707_v35, %v5706_v16 }
0x3960   :  { %10922 = vmatmul.mubr.msk.bf16.vlgmr.msra.gmra.mrb[184].mxu0 %vm111_vm0, %v5716_v37 }
0x3961   :  { %10927 = vmatprep.mubr.msk.bf16.mxu0 %vm11917_vm2, %v11916_v8 }
0x3a33   :  { %v5766_v34 = vpop.f32.mrb[184].mxu0 }
0x3a34   :  { %v10923_v12 = vpop.f32.mrb[185].mxu0 }
0x3a35   :  { %v5769_v41 = vpop.f32.mrb[186].mxu0 }
0x3a36   :  { %v13377_v39 = vpack.c.bf16 %v5769_v41, %v5766_v34  ;;  %v10924_v20 = vpop.f32.mrb[187].mxu0 }
0x3a38   :  { %5898 = vrot.lane.b32.xlu0 %v13377_v39, %s14327_s2  ;;  %5775 = vrot.lane.b32.xlu1 %v13377_v39, %s14328_s27 }
0x3a3c   :  { %6019 = vrot.lane.b32.xlu0 %v13377_v39, %s14318_s26  ;;  %5896 = vrot.lane.b32.xlu1 %v13377_v39, %s14316_s5 }
0x3a40   :  { %6142 = vrot.lane.b32.xlu0 %v13377_v39, %s14320_s25  ;;  %6021 = vrot.lane.b32.xlu1 %v13377_v39, %s14317_s6 }
0x3a44   :  { %6144 = vrot.lane.b32.xlu1 %v13377_v39, %s14319_s7 }
0x3aaa   :  { %v5776_v24 = vpop.permute.xlu1 %5775  ;;  %v5899_v40 = vpop.permute.xlu0 %5898 }
0x3aab   :  { %v5781_v38 = vsel %vm205_vm3, %v5776_v24, 0  ;;  %v5904_v46 = vsel %vm205_vm3, %v5899_v40, 0 }
0x3aac   :  { %10926 = vmatpush3.bf16.xpose.msra.mxu0 %v5781_v38 }
0x3aad   :  { %10937 = vmatprep.subr.bf16.mxu0 %v11916_v8 }
0x3aae   :  { %v5897_v50 = vpop.permute.xlu1 %5896  ;;  %v6020_v55 = vpop.permute.xlu0 %6019 }
0x3ab2   :  { %v6022_v47 = vpop.permute.xlu1 %6021  ;;  %v6143_v58 = vpop.permute.xlu0 %6142 }
0x3ab3   :  { %10928 = vmatmul.mubr.msk.bf16.vlgmr.msra.gmra.mrb[188].mxu0 %vm205_vm3, %v13377_v39  ;;  %v6027_v51 = vsel %vm205_vm3, %v6022_v47, 0 }
0x3ab4   :  { %10938 = vmatpush3.bf16.xpose.msra.mxu0 %v5904_v46  ;;  %10939 = vmatprep.mubr.msk.bf16.mxu0 %vm11917_vm2, %v11916_v8 }
0x3ab5   :  { %10949 = vmatprep.subr.bf16.mxu0 %v11916_v8 }
0x3ab6   :  { %v6145_v36 = vpop.permute.xlu1 %6144 }
0x3ab7   :  { %v6150_v56 = vsel %vm205_vm3, %v6145_v36, 0 }
0x3abb   :  { %10940 = vmatmul.mubr.msk.bf16.vlgmr.msra.gmra.mrb[192].mxu0 %vm205_vm3, %v5897_v50 }
0x3abc   :  { %10950 = vmatpush3.bf16.xpose.msra.mxu0 %v6027_v51  ;;  %10951 = vmatprep.mubr.msk.bf16.mxu0 %vm11917_vm2, %v11916_v8 }
0x3abd   :  { %10961 = vmatprep.subr.bf16.mxu0 %v11916_v8 }
0x3ac3   :  { %10952 = vmatmul.mubr.msk.bf16.vlgmr.msra.gmra.mrb[196].mxu0 %vm205_vm3, %v6020_v55 }
0x3ac4   :  { %10962 = vmatpush3.bf16.xpose.msra.mxu0 %v6150_v56  ;;  %10963 = vmatprep.mubr.msk.bf16.mxu0 %vm11917_vm2, %v11916_v8 }
0x3ac5   :  { %10973 = vmatprep.subr.bf16.mxu0 %v11916_v8 }
0x3acb   :  { %10964 = vmatmul.mubr.msk.bf16.vlgmr.msra.gmra.mrb[200].mxu0 %vm205_vm3, %v6143_v58 }
0x3acc   :  { %10977 = vmatprep.mubr.msk.bf16.mxu0 %vm11917_vm2, %v11916_v8 }
0x3b86   :  { %v5817_v59 = vpop.f32.mrb[188].mxu0 }
0x3b87   :  { %v5818_v17 = vadd.f32 %v5817_v59, %v13114_v15  ;;  %v10929_v60 = vpop.f32.mrb[189].mxu0 }
0x3b88   :  { %v5820_v61 = vpop.f32.mrb[190].mxu0 }
0x3b89   :  { %v5821_v62 = vadd.f32 %v5820_v61, %v13120_v14  ;;  %v10930_v63 = vpop.f32.mrb[191].mxu0  ;;  %v5824_v32 = vsel %vm253_vm4, %v5818_v17, -inf }
0x3b8a   :  { %5825 = vmax.xlane.f32.xlu1 %v5824_v32 }
0x3b8b   :  { %v5827_v0 = vsel %vm257_vm5, %v5821_v62, -inf }
0x3b8c   :  { %5828 = vmax.xlane.f32.xlu0 %v5827_v0 }
0x3b8e   :  { %v5940_v10 = vpop.f32.mrb[192].mxu0 }
0x3b8f   :  { %v5941_v1 = vadd.f32 %v5940_v10, %v13173_v49  ;;  %v10941_v4 = vpop.f32.mrb[193].mxu0 }
0x3b90   :  { %v5943_v5 = vpop.f32.mrb[194].mxu0 }
0x3b91   :  { %v5944_v7 = vadd.f32 %v5943_v5, %v13181_v54  ;;  %v10942_v9 = vpop.f32.mrb[195].mxu0  ;;  %v5947_v15 = vsel %vm253_vm4, %v5941_v1, -inf }
0x3b92   :  { %5948 = vmax.xlane.f32.xlu0 %v5947_v15 }
0x3b93   :  { %v5950_v14 = vsel %vm257_vm5, %v5944_v7, -inf }
0x3b94   :  { %5951 = vmax.xlane.f32.xlu1 %v5950_v14 }
0x3b96   :  { %v6063_v28 = vpop.f32.mrb[196].mxu0 }
0x3b97   :  { %v6064_v42 = vadd.f32 %v6063_v28, %v13246_v48  ;;  %v10953_v45 = vpop.f32.mrb[197].mxu0 }
0x3b98   :  { %v6066_v13 = vpop.f32.mrb[198].mxu0 }
0x3b99   :  { %v6067_v44 = vadd.f32 %v6066_v13, %v13258_v53  ;;  %v10954_v18 = vpop.f32.mrb[199].mxu0  ;;  %v6070_v49 = vsel %vm253_vm4, %v6064_v42, -inf }
0x3b9a   :  { %6071 = vmax.xlane.f32.xlu0 %v6070_v49 }
0x3b9b   :  { %v6073_v54 = vsel %vm257_vm5, %v6067_v44, -inf }
0x3b9c   :  { %6074 = vmax.xlane.f32.xlu1 %v6073_v54 }
0x3b9e   :  { %v6186_v33 = vpop.f32.mrb[200].mxu0 }
0x3b9f   :  { %v6187_v23 = vadd.f32 %v6186_v33, %v13264_v57  ;;  %v10965_v19 = vpop.f32.mrb[201].mxu0 }
0x3ba0   :  { %v6189_v3 = vpop.f32.mrb[202].mxu0 }
0x3ba1   :  { %v6190_v21 = vadd.f32 %v6189_v3, %v13252_v52  ;;  %v10966_v25 = vpop.f32.mrb[203].mxu0  ;;  %v6193_v48 = vsel %vm253_vm4, %v6187_v23, -inf }
0x3ba2   :  { %6194 = vmax.xlane.f32.xlu0 %v6193_v48 }
0x3ba3   :  { %v6196_v53 = vsel %vm257_vm5, %v6190_v21, -inf }
0x3ba4   :  { %6197 = vmax.xlane.f32.xlu1 %v6196_v53 }
0x3c17   :  { %v5826_v43 = vpop.xlane.xlu1 %5825 }
0x3c18   :  { %v5830_v27 = vsub.f32 %v5818_v17, %v5826_v43 }
0x3c19   :  { %v5829_v2 = vpop.xlane.xlu0 %5828 }
0x3c1a   :  { %v5832_v29 = vmul.f32 1.442695, %v5830_v27  ;;  %v5831_v30 = vsub.f32 %v5821_v62, %v5829_v2 }
0x3c1c   :  { %11749 = vpow2.f32 %v5832_v29  ;;  %v5834_v31 = vmul.f32 1.442695, %v5831_v30 }
0x3c1e   :  { %11751 = vpow2.f32 %v5834_v31 }
0x3c1f   :  { %v5949_v57 = vpop.xlane.xlu0 %5948 }
0x3c20   :  { %v5953_v16 = vsub.f32 %v5941_v1, %v5949_v57 }
0x3c21   :  { %v5952_v24 = vpop.xlane.xlu1 %5951 }
0x3c22   :  { %v5955_v35 = vmul.f32 1.442695, %v5953_v16  ;;  %v5954_v38 = vsub.f32 %v5944_v7, %v5952_v24 }
0x3c24   :  { %11753 = vpow2.f32 %v5955_v35  ;;  %v5957_v46 = vmul.f32 1.442695, %v5954_v38 }
0x3c26   :  { %v11750_v52 = vpop.eup %11749  ;;  %11755 = vpow2.f32 %v5957_v46 }
0x3c27   :  { %v5836_v37 = vsel %vm253_vm4, %v11750_v52, 0.0  ;;  %v6072_v50 = vpop.xlane.xlu0 %6071 }
0x3c28   :  { %v11752_v34 = vpop.eup %11751  ;;  %5837 = vadd.xlane.f32.xlu0 %v5836_v37  ;;  %v6076_v36 = vsub.f32 %v6064_v42, %v6072_v50 }
0x3c29   :  { %v5839_v12 = vsel %vm257_vm5, %v11752_v34, 0.0  ;;  %v6075_v40 = vpop.xlane.xlu1 %6074 }
0x3c2a   :  { %5840 = vadd.xlane.f32.xlu1 %v5839_v12  ;;  %v6077_v47 = vsub.f32 %v6067_v44, %v6075_v40  ;;  %v6078_v59 = vmul.f32 1.442695, %v6076_v36 }
0x3c2c   :  { %v6080_v56 = vmul.f32 1.442695, %v6077_v47 }
0x3c2e   :  { %v13432_v41 = vpop.eup %11753  ;;  %11757 = vpow2.f32 %v6080_v56  ;;  %v11495_v56 = vld [vmem:[%s14338_s8 + $0x10] sm:$0xff]  }
0x3c2f   :  { %v5959_v20 = vsel %vm253_vm4, %v13432_v41, 0.0  ;;  %v6195_v55 = vpop.xlane.xlu0 %6194  ;;  %11759 = vpow2.f32 %v6078_v59  ;;  %10974 = vmatpush3.bf16.msra.mxu0 %v11495_v56 }
0x3c30   :  { %5960 = vadd.xlane.f32.xlu0 %v5959_v20  ;;  %v6199_v17 = vsub.f32 %v6187_v23, %v6195_v55  ;;  %v11756_v62 = vpop.eup %11755  ;;  %10975 = vmatprep.subr.bf16.mxu0 %v11916_v8 }
0x3c31   :  { %v6198_v51 = vpop.xlane.xlu1 %6197  ;;  %v5962_v63 = vsel %vm257_vm5, %v11756_v62, 0.0 }
0x3c32   :  { %v6200_v58 = vsub.f32 %v6190_v21, %v6198_v51  ;;  %v6201_v61 = vmul.f32 1.442695, %v6199_v17 }
0x3c34   :  { %v6203_v60 = vmul.f32 1.442695, %v6200_v58 }
0x3c36   :  { %11761 = vpow2.f32 %v6203_v60 }
0x3c37   :  { %11763 = vpow2.f32 %v6201_v61 }
0x3c38   :  { %v11758_v32 = vpop.eup %11757 }
0x3c39   :  { %v11760_v0 = vpop.eup %11759  ;;  %v6085_v10 = vsel %vm257_vm5, %v11758_v32, 0.0 }
0x3c3a   :  { %v6082_v4 = vsel %vm253_vm4, %v11760_v0, 0.0 }
0x3c3b   :  { %5970 = vrot.lane.b32.xlu1 %v13377_v39, %s14322_s3 }
0x3c40   :  { %v13442_v1 = vpop.eup %11761 }
0x3c41   :  { %v11764_v5 = vpop.eup %11763  ;;  %v6208_v7 = vsel %vm257_vm5, %v13442_v1, 0.0 }
0x3c42   :  { %v6205_v9 = vsel %vm253_vm4, %v11764_v5, 0.0 }
0x3c46   :  { %5847 = vrot.lane.b32.xlu0 %v13377_v39, %s14330_s21 }
0x3c5f   :  { %5963 = vadd.xlane.f32.xlu1 %v5962_v63 }
0x3c63   :  { %6086 = vadd.xlane.f32.xlu1 %v6085_v10 }
0x3c65   :  { %6083 = vadd.xlane.f32.xlu0 %v6082_v4 }
0x3c67   :  { %6209 = vadd.xlane.f32.xlu1 %v6208_v7 }
0x3c69   :  { %6206 = vadd.xlane.f32.xlu0 %v6205_v9 }
0x3c78   :  { %6093 = vrot.lane.b32.xlu1 %v13377_v39, %s14331_s24 }
0x3c7f   :  { %6216 = vrot.lane.b32.xlu0 %v13377_v39, %s14321_s28 }
0x3cb5   :  { %v5838_v15 = vpop.xlane.xlu0 %5837 }
0x3cb6   :  { %11765 = vrcp.f32 %v5838_v15 }
0x3cb7   :  { %v5841_v14 = vpop.xlane.xlu1 %5840 }
0x3cb8   :  { %11767 = vrcp.f32 %v5841_v14 }
0x3cbb   :  { %v5971_v54 = vpop.permute.xlu1 %5970 }
0x3cbc   :  { %v5976_v23 = vsel %vm283_vm6, %v5971_v54, 0 }
0x3cbd   :  { %v5961_v28 = vpop.xlane.xlu0 %5960 }
0x3cbe   :  { %11769 = vrcp.f32 %v5961_v28 }
0x3cc0   :  { %v11766_v42 = vpop.eup %11765 }
0x3cc1   :  { %v5848_v45 = vpop.permute.xlu0 %5847  ;;  %v5844_v18 = vmul.f32 %v11766_v42, %v11750_v52 }
0x3cc2   :  { %v11768_v13 = vpop.eup %11767  ;;  %v5853_v44 = vsel %vm283_vm6, %v5848_v45, 0 }
0x3cc3   :  { %v5845_v49 = vmul.f32 %v11768_v13, %v11752_v34  ;;  %10932 = vmatpush3.bf16.msra.mxu1 %v5853_v44 }
0x3cc4   :  { %10943 = vmatprep.subr.bf16.mxu1 %v11916_v8 }
0x3cc5   :  { %v5846_v33 = vpack.c.bf16 %v5845_v49, %v5844_v18 }
0x3cc7   :  { %10934 = vmatmul.mubr.msk.bf16.vlgmr.msra.gmra.mrb[148].mxu1 %vm253_vm4, %v5846_v33 }
0x3cc8   :  { %10944 = vmatpush3.bf16.msra.mxu1 %v5976_v23  ;;  %10945 = vmatprep.mubr.msk.bf16.mxu1 %vm11917_vm2, %v11916_v8  ;;  %v11770_v25 = vpop.eup %11769 }
0x3cc9   :  { %10955 = vmatprep.subr.bf16.mxu1 %v11916_v8  ;;  %v5967_v43 = vmul.f32 %v11770_v25, %v13432_v41 }
0x3cec   :  { %v5964_v39 = vpop.xlane.xlu1 %5963 }
0x3ced   :  { %11771 = vrcp.f32 %v5964_v39 }
0x3cf0   :  { %v6087_v19 = vpop.xlane.xlu1 %6086 }
0x3cf1   :  { %11773 = vrcp.f32 %v6087_v19 }
0x3cf2   :  { %v6084_v3 = vpop.xlane.xlu0 %6083 }
0x3cf3   :  { %11775 = vrcp.f32 %v6084_v3 }
0x3cf4   :  { %v6210_v21 = vpop.xlane.xlu1 %6209 }
0x3cf6   :  { %v6207_v48 = vpop.xlane.xlu0 %6206 }
0x3cf7   :  { %v11772_v53 = vpop.eup %11771  ;;  %11777 = vrcp.f32 %v6207_v48 }
0x3cf8   :  { %v5968_v27 = vmul.f32 %v11772_v53, %v11756_v62  ;;  %v6094_v2 = vpop.permute.xlu1 %6093  ;;  %11779 = vrcp.f32 %v6210_v21  ;;  %v11496_v62 = vld [vmem:[%s14338_s8 + $0x18] sm:$0xff]   ;;  %v13497_v21 = vld [vmem:[%s14341_s17 + $0x8] sm:$0xff]  ;;  %s14345_s17 = sld [smem:[#allocation7_spill]]  ;;  %s14347_s8 = sld [smem:[#allocation19_spill]] }
0x3cf9   :  { %v6099_v31 = vsel %vm283_vm6, %v6094_v2, 0  ;;  %10976 = vmatpush3.bf16.msra.mxu0 %v11496_v62 }
0x3cfa   :  { %v5969_v29 = vpack.c.bf16 %v5968_v27, %v5967_v43  ;;  %v6217_v52 = vpop.permute.xlu0 %6216  ;;  %10989 = vmatprep.subr.bf16.mxu0 %v11916_v8 }
0x3cfb   :  { %v11774_v30 = vpop.eup %11773  ;;  %v6222_v12 = vsel %vm283_vm6, %v6217_v52, 0  ;;  %v11502_v52 = vld [vmem:[%s14340_s18 + $0x28] sm:$0xff]  }
0x3cfc   :  { %10946 = vmatmul.mubr.msk.bf16.vlgmr.msra.gmra.mrb[152].mxu1 %vm253_vm4, %v5969_v29  ;;  %v6091_v35 = vmul.f32 %v11774_v30, %v11758_v32  ;;  %v6549_v29 = vmul.f32 %v13497_v21, %v13497_v21 }
0x3cfd   :  { %v11776_v57 = vpop.eup %11775  ;;  %10956 = vmatpush3.bf16.msra.mxu1 %v6099_v31  ;;  %10957 = vmatprep.mubr.msk.bf16.mxu1 %vm11917_vm2, %v11916_v8 }
0x3cfe   :  { %v6090_v16 = vmul.f32 %v11776_v57, %v11760_v0  ;;  %10967 = vmatprep.subr.bf16.mxu1 %v11916_v8  ;;  %v6550_v57 = vsel %vm111_vm0, %v6549_v29, 0.0 }
0x3d00   :  { %v6092_v37 = vpack.c.bf16 %v6091_v35, %v6090_v16  ;;  %v11498_v16 = vld [vmem:[%s14339_s10 + $0x18] sm:$0xff]   ;;  %v11501_v35 = vld [vmem:[%s14340_s18 + $0x20] sm:$0xff]  }
0x3d01   :  { %v11778_v34 = vpop.eup %11777 }
0x3d02   :  { %v11780_v41 = vpop.eup %11779  ;;  %v6213_v20 = vmul.f32 %v11778_v34, %v11764_v5 }
0x3d03   :  { %v6214_v24 = vmul.f32 %v11780_v41, %v13442_v1 }
0x3d04   :  { %10958 = vmatmul.mubr.msk.bf16.vlgmr.msra.gmra.mrb[156].mxu1 %vm253_vm4, %v6092_v37 }
0x3d05   :  { %10968 = vmatpush3.bf16.msra.mxu1 %v6222_v12  ;;  %10969 = vmatprep.mubr.msk.bf16.mxu1 %vm11917_vm2, %v11916_v8  ;;  %v6215_v38 = vpack.c.bf16 %v6214_v24, %v6213_v20 }
0x3d06   :  { %10981 = vmatprep.subr.bf16.mxu1 %v11916_v8 }
0x3d0c   :  { %10970 = vmatmul.mubr.msk.bf16.vlgmr.msra.gmra.mrb[160].mxu1 %vm253_vm4, %v6215_v38 }
0x3d0d   :  { %10985 = vmatprep.mubr.msk.bf16.mxu1 %vm11917_vm2, %v11916_v8 }
0x3d9a   :  { %v5889_v40 = vpop.f32.mrb[148].mxu1 }
0x3d9b   :  { %v10935_v50 = vpop.f32.mrb[149].mxu1 }
0x3d9c   :  { %v5892_v46 = vpop.f32.mrb[150].mxu1 }
0x3d9d   :  { %v10936_v47 = vpop.f32.mrb[151].mxu1 }
0x3dcf   :  { %v6012_v51 = vpop.f32.mrb[152].mxu1 }
0x3dd0   :  { %v10947_v36 = vpop.f32.mrb[153].mxu1 }
0x3dd1   :  { %v6015_v55 = vpop.f32.mrb[154].mxu1  ;;  %v9818_v36 = vld [vmem:[%s14313_s29 + $0x3] ss:$0 sm:$0xff] }
0x3dd2   :  { %v11406_v58 = vpack.i.bf16 %v6015_v55, %v6012_v51  ;;  %v10948_v59 = vpop.f32.mrb[155].mxu1 }
0x3dd4   :  { %11407 = vrot.lane.b32.xlu1 %v11406_v58, %s14323_s4 }
0x3dd7   :  { %v6135_v17 = vpop.f32.mrb[156].mxu1 }
0x3dd8   :  { %v10959_v60 = vpop.f32.mrb[157].mxu1 }
0x3dd9   :  { %v6138_v61 = vpop.f32.mrb[158].mxu1  ;;  %v11499_v60 = vld [vmem:[%s14220_s13] sm:$0xff]  }
0x3dda   :  { %v11411_v63 = vpack.i.bf16 %v6138_v61, %v6135_v17  ;;  %v10960_v32 = vpop.f32.mrb[159].mxu1  ;;  %v9841_v61 = vld [vmem:[%s14219_s12] ss:$0 sm:$0xff] }
0x3ddb   :  { %v11500_v32 = vld [vmem:[%s14220_s13 + $0x8] sm:$0xff]  }
0x3ddc   :  { %11412 = vrot.lane.b32.xlu0 %v11411_v63, %s14324_s0 }
0x3ddf   :  { %v6258_v0 = vpop.f32.mrb[160].mxu1 }
0x3de0   :  { %v10971_v10 = vpop.f32.mrb[161].mxu1 }
0x3de1   :  { %v6261_v1 = vpop.f32.mrb[162].mxu1  ;;  %v11503_v10 = vld [vmem:[%s14340_s18 + $0x30] sm:$0xff]  }
0x3de2   :  { %v11416_v4 = vpack.i.bf16 %v6261_v1, %v6258_v0  ;;  %v10972_v5 = vpop.f32.mrb[163].mxu1  ;;  %v11504_v1 = vld [vmem:[%s14340_s18 + $0x38] sm:$0xff]  }
0x3de4   :  { %11417 = vrot.lane.b32.xlu1 %v11416_v4, %s14325_s30 }
0x3e46   :  { %v11408_v7 = vpop.permute.xlu1 %11407 }
0x3e47   :  { %v11410_v15 = vunpack.i.h.bf16 %v11408_v7  ;;  %v11409_v14 = vunpack.i.l.bf16 %v11408_v7 }
0x3e49   :  { %v6290_v13 = vsel %vm205_vm3, %v5892_v46, %v11410_v15  ;;  %v6289_v44 = vsel %vm205_vm3, %v5889_v40, %v11409_v14 }
0x3e4e   :  { %v11413_v9 = vpop.permute.xlu0 %11412 }
0x3e4f   :  { %v11415_v28 = vunpack.i.h.bf16 %v11413_v9  ;;  %v11414_v42 = vunpack.i.l.bf16 %v11413_v9 }
0x3e51   :  { %v6292_v54 = vsel %vm723_vm7, %v6290_v13, %v11415_v28  ;;  %v6291_v33 = vsel %vm723_vm7, %v6289_v44, %v11414_v42 }
0x3e56   :  { %v11418_v45 = vpop.permute.xlu1 %11417 }
0x3e57   :  { %v11420_v18 = vunpack.i.h.bf16 %v11418_v45  ;;  %v11419_v49 = vunpack.i.l.bf16 %v11418_v45 }
0x3e59   :  { %v6294_v23 = vsel %vm726_vm8, %v6292_v54, %v11420_v18  ;;  %v6293_v39 = vsel %vm726_vm8, %v6291_v33, %v11419_v49 }
0x3e5a   :  { %v6295_v19 = vpack.c.bf16 %v6294_v23, %v6293_v39 }
0x3e5c   :  { %10978 = vmatmul.mubr.msk.bf16.vlgmr.msra.gmra.mrb[204].mxu0 %vm111_vm0, %v6295_v19 }
0x3e5d   :  { %10997 = vmatprep.mubr.msk.bf16.mxu0 %vm11917_vm2, %v11916_v8  ;;  %10990 = vmatpush3.bf16.msra.mxu0 %v11501_v35 }
0x3e5e   :  { %10991 = vmatprep.subr.bf16.mxu0 %v11916_v8 }
0x3e61   :  { %10992 = vmatpush3.bf16.msra.mxu0 %v11502_v52 }
0x3e62   :  { %10993 = vmatprep.subr.bf16.mxu0 %v11916_v8 }
0x3e65   :  { %10994 = vmatpush3.bf16.msra.mxu0 %v11503_v10 }
0x3e66   :  { %10995 = vmatprep.subr.bf16.mxu0 %v11916_v8 }
0x3e69   :  { %10996 = vmatpush3.bf16.msra.mxu0 %v11504_v1 }
0x3e6a   :  { %11015 = vmatprep.subr.bf16.mxu0 %v11916_v8 }
0x3f2f   :  { %v6345_v3 = vpop.f32.mrb[204].mxu0 }
0x3f30   :  { %v13500_v25 = vadd.f32 %v6345_v3, %v13351_v6  ;;  %v10979_v48 = vpop.f32.mrb[205].mxu0 }
0x3f31   :  { %v6348_v53 = vpop.f32.mrb[206].mxu0 }
0x3f32   :  { %v13503_v43 = vadd.f32 %v6348_v53, %v13353_v11  ;;  %v10980_v27 = vpop.f32.mrb[207].mxu0  ;;  %v6355_v2 = vmul.f32 %v13500_v25, %v13500_v25  ;;  %v11497_v11 = vld [vmem:[%s14339_s10 + $0x10] sm:$0xff]   ;;  %s14350_s10 = sld [smem:[#allocation22_spill]] }
0x3f33   :  { %10982 = vmatpush3.bf16.msra.mxu1 %v11497_v11  ;;  %v13608_v11 = vld [vmem:[%s14342_s9] sm:$0xff] }
0x3f34   :  { %v6357_v30 = vsel %vm111_vm0, %v6355_v2, 0.0  ;;  %v6356_v31 = vmul.f32 %v13503_v43, %v13503_v43  ;;  %10983 = vmatprep.subr.bf16.mxu1 %v11916_v8 }
0x3f35   :  { %6358 = vadd.xlane.f32.xlu0 %v6357_v30 }
0x3f36   :  { %v6360_v6 = vsel %vm115_vm1, %v6356_v31, 0.0 }
0x3f37   :  { %6361 = vadd.xlane.f32.xlu1 %v6360_v6  ;;  %10984 = vmatpush3.bf16.msra.mxu1 %v11498_v16 }
0x3f38   :  { %11001 = vmatprep.subr.bf16.mxu1 %v11916_v8 }
0x3f39   :  { %6551 = vadd.xlane.f32.xlu0 %v6550_v57 }
0x3fc2   :  { %v6359_v37 = vpop.xlane.xlu0 %6358 }
0x3fc3   :  { %v6363_v34 = vmul.f32 0.03125, %v6359_v37 }
0x3fc4   :  { %v6362_v12 = vpop.xlane.xlu1 %6361 }
0x3fc5   :  { %v6365_v41 = vadd.f32 1e-06, %v6363_v34  ;;  %v6364_v20 = vmul.f32 0.03125, %v6362_v12 }
0x3fc6   :  { %v6552_v24 = vpop.xlane.xlu0 %6551 }
0x3fc7   :  { %11781 = vrsqrt.f32 %v6365_v41  ;;  %v6366_v38 = vadd.f32 1e-06, %v6364_v20  ;;  %v6553_v40 = vmul.f32 0.03125, %v6552_v24  ;;  %v13615_v41 = vld [vmem:[%s14342_s9 + $0x8] sm:$0xff] }
0x3fc9   :  { %11783 = vrsqrt.f32 %v6366_v38  ;;  %v6554_v50 = vadd.f32 1e-06, %v6553_v40 }
0x3fcb   :  { %11785 = vrsqrt.f32 %v6554_v50 }
0x3fd1   :  { %v11782_v46 = vpop.eup %11781 }
0x3fd2   :  { %v6369_v47 = vmul.f32 %v11782_v46, %v13500_v25 }
0x3fd3   :  { %v11784_v51 = vpop.eup %11783 }
0x3fd4   :  { %v6370_v55 = vmul.f32 %v11784_v51, %v13503_v43  ;;  %v6377_v59 = vmul.f32 %v9818_v36, %v6369_v47  ;;  %v13622_v47 = vld [vmem:[%s14342_s9 + $0x10] sm:$0xff] }
0x3fd5   :  { %v11786_v56 = vpop.eup %11785 }
0x3fd6   :  { %v6556_v58 = vmul.f32 %v11786_v56, %v13497_v21  ;;  %v6378_v17 = vmul.f32 %v9818_v36, %v6370_v55 }
0x3fd8   :  { %v6383_v62 = vpack.c.bf16 %v6378_v17, %v6377_v59  ;;  %v6563_v63 = vmul.f32 %v9841_v61, %v6556_v58  ;;  %v13629_v17 = vld [vmem:[%s14342_s9 + $0x18] sm:$0xff] }
0x3fda   :  { %10986 = vmatmul.mubr.msk.bf16.vlgmr.msra.gmra.mrb[164].mxu1 %vm111_vm0, %v6383_v62  ;;  %v6572_v0 = vpack.c.bf16 %v6563_v63, %v6563_v63 }
0x3fdb   :  { %11002 = vmatpush3.bf16.msra.mxu1 %v11499_v60  ;;  %11005 = vmatprep.mubr.msk.bf16.mxu1 %vm11917_vm2, %v11916_v8 }
0x3fdc   :  { %11003 = vmatprep.subr.bf16.mxu1 %v11916_v8 }
0x3fdf   :  { %11004 = vmatpush3.bf16.msra.mxu1 %v11500_v32 }
0x3fe0   :  { %11009 = vmatprep.subr.bf16.mxu1 %v11916_v8 }
0x3fe2   :  { %11006 = vmatmul.mubr.msk.bf16.vlgmr.msra.gmra.mrb[168].mxu1 %vm111_vm0, %v6572_v0 }
0x3fe3   :  { %11011 = vmatprep.mubr.msk.bf16.mxu1 %vm11917_vm2, %v11916_v8 }
0x40ad   :  { %v6433_v4 = vpop.f32.mrb[164].mxu1 }
0x40ae   :  { %v10987_v5 = vpop.f32.mrb[165].mxu1  ;;  %v6440_v9 = vmax.f32 %v6433_v4, 0.0 }
0x40af   :  { %v6436_v7 = vpop.f32.mrb[166].mxu1 }
0x40b0   :  { %v6441_v15 = vmax.f32 %v6436_v7, 0.0  ;;  %v10988_v14 = vpop.f32.mrb[167].mxu1 }
0x40b2   :  { %v6450_v28 = vpack.c.bf16 %v6441_v15, %v6440_v9 }
0x40b4   :  { %10998 = vmatmul.mubr.msk.bf16.vlgmr.msra.gmra.mrb[208].mxu0 %vm910_vm9, %v6450_v28 }
0x40b5   :  { %v6622_v42 = vpop.f32.mrb[168].mxu1  ;;  %11017 = vmatprep.mubr.msk.bf16.mxu0 %vm11917_vm2, %v11916_v8 }
0x40b6   :  { %v13564_v45 = vpack.c.bf16 %v6622_v42, %v6622_v42  ;;  %v11007_v13 = vpop.f32.mrb[169].mxu1 }
0x40b7   :  { %v6625_v44 = vpop.f32.mrb[170].mxu1 }
0x40b8   :  { %6740 = vrot.lane.b32.xlu1 %v13564_v45, %s14327_s2  ;;  %6630 = vrot.lane.b32.xlu0 %v13564_v45, %s14328_s27  ;;  %v11008_v18 = vpop.f32.mrb[171].mxu1 }
0x40bc   :  { %6738 = vrot.lane.b32.xlu1 %v13564_v45, %s14316_s5  ;;  %6850 = vrot.lane.b32.xlu0 %v13564_v45, %s14317_s6 }
0x40c0   :  { %6848 = vrot.lane.b32.xlu1 %v13564_v45, %s14318_s26  ;;  %6960 = vrot.lane.b32.xlu0 %v13564_v45, %s14319_s7 }
0x40c4   :  { %6958 = vrot.lane.b32.xlu1 %v13564_v45, %s14320_s25 }
0x412a   :  { %v6631_v49 = vpop.permute.xlu0 %6630  ;;  %v6741_v33 = vpop.permute.xlu1 %6740 }
0x412b   :  { %v6636_v54 = vsel %vm205_vm3, %v6631_v49, 0  ;;  %v6746_v23 = vsel %vm205_vm3, %v6741_v33, 0 }
0x412c   :  { %11010 = vmatpush3.bf16.xpose.msra.mxu1 %v6636_v54 }
0x412d   :  { %11021 = vmatprep.subr.bf16.mxu1 %v11916_v8 }
0x412e   :  { %v6851_v39 = vpop.permute.xlu0 %6850  ;;  %v6739_v19 = vpop.permute.xlu1 %6738 }
0x412f   :  { %v6856_v3 = vsel %vm205_vm3, %v6851_v39, 0 }
0x4132   :  { %v6961_v48 = vpop.permute.xlu0 %6960  ;;  %v6849_v53 = vpop.permute.xlu1 %6848 }
0x4133   :  { %11012 = vmatmul.mubr.msk.bf16.vlgmr.msra.gmra.mrb[172].mxu1 %vm205_vm3, %v13564_v45  ;;  %v6966_v27 = vsel %vm205_vm3, %v6961_v48, 0 }
0x4134   :  { %11022 = vmatpush3.bf16.xpose.msra.mxu1 %v6746_v23  ;;  %11023 = vmatprep.mubr.msk.bf16.mxu1 %vm11917_vm2, %v11916_v8 }
0x4135   :  { %11033 = vmatprep.subr.bf16.mxu1 %v11916_v8 }
0x4136   :  { %v6959_v2 = vpop.permute.xlu1 %6958 }
0x413b   :  { %11024 = vmatmul.mubr.msk.bf16.vlgmr.msra.gmra.mrb[176].mxu1 %vm205_vm3, %v6739_v19 }
0x413c   :  { %11034 = vmatpush3.bf16.xpose.msra.mxu1 %v6856_v3  ;;  %11035 = vmatprep.mubr.msk.bf16.mxu1 %vm11917_vm2, %v11916_v8 }
0x413d   :  { %11045 = vmatprep.subr.bf16.mxu1 %v11916_v8 }
0x4143   :  { %11036 = vmatmul.mubr.msk.bf16.vlgmr.msra.gmra.mrb[180].mxu1 %vm205_vm3, %v6849_v53 }
0x4144   :  { %11046 = vmatpush3.bf16.xpose.msra.mxu1 %v6966_v27  ;;  %11047 = vmatprep.mubr.msk.bf16.mxu1 %vm11917_vm2, %v11916_v8 }
0x4145   :  { %11057 = vmatprep.subr.bf16.mxu1 %v11916_v8 }
0x414b   :  { %11048 = vmatmul.mubr.msk.bf16.vlgmr.msra.gmra.mrb[184].mxu1 %vm205_vm3, %v6959_v2 }
0x414c   :  { %11061 = vmatprep.mubr.msk.bf16.mxu1 %vm11917_vm2, %v11916_v8 }
0x4187   :  { %v13601_v29 = vpop.f32.mrb[208].mxu0 }
0x4188   :  { %v10999_v30 = vpop.f32.mrb[209].mxu0 }
0x4189   :  { %v13603_v31 = vpop.f32.mrb[210].mxu0 }
0x418a   :  { %v11000_v6 = vpop.f32.mrb[211].mxu0 }
0x4206   :  { %v6672_v57 = vpop.f32.mrb[172].mxu1 }
0x4207   :  { %v6673_v16 = vadd.f32 %v13608_v11, %v6672_v57  ;;  %v11013_v35 = vpop.f32.mrb[173].mxu1 }
0x4208   :  { %v6675_v52 = vpop.f32.mrb[174].mxu1 }
0x4209   :  { %v11014_v37 = vpop.f32.mrb[175].mxu1  ;;  %v6678_v34 = vsel %vm205_vm3, %v6673_v16, -inf }
0x420a   :  { %6679 = vmax.xlane.f32.xlu0 %v6678_v34 }
0x420e   :  { %v6782_v12 = vpop.f32.mrb[176].mxu1 }
0x420f   :  { %v6783_v20 = vadd.f32 %v13615_v41, %v6782_v12  ;;  %v11025_v24 = vpop.f32.mrb[177].mxu1 }
0x4210   :  { %v6785_v38 = vpop.f32.mrb[178].mxu1 }
0x4211   :  { %v11026_v40 = vpop.f32.mrb[179].mxu1  ;;  %v6788_v50 = vsel %vm205_vm3, %v6783_v20, -inf }
0x4212   :  { %6789 = vmax.xlane.f32.xlu1 %v6788_v50 }
0x4216   :  { %v6892_v46 = vpop.f32.mrb[180].mxu1 }
0x4217   :  { %v6893_v51 = vadd.f32 %v13622_v47, %v6892_v46  ;;  %v11037_v36 = vpop.f32.mrb[181].mxu1 }
0x4218   :  { %v6895_v55 = vpop.f32.mrb[182].mxu1 }
0x4219   :  { %v11038_v56 = vpop.f32.mrb[183].mxu1  ;;  %v6898_v58 = vsel %vm205_vm3, %v6893_v51, -inf }
0x421a   :  { %6899 = vmax.xlane.f32.xlu0 %v6898_v58 }
0x421e   :  { %v7002_v59 = vpop.f32.mrb[184].mxu1 }
0x421f   :  { %v7003_v60 = vadd.f32 %v13629_v17, %v7002_v59  ;;  %v11049_v61 = vpop.f32.mrb[185].mxu1 }
0x4220   :  { %v7005_v62 = vpop.f32.mrb[186].mxu1 }
0x4221   :  { %v11050_v63 = vpop.f32.mrb[187].mxu1  ;;  %v7008_v32 = vsel %vm205_vm3, %v7003_v60, -inf }
0x4222   :  { %7009 = vmax.xlane.f32.xlu0 %v7008_v32 }
0x4297   :  { %v6680_v0 = vpop.xlane.xlu0 %6679 }
0x4298   :  { %v6681_v10 = vsub.f32 %v6673_v16, %v6680_v0  ;;  %v11505_v0 = vld [vmem:[%s14221_s14] sm:$0xff]  }
0x4299   :  { %11058 = vmatpush3.bf16.msra.mxu1 %v11505_v0  ;;  %v9857_v0 = vld [vmem:[%s14219_s12 + $0x1] ss:$0 sm:$0xff] }
0x429a   :  { %v6682_v1 = vmul.f32 1.442695, %v6681_v10  ;;  %11059 = vmatprep.subr.bf16.mxu1 %v11916_v8  ;;  %v11506_v10 = vld [vmem:[%s14221_s14 + $0x8] sm:$0xff]  }
0x429c   :  { %11787 = vpow2.f32 %v6682_v1 }
0x429d   :  { %11060 = vmatpush3.bf16.msra.mxu1 %v11506_v10 }
0x429e   :  { %11073 = vmatprep.subr.bf16.mxu1 %v11916_v8 }
0x429f   :  { %v6790_v4 = vpop.xlane.xlu1 %6789 }
0x42a0   :  { %v6791_v5 = vsub.f32 %v6783_v20, %v6790_v4 }
0x42a2   :  { %v6792_v7 = vmul.f32 1.442695, %v6791_v5 }
0x42a4   :  { %11789 = vpow2.f32 %v6792_v7 }
0x42a6   :  { %v11788_v9 = vpop.eup %11787 }
0x42a7   :  { %v6684_v15 = vsel %vm205_vm3, %v11788_v9, 0.0  ;;  %v6900_v14 = vpop.xlane.xlu0 %6899 }
0x42a8   :  { %6685 = vadd.xlane.f32.xlu1 %v6684_v15  ;;  %v6901_v33 = vsub.f32 %v6893_v51, %v6900_v14 }
0x42aa   :  { %v6902_v23 = vmul.f32 1.442695, %v6901_v33 }
0x42ae   :  { %v11790_v28 = vpop.eup %11789 }
0x42af   :  { %v7010_v42 = vpop.xlane.xlu0 %7009  ;;  %v6794_v13 = vsel %vm205_vm3, %v11790_v28, 0.0 }
0x42b0   :  { %v7011_v44 = vsub.f32 %v7003_v60, %v7010_v42  ;;  %6795 = vadd.xlane.f32.xlu0 %v6794_v13  ;;  %v6519_v42 = vadd.f32 %v13601_v29, %v13500_v25  ;;  %v6520_v13 = vadd.f32 %v13603_v31, %v13503_v43  ;;  %v11507_v43 = vld [vmem:[%s14223_s16] sm:$0xff]   ;;  %v11508_v31 = vld [vmem:[%s14223_s16 + $0x8] sm:$0xff]  }
0x42b2   :  { %v7012_v18 = vmul.f32 1.442695, %v7011_v44  ;;  %v6522_v44 = vmul.f32 %v6519_v42, %v6519_v42 }
0x42b4   :  { %11791 = vpow2.f32 %v7012_v18  ;;  %v6523_v18 = vmul.f32 %v6520_v13, %v6520_v13 }
0x42b5   :  { %11793 = vpow2.f32 %v6902_v23 }
0x42b9   :  { %6690 = vrot.lane.b32.xlu1 %v13564_v45, %s14330_s21 }
0x42be   :  { %v11792_v49 = vpop.eup %11791 }
0x42bf   :  { %v7014_v54 = vsel %vm205_vm3, %v11792_v49, 0.0  ;;  %v11794_v39 = vpop.eup %11793 }
0x42c0   :  { %7015 = vadd.xlane.f32.xlu0 %v7014_v54  ;;  %v6904_v19 = vsel %vm205_vm3, %v11794_v39, 0.0  ;;  %v6527_v54 = vsel %vm115_vm1, %v6523_v18, 0.0 }
0x42d6   :  { %6800 = vrot.lane.b32.xlu0 %v13564_v45, %s14322_s3 }
0x42dd   :  { %6905 = vadd.xlane.f32.xlu1 %v6904_v19 }
0x42ee   :  { %6910 = vrot.lane.b32.xlu1 %v13564_v45, %s14331_s24 }
0x42f2   :  { %7020 = vrot.lane.b32.xlu1 %v13564_v45, %s14321_s28 }
0x4335   :  { %v6686_v3 = vpop.xlane.xlu1 %6685 }
0x4336   :  { %11795 = vrcp.f32 %v6686_v3 }
0x4339   :  { %v6691_v48 = vpop.permute.xlu1 %6690 }
0x433a   :  { %v6696_v53 = vsel %vm1974_vm10, %v6691_v48, 0 }
0x433b   :  { %11016 = vmatpush3.bf16.msra.mxu0 %v6696_v53 }
0x433c   :  { %11027 = vmatprep.subr.bf16.mxu0 %v11916_v8 }
0x433d   :  { %v6796_v2 = vpop.xlane.xlu0 %6795 }
0x433e   :  { %11797 = vrcp.f32 %v6796_v2 }
0x4340   :  { %v11796_v27 = vpop.eup %11795 }
0x4341   :  { %v6688_v30 = vmul.f32 %v11796_v27, %v11788_v9 }
0x4343   :  { %v6689_v6 = vpack.c.bf16 %v6688_v30, %v6688_v30 }
0x4345   :  { %11018 = vmatmul.mubr.msk.bf16.vlgmr.msra.gmra.mrb[212].mxu0 %vm205_vm3, %v6689_v6 }
0x4346   :  { %11029 = vmatprep.mubr.msk.bf16.mxu0 %vm11917_vm2, %v11916_v8 }
0x4348   :  { %v11798_v57 = vpop.eup %11797 }
0x4349   :  { %v6798_v16 = vmul.f32 %v11798_v57, %v11790_v28 }
0x434b   :  { %v6799_v37 = vpack.c.bf16 %v6798_v16, %v6798_v16 }
0x434d   :  { %v7016_v45 = vpop.xlane.xlu0 %7015 }
0x4351   :  { %v6801_v35 = vpop.permute.xlu0 %6800 }
0x4352   :  { %v6806_v52 = vsel %vm1974_vm10, %v6801_v35, 0  ;;  %v9839_v35 = vld [vmem:[%s14343_s22] ss:$0 sm:$0xff]  ;;  %s14346_s22 = sld [smem:[#allocation18_spill]] }
0x4353   :  { %11028 = vmatpush3.bf16.msra.mxu0 %v6806_v52 }
0x4354   :  { %11039 = vmatprep.subr.bf16.mxu0 %v11916_v8 }
0x4356   :  { %11030 = vmatmul.mubr.msk.bf16.vlgmr.msra.gmra.mrb[216].mxu0 %vm205_vm3, %v6799_v37 }
0x4357   :  { %11041 = vmatprep.mubr.msk.bf16.mxu0 %vm11917_vm2, %v11916_v8 }
0x436a   :  { %v6906_v34 = vpop.xlane.xlu1 %6905 }
0x436b   :  { %11799 = vrcp.f32 %v6906_v34 }
0x436c   :  { %11801 = vrcp.f32 %v7016_v45 }
0x436e   :  { %v6911_v12 = vpop.permute.xlu1 %6910 }
0x436f   :  { %v6916_v20 = vsel %vm1974_vm10, %v6911_v12, 0 }
0x4370   :  { %11040 = vmatpush3.bf16.msra.mxu0 %v6916_v20 }
0x4371   :  { %11051 = vmatprep.subr.bf16.mxu0 %v11916_v8 }
0x4372   :  { %v7021_v40 = vpop.permute.xlu1 %7020 }
0x4373   :  { %v7026_v51 = vsel %vm1974_vm10, %v7021_v40, 0 }
0x4375   :  { %v11800_v24 = vpop.eup %11799 }
0x4376   :  { %v6908_v38 = vmul.f32 %v11800_v24, %v11794_v39  ;;  %v11802_v46 = vpop.eup %11801 }
0x4377   :  { %v7018_v36 = vmul.f32 %v11802_v46, %v11792_v49  ;;  %v6524_v49 = vsel %vm111_vm0, %v6522_v44, 0.0 }
0x4378   :  { %v6909_v50 = vpack.c.bf16 %v6908_v38, %v6908_v38 }
0x4379   :  { %v7019_v55 = vpack.c.bf16 %v7018_v36, %v7018_v36  ;;  %v11509_v36 = vld [vmem:[%s14344_s1] sm:$0xff]  }
0x437a   :  { %11042 = vmatmul.mubr.msk.bf16.vlgmr.msra.gmra.mrb[220].mxu0 %vm205_vm3, %v6909_v50 }
0x437b   :  { %11052 = vmatpush3.bf16.msra.mxu0 %v7026_v51  ;;  %11053 = vmatprep.mubr.msk.bf16.mxu0 %vm11917_vm2, %v11916_v8 }
0x437c   :  { %11065 = vmatprep.subr.bf16.mxu0 %v11916_v8 }
0x4382   :  { %11054 = vmatmul.mubr.msk.bf16.vlgmr.msra.gmra.mrb[224].mxu0 %vm205_vm3, %v7019_v55 }
0x4383   :  { %11069 = vmatprep.mubr.msk.bf16.mxu0 %vm11917_vm2, %v11916_v8  ;;  %11066 = vmatpush3.bf16.msra.mxu0 %v11509_v36 }
0x4384   :  { %11067 = vmatprep.subr.bf16.mxu0 %v11916_v8 }
0x4418   :  { %v6732_v56 = vpop.f32.mrb[212].mxu0 }
0x4419   :  { %v11019_v58 = vpop.f32.mrb[213].mxu0 }
0x441a   :  { %v6735_v59 = vpop.f32.mrb[214].mxu0 }
0x441b   :  { %v11020_v60 = vpop.f32.mrb[215].mxu0 }
0x4429   :  { %v6842_v61 = vpop.f32.mrb[216].mxu0 }
0x442a   :  { %7069 = vrot.lane.b32.xlu0 %v6842_v61, %s14323_s4  ;;  %v11031_v62 = vpop.f32.mrb[217].mxu0 }
0x442b   :  { %v6845_v63 = vpop.f32.mrb[218].mxu0 }
0x442c   :  { %v11032_v32 = vpop.f32.mrb[219].mxu0 }
0x444d   :  { %v6952_v1 = vpop.f32.mrb[220].mxu0 }
0x444e   :  { %7073 = vrot.lane.b32.xlu1 %v6952_v1, %s14324_s0  ;;  %v11043_v4 = vpop.f32.mrb[221].mxu0 }
0x444f   :  { %v6955_v5 = vpop.f32.mrb[222].mxu0 }
0x4450   :  { %v11044_v7 = vpop.f32.mrb[223].mxu0 }
0x4455   :  { %v7062_v9 = vpop.f32.mrb[224].mxu0 }
0x4456   :  { %7077 = vrot.lane.b32.xlu0 %v7062_v9, %s14325_s30  ;;  %v11055_v15 = vpop.f32.mrb[225].mxu0 }
0x4457   :  { %v7065_v14 = vpop.f32.mrb[226].mxu0 }
0x4458   :  { %v11056_v28 = vpop.f32.mrb[227].mxu0 }
0x4472   :  { %6525 = vadd.xlane.f32.xlu1 %v6524_v49 }
0x4475   :  { %6528 = vadd.xlane.f32.xlu0 %v6527_v54 }
0x449c   :  { %v7070_v33 = vpop.permute.xlu0 %7069 }
0x449d   :  { %v7080_v39 = vsel %vm205_vm3, %v6732_v56, %v7070_v33 }
0x44c0   :  { %v7074_v23 = vpop.permute.xlu1 %7073 }
0x44c1   :  { %v7081_v19 = vsel %vm723_vm7, %v7080_v39, %v7074_v23 }
0x44c8   :  { %v7078_v3 = vpop.permute.xlu0 %7077 }
0x44c9   :  { %v7082_v25 = vsel %vm726_vm8, %v7081_v19, %v7078_v3  ;;  %v13761_v3 = vld [vmem:[%s14345_s17 + $0x1] ss:$0 sm:$0xff] }
0x44ca   :  { %v7083_v29 = vpack.c.bf16 %v7082_v25, %v7082_v25 }
0x44cc   :  { %11062 = vmatmul.mubr.msk.bf16.vlgmr.msra.gmra.mrb[188].mxu1 %vm111_vm0, %v7083_v29 }
0x44cd   :  { %11074 = vmatpush3.bf16.msra.mxu1 %v11507_v43  ;;  %11077 = vmatprep.mubr.msk.bf16.mxu1 %vm11917_vm2, %v11916_v8 }
0x44ce   :  { %11075 = vmatprep.subr.bf16.mxu1 %v11916_v8 }
0x44d1   :  { %11076 = vmatpush3.bf16.msra.mxu1 %v11508_v31 }
0x44d2   :  { %11087 = vmatprep.subr.bf16.mxu1 %v11916_v8 }
0x44ff   :  { %v6526_v48 = vpop.xlane.xlu1 %6525 }
0x4500   :  { %v6530_v53 = vmul.f32 0.03125, %v6526_v48 }
0x4502   :  { %v6532_v27 = vadd.f32 1e-06, %v6530_v53  ;;  %v6529_v2 = vpop.xlane.xlu0 %6528 }
0x4503   :  { %v6531_v30 = vmul.f32 0.03125, %v6529_v2 }
0x4504   :  { %11803 = vrsqrt.f32 %v6532_v27 }
0x4505   :  { %v6533_v6 = vadd.f32 1e-06, %v6531_v30 }
0x4507   :  { %11805 = vrsqrt.f32 %v6533_v6 }
0x450e   :  { %v11804_v57 = vpop.eup %11803 }
0x450f   :  { %v6536_v45 = vmul.f32 %v11804_v57, %v6519_v42 }
0x4511   :  { %v11806_v16 = vpop.eup %11805  ;;  %v6544_v37 = vmul.f32 %v9839_v35, %v6536_v45 }
0x4512   :  { %v6537_v52 = vmul.f32 %v11806_v16, %v6520_v13 }
0x4514   :  { %v6545_v34 = vmul.f32 %v9839_v35, %v6537_v52 }
0x4516   :  { %v13699_v12 = vpack.c.bf16 %v6545_v34, %v6544_v37 }
0x4518   :  { %11078 = vmatmul.mubr.msk.bf16.vlgmr.msra.gmra.mrb[192].mxu1 %vm111_vm0, %v13699_v12 }
0x4519   :  { %11089 = vmatprep.mubr.msk.bf16.mxu1 %vm11917_vm2, %v11916_v8 }
0x459f   :  { %v7133_v20 = vpop.f32.mrb[188].mxu1 }
0x45a0   :  { %v13706_v24 = vadd.f32 %v13497_v21, %v7133_v20  ;;  %v11063_v38 = vpop.f32.mrb[189].mxu1  ;;  %v11510_v21 = vld [vmem:[%s14344_s1 + $0x8] sm:$0xff]  }
0x45a1   :  { %v7136_v40 = vpop.f32.mrb[190].mxu1  ;;  %11068 = vmatpush3.bf16.msra.mxu0 %v11510_v21 }
0x45a2   :  { %v11064_v50 = vpop.f32.mrb[191].mxu1  ;;  %v7141_v46 = vmul.f32 %v13706_v24, %v13706_v24  ;;  %11081 = vmatprep.subr.bf16.mxu0 %v11916_v8 }
0x45a4   :  { %v7142_v51 = vsel %vm111_vm0, %v7141_v46, 0.0 }
0x45a5   :  { %7143 = vadd.xlane.f32.xlu0 %v7142_v51 }
0x45eb   :  { %v7274_v55 = vpop.f32.mrb[192].mxu1 }
0x45ec   :  { %v11079_v56 = vpop.f32.mrb[193].mxu1 }
0x45ed   :  { %v7277_v58 = vpop.f32.mrb[194].mxu1 }
0x45ee   :  { %v13719_v59 = vpack.c.bf16 %v7277_v58, %v7274_v55  ;;  %v11080_v60 = vpop.f32.mrb[195].mxu1 }
0x45f0   :  { %7393 = vrot.lane.b32.xlu1 %v13719_v59, %s14316_s5  ;;  %v7287_v5 = vsel %vm205_vm3, %v13719_v59, 0 }
0x45f4   :  { %7503 = vrot.lane.b32.xlu1 %v13719_v59, %s14318_s26 }
0x4632   :  { %v7144_v61 = vpop.xlane.xlu0 %7143 }
0x4633   :  { %v7145_v62 = vmul.f32 0.03125, %v7144_v61 }
0x4635   :  { %v7146_v63 = vadd.f32 1e-06, %v7145_v62 }
0x4637   :  { %11807 = vrsqrt.f32 %v7146_v63 }
0x4641   :  { %v11808_v32 = vpop.eup %11807 }
0x4642   :  { %v7148_v10 = vmul.f32 %v11808_v32, %v13706_v24 }
0x4644   :  { %v7155_v1 = vmul.f32 %v9857_v0, %v7148_v10 }
0x4646   :  { %v7168_v4 = vpack.c.bf16 %v7155_v1, %v7155_v1 }
0x4648   :  { %11070 = vmatmul.mubr.msk.bf16.vlgmr.msra.gmra.mrb[228].mxu0 %vm111_vm0, %v7168_v4 }
0x4649   :  { %11082 = vmatpush3.bf16.xpose.msra.mxu0 %v7287_v5  ;;  %11083 = vmatprep.mubr.msk.bf16.mxu0 %vm11917_vm2, %v11916_v8 }
0x464a   :  { %11093 = vmatprep.subr.bf16.mxu0 %v11916_v8 }
0x4662   :  { %v7394_v9 = vpop.permute.xlu1 %7393 }
0x4663   :  { %v7399_v13 = vsel %vm205_vm3, %v7394_v9, 0 }
0x4666   :  { %v7504_v44 = vpop.permute.xlu1 %7503 }
0x4667   :  { %v7509_v49 = vsel %vm205_vm3, %v7504_v44, 0 }
0x471b   :  { %v7218_v7 = vpop.f32.mrb[228].mxu0 }
0x471c   :  { %v7281_v15 = vpack.c.bf16 %v7218_v7, %v7218_v7  ;;  %v11071_v14 = vpop.f32.mrb[229].mxu0 }
0x471d   :  { %v7221_v28 = vpop.f32.mrb[230].mxu0 }
0x471e   :  { %7391 = vrot.lane.b32.xlu0 %v7281_v15, %s14316_s5  ;;  %v11072_v42 = vpop.f32.mrb[231].mxu0  ;;  %7501 = vrot.lane.b32.xlu1 %v7281_v15, %s14318_s26 }
0x471f   :  { %11084 = vmatmul.mubr.msk.bf16.vlgmr.msra.gmra.mrb[232].mxu0 %vm205_vm3, %v7281_v15 }
0x4720   :  { %11094 = vmatpush3.bf16.xpose.msra.mxu0 %v7399_v13  ;;  %11095 = vmatprep.mubr.msk.bf16.mxu0 %vm11917_vm2, %v11916_v8 }
0x4721   :  { %11105 = vmatprep.subr.bf16.mxu0 %v11916_v8 }
0x4722   :  { %7613 = vrot.lane.b32.xlu0 %v13719_v59, %s14320_s25  ;;  %7611 = vrot.lane.b32.xlu1 %v7281_v15, %s14320_s25 }
0x4790   :  { %v7392_v18 = vpop.permute.xlu0 %7391  ;;  %v7502_v33 = vpop.permute.xlu1 %7501 }
0x4791   :  { %11096 = vmatmul.mubr.msk.bf16.vlgmr.msra.gmra.mrb[236].mxu0 %vm205_vm3, %v7392_v18 }
0x4792   :  { %11106 = vmatpush3.bf16.xpose.msra.mxu0 %v7509_v49  ;;  %11107 = vmatprep.mubr.msk.bf16.mxu0 %vm11917_vm2, %v11916_v8 }
0x4793   :  { %11117 = vmatprep.subr.bf16.mxu0 %v11916_v8 }
0x4794   :  { %v7614_v54 = vpop.permute.xlu0 %7613  ;;  %v7612_v39 = vpop.permute.xlu1 %7611 }
0x4795   :  { %v7619_v23 = vsel %vm205_vm3, %v7614_v54, 0 }
0x4799   :  { %11108 = vmatmul.mubr.msk.bf16.vlgmr.msra.gmra.mrb[240].mxu0 %vm205_vm3, %v7502_v33 }
0x479a   :  { %11118 = vmatpush3.bf16.xpose.msra.mxu0 %v7619_v23  ;;  %11119 = vmatprep.mubr.msk.bf16.mxu0 %vm11917_vm2, %v11916_v8 }
0x479b   :  { %11129 = vmatprep.subr.bf16.mxu0 %v11916_v8 }
0x47a1   :  { %11120 = vmatmul.mubr.msk.bf16.vlgmr.msra.gmra.mrb[244].mxu0 %vm205_vm3, %v7612_v39 }
0x47a2   :  { %11133 = vmatprep.mubr.msk.bf16.mxu0 %vm11917_vm2, %v11916_v8 }
0x47f2   :  { %v7323_v19 = vpop.f32.mrb[232].mxu0 }
0x47f3   :  { %v7324_v25 = vadd.f32 %v13761_v3, %v7323_v19  ;;  %v11085_v43 = vpop.f32.mrb[233].mxu0 }
0x47f4   :  { %v7326_v29 = vpop.f32.mrb[234].mxu0 }
0x47f5   :  { %v11086_v31 = vpop.f32.mrb[235].mxu0  ;;  %v7329_v48 = vsel %vm253_vm4, %v7324_v25, -inf }
0x47f6   :  { %7330 = vmax.xlane.f32.xlu0 %v7329_v48 }
0x4864   :  { %v7435_v53 = vpop.f32.mrb[236].mxu0 }
0x4865   :  { %v7436_v27 = vadd.f32 %v13761_v3, %v7435_v53  ;;  %v11097_v2 = vpop.f32.mrb[237].mxu0 }
0x4866   :  { %v7438_v30 = vpop.f32.mrb[238].mxu0 }
0x4867   :  { %v11098_v6 = vpop.f32.mrb[239].mxu0  ;;  %v7441_v57 = vsel %vm253_vm4, %v7436_v27, -inf }
0x4868   :  { %7442 = vmax.xlane.f32.xlu1 %v7441_v57 }
0x486c   :  { %v7545_v45 = vpop.f32.mrb[240].mxu0 }
0x486d   :  { %v7546_v16 = vadd.f32 %v13761_v3, %v7545_v45  ;;  %v11109_v35 = vpop.f32.mrb[241].mxu0 }
0x486e   :  { %v7548_v52 = vpop.f32.mrb[242].mxu0 }
0x486f   :  { %v11110_v37 = vpop.f32.mrb[243].mxu0  ;;  %v7551_v34 = vsel %vm253_vm4, %v7546_v16, -inf }
0x4870   :  { %7552 = vmax.xlane.f32.xlu0 %v7551_v34 }
0x4874   :  { %v7655_v20 = vpop.f32.mrb[244].mxu0 }
0x4875   :  { %v7656_v38 = vadd.f32 %v13761_v3, %v7655_v20  ;;  %v11121_v40 = vpop.f32.mrb[245].mxu0  ;;  %v11511_v20 = vld [vmem:[%s14346_s22] sm:$0xff]  }
0x4876   :  { %v7658_v50 = vpop.f32.mrb[246].mxu0  ;;  %11130 = vmatpush3.bf16.msra.mxu0 %v11511_v20  ;;  %v11519_v20 = vld [vmem:[%s14220_s13 + $0x10] sm:$0xff]  }
0x4877   :  { %v11122_v46 = vpop.f32.mrb[247].mxu0  ;;  %v7661_v51 = vsel %vm253_vm4, %v7656_v38, -inf  ;;  %11131 = vmatprep.subr.bf16.mxu0 %v11916_v8 }
0x4878   :  { %7662 = vmax.xlane.f32.xlu0 %v7661_v51  ;;  %v11512_v51 = vld [vmem:[%s14346_s22 + $0x8] sm:$0xff]  }
0x487a   :  { %11132 = vmatpush3.bf16.msra.mxu0 %v11512_v51 }
0x487b   :  { %11145 = vmatprep.subr.bf16.mxu0 %v11916_v8 }
0x4883   :  { %v7331_v36 = vpop.xlane.xlu0 %7330 }
0x4884   :  { %v7332_v21 = vsub.f32 %v7324_v25, %v7331_v36 }
0x4886   :  { %v7333_v55 = vmul.f32 1.442695, %v7332_v21 }
0x4888   :  { %11809 = vpow2.f32 %v7333_v55 }
0x4892   :  { %v11810_v56 = vpop.eup %11809 }
0x4893   :  { %v7335_v58 = vsel %vm253_vm4, %v11810_v56, 0.0 }
0x4894   :  { %7336 = vadd.xlane.f32.xlu1 %v7335_v58 }
0x48a5   :  { %7342 = vrot.lane.b32.xlu1 %v13719_v59, %s14328_s27 }
0x48f5   :  { %v7443_v60 = vpop.xlane.xlu1 %7442 }
0x48f6   :  { %v7444_v61 = vsub.f32 %v7436_v27, %v7443_v60 }
0x48f8   :  { %v7445_v62 = vmul.f32 1.442695, %v7444_v61 }
0x48fa   :  { %11811 = vpow2.f32 %v7445_v62 }
0x48fd   :  { %v7553_v63 = vpop.xlane.xlu0 %7552 }
0x48fe   :  { %v7554_v32 = vsub.f32 %v7546_v16, %v7553_v63 }
0x4900   :  { %v7555_v0 = vmul.f32 1.442695, %v7554_v32 }
0x4902   :  { %11813 = vpow2.f32 %v7555_v0 }
0x4904   :  { %v11812_v10 = vpop.eup %11811 }
0x4905   :  { %v7663_v1 = vpop.xlane.xlu0 %7662  ;;  %v7447_v4 = vsel %vm253_vm4, %v11812_v10, 0.0 }
0x4906   :  { %v7664_v5 = vsub.f32 %v7656_v38, %v7663_v1  ;;  %7448 = vadd.xlane.f32.xlu0 %v7447_v4 }
0x4908   :  { %v7665_v7 = vmul.f32 1.442695, %v7664_v5 }
0x490a   :  { %11815 = vpow2.f32 %v7665_v7 }
0x490c   :  { %v11814_v9 = vpop.eup %11813 }
0x490d   :  { %v7557_v15 = vsel %vm253_vm4, %v11814_v9, 0.0 }
0x490e   :  { %7558 = vadd.xlane.f32.xlu1 %v7557_v15 }
0x4914   :  { %v11816_v14 = vpop.eup %11815 }
0x4915   :  { %v7667_v28 = vsel %vm253_vm4, %v11816_v14, 0.0 }
0x4916   :  { %7668 = vadd.xlane.f32.xlu0 %v7667_v28 }
0x491f   :  { %7563 = vrot.lane.b32.xlu1 %v13719_v59, %s14317_s6 }
0x4921   :  { %v7337_v42 = vpop.xlane.xlu1 %7336 }
0x4922   :  { %11817 = vrcp.f32 %v7337_v42 }
0x4923   :  { %7673 = vrot.lane.b32.xlu1 %v13719_v59, %s14319_s7 }
0x4925   :  { %v7343_v13 = vpop.permute.xlu1 %7342 }
0x4926   :  { %v7348_v44 = vsel %vm283_vm6, %v7343_v13, 0 }
0x4927   :  { %11088 = vmatpush3.bf16.msra.mxu1 %v7348_v44  ;;  %v11513_v44 = vld [vmem:[%s14347_s8] sm:$0xff]  }
0x4928   :  { %11099 = vmatprep.subr.bf16.mxu1 %v11916_v8 }
0x492c   :  { %v11818_v18 = vpop.eup %11817  ;;  %7453 = vrot.lane.b32.xlu0 %v13719_v59, %s14327_s2 }
0x492d   :  { %v7339_v49 = vmul.f32 %v11818_v18, %v11810_v56  ;;  %v11514_v18 = vld [vmem:[%s14347_s8 + $0x8] sm:$0xff]  }
0x492f   :  { %v7340_v54 = vpack.c.bf16 %v7339_v49, %v7339_v49  ;;  %v11516_v49 = vld [vmem:[%s14348_s11 + $0x8] sm:$0xff]  }
0x4931   :  { %11090 = vmatmul.mubr.msk.bf16.vlgmr.msra.gmra.mrb[196].mxu1 %vm253_vm4, %v7340_v54  ;;  %v11517_v54 = vld [vmem:[%s14348_s11 + $0x10] sm:$0xff]  }
0x4932   :  { %11101 = vmatprep.mubr.msk.bf16.mxu1 %vm11917_vm2, %v11916_v8 }
0x4993   :  { %v7449_v33 = vpop.xlane.xlu0 %7448 }
0x4994   :  { %11819 = vrcp.f32 %v7449_v33 }
0x499b   :  { %v7559_v23 = vpop.xlane.xlu1 %7558 }
0x499c   :  { %11821 = vrcp.f32 %v7559_v23 }
0x499e   :  { %v11820_v39 = vpop.eup %11819 }
0x499f   :  { %v7451_v25 = vmul.f32 %v11820_v39, %v11812_v10  ;;  %v7564_v31 = vpop.permute.xlu1 %7563 }
0x49a0   :  { %v7569_v53 = vsel %vm283_vm6, %v7564_v31, 0 }
0x49a1   :  { %v7452_v59 = vpack.c.bf16 %v7451_v25, %v7451_v25  ;;  %v9876_v25 = vld [vmem:[%s14219_s12 + $0x2] ss:$0 sm:$0xff] }
0x49a3   :  { %v7669_v19 = vpop.xlane.xlu0 %7668  ;;  %v7674_v2 = vpop.permute.xlu1 %7673 }
0x49a4   :  { %11823 = vrcp.f32 %v7669_v19  ;;  %v7679_v57 = vsel %vm283_vm6, %v7674_v2, 0 }
0x49a6   :  { %v11822_v48 = vpop.eup %11821 }
0x49a7   :  { %v7454_v43 = vpop.permute.xlu0 %7453  ;;  %v7561_v27 = vmul.f32 %v11822_v48, %v11814_v9 }
0x49a8   :  { %v7459_v29 = vsel %vm283_vm6, %v7454_v43, 0 }
0x49a9   :  { %11100 = vmatpush3.bf16.msra.mxu1 %v7459_v29  ;;  %v7562_v30 = vpack.c.bf16 %v7561_v27, %v7561_v27 }
0x49aa   :  { %11111 = vmatprep.subr.bf16.mxu1 %v11916_v8 }
0x49ac   :  { %11102 = vmatmul.mubr.msk.bf16.vlgmr.msra.gmra.mrb[200].mxu1 %vm253_vm4, %v7452_v59  ;;  %v11518_v59 = vld [vmem:[%s14348_s11 + $0x18] sm:$0xff]  }
0x49ad   :  { %11112 = vmatpush3.bf16.msra.mxu1 %v7569_v53  ;;  %11113 = vmatprep.mubr.msk.bf16.mxu1 %vm11917_vm2, %v11916_v8 }
0x49ae   :  { %11123 = vmatprep.subr.bf16.mxu1 %v11916_v8  ;;  %v11824_v6 = vpop.eup %11823 }
0x49af   :  { %v7671_v45 = vmul.f32 %v11824_v6, %v11816_v14 }
0x49b1   :  { %v7672_v16 = vpack.c.bf16 %v7671_v45, %v7671_v45 }
0x49b4   :  { %11114 = vmatmul.mubr.msk.bf16.vlgmr.msra.gmra.mrb[204].mxu1 %vm253_vm4, %v7562_v30 }
0x49b5   :  { %11124 = vmatpush3.bf16.msra.mxu1 %v7679_v57  ;;  %11125 = vmatprep.mubr.msk.bf16.mxu1 %vm11917_vm2, %v11916_v8 }
0x49b6   :  { %11137 = vmatprep.subr.bf16.mxu1 %v11916_v8 }
0x49bc   :  { %11126 = vmatmul.mubr.msk.bf16.vlgmr.msra.gmra.mrb[208].mxu1 %vm253_vm4, %v7672_v16 }
0x49bd   :  { %11141 = vmatprep.mubr.msk.bf16.mxu1 %vm11917_vm2, %v11916_v8  ;;  %11138 = vmatpush3.bf16.msra.mxu1 %v11513_v44 }
0x49be   :  { %11139 = vmatprep.subr.bf16.mxu1 %v11916_v8 }
0x49c1   :  { %11140 = vmatpush3.bf16.msra.mxu1 %v11514_v18 }
0x49c2   :  { %11157 = vmatprep.subr.bf16.mxu1 %v11916_v8 }
0x4a04   :  { %v7384_v35 = vpop.f32.mrb[196].mxu1 }
0x4a05   :  { %v11091_v52 = vpop.f32.mrb[197].mxu1 }
0x4a06   :  { %v7387_v37 = vpop.f32.mrb[198].mxu1 }
0x4a07   :  { %v11092_v34 = vpop.f32.mrb[199].mxu1 }
0x4a7f   :  { %v7495_v38 = vpop.f32.mrb[200].mxu1 }
0x4a80   :  { %7722 = vrot.lane.b32.xlu0 %v7495_v38, %s14323_s4  ;;  %v11103_v40 = vpop.f32.mrb[201].mxu1  ;;  %v11520_v38 = vld [vmem:[%s14220_s13 + $0x18] sm:$0xff]  }
0x4a81   :  { %v7498_v50 = vpop.f32.mrb[202].mxu1 }
0x4a82   :  { %v11104_v46 = vpop.f32.mrb[203].mxu1 }
0x4a87   :  { %v7605_v36 = vpop.f32.mrb[204].mxu1 }
0x4a88   :  { %7726 = vrot.lane.b32.xlu1 %v7605_v36, %s14324_s0  ;;  %v11115_v21 = vpop.f32.mrb[205].mxu1  ;;  %v9886_v36 = vld [vmem:[%s14219_s12 + $0x3] ss:$0 sm:$0xff] }
0x4a89   :  { %v7608_v55 = vpop.f32.mrb[206].mxu1 }
0x4a8a   :  { %v11116_v56 = vpop.f32.mrb[207].mxu1 }
0x4a8f   :  { %v7715_v58 = vpop.f32.mrb[208].mxu1 }
0x4a90   :  { %7730 = vrot.lane.b32.xlu0 %v7715_v58, %s14325_s30  ;;  %v11127_v60 = vpop.f32.mrb[209].mxu1 }
0x4a91   :  { %v7718_v61 = vpop.f32.mrb[210].mxu1 }
0x4a92   :  { %v11128_v62 = vpop.f32.mrb[211].mxu1 }
0x4af2   :  { %v7723_v63 = vpop.permute.xlu0 %7722 }
0x4af3   :  { %v7733_v0 = vsel %vm205_vm3, %v7384_v35, %v7723_v63 }
0x4afa   :  { %v7727_v32 = vpop.permute.xlu1 %7726 }
0x4afb   :  { %v7734_v10 = vsel %vm723_vm7, %v7733_v0, %v7727_v32 }
0x4b02   :  { %v7731_v1 = vpop.permute.xlu0 %7730 }
0x4b03   :  { %v7735_v4 = vsel %vm726_vm8, %v7734_v10, %v7731_v1 }
0x4b04   :  { %v7736_v5 = vpack.c.bf16 %v7735_v4, %v7735_v4 }
0x4b06   :  { %11134 = vmatmul.mubr.msk.bf16.vlgmr.msra.gmra.mrb[248].mxu0 %vm111_vm0, %v7736_v5 }
0x4b07   :  { %11153 = vmatprep.mubr.msk.bf16.mxu0 %vm11917_vm2, %v11916_v8 }
0x4bd9   :  { %v7786_v7 = vpop.f32.mrb[248].mxu0 }
0x4bda   :  { %v7792_v9 = vadd.f32 %v7786_v7, %v13706_v24  ;;  %v11135_v15 = vpop.f32.mrb[249].mxu0  ;;  %v11515_v24 = vld [vmem:[%s14348_s11] sm:$0xff]  }
0x4bdb   :  { %v7789_v14 = vpop.f32.mrb[250].mxu0  ;;  %11146 = vmatpush3.bf16.msra.mxu0 %v11515_v24 }
0x4bdc   :  { %v11136_v28 = vpop.f32.mrb[251].mxu0  ;;  %v7794_v42 = vmul.f32 %v7792_v9, %v7792_v9  ;;  %11147 = vmatprep.subr.bf16.mxu0 %v11916_v8 }
0x4bde   :  { %v7795_v13 = vsel %vm111_vm0, %v7794_v42, 0.0 }
0x4bdf   :  { %7796 = vadd.xlane.f32.xlu1 %v7795_v13  ;;  %11148 = vmatpush3.bf16.msra.mxu0 %v11516_v49 }
0x4be0   :  { %11149 = vmatprep.subr.bf16.mxu0 %v11916_v8 }
0x4be3   :  { %11150 = vmatpush3.bf16.msra.mxu0 %v11517_v54 }
0x4be4   :  { %11151 = vmatprep.subr.bf16.mxu0 %v11916_v8 }
0x4be7   :  { %11152 = vmatpush3.bf16.msra.mxu0 %v11518_v59 }
0x4be8   :  { %11171 = vmatprep.subr.bf16.mxu0 %v11916_v8 }
0x4c6c   :  { %v7797_v33 = vpop.xlane.xlu1 %7796 }
0x4c6d   :  { %v7798_v23 = vmul.f32 0.03125, %v7797_v33 }
0x4c6f   :  { %v7799_v39 = vadd.f32 1e-06, %v7798_v23 }
0x4c71   :  { %11825 = vrsqrt.f32 %v7799_v39 }
0x4c7b   :  { %v11826_v19 = vpop.eup %11825 }
0x4c7c   :  { %v7801_v43 = vmul.f32 %v11826_v19, %v7792_v9 }
0x4c7e   :  { %v7808_v29 = vmul.f32 %v9876_v25, %v7801_v43 }
0x4c80   :  { %v7813_v31 = vpack.c.bf16 %v7808_v29, %v7808_v29 }
0x4c82   :  { %11142 = vmatmul.mubr.msk.bf16.vlgmr.msra.gmra.mrb[212].mxu1 %vm111_vm0, %v7813_v31 }
0x4c83   :  { %11161 = vmatprep.mubr.msk.bf16.mxu1 %vm11917_vm2, %v11916_v8  ;;  %11158 = vmatpush3.bf16.msra.mxu1 %v11519_v20 }
0x4c84   :  { %11159 = vmatprep.subr.bf16.mxu1 %v11916_v8 }
0x4c87   :  { %11160 = vmatpush3.bf16.msra.mxu1 %v11520_v38 }
0x4c88   :  { %11165 = vmatprep.subr.bf16.mxu1 %v11916_v8 }
0x4d55   :  { %v7863_v48 = vpop.f32.mrb[212].mxu1 }
0x4d56   :  { %v7869_v53 = vmax.f32 %v7863_v48, 0.0  ;;  %v11143_v27 = vpop.f32.mrb[213].mxu1 }
0x4d57   :  { %v7866_v2 = vpop.f32.mrb[214].mxu1 }
0x4d58   :  { %v7878_v30 = vpack.c.bf16 %v7869_v53, %v7869_v53  ;;  %v11144_v6 = vpop.f32.mrb[215].mxu1 }
0x4d5a   :  { %11154 = vmatmul.mubr.msk.bf16.vlgmr.msra.gmra.mrb[252].mxu0 %vm910_vm9, %v7878_v30 }
0x4d5b   :  { %11173 = vmatprep.mubr.msk.bf16.mxu0 %vm11917_vm2, %v11916_v8 }
0x4e2d   :  { %v7940_v57 = vpop.f32.mrb[252].mxu0 }
0x4e2e   :  { %v13855_v45 = vadd.f32 %v7940_v57, %v7792_v9  ;;  %v11155_v16 = vpop.f32.mrb[253].mxu0 }
0x4e2f   :  { %v7943_v35 = vpop.f32.mrb[254].mxu0 }
0x4e30   :  { %v11156_v52 = vpop.f32.mrb[255].mxu0  ;;  %v7948_v37 = vmul.f32 %v13855_v45, %v13855_v45 }
0x4e32   :  { %v7949_v34 = vsel %vm111_vm0, %v7948_v37, 0.0 }
0x4e33   :  { %7950 = vadd.xlane.f32.xlu0 %v7949_v34 }
0x4ec0   :  { %v7951_v40 = vpop.xlane.xlu0 %7950 }
0x4ec1   :  { %v7952_v50 = vmul.f32 0.03125, %v7951_v40 }
0x4ec3   :  { %v7953_v46 = vadd.f32 1e-06, %v7952_v50 }
0x4ec5   :  { %11827 = vrsqrt.f32 %v7953_v46 }
0x4ecf   :  { %v11828_v51 = vpop.eup %11827 }
0x4ed0   :  { %v7955_v21 = vmul.f32 %v11828_v51, %v13855_v45 }
0x4ed2   :  { %v7962_v55 = vmul.f32 %v9886_v36, %v7955_v21 }
0x4ed4   :  { %v7971_v56 = vpack.c.bf16 %v7962_v55, %v7962_v55 }
0x4ed6   :  { %11162 = vmatmul.mubr.msk.bf16.vlgmr.msra.gmra.mrb[216].mxu1 %vm111_vm0, %v7971_v56 }
0x4ed7   :  { %11167 = vmatprep.mubr.msk.bf16.mxu1 %vm11917_vm2, %v11916_v8 }
0x4fa9   :  { %v8021_v58 = vpop.f32.mrb[216].mxu1 }
0x4faa   :  { %v13875_v60 = vpack.c.bf16 %v8021_v58, %v8021_v58  ;;  %v11163_v61 = vpop.f32.mrb[217].mxu1 }
0x4fab   :  { %v8024_v62 = vpop.f32.mrb[218].mxu1 }
0x4fac   :  { %8139 = vrot.lane.b32.xlu1 %v13875_v60, %s14327_s2  ;;  %8029 = vrot.lane.b32.xlu0 %v13875_v60, %s14328_s27  ;;  %v11164_v63 = vpop.f32.mrb[219].mxu1 }
0x4fb0   :  { %8137 = vrot.lane.b32.xlu1 %v13875_v60, %s14316_s5  ;;  %8249 = vrot.lane.b32.xlu0 %v13875_v60, %s14317_s6 }
0x4fb4   :  { %8247 = vrot.lane.b32.xlu1 %v13875_v60, %s14318_s26  ;;  %8359 = vrot.lane.b32.xlu0 %v13875_v60, %s14319_s7 }
0x4fb8   :  { %8357 = vrot.lane.b32.xlu1 %v13875_v60, %s14320_s25 }
0x501e   :  { %v8030_v32 = vpop.permute.xlu0 %8029  ;;  %v8140_v10 = vpop.permute.xlu1 %8139 }
0x501f   :  { %v8035_v0 = vsel %vm205_vm3, %v8030_v32, 0  ;;  %v8145_v1 = vsel %vm205_vm3, %v8140_v10, 0 }
0x5020   :  { %11166 = vmatpush3.bf16.xpose.msra.mxu1 %v8035_v0 }
0x5021   :  { %11177 = vmatprep.subr.bf16.mxu1 %v11916_v8 }
0x5022   :  { %v8250_v4 = vpop.permute.xlu0 %8249  ;;  %v8138_v5 = vpop.permute.xlu1 %8137 }
0x5023   :  { %v8255_v7 = vsel %vm205_vm3, %v8250_v4, 0 }
0x5026   :  { %v8360_v9 = vpop.permute.xlu0 %8359  ;;  %v8248_v15 = vpop.permute.xlu1 %8247 }
0x5027   :  { %11168 = vmatmul.mubr.msk.bf16.vlgmr.msra.gmra.mrb[220].mxu1 %vm205_vm3, %v13875_v60  ;;  %v8365_v14 = vsel %vm205_vm3, %v8360_v9, 0 }
0x5028   :  { %11178 = vmatpush3.bf16.xpose.msra.mxu1 %v8145_v1  ;;  %11179 = vmatprep.mubr.msk.bf16.mxu1 %vm11917_vm2, %v11916_v8 }
0x5029   :  { %11189 = vmatprep.subr.bf16.mxu1 %v11916_v8 }
0x502a   :  { %v8358_v28 = vpop.permute.xlu1 %8357 }
0x502f   :  { %11180 = vmatmul.mubr.msk.bf16.vlgmr.msra.gmra.mrb[224].mxu1 %vm205_vm3, %v8138_v5 }
0x5030   :  { %11190 = vmatpush3.bf16.xpose.msra.mxu1 %v8255_v7  ;;  %11191 = vmatprep.mubr.msk.bf16.mxu1 %vm11917_vm2, %v11916_v8 }
0x5031   :  { %11201 = vmatprep.subr.bf16.mxu1 %v11916_v8 }
0x5037   :  { %11192 = vmatmul.mubr.msk.bf16.vlgmr.msra.gmra.mrb[228].mxu1 %vm205_vm3, %v8248_v15 }
0x5038   :  { %11202 = vmatpush3.bf16.xpose.msra.mxu1 %v8365_v14  ;;  %11203 = vmatprep.mubr.msk.bf16.mxu1 %vm11917_vm2, %v11916_v8 }
0x5039   :  { %11213 = vmatprep.subr.bf16.mxu1 %v11916_v8 }
0x503f   :  { %11204 = vmatmul.mubr.msk.bf16.vlgmr.msra.gmra.mrb[232].mxu1 %vm205_vm3, %v8358_v28 }
0x5040   :  { %11217 = vmatprep.mubr.msk.bf16.mxu1 %vm11917_vm2, %v11916_v8 }
0x50fa   :  { %v8071_v42 = vpop.f32.mrb[220].mxu1 }
0x50fb   :  { %v8072_v13 = vadd.f32 %v13608_v11, %v8071_v42  ;;  %v11169_v44 = vpop.f32.mrb[221].mxu1 }
0x50fc   :  { %v8074_v18 = vpop.f32.mrb[222].mxu1 }
0x50fd   :  { %v11170_v24 = vpop.f32.mrb[223].mxu1  ;;  %v8077_v49 = vsel %vm205_vm3, %v8072_v13, -inf }
0x50fe   :  { %8078 = vmax.xlane.f32.xlu0 %v8077_v49 }
0x5102   :  { %v8181_v54 = vpop.f32.mrb[224].mxu1 }
0x5103   :  { %v8182_v33 = vadd.f32 %v13615_v41, %v8181_v54  ;;  %v11181_v23 = vpop.f32.mrb[225].mxu1 }
0x5104   :  { %v8184_v39 = vpop.f32.mrb[226].mxu1 }
0x5105   :  { %v11182_v19 = vpop.f32.mrb[227].mxu1  ;;  %v8187_v25 = vsel %vm205_vm3, %v8182_v33, -inf }
0x5106   :  { %8188 = vmax.xlane.f32.xlu1 %v8187_v25 }
0x510a   :  { %v8291_v43 = vpop.f32.mrb[228].mxu1 }
0x510b   :  { %v8292_v29 = vadd.f32 %v13622_v47, %v8291_v43  ;;  %v11193_v31 = vpop.f32.mrb[229].mxu1 }
0x510c   :  { %v8294_v11 = vpop.f32.mrb[230].mxu1 }
0x510d   :  { %v11194_v59 = vpop.f32.mrb[231].mxu1  ;;  %v8297_v48 = vsel %vm205_vm3, %v8292_v29, -inf }
0x510e   :  { %8298 = vmax.xlane.f32.xlu0 %v8297_v48 }
0x5112   :  { %v8401_v53 = vpop.f32.mrb[232].mxu1 }
0x5113   :  { %v8402_v27 = vadd.f32 %v13629_v17, %v8401_v53  ;;  %v11205_v2 = vpop.f32.mrb[233].mxu1  ;;  %v11521_v53 = vld [vmem:[%s14221_s14 + $0x10] sm:$0xff]  }
0x5114   :  { %v8404_v41 = vpop.f32.mrb[234].mxu1  ;;  %11214 = vmatpush3.bf16.msra.mxu1 %v11521_v53 }
0x5115   :  { %v11206_v30 = vpop.f32.mrb[235].mxu1  ;;  %v8407_v6 = vsel %vm205_vm3, %v8402_v27, -inf  ;;  %11215 = vmatprep.subr.bf16.mxu1 %v11916_v8 }
0x5116   :  { %8408 = vmax.xlane.f32.xlu0 %v8407_v6 }
0x518b   :  { %v8079_v57 = vpop.xlane.xlu0 %8078 }
0x518c   :  { %v8080_v16 = vsub.f32 %v8072_v13, %v8079_v57 }
0x518e   :  { %v8081_v35 = vmul.f32 1.442695, %v8080_v16 }
0x5190   :  { %11829 = vpow2.f32 %v8081_v35 }
0x5193   :  { %v8189_v47 = vpop.xlane.xlu1 %8188 }
0x5194   :  { %v8190_v52 = vsub.f32 %v8182_v33, %v8189_v47 }
0x5196   :  { %v8191_v37 = vmul.f32 1.442695, %v8190_v52 }
0x5198   :  { %11831 = vpow2.f32 %v8191_v37 }
0x519a   :  { %v11830_v34 = vpop.eup %11829 }
0x519b   :  { %v8083_v20 = vsel %vm205_vm3, %v11830_v34, 0.0  ;;  %v8299_v38 = vpop.xlane.xlu0 %8298 }
0x519c   :  { %8084 = vadd.xlane.f32.xlu1 %v8083_v20  ;;  %v8300_v55 = vsub.f32 %v8292_v29, %v8299_v38 }
0x519e   :  { %v8301_v56 = vmul.f32 1.442695, %v8300_v55 }
0x51a2   :  { %v11832_v17 = vpop.eup %11831 }
0x51a3   :  { %v8409_v40 = vpop.xlane.xlu0 %8408  ;;  %v8193_v50 = vsel %vm205_vm3, %v11832_v17, 0.0 }
0x51a4   :  { %v8410_v46 = vsub.f32 %v8402_v27, %v8409_v40  ;;  %8194 = vadd.xlane.f32.xlu0 %v8193_v50  ;;  %v11522_v27 = vld [vmem:[%s14221_s14 + $0x18] sm:$0xff]   ;;  %v11523_v40 = vld [vmem:[%s14223_s16 + $0x10] sm:$0xff]  }
0x51a5   :  { %11216 = vmatpush3.bf16.msra.mxu1 %v11522_v27 }
0x51a6   :  { %v8411_v51 = vmul.f32 1.442695, %v8410_v46  ;;  %11229 = vmatprep.subr.bf16.mxu1 %v11916_v8  ;;  %v11524_v46 = vld [vmem:[%s14223_s16 + $0x18] sm:$0xff]  }
0x51a8   :  { %11833 = vpow2.f32 %v8411_v51 }
0x51a9   :  { %11835 = vpow2.f32 %v8301_v56 }
0x51ad   :  { %8089 = vrot.lane.b32.xlu1 %v13875_v60, %s14330_s21 }
0x51b2   :  { %v11834_v36 = vpop.eup %11833 }
0x51b3   :  { %v8413_v21 = vsel %vm205_vm3, %v11834_v36, 0.0  ;;  %v11836_v58 = vpop.eup %11835 }
0x51b4   :  { %8414 = vadd.xlane.f32.xlu0 %v8413_v21  ;;  %v8303_v61 = vsel %vm205_vm3, %v11836_v58, 0.0 }
0x51ca   :  { %8199 = vrot.lane.b32.xlu0 %v13875_v60, %s14322_s3 }
0x51d1   :  { %8304 = vadd.xlane.f32.xlu1 %v8303_v61 }
0x51e2   :  { %8309 = vrot.lane.b32.xlu1 %v13875_v60, %s14331_s24 }
0x51e6   :  { %8419 = vrot.lane.b32.xlu1 %v13875_v60, %s14321_s28 }
0x5229   :  { %v8085_v62 = vpop.xlane.xlu1 %8084 }
0x522a   :  { %11837 = vrcp.f32 %v8085_v62 }
0x522d   :  { %v8090_v63 = vpop.permute.xlu1 %8089 }
0x522e   :  { %v8095_v32 = vsel %vm1974_vm10, %v8090_v63, 0 }
0x522f   :  { %11172 = vmatpush3.bf16.msra.mxu0 %v8095_v32 }
0x5230   :  { %11183 = vmatprep.subr.bf16.mxu0 %v11916_v8 }
0x5231   :  { %v8195_v10 = vpop.xlane.xlu0 %8194 }
0x5232   :  { %11839 = vrcp.f32 %v8195_v10  ;;  %v11526_v10 = vld [vmem:[%s14344_s1 + $0x18] sm:$0xff]  }
0x5234   :  { %v11838_v0 = vpop.eup %11837 }
0x5235   :  { %v8087_v1 = vmul.f32 %v11838_v0, %v11830_v34 }
0x5237   :  { %v8088_v4 = vpack.c.bf16 %v8087_v1, %v8087_v1 }
0x5239   :  { %11174 = vmatmul.mubr.msk.bf16.vlgmr.msra.gmra.mrb[0].mxu0 %vm205_vm3, %v8088_v4 }
0x523a   :  { %11185 = vmatprep.mubr.msk.bf16.mxu0 %vm11917_vm2, %v11916_v8 }
0x523c   :  { %v11840_v5 = vpop.eup %11839 }
0x523d   :  { %v8197_v7 = vmul.f32 %v11840_v5, %v11832_v17 }
0x523f   :  { %v8198_v14 = vpack.c.bf16 %v8197_v7, %v8197_v7  ;;  %v9910_v7 = vld [vmem:[%s14219_s12 + $0x4] ss:$0 sm:$0xff] }
0x5241   :  { %v8415_v60 = vpop.xlane.xlu0 %8414 }
0x5245   :  { %v8200_v9 = vpop.permute.xlu0 %8199 }
0x5246   :  { %v8205_v15 = vsel %vm1974_vm10, %v8200_v9, 0 }
0x5247   :  { %11184 = vmatpush3.bf16.msra.mxu0 %v8205_v15 }
0x5248   :  { %11195 = vmatprep.subr.bf16.mxu0 %v11916_v8 }
0x524a   :  { %11186 = vmatmul.mubr.msk.bf16.vlgmr.msra.gmra.mrb[4].mxu0 %vm205_vm3, %v8198_v14 }
0x524b   :  { %11197 = vmatprep.mubr.msk.bf16.mxu0 %vm11917_vm2, %v11916_v8 }
0x525e   :  { %v8305_v28 = vpop.xlane.xlu1 %8304 }
0x525f   :  { %11841 = vrcp.f32 %v8305_v28 }
0x5260   :  { %11843 = vrcp.f32 %v8415_v60 }
0x5262   :  { %v8310_v42 = vpop.permute.xlu1 %8309 }
0x5263   :  { %v8315_v13 = vsel %vm1974_vm10, %v8310_v42, 0 }
0x5264   :  { %11196 = vmatpush3.bf16.msra.mxu0 %v8315_v13 }
0x5265   :  { %11207 = vmatprep.subr.bf16.mxu0 %v11916_v8 }
0x5266   :  { %v8420_v24 = vpop.permute.xlu1 %8419 }
0x5267   :  { %v8425_v33 = vsel %vm1974_vm10, %v8420_v24, 0 }
0x5269   :  { %v11842_v44 = vpop.eup %11841 }
0x526a   :  { %v8307_v18 = vmul.f32 %v11842_v44, %v11836_v58  ;;  %v11844_v54 = vpop.eup %11843 }
0x526b   :  { %v8417_v23 = vmul.f32 %v11844_v54, %v11834_v36 }
0x526c   :  { %v8308_v49 = vpack.c.bf16 %v8307_v18, %v8307_v18 }
0x526d   :  { %v8418_v39 = vpack.c.bf16 %v8417_v23, %v8417_v23 }
0x526e   :  { %11198 = vmatmul.mubr.msk.bf16.vlgmr.msra.gmra.mrb[8].mxu0 %vm205_vm3, %v8308_v49 }
0x526f   :  { %11208 = vmatpush3.bf16.msra.mxu0 %v8425_v33  ;;  %11209 = vmatprep.mubr.msk.bf16.mxu0 %vm11917_vm2, %v11916_v8 }
0x5270   :  { %11221 = vmatprep.subr.bf16.mxu0 %v11916_v8 }
0x5276   :  { %11210 = vmatmul.mubr.msk.bf16.vlgmr.msra.gmra.mrb[12].mxu0 %vm205_vm3, %v8418_v39 }
0x5277   :  { %11225 = vmatprep.mubr.msk.bf16.mxu0 %vm11917_vm2, %v11916_v8 }
0x530c   :  { %v8131_v19 = vpop.f32.mrb[0].mxu0 }
0x530d   :  { %v11175_v25 = vpop.f32.mrb[1].mxu0 }
0x530e   :  { %v8134_v43 = vpop.f32.mrb[2].mxu0 }
0x530f   :  { %v11176_v29 = vpop.f32.mrb[3].mxu0 }
0x531d   :  { %v8241_v31 = vpop.f32.mrb[4].mxu0 }
0x531e   :  { %8468 = vrot.lane.b32.xlu0 %v8241_v31, %s14323_s4  ;;  %v11187_v11 = vpop.f32.mrb[5].mxu0 }
0x531f   :  { %v8244_v59 = vpop.f32.mrb[6].mxu0 }
0x5320   :  { %v11188_v48 = vpop.f32.mrb[7].mxu0 }
0x5341   :  { %v8351_v2 = vpop.f32.mrb[8].mxu0 }
0x5342   :  { %8472 = vrot.lane.b32.xlu1 %v8351_v2, %s14324_s0  ;;  %v11199_v41 = vpop.f32.mrb[9].mxu0 }
0x5343   :  { %v8354_v30 = vpop.f32.mrb[10].mxu0 }
0x5344   :  { %v11200_v6 = vpop.f32.mrb[11].mxu0 }
0x5349   :  { %v8461_v57 = vpop.f32.mrb[12].mxu0 }
0x534a   :  { %8476 = vrot.lane.b32.xlu0 %v8461_v57, %s14325_s30  ;;  %v11211_v16 = vpop.f32.mrb[13].mxu0 }
0x534b   :  { %v8464_v35 = vpop.f32.mrb[14].mxu0 }
0x534c   :  { %v11212_v47 = vpop.f32.mrb[15].mxu0 }
0x5390   :  { %v8469_v52 = vpop.permute.xlu0 %8468 }
0x5391   :  { %v8479_v34 = vsel %vm205_vm3, %v8131_v19, %v8469_v52 }
0x53b4   :  { %v8473_v37 = vpop.permute.xlu1 %8472 }
0x53b5   :  { %v8480_v20 = vsel %vm723_vm7, %v8479_v34, %v8473_v37 }
0x53bc   :  { %v8477_v38 = vpop.permute.xlu0 %8476 }
0x53bd   :  { %v8481_v17 = vsel %vm726_vm8, %v8480_v20, %v8477_v38 }
0x53be   :  { %v8482_v50 = vpack.c.bf16 %v8481_v17, %v8481_v17 }
0x53c0   :  { %11218 = vmatmul.mubr.msk.bf16.vlgmr.msra.gmra.mrb[236].mxu1 %vm111_vm0, %v8482_v50 }
0x53c1   :  { %11230 = vmatpush3.bf16.msra.mxu1 %v11523_v40  ;;  %11233 = vmatprep.mubr.msk.bf16.mxu1 %vm11917_vm2, %v11916_v8 }
0x53c2   :  { %11231 = vmatprep.subr.bf16.mxu1 %v11916_v8 }
0x53c5   :  { %11232 = vmatpush3.bf16.msra.mxu1 %v11524_v46 }
0x53c6   :  { %11243 = vmatprep.subr.bf16.mxu1 %v11916_v8 }
0x53c8   :  { %11234 = vmatmul.mubr.msk.bf16.vlgmr.msra.gmra.mrb[240].mxu1 %vm111_vm0, %v13699_v12 }
0x53c9   :  { %11245 = vmatprep.mubr.msk.bf16.mxu1 %vm11917_vm2, %v11916_v8 }
0x5493   :  { %v8532_v51 = vpop.f32.mrb[236].mxu1 }
0x5494   :  { %v13982_v36 = vadd.f32 %v8532_v51, %v13855_v45  ;;  %v11219_v21 = vpop.f32.mrb[237].mxu1  ;;  %v11525_v45 = vld [vmem:[%s14344_s1 + $0x10] sm:$0xff]  }
0x5495   :  { %v8535_v55 = vpop.f32.mrb[238].mxu1  ;;  %11222 = vmatpush3.bf16.msra.mxu0 %v11525_v45 }
0x5496   :  { %v11220_v56 = vpop.f32.mrb[239].mxu1  ;;  %v8540_v58 = vmul.f32 %v13982_v36, %v13982_v36  ;;  %11223 = vmatprep.subr.bf16.mxu0 %v11916_v8 }
0x5498   :  { %v8541_v61 = vsel %vm111_vm0, %v8540_v58, 0.0 }
0x5499   :  { %8542 = vadd.xlane.f32.xlu1 %v8541_v61  ;;  %11224 = vmatpush3.bf16.msra.mxu0 %v11526_v10 }
0x549a   :  { %11237 = vmatprep.subr.bf16.mxu0 %v11916_v8 }
0x549b   :  { %v8669_v62 = vpop.f32.mrb[240].mxu1 }
0x549c   :  { %v11235_v63 = vpop.f32.mrb[241].mxu1 }
0x549d   :  { %v8672_v32 = vpop.f32.mrb[242].mxu1 }
0x549e   :  { %v13987_v12 = vpack.c.bf16 %v8672_v32, %v8669_v62  ;;  %v11236_v0 = vpop.f32.mrb[243].mxu1 }
0x54a0   :  { %8788 = vrot.lane.b32.xlu0 %v13987_v12, %s14316_s5  ;;  %v8682_v28 = vsel %vm205_vm3, %v13987_v12, 0 }
0x54a4   :  { %8898 = vrot.lane.b32.xlu0 %v13987_v12, %s14318_s26 }
0x5512   :  { %v8789_v42 = vpop.permute.xlu0 %8788 }
0x5513   :  { %v8794_v49 = vsel %vm205_vm3, %v8789_v42, 0 }
0x5516   :  { %v8899_v33 = vpop.permute.xlu0 %8898 }
0x5517   :  { %v8904_v39 = vsel %vm205_vm3, %v8899_v33, 0 }
0x5526   :  { %v8543_v1 = vpop.xlane.xlu1 %8542 }
0x5527   :  { %v8544_v4 = vmul.f32 0.03125, %v8543_v1 }
0x5529   :  { %v8545_v5 = vadd.f32 1e-06, %v8544_v4 }
0x552b   :  { %11845 = vrsqrt.f32 %v8545_v5 }
0x5535   :  { %v11846_v60 = vpop.eup %11845 }
0x5536   :  { %v8547_v9 = vmul.f32 %v11846_v60, %v13982_v36 }
0x5538   :  { %v8554_v15 = vmul.f32 %v9910_v7, %v8547_v9 }
0x553a   :  { %v8567_v14 = vpack.c.bf16 %v8554_v15, %v8554_v15 }
0x553c   :  { %11226 = vmatmul.mubr.msk.bf16.vlgmr.msra.gmra.mrb[16].mxu0 %vm111_vm0, %v8567_v14 }
0x553d   :  { %11238 = vmatpush3.bf16.xpose.msra.mxu0 %v8682_v28  ;;  %11239 = vmatprep.mubr.msk.bf16.mxu0 %vm11917_vm2, %v11916_v8 }
0x553e   :  { %11249 = vmatprep.subr.bf16.mxu0 %v11916_v8 }
0x560f   :  { %v8617_v13 = vpop.f32.mrb[16].mxu0 }
0x5610   :  { %v8676_v44 = vpack.c.bf16 %v8617_v13, %v8617_v13  ;;  %v11227_v18 = vpop.f32.mrb[17].mxu0 }
0x5611   :  { %v8620_v24 = vpop.f32.mrb[18].mxu0 }
0x5612   :  { %v11228_v54 = vpop.f32.mrb[19].mxu0  ;;  %8786 = vrot.lane.b32.xlu0 %v8676_v44, %s14316_s5  ;;  %11240 = vmatmul.mubr.msk.bf16.vlgmr.msra.gmra.mrb[20].mxu0 %vm205_vm3, %v8676_v44 }
0x5613   :  { %11250 = vmatpush3.bf16.xpose.msra.mxu0 %v8794_v49  ;;  %11251 = vmatprep.mubr.msk.bf16.mxu0 %vm11917_vm2, %v11916_v8 }
0x5614   :  { %11261 = vmatprep.subr.bf16.mxu0 %v11916_v8 }
0x5616   :  { %8896 = vrot.lane.b32.xlu0 %v8676_v44, %s14318_s26 }
0x561a   :  { %9008 = vrot.lane.b32.xlu0 %v13987_v12, %s14320_s25 }
0x561e   :  { %9006 = vrot.lane.b32.xlu0 %v8676_v44, %s14320_s25 }
0x5684   :  { %v8787_v23 = vpop.permute.xlu0 %8786 }
0x5685   :  { %11252 = vmatmul.mubr.msk.bf16.vlgmr.msra.gmra.mrb[24].mxu0 %vm205_vm3, %v8787_v23 }
0x5686   :  { %11262 = vmatpush3.bf16.xpose.msra.mxu0 %v8904_v39  ;;  %11263 = vmatprep.mubr.msk.bf16.mxu0 %vm11917_vm2, %v11916_v8 }
0x5687   :  { %11273 = vmatprep.subr.bf16.mxu0 %v11916_v8 }
0x5688   :  { %v8897_v19 = vpop.permute.xlu0 %8896 }
0x568c   :  { %v9009_v25 = vpop.permute.xlu0 %9008 }
0x568d   :  { %v9014_v43 = vsel %vm205_vm3, %v9009_v25, 0  ;;  %11264 = vmatmul.mubr.msk.bf16.vlgmr.msra.gmra.mrb[28].mxu0 %vm205_vm3, %v8897_v19 }
0x568e   :  { %11274 = vmatpush3.bf16.xpose.msra.mxu0 %v9014_v43  ;;  %11275 = vmatprep.mubr.msk.bf16.mxu0 %vm11917_vm2, %v11916_v8 }
0x568f   :  { %11285 = vmatprep.subr.bf16.mxu0 %v11916_v8 }
0x5690   :  { %v9007_v29 = vpop.permute.xlu0 %9006 }
0x5695   :  { %11276 = vmatmul.mubr.msk.bf16.vlgmr.msra.gmra.mrb[32].mxu0 %vm205_vm3, %v9007_v29 }
0x5696   :  { %11289 = vmatprep.mubr.msk.bf16.mxu0 %vm11917_vm2, %v11916_v8 }
0x56e5   :  { %v8718_v31 = vpop.f32.mrb[20].mxu0 }
0x56e6   :  { %v8719_v11 = vadd.f32 %v13761_v3, %v8718_v31  ;;  %v11241_v59 = vpop.f32.mrb[21].mxu0 }
0x56e7   :  { %v8721_v48 = vpop.f32.mrb[22].mxu0 }
0x56e8   :  { %v11242_v53 = vpop.f32.mrb[23].mxu0  ;;  %v8724_v27 = vsel %vm253_vm4, %v8719_v11, -inf }
0x56e9   :  { %8725 = vmax.xlane.f32.xlu0 %v8724_v27 }
0x5758   :  { %v8830_v2 = vpop.f32.mrb[24].mxu0 }
0x5759   :  { %v8831_v41 = vadd.f32 %v13761_v3, %v8830_v2  ;;  %v11253_v30 = vpop.f32.mrb[25].mxu0 }
0x575a   :  { %v8833_v6 = vpop.f32.mrb[26].mxu0 }
0x575b   :  { %v11254_v57 = vpop.f32.mrb[27].mxu0  ;;  %v8836_v16 = vsel %vm253_vm4, %v8831_v41, -inf }
0x575c   :  { %8837 = vmax.xlane.f32.xlu1 %v8836_v16 }
0x5760   :  { %v8940_v35 = vpop.f32.mrb[28].mxu0 }
0x5761   :  { %v8941_v47 = vadd.f32 %v13761_v3, %v8940_v35  ;;  %v11265_v52 = vpop.f32.mrb[29].mxu0  ;;  %v11527_v35 = vld [vmem:[%s14346_s22 + $0x10] sm:$0xff]  }
0x5762   :  { %v8943_v37 = vpop.f32.mrb[30].mxu0  ;;  %11286 = vmatpush3.bf16.msra.mxu0 %v11527_v35 }
0x5763   :  { %v11266_v34 = vpop.f32.mrb[31].mxu0  ;;  %v8946_v20 = vsel %vm253_vm4, %v8941_v47, -inf  ;;  %11287 = vmatprep.subr.bf16.mxu0 %v11916_v8 }
0x5764   :  { %8947 = vmax.xlane.f32.xlu1 %v8946_v20  ;;  %v11528_v20 = vld [vmem:[%s14346_s22 + $0x18] sm:$0xff]  }
0x5766   :  { %11288 = vmatpush3.bf16.msra.mxu0 %v11528_v20 }
0x5767   :  { %11301 = vmatprep.subr.bf16.mxu0 %v11916_v8 }
0x5768   :  { %v9050_v38 = vpop.f32.mrb[32].mxu0 }
0x5769   :  { %v9051_v17 = vadd.f32 %v13761_v3, %v9050_v38  ;;  %v11277_v40 = vpop.f32.mrb[33].mxu0 }
0x576a   :  { %v9053_v50 = vpop.f32.mrb[34].mxu0 }
0x576b   :  { %v11278_v46 = vpop.f32.mrb[35].mxu0  ;;  %v9056_v51 = vsel %vm253_vm4, %v9051_v17, -inf }
0x576c   :  { %9057 = vmax.xlane.f32.xlu1 %v9056_v51 }
0x5776   :  { %v8726_v21 = vpop.xlane.xlu0 %8725 }
0x5777   :  { %v8727_v55 = vsub.f32 %v8719_v11, %v8726_v21 }
0x5779   :  { %v8728_v56 = vmul.f32 1.442695, %v8727_v55 }
0x577b   :  { %11847 = vpow2.f32 %v8728_v56  ;;  %v11891_v56 = vld [vmem:[#allocation2] sm:$0xff] }
0x577d   :  { %8737 = vrot.lane.b32.xlu1 %v13987_v12, %s14328_s27 }
0x5785   :  { %v11848_v58 = vpop.eup %11847 }
0x5786   :  { %v8730_v61 = vsel %vm253_vm4, %v11848_v58, 0.0 }
0x57a1   :  { %8731 = vadd.xlane.f32.xlu1 %v8730_v61 }
0x57e9   :  { %v8838_v62 = vpop.xlane.xlu1 %8837 }
0x57ea   :  { %v8839_v63 = vsub.f32 %v8831_v41, %v8838_v62 }
0x57ec   :  { %v8840_v3 = vmul.f32 1.442695, %v8839_v63 }
0x57ee   :  { %11849 = vpow2.f32 %v8840_v3 }
0x57f1   :  { %v8948_v32 = vpop.xlane.xlu1 %8947 }
0x57f2   :  { %v8949_v0 = vsub.f32 %v8941_v47, %v8948_v32 }
0x57f4   :  { %v8950_v45 = vmul.f32 1.442695, %v8949_v0 }
0x57f6   :  { %11851 = vpow2.f32 %v8950_v45 }
0x57f8   :  { %v11850_v10 = vpop.eup %11849 }
0x57f9   :  { %v9058_v1 = vpop.xlane.xlu1 %9057  ;;  %v8842_v4 = vsel %vm253_vm4, %v11850_v10, 0.0 }
0x57fa   :  { %v9059_v5 = vsub.f32 %v9051_v17, %v9058_v1  ;;  %8843 = vadd.xlane.f32.xlu1 %v8842_v4 }
0x57fc   :  { %v9060_v60 = vmul.f32 1.442695, %v9059_v5  ;;  %v11933_v5 = vmov 0  }
0x57fd   :  { %v8738_v7 = vpop.permute.xlu1 %8737  ;;  %11421 = vset.pattern.permute.xlu1 %v11933_v5  ;;  %11422 = vset.pattern.permute.xlu0 %v11933_v5 }
0x57fe   :  { %11853 = vpow2.f32 %v9060_v60  ;;  %v8743_v9 = vsel %vm283_vm6, %v8738_v7, 0 }
0x57ff   :  { %11244 = vmatpush3.bf16.msra.mxu1 %v8743_v9 }
0x5800   :  { %v11852_v15 = vpop.eup %11851  ;;  %11255 = vmatprep.subr.bf16.mxu1 %v11916_v8 }
0x5801   :  { %v8952_v14 = vsel %vm253_vm4, %v11852_v15, 0.0 }
0x5802   :  { %8953 = vadd.xlane.f32.xlu1 %v8952_v14 }
0x5808   :  { %v11854_v28 = vpop.eup %11853 }
0x5809   :  { %v9062_v42 = vsel %vm253_vm4, %v11854_v28, 0.0 }
0x580a   :  { %9063 = vadd.xlane.f32.xlu0 %v9062_v42 }
0x5813   :  { %8958 = vrot.lane.b32.xlu1 %v13987_v12, %s14317_s6 }
0x5817   :  { %9068 = vrot.lane.b32.xlu1 %v13987_v12, %s14319_s7 }
0x5820   :  { %8848 = vrot.lane.b32.xlu0 %v13987_v12, %s14327_s2 }
0x582e   :  { %v8732_v13 = vpop.xlane.xlu1 %8731 }
0x582f   :  { %11855 = vrcp.f32 %v8732_v13 }
0x5839   :  { %v11856_v44 = vpop.eup %11855 }
0x583a   :  { %v8734_v18 = vmul.f32 %v11856_v44, %v11848_v58  ;;  %v11529_v44 = vld [vmem:[%s14347_s8 + $0x10] sm:$0xff]  }
0x583c   :  { %v8735_v24 = vpack.c.bf16 %v8734_v18, %v8734_v18 }
0x583e   :  { %11246 = vmatmul.mubr.msk.bf16.vlgmr.msra.gmra.mrb[244].mxu1 %vm253_vm4, %v8735_v24 }
0x583f   :  { %11257 = vmatprep.mubr.msk.bf16.mxu1 %vm11917_vm2, %v11916_v8 }
0x5887   :  { %v8844_v49 = vpop.xlane.xlu1 %8843 }
0x5888   :  { %11857 = vrcp.f32 %v8844_v49 }
0x588f   :  { %v8954_v54 = vpop.xlane.xlu1 %8953 }
0x5890   :  { %11859 = vrcp.f32 %v8954_v54 }
0x5892   :  { %v11858_v33 = vpop.eup %11857 }
0x5893   :  { %v8846_v39 = vmul.f32 %v11858_v33, %v11850_v10  ;;  %v8959_v25 = vpop.permute.xlu1 %8958 }
0x5894   :  { %v8964_v31 = vsel %vm283_vm6, %v8959_v25, 0 }
0x5895   :  { %v8847_v43 = vpack.c.bf16 %v8846_v39, %v8846_v39 }
0x5897   :  { %v9064_v23 = vpop.xlane.xlu0 %9063  ;;  %v9069_v59 = vpop.permute.xlu1 %9068 }
0x5898   :  { %11861 = vrcp.f32 %v9064_v23  ;;  %v9074_v27 = vsel %vm283_vm6, %v9069_v59, 0  ;;  %v11534_v59 = vld [vmem:[%s14348_s11 + $0x38] sm:$0xff]  }
0x589a   :  { %v11860_v29 = vpop.eup %11859 }
0x589b   :  { %v8849_v19 = vpop.permute.xlu0 %8848  ;;  %v8956_v11 = vmul.f32 %v11860_v29, %v11852_v15  ;;  %v11531_v29 = vld [vmem:[%s14348_s11 + $0x20] sm:$0xff]  }
0x589c   :  { %v8854_v12 = vsel %vm283_vm6, %v8849_v19, 0  ;;  %v9941_v19 = vld [vmem:[%s14219_s12 + $0x5] ss:$0 sm:$0xff] }
0x589d   :  { %11256 = vmatpush3.bf16.msra.mxu1 %v8854_v12  ;;  %v8957_v48 = vpack.c.bf16 %v8956_v11, %v8956_v11  ;;  %v11533_v11 = vld [vmem:[%s14348_s11 + $0x30] sm:$0xff]  }
0x589e   :  { %11267 = vmatprep.subr.bf16.mxu1 %v11916_v8 }
0x58a0   :  { %11258 = vmatmul.mubr.msk.bf16.vlgmr.msra.gmra.mrb[248].mxu1 %vm253_vm4, %v8847_v43 }
0x58a1   :  { %11268 = vmatpush3.bf16.msra.mxu1 %v8964_v31  ;;  %11269 = vmatprep.mubr.msk.bf16.mxu1 %vm11917_vm2, %v11916_v8  ;;  %v11532_v31 = vld [vmem:[%s14348_s11 + $0x28] sm:$0xff]  }
0x58a2   :  { %11279 = vmatprep.subr.bf16.mxu1 %v11916_v8  ;;  %v11862_v53 = vpop.eup %11861 }
0x58a3   :  { %v9066_v2 = vmul.f32 %v11862_v53, %v11854_v28 }
0x58a5   :  { %v9067_v41 = vpack.c.bf16 %v9066_v2, %v9066_v2 }
0x58a8   :  { %11270 = vmatmul.mubr.msk.bf16.vlgmr.msra.gmra.mrb[252].mxu1 %vm253_vm4, %v8957_v48 }
0x58a9   :  { %11280 = vmatpush3.bf16.msra.mxu1 %v9074_v27  ;;  %11281 = vmatprep.mubr.msk.bf16.mxu1 %vm11917_vm2, %v11916_v8 }
0x58aa   :  { %11293 = vmatprep.subr.bf16.mxu1 %v11916_v8 }
0x58b0   :  { %11282 = vmatmul.mubr.msk.bf16.vlgmr.msra.gmra.mrb[0].mxu1 %vm253_vm4, %v9067_v41 }
0x58b1   :  { %11297 = vmatprep.mubr.msk.bf16.mxu1 %vm11917_vm2, %v11916_v8  ;;  %11294 = vmatpush3.bf16.msra.mxu1 %v11529_v44 }
0x58b2   :  { %11295 = vmatprep.subr.bf16.mxu1 %v11916_v8 }
0x5911   :  { %v8779_v30 = vpop.f32.mrb[244].mxu1 }
0x5912   :  { %v11247_v6 = vpop.f32.mrb[245].mxu1 }
0x5913   :  { %v8782_v57 = vpop.f32.mrb[246].mxu1 }
0x5914   :  { %v11248_v16 = vpop.f32.mrb[247].mxu1 }
0x5973   :  { %v8890_v47 = vpop.f32.mrb[248].mxu1 }
0x5974   :  { %9117 = vrot.lane.b32.xlu0 %v8890_v47, %s14323_s4  ;;  %v11259_v52 = vpop.f32.mrb[249].mxu1 }
0x5975   :  { %v8893_v37 = vpop.f32.mrb[250].mxu1 }
0x5976   :  { %v11260_v34 = vpop.f32.mrb[251].mxu1 }
0x597b   :  { %v9000_v38 = vpop.f32.mrb[252].mxu1 }
0x597c   :  { %9121 = vrot.lane.b32.xlu1 %v9000_v38, %s14324_s0  ;;  %v11271_v17 = vpop.f32.mrb[253].mxu1 }
0x597d   :  { %v9003_v40 = vpop.f32.mrb[254].mxu1 }
0x597e   :  { %v11272_v50 = vpop.f32.mrb[255].mxu1 }
0x5983   :  { %v9110_v46 = vpop.f32.mrb[0].mxu1 }
0x5984   :  { %9125 = vrot.lane.b32.xlu0 %v9110_v46, %s14325_s30  ;;  %v11283_v51 = vpop.f32.mrb[1].mxu1  ;;  %s14349_s30 = sld [smem:[#allocation10_spill]] }
0x5985   :  { %v9113_v21 = vpop.f32.mrb[2].mxu1 }
0x5986   :  { %v11284_v55 = vpop.f32.mrb[3].mxu1 }
0x598a   :  { %v4776_v13 = vld [vmem:[%s14349_s30] sm:$0xff] }
0x598b   :  { %vm4796_vm13 = vcmp.ne.s32.totalorder %v4776_v13, 0 }
0x598c   :  { %v9763_v41 = vsel %vm4796_vm13, 1.0, %v11916_v8 }
0x598d   :  { %v4814_v55 = vsel %vm4801_vm14, %v9763_v41, 0.0 }
0x59a3   :  { %4777 = vmax.xlane.f32.xlu0 %v11891_v56 }
0x59e6   :  { %v9118_v58 = vpop.permute.xlu0 %9117 }
0x59e7   :  { %v9128_v62 = vsel %vm205_vm3, %v8779_v30, %v9118_v58 }
0x59ee   :  { %v9122_v61 = vpop.permute.xlu1 %9121 }
0x59ef   :  { %v9129_v63 = vsel %vm723_vm7, %v9128_v62, %v9122_v61  ;;  %v11536_v61 = vld [vmem:[%s14350_s10 + $0x8] sm:$0xff]  }
0x59f0   :  { %v9423_v62 = vsel %vm111_vm0, %v11536_v61, 0 }
0x59f6   :  { %v9126_v3 = vpop.permute.xlu0 %9125 }
0x59f7   :  { %v9130_v32 = vsel %vm726_vm8, %v9129_v63, %v9126_v3  ;;  %v11537_v63 = vld [vmem:[%s14350_s10 + $0x10] sm:$0xff]  }
0x59f8   :  { %v9131_v0 = vpack.c.bf16 %v9130_v32, %v9130_v32  ;;  %v9426_v3 = vsel %vm111_vm0, %v11537_v63, 0  ;;  %v11538_v32 = vld [vmem:[%s14350_s10 + $0x18] sm:$0xff]  }
0x59fa   :  { %11290 = vmatmul.mubr.msk.bf16.vlgmr.msra.gmra.mrb[36].mxu0 %vm111_vm0, %v9131_v0  ;;  %v9429_v0 = vsel %vm111_vm0, %v11538_v32, 0 }
0x59fb   :  { %11309 = vmatprep.mubr.msk.bf16.mxu0 %vm11917_vm2, %v11916_v8  ;;  %11302 = vmatpush3.bf16.msra.mxu0 %v11531_v29  ;;  %v9962_v29 = vld [vmem:[%s14351_s19] ss:$0 sm:$0xff] }
0x59fc   :  { %11303 = vmatprep.subr.bf16.mxu0 %v11916_v8 }
0x59ff   :  { %11304 = vmatpush3.bf16.msra.mxu0 %v11532_v31 }
0x5a00   :  { %11305 = vmatprep.subr.bf16.mxu0 %v11916_v8 }
0x5a03   :  { %11306 = vmatpush3.bf16.msra.mxu0 %v11533_v11 }
0x5a04   :  { %11307 = vmatprep.subr.bf16.mxu0 %v11916_v8 }
0x5a07   :  { %11308 = vmatpush3.bf16.msra.mxu0 %v11534_v59 }
0x5a30   :  { %v4778_v45 = vpop.xlane.xlu0 %4777 }
0x5a31   :  { %v4779_v10 = vsub.f32 %v11891_v56, %v4778_v45 }
0x5a33   :  { %v4780_v1 = vmul.f32 1.442695, %v4779_v10 }
0x5a35   :  { %11863 = vpow2.f32 %v4780_v1 }
0x5a3f   :  { %v11864_v4 = vpop.eup %11863 }
0x5a40   :  { %4782 = vadd.xlane.f32.xlu0 %v11864_v4 }
0x5acd   :  { %v9181_v60 = vpop.f32.mrb[36].mxu0  ;;  %v4783_v48 = vpop.xlane.xlu0 %4782 }
0x5ace   :  { %v14092_v7 = vadd.f32 %v9181_v60, %v13982_v36  ;;  %v11291_v9 = vpop.f32.mrb[37].mxu0  ;;  %v11530_v36 = vld [vmem:[%s14347_s8 + $0x18] sm:$0xff]  }
0x5acf   :  { %v9184_v15 = vpop.f32.mrb[38].mxu0  ;;  %11296 = vmatpush3.bf16.msra.mxu1 %v11530_v36 }
0x5ad0   :  { %v11292_v14 = vpop.f32.mrb[39].mxu0  ;;  %v9189_v28 = vmul.f32 %v14092_v7, %v14092_v7  ;;  %11313 = vmatprep.subr.bf16.mxu1 %v11916_v8 }
0x5ad2   :  { %v9190_v42 = vsel %vm111_vm0, %v9189_v28, 0.0 }
0x5ad3   :  { %9191 = vadd.xlane.f32.xlu1 %v9190_v42 }
0x5ae4   :  { %4788 = vperm.xlu1 %11421, %v4776_v13  }
0x5b60   :  { %v9192_v18 = vpop.xlane.xlu1 %9191 }
0x5b61   :  { %v9193_v24 = vmul.f32 0.03125, %v9192_v18  ;;  %v11540_v18 = vld [vmem:[%s14350_s10 + $0x28] sm:$0xff]  }
0x5b63   :  { %v9194_v49 = vadd.f32 1e-06, %v9193_v24 }
0x5b64   :  { %v4789_v54 = vpop.permute.xlu1 %4788 }
0x5b65   :  { %11865 = vrsqrt.f32 %v9194_v49  ;;  %vm4790_vm12 = vcmp.eq.s32.totalorder %v13236_v22, %v4789_v54  ;;  %v9435_v49 = vsel %vm111_vm0, %v11540_v18, 0  ;;  %v11541_v54 = vld [vmem:[%s14350_s10 + $0x30] sm:$0xff]  }
0x5b66   :  { %v9762_v33 = vsel %vm4790_vm12, 1.0, %v11916_v8  ;;  %11867 = vlog2.f32 %v4783_v48 }
0x5b67   :  { %v4793_v23 = vmul.f32 %v11891_v56, %v9762_v33  ;;  %v11535_v56 = vld [vmem:[%s14350_s10] sm:$0xff]   ;;  %v9438_v33 = vsel %vm111_vm0, %v11541_v54, 0 }
0x5b68   :  { %v9420_v58 = vsel %vm111_vm0, %v11535_v56, 0 }
0x5b69   :  { %4794 = vadd.xlane.f32.xlu0 %v4793_v23  ;;  %v11542_v23 = vld [vmem:[%s14350_s10 + $0x38] sm:$0xff]  }
0x5b6f   :  { %v11866_v39 = vpop.eup %11865 }
0x5b70   :  { %v9196_v12 = vmul.f32 %v11866_v39, %v14092_v7  ;;  %v11868_v53 = vpop.eup %11867  ;;  %v9441_v39 = vsel %vm111_vm0, %v11542_v23, 0 }
0x5b71   :  { %v4785_v27 = vmul.f32 0.6931472, %v11868_v53 }
0x5b72   :  { %v9203_v25 = vmul.f32 %v9941_v19, %v9196_v12 }
0x5b73   :  { %v4786_v2 = vadd.f32 %v4785_v27, %v4778_v45  ;;  %v11539_v45 = vld [vmem:[%s14350_s10 + $0x20] sm:$0xff]  }
0x5b74   :  { %v9208_v43 = vpack.c.bf16 %v9203_v25, %v9203_v25  ;;  %v9432_v10 = vsel %vm111_vm0, %v11539_v45, 0 }
0x5b76   :  { %11298 = vmatmul.mubr.msk.bf16.vlgmr.msra.gmra.mrb[4].mxu1 %vm111_vm0, %v9208_v43 }
0x5b77   :  { %11329 = vmatprep.mubr.msk.bf16.mxu1 %vm11917_vm2, %v11916_v8  ;;  %11314 = vmatpush3.bf16.xpose.msra.mxu1 %v9420_v58 }
0x5b78   :  { %11315 = vmatprep.subr.bf16.mxu1 %v11916_v8 }
0x5b7f   :  { %11316 = vmatpush3.bf16.xpose.msra.mxu1 %v9423_v62 }
0x5b80   :  { %11317 = vmatprep.subr.bf16.mxu1 %v11916_v8 }
0x5b87   :  { %11318 = vmatpush3.bf16.xpose.msra.mxu1 %v9426_v3 }
0x5b88   :  { %11319 = vmatprep.subr.bf16.mxu1 %v11916_v8 }
0x5b8f   :  { %11320 = vmatpush3.bf16.xpose.msra.mxu1 %v9429_v0 }
0x5b90   :  { %11321 = vmatprep.subr.bf16.mxu1 %v11916_v8 }
0x5b97   :  { %11322 = vmatpush3.bf16.xpose.msra.mxu1 %v9432_v10 }
0x5b98   :  { %11323 = vmatprep.subr.bf16.mxu1 %v11916_v8 }
0x5b9f   :  { %11324 = vmatpush3.bf16.xpose.msra.mxu1 %v9435_v49 }
0x5ba0   :  { %11325 = vmatprep.subr.bf16.mxu1 %v11916_v8 }
0x5ba7   :  { %11326 = vmatpush3.bf16.xpose.msra.mxu1 %v9438_v33 }
0x5ba8   :  { %11327 = vmatprep.subr.bf16.mxu1 %v11916_v8 }
0x5baf   :  { %11328 = vmatpush3.bf16.xpose.msra.mxu1 %v9441_v39 }
0x5bf6   :  { %v4795_v30 = vpop.xlane.xlu0 %4794 }
0x5bf7   :  { %v4799_v6 = vsub.f32 %v4786_v2, %v4795_v30 }
0x5bf9   :  { %v4800_v57 = vmul.f32 %v9763_v41, %v4799_v6  ;;  %v9972_v6 = vld [vmem:[%s14349_s30 + $0x8] sm:$0xff]  ;;  %s11934_s30 = smov [#allocation2]  }
0x5bfa   :  { %s9543_s13 = sshll.u32 %s11934_s30, 4  ;;  %s9544_s13 = int_to_ptr.vmem [resolvable:$true] %s9543_s13 }
0x5bfb   :  { %v4802_v16 = vsel %vm4801_vm14, %v4800_v57, 0.0  ;;  %s11892_s3 = scalar_lea.vmem %s9544_s13, 256  ;;  %p11897_p1 = scmp.lt.s32.totalorder %s9544_s13, %s9544_s13 }
0x5bfc   :  { %4803 = vadd.xlane.f32.xlu0 %v4802_v16  ;;  %p11893_p0 = scmp.ne.s32.totalorder %s9544_s13, %s11892_s3  ;;  %p11898_p2 = scmp.lt.s32.totalorder %s11892_s3, %s11892_s3 }
0x5bfe   :  { %p11899_p3 = por %p11898_p2, %p11897_p1 }
0x5c00   :  { %4815 = vadd.xlane.f32.xlu0 %v4814_v55  ;;  %p11900_p4 = pnand %p11899_p3, %p11893_p0 }
0x5c49   :  { %v9258_v35 = vpop.f32.mrb[4].mxu1 }
0x5c4a   :  { %v9264_v47 = vmax.f32 %v9258_v35, 0.0  ;;  %v11299_v52 = vpop.f32.mrb[5].mxu1 }
0x5c4b   :  { %v9261_v37 = vpop.f32.mrb[6].mxu1 }
0x5c4c   :  { %v9273_v34 = vpack.c.bf16 %v9264_v47, %v9264_v47  ;;  %v11300_v20 = vpop.f32.mrb[7].mxu1 }
0x5c4e   :  { %11310 = vmatmul.mubr.msk.bf16.vlgmr.msra.gmra.mrb[40].mxu0 %vm910_vm9, %v9273_v34 }
0x5c89   :  { %v4804_v38 = vpop.xlane.xlu0 %4803 }
0x5c8a   :  { %v4805_v17 = vrot.slane %v4804_v38, 4 }
0x5c8c   :  { %v4806_v40 = vadd.f32 %v4805_v17, %v4804_v38 }
0x5c8d   :  { %v4816_v28 = vpop.xlane.xlu0 %4815 }
0x5c8e   :  { %v4807_v50 = vrot.slane %v4806_v40, 2  ;;  %v4817_v42 = vrot.slane %v4816_v28, 4 }
0x5c90   :  { %v4808_v46 = vadd.f32 %v4807_v50, %v4806_v40  ;;  %v4818_v13 = vadd.f32 %v4817_v42, %v4816_v28 }
0x5c92   :  { %v4809_v51 = vrot.slane %v4808_v46, 1  ;;  %v4819_v44 = vrot.slane %v4818_v13, 2 }
0x5c94   :  { %v4810_v21 = vadd.f32 %v4809_v51, %v4808_v46  ;;  %v4820_v36 = vadd.f32 %v4819_v44, %v4818_v13 }
0x5c96   :  { %11333 = vpush %v4810_v21  ;;  %v4821_v24 = vrot.slane %v4820_v36, 1 }
0x5d21   :  { %v9335_v1 = vpop.f32.mrb[40].mxu0 }
0x5d22   :  { %v9341_v4 = vadd.f32 %v9335_v1, %v14092_v7  ;;  %v11311_v5 = vpop.f32.mrb[41].mxu0  ;;  %v4822_v7 = vadd.f32 %v4821_v24, %v4820_v36 }
0x5d23   :  { %v9338_v60 = vpop.f32.mrb[42].mxu0 }
0x5d24   :  { %v9343_v9 = vmul.f32 %v9341_v4, %v9341_v4  ;;  %v11312_v15 = vpop.f32.mrb[43].mxu0  ;;  %11335 = vpush %v4822_v7 }
0x5d26   :  { %v9344_v14 = vsel %vm111_vm0, %v9343_v9, 0.0 }
0x5d27   :  { %9345 = vadd.xlane.f32.xlu0 %v9344_v14 }
0x5db4   :  { %v9346_v19 = vpop.xlane.xlu0 %9345 }
0x5db5   :  { %v9347_v12 = vmul.f32 0.03125, %v9346_v19 }
0x5db7   :  { %v9348_v25 = vadd.f32 1e-06, %v9347_v12 }
0x5db9   :  { %11869 = vrsqrt.f32 %v9348_v25 }
0x5dc3   :  { %v11870_v43 = vpop.eup %11869 }
0x5dc4   :  { %v9350_v31 = vmul.f32 %v11870_v43, %v9341_v4 }
0x5dc6   :  { %v9357_v11 = vmul.f32 %v9962_v29, %v9350_v31 }
0x5dc8   :  { %v9358_v59 = vmul.f32 0.17677669, %v9357_v11 }
0x5dca   :  { %v9375_v48 = vpack.c.bf16 %v9358_v59, %v9358_v59 }
0x5dcc   :  { %11330 = vmatmul.mubr.msk.bf16.vlgmr.msra.gmra.mrb[8].mxu1 %vm111_vm0, %v9375_v48  ;;  %vm9506_vm0 = vcmp.ne.s32.totalorder %v9972_v6, 0 }
0x5dcd   :  { %v9974_v40 = vsel %vm9506_vm0, 1.0, %v11916_v8 }
0x5e9f   :  { %v9477_v53 = vpop.f32.mrb[8].mxu1 }
0x5ea0   :  { %v9478_v27 = vadd.f32 %v9477_v53, %v13239_v26  ;;  %v11331_v2 = vpop.f32.mrb[9].mxu1 }
0x5ea1   :  { %v9480_v41 = vpop.f32.mrb[10].mxu1 }
0x5ea2   :  { %9484 = vst [vmem:[#allocation2 + $0x8] sm:$0xff] %v9478_v27  ;;  %9487 = vmax.xlane.f32.xlu0 %v9478_v27  ;;  %v11332_v30 = vpop.f32.mrb[11].mxu1 }
0x5eb8   :  { %9498 = vperm.xlu0 %11422, %v9972_v6  }
0x5f2f   :  { %v9488_v57 = vpop.xlane.xlu0 %9487 }
0x5f30   :  { %v9489_v16 = vsub.f32 %v9478_v27, %v9488_v57 }
0x5f32   :  { %v9490_v35 = vmul.f32 1.442695, %v9489_v16 }
0x5f34   :  { %11871 = vpow2.f32 %v9490_v35 }
0x5f37   :  { %v9499_v47 = vpop.permute.xlu0 %9498 }
0x5f38   :  { %vm9500_vm15 = vcmp.eq.s32.totalorder %v13236_v22, %v9499_v47  ;;  %v9523_v22 = vsel %vm4801_vm14, %v9974_v40, 0.0 }
0x5f39   :  { %v9973_v26 = vsel %vm9500_vm15, 1.0, %v11916_v8 }
0x5f3a   :  { %v9503_v37 = vmul.f32 %v9973_v26, %v9478_v27 }
0x5f3e   :  { %v11872_v52 = vpop.eup %11871 }
0x5f3f   :  { %9492 = vadd.xlane.f32.xlu1 %v11872_v52 }
0x5f43   :  { %9504 = vadd.xlane.f32.xlu1 %v9503_v37 }
0x5fcc   :  { %v9493_v34 = vpop.xlane.xlu1 %9492 }
0x5fcd   :  { %11873 = vlog2.f32 %v9493_v34 }
0x5fd0   :  { %v9505_v50 = vpop.xlane.xlu1 %9504 }
0x5fd7   :  { %v11874_v20 = vpop.eup %11873 }
0x5fd8   :  { %v9495_v38 = vmul.f32 0.6931472, %v11874_v20 }
0x5fda   :  { %v9496_v17 = vadd.f32 %v9495_v38, %v9488_v57 }
0x5fdc   :  { %v9509_v46 = vsub.f32 %v9496_v17, %v9505_v50 }
0x5fde   :  { %v9510_v51 = vmul.f32 %v9974_v40, %v9509_v46 }
0x5fe0   :  { %v9511_v21 = vsel %vm4801_vm14, %v9510_v51, 0.0 }
0x5fe1   :  { %9512 = vadd.xlane.f32.xlu1 %v9511_v21 }
0x5fe5   :  { %9524 = vadd.xlane.f32.xlu1 %v9523_v22 }
0x5fe6   :  { %11903 = shalt.err (!%p11900_p4)
}
0x5fe7   :  { %s14352_s21 = sld [smem:[#allocation23_spill]] }
0x5fed   :  { %s11904_s14 = scalar_lea.hbm %s14352_s21, 256 }
0x5fee   :  { %p11905_p5 = scmp.ne.s32.totalorder %s14352_s21, %s11904_s14  ;;  %p11908_p6 = scmp.lt.u32.totalorder %s11904_s14, %s14352_s21 }
0x5ff0   :  { %p11910_p7 = pnand %p11908_p6, %p11905_p5 }
0x5ff2   :  { %11913 = shalt.err (!%p11910_p7)
}
0x5ff3   :  { %s11935_s16 = smov 128   ;;  %s11334_s15 = spop %11333  ;;  %vm9536_vm1 = vcmask 8192  }
0x5ff4   :  { %9549 = dma.vmem_to_hbm [thread:$0]  %s9544_s13, 256, %s14352_s21, [#allocation3], %s11935_s16, %s11935_s16, %s14323_s4  }
0x5ff5   :  { %s11336_s29 = spop %11335  ;;  %v4812_v60 = vstv %s11334_s15  ;;  %s14353_s26 = sld [smem:[#allocation24_spill]] }
0x5ff6   :  { %v4824_v9 = vstv %s11336_s29 }
0x606e   :  { %v9513_v8 = vpop.xlane.xlu1 %9512 }
0x606f   :  { %v9514_v55 = vrot.slane %v9513_v8, 4 }
0x6071   :  { %v9515_v56 = vadd.f32 %v9514_v55, %v9513_v8 }
0x6072   :  { %v9525_v58 = vpop.xlane.xlu1 %9524 }
0x6073   :  { %v9516_v61 = vrot.slane %v9515_v56, 2  ;;  %v9526_v62 = vrot.slane %v9525_v58, 4 }
0x6075   :  { %v9527_v63 = vadd.f32 %v9526_v62, %v9525_v58  ;;  %v9517_v3 = vadd.f32 %v9516_v61, %v9515_v56 }
0x6077   :  { %v9528_v32 = vrot.slane %v9527_v63, 2  ;;  %v9518_v0 = vrot.slane %v9517_v3, 1 }
0x6079   :  { %v9529_v45 = vadd.f32 %v9528_v32, %v9527_v63  ;;  %v9519_v10 = vadd.f32 %v9518_v0, %v9517_v3 }
0x607b   :  { %11337 = vpush %v9519_v10  ;;  %v9530_v1 = vrot.slane %v9529_v45, 1 }
0x607d   :  { %v9531_v4 = vadd.f32 %v9530_v1, %v9529_v45 }
0x607f   :  { %11339 = vpush %v9531_v4 }
0x60ac   :  { %s11338_s23 = spop %11337 }
0x60ad   :  { %v9521_v5 = vstv %s11338_s23 }
0x60ae   :  { %v9522_v14 = vadd.f32 %v9521_v5, %v4812_v60 }
0x60b0   :  { %s11340_s4 = spop %11339 }
0x60b1   :  { %v9533_v15 = vstv %s11340_s4 }
0x60b2   :  { %v9534_v28 = vadd.f32 %v9533_v15, %v4824_v9 }
0x60b4   :  { %v9535_v42 = vsel %vm4801_vm14, %v9522_v14, %v9534_v28 }
0x60b5   :  { %9537 = vst.msk [vmem:[%s14353_s26] sm:$0x1] %vm9536_vm1, %v9535_v42 }
0x60b6   :  { %11914 = dma.done.wait [#allocation3], 256  }
0x60b7   :  { %11915 = vsyncadd [#allocation3], 4294967040 }
0x60b8   :  { %9557 = vsyncpa [#allocation3], 1 }

</bundles_post_ra>
